<compile_context>
chip_gen: v6e
topology: v6e:2x2x1
jax: 0.10.0
libtpu: 0.0.40
codegen_flags: <defaults>
</compile_context>

<pallas_src>
import jax
import jax.numpy as jnp
from jax.experimental import pallas as pl
from jax.experimental.pallas import tpu as pltpu


LANES = 128     # lane-padded channel width for all layers
ROW_PAD = 8     # extra zero rows per flat activation so wrap-reads stay in bounds


def _make_colornet_kernel(W, M1, M2, M3):
    """Fused ColorNet kernel. Flat activations are [OH*W (+pad), 128]."""

    def kernel(cols_ref, w1_ref, b1_ref, w2_ref, b2_ref, w3_ref, b3_ref,
               w4_ref, b4_ref, o_ref, h1_ref, h2_ref):
        f32 = jnp.float32

        # ---- conv1 (7x7): single im2col matmul, K = 49*Cin (padded) --------
        a1 = jnp.dot(cols_ref[...], w1_ref[...],
                     preferred_element_type=f32) + b1_ref[...]
        h1_ref[0:M1, :] = jnp.maximum(a1, 0.0)
        h1_ref[M1:M1 + ROW_PAD, :] = jnp.zeros((ROW_PAD, LANES), f32)

        # ---- conv2 (5x5): per-tap matmuls on the flat layout (K = 128) -----
        h1 = h1_ref[...]
        a2 = jnp.zeros((M2, LANES), f32)
        for kh in range(5):
            for kw in range(5):
                off = kh * W + kw
                a2 = a2 + jnp.dot(h1[off:off + M2, :], w2_ref[kh * 5 + kw],
                                  preferred_element_type=f32)
        h2_ref[0:M2, :] = jnp.maximum(a2 + b2_ref[...], 0.0)
        h2_ref[M2:M2 + ROW_PAD, :] = jnp.zeros((ROW_PAD, LANES), f32)

        # ---- conv3 (3x3) + ReLU, with conv4 (1x1) fused into the epilogue --
        h2 = h2_ref[...]
        a3 = jnp.zeros((M3, LANES), f32)
        for kh in range(3):
            for kw in range(3):
                off = kh * W + kw
                a3 = a3 + jnp.dot(h2[off:off + M3, :], w3_ref[kh * 3 + kw],
                                  preferred_element_type=f32)
        h3 = jnp.maximum(a3 + b3_ref[...], 0.0)
        out = jnp.dot(h3, w4_ref[...],
                      preferred_element_type=f32) + b4_ref[...]
        o_ref[...] = out.astype(o_ref.dtype)

    return kernel


def _pad_to(x, shape):
    return jnp.pad(x, [(0, t - s) for s, t in zip(x.shape, shape)])


@jax.jit
def colornet_forward(x_nchw, params):
    (w1, b1), (w2, b2), (w3, b3), (w4, b4) = params
    N, Cin, H, W = x_nchw.shape
    OH1 = H - 6
    OH2, OW2 = OH1 - 4, (W - 6) - 4
    OH3, OW3 = OH2 - 2, OW2 - 2
    M1, M2, M3 = OH1 * W, OH2 * W, OH3 * W

    # NCHW -> NHWC -> flat [N, H*W, Cin], plus zero row padding so the
    # wrap-around reads of the (cropped) garbage columns stay in bounds.
    x = jnp.transpose(x_nchw, (0, 2, 3, 1)).reshape(N, H * W, Cin)
    x = jnp.pad(x, ((0, 0), (0, ROW_PAD), (0, 0)))

    # im2col strip for conv1, built with plain XLA outside the kernel:
    # cols[n, oh*W + w, (kh*7 + kw)*Cin + c] = x[n, (oh+kh)*W + (w+kw), c]
    parts = [x[:, kh * W + kw: kh * W + kw + M1, :]
             for kh in range(7) for kw in range(7)]
    cols = jnp.concatenate(parts, axis=-1)                  # [N, M1, 49*Cin]
    K1 = 49 * Cin
    K1p = ((K1 + LANES - 1) // LANES) * LANES
    cols = jnp.pad(cols, ((0, 0), (0, 0), (0, K1p - K1)))

    # Zero-pad weights / biases to 128-lane channel blocks (padded channels
    # therefore stay exactly zero through every layer).
    w1p = _pad_to(w1.reshape(K1, w1.shape[-1]), (K1p, LANES))
    b1p = _pad_to(b1.reshape(1, -1), (1, LANES))
    w2p = _pad_to(w2, (5, 5, LANES, LANES)).reshape(25, LANES, LANES)
    b2p = _pad_to(b2.reshape(1, -1), (1, LANES))
    w3p = _pad_to(w3, (3, 3, LANES, LANES)).reshape(9, LANES, LANES)
    b3p = _pad_to(b3.reshape(1, -1), (1, LANES))
    w4p = _pad_to(w4.reshape(w4.shape[2], w4.shape[3]), (LANES, LANES))
    b4p = _pad_to(b4.reshape(1, -1), (1, LANES))

    kernel = _make_colornet_kernel(W, M1, M2, M3)
    out_flat = pl.pallas_call(
        kernel,
        out_shape=jax.ShapeDtypeStruct((N, M3, LANES), x_nchw.dtype),
        grid=(N,),
        in_specs=[
            pl.BlockSpec((None, M1, K1p), lambda n: (n, 0, 0)),   # im2col(x)
            pl.BlockSpec((K1p, LANES), lambda n: (0, 0)),         # w1
            pl.BlockSpec((1, LANES), lambda n: (0, 0)),           # b1
            pl.BlockSpec((25, LANES, LANES), lambda n: (0, 0, 0)),  # w2
            pl.BlockSpec((1, LANES), lambda n: (0, 0)),           # b2
            pl.BlockSpec((9, LANES, LANES), lambda n: (0, 0, 0)),   # w3
            pl.BlockSpec((1, LANES), lambda n: (0, 0)),           # b3
            pl.BlockSpec((LANES, LANES), lambda n: (0, 0)),       # w4 (1x1)
            pl.BlockSpec((1, LANES), lambda n: (0, 0)),           # b4
        ],
        out_specs=pl.BlockSpec((None, M3, LANES), lambda n: (n, 0, 0)),
        scratch_shapes=[
            pltpu.VMEM((M1 + ROW_PAD, LANES), jnp.float32),   # conv1 output
            pltpu.VMEM((M2 + ROW_PAD, LANES), jnp.float32),   # conv2 output
        ],
        compiler_params=pltpu.CompilerParams(
            dimension_semantics=("parallel",),
            vmem_limit_bytes=32 * 1024 * 1024),
    )(cols, w1p, b1p, w2p, b2p, w3p, b3p, w4p, b4p)

    # Crop the valid spatial window and the 3 real output channels; -> NCHW.
    out = out_flat.reshape(N, OH3, W, LANES)[:, :, :OW3, :3]
    return jnp.transpose(out, (0, 3, 1, 2))


def init_colornet_params(key):
    """Deterministic synthetic weights with the ColorNet shapes (HWIO layout)."""
    shapes = [
        (7, 7, 15, 100),
        (5, 5, 100, 100),
        (3, 3, 100, 50),
        (1, 1, 50, 3),
    ]
    params = []
    for i, s in enumerate(shapes):
        kw_, kb_ = jax.random.split(jax.random.fold_in(key, i))
        fan_in = s[0] * s[1] * s[2]
        scale = 1.0 / jnp.sqrt(jnp.float32(fan_in))
        w = jax.random.normal(kw_, s, jnp.float32) * scale
        b = jax.random.normal(kb_, (1, s[3]), jnp.float32) * scale
        params.append((w, b))
    return params


def reference_forward(x_nchw, params):
    """Pure-JAX reference (lax conv) for the correctness check."""
    x = jnp.transpose(x_nchw, (0, 2, 3, 1))
    dn = ("NHWC", "HWIO", "NHWC")
    for i, (w, b) in enumerate(params):
        x = jax.lax.conv_general_dilated(
            x, w, window_strides=(1, 1), padding="VALID",
            dimension_numbers=dn)
        x = x + b.reshape(1, 1, 1, -1)
        if i < 3:
            x = jnp.maximum(x, 0.0)
    return jnp.transpose(x, (0, 3, 1, 2))


if __name__ == "__main__":
    key = jax.random.PRNGKey(0)
    kx, kp = jax.random.split(key)

    # Input in PyTorch's NCHW convention: batch=2, channels=15, spatial=16.
    x = jax.random.normal(kx, (2, 15, 16, 16), jnp.float32)
    params = init_colornet_params(kp)

    out = colornet_forward(x, params)
    out = jax.block_until_ready(out)

    ref = reference_forward(x, params)
    assert out.shape == (2, 3, 4, 4), out.shape
    assert jnp.allclose(out, ref, atol=5e-4, rtol=5e-4), \
        float(jnp.max(jnp.abs(out - ref)))

    print("KERNEL_OK")
</pallas_src>

<mosaic_0001>
module attributes {stable_mosaic.version = 11 : i64} {
  func.func @kernel(%arg0: i32, %arg1: memref<1x160x768xf32, #tpu.memory_space<vmem>>, %arg2: memref<768x128xf32, #tpu.memory_space<vmem>>, %arg3: memref<1x128xf32, #tpu.memory_space<vmem>>, %arg4: memref<25x128x128xf32, #tpu.memory_space<vmem>>, %arg5: memref<1x128xf32, #tpu.memory_space<vmem>>, %arg6: memref<9x128x128xf32, #tpu.memory_space<vmem>>, %arg7: memref<1x128xf32, #tpu.memory_space<vmem>>, %arg8: memref<128x128xf32, #tpu.memory_space<vmem>>, %arg9: memref<1x128xf32, #tpu.memory_space<vmem>>, %arg10: memref<1x64x128xf32, #tpu.memory_space<vmem>>, %arg11: memref<168x128xf32, #tpu.memory_space<vmem>>, %arg12: memref<104x128xf32, #tpu.memory_space<vmem>>) attributes {dimension_semantics = [#tpu.dimension_semantics<parallel>], iteration_bounds = array<i64: 2>, scalar_prefetch = 0 : i64, scratch_operands = 2 : i64, tpu.core_type = #tpu.core_type<tc>, window_params = [{transform_indices = @transform_0, window_bounds = array<i64: 1, 160, 768>}, {pipeline_mode = #tpu.pipeline_mode<synchronous>, transform_indices = @transform_1, window_bounds = array<i64: 768, 128>}, {pipeline_mode = #tpu.pipeline_mode<synchronous>, transform_indices = @transform_2, window_bounds = array<i64: 1, 128>}, {pipeline_mode = #tpu.pipeline_mode<synchronous>, transform_indices = @transform_3, window_bounds = array<i64: 25, 128, 128>}, {pipeline_mode = #tpu.pipeline_mode<synchronous>, transform_indices = @transform_4, window_bounds = array<i64: 1, 128>}, {pipeline_mode = #tpu.pipeline_mode<synchronous>, transform_indices = @transform_5, window_bounds = array<i64: 9, 128, 128>}, {pipeline_mode = #tpu.pipeline_mode<synchronous>, transform_indices = @transform_6, window_bounds = array<i64: 1, 128>}, {pipeline_mode = #tpu.pipeline_mode<synchronous>, transform_indices = @transform_7, window_bounds = array<i64: 128, 128>}, {pipeline_mode = #tpu.pipeline_mode<synchronous>, transform_indices = @transform_8, window_bounds = array<i64: 1, 128>}, {transform_indices = @transform_9, window_bounds = array<i64: 1, 64, 128>}]} {
    %c0 = arith.constant 0 : index
    %c0_0 = arith.constant 0 : index
    %c0_1 = arith.constant 0 : index
    %0 = vector.load %arg1[%c0, %c0_0, %c0_1] : memref<1x160x768xf32, #tpu.memory_space<vmem>>, vector<1x160x768xf32>
    %1 = vector.shape_cast %0 : vector<1x160x768xf32> to vector<160x768xf32>
    %c0_2 = arith.constant 0 : index
    %c0_3 = arith.constant 0 : index
    %2 = vector.load %arg2[%c0_2, %c0_3] : memref<768x128xf32, #tpu.memory_space<vmem>>, vector<768x128xf32>
    %cst = arith.constant dense<0.000000e+00> : vector<160x128xf32>
    %3 = tpu.matmul %1, %2, %cst {dimension_numbers = #tpu.dot_dimension_numbers<[1], [0], [0], [1], [0, 0, 1, 1], [], []>} : vector<160x768xf32>, vector<768x128xf32>, vector<160x128xf32> -> vector<160x128xf32>
    %c0_4 = arith.constant 0 : index
    %c0_5 = arith.constant 0 : index
    %4 = vector.load %arg3[%c0_4, %c0_5] : memref<1x128xf32, #tpu.memory_space<vmem>>, vector<1x128xf32>
    %5 = vector.broadcast %4 : vector<1x128xf32> to vector<160x128xf32>
    %6 = arith.addf %3, %5 : vector<160x128xf32>
    %cst_6 = arith.constant 0.000000e+00 : f32
    %7 = vector.broadcast %cst_6 : f32 to vector<160x128xf32>
    %8 = arith.maximumf %6, %7 : vector<160x128xf32>
    %c0_7 = arith.constant 0 : index
    %c0_8 = arith.constant 0 : index
    %9 = vector.load %arg11[%c0_7, %c0_8] : memref<168x128xf32, #tpu.memory_space<vmem>>, vector<160x128xf32>
    tpu.vector_store %arg11[%c0_7, %c0_8], %8 {strides = array<i32>} : memref<168x128xf32, #tpu.memory_space<vmem>>, vector<160x128xf32>,
    %cst_9 = arith.constant 0.000000e+00 : f32
    %10 = vector.broadcast %cst_9 : f32 to vector<8x128xf32>
    %c160 = arith.constant 160 : index
    %c0_10 = arith.constant 0 : index
    %11 = vector.load %arg11[%c160, %c0_10] : memref<168x128xf32, #tpu.memory_space<vmem>>, vector<8x128xf32>
    tpu.vector_store %arg11[%c160, %c0_10], %10 {strides = array<i32>} : memref<168x128xf32, #tpu.memory_space<vmem>>, vector<8x128xf32>,
    %c0_11 = arith.constant 0 : index
    %c0_12 = arith.constant 0 : index
    %12 = vector.load %arg11[%c0_11, %c0_12] : memref<168x128xf32, #tpu.memory_space<vmem>>, vector<168x128xf32>
    %cst_13 = arith.constant 0.000000e+00 : f32
    %13 = vector.broadcast %cst_13 : f32 to vector<96x128xf32>
    %14 = vector.extract_strided_slice %12 {offsets = [0, 0], sizes = [96, 128], strides = [1, 1]} : vector<168x128xf32> to vector<96x128xf32>
    %c0_14 = arith.constant 0 : index
    %c0_15 = arith.constant 0 : index
    %c0_16 = arith.constant 0 : index
    %15 = vector.load %arg4[%c0_14, %c0_15, %c0_16] : memref<25x128x128xf32, #tpu.memory_space<vmem>>, vector<1x128x128xf32>
    %16 = vector.shape_cast %15 : vector<1x128x128xf32> to vector<128x128xf32>
    %cst_17 = arith.constant dense<0.000000e+00> : vector<96x128xf32>
    %17 = tpu.matmul %14, %16, %cst_17 {dimension_numbers = #tpu.dot_dimension_numbers<[1], [0], [0], [1], [0, 0, 1, 1], [], []>} : vector<96x128xf32>, vector<128x128xf32>, vector<96x128xf32> -> vector<96x128xf32>
    %18 = arith.addf %13, %17 : vector<96x128xf32>
    %19 = vector.extract_strided_slice %12 {offsets = [1, 0], sizes = [96, 128], strides = [1, 1]} : vector<168x128xf32> to vector<96x128xf32>
    %c1 = arith.constant 1 : index
    %c0_18 = arith.constant 0 : index
    %c0_19 = arith.constant 0 : index
    %20 = vector.load %arg4[%c1, %c0_18, %c0_19] : memref<25x128x128xf32, #tpu.memory_space<vmem>>, vector<1x128x128xf32>
    %21 = vector.shape_cast %20 : vector<1x128x128xf32> to vector<128x128xf32>
    %cst_20 = arith.constant dense<0.000000e+00> : vector<96x128xf32>
    %22 = tpu.matmul %19, %21, %cst_20 {dimension_numbers = #tpu.dot_dimension_numbers<[1], [0], [0], [1], [0, 0, 1, 1], [], []>} : vector<96x128xf32>, vector<128x128xf32>, vector<96x128xf32> -> vector<96x128xf32>
    %23 = arith.addf %18, %22 : vector<96x128xf32>
    %24 = vector.extract_strided_slice %12 {offsets = [2, 0], sizes = [96, 128], strides = [1, 1]} : vector<168x128xf32> to vector<96x128xf32>
    %c2 = arith.constant 2 : index
    %c0_21 = arith.constant 0 : index
    %c0_22 = arith.constant 0 : index
    %25 = vector.load %arg4[%c2, %c0_21, %c0_22] : memref<25x128x128xf32, #tpu.memory_space<vmem>>, vector<1x128x128xf32>
    %26 = vector.shape_cast %25 : vector<1x128x128xf32> to vector<128x128xf32>
    %cst_23 = arith.constant dense<0.000000e+00> : vector<96x128xf32>
    %27 = tpu.matmul %24, %26, %cst_23 {dimension_numbers = #tpu.dot_dimension_numbers<[1], [0], [0], [1], [0, 0, 1, 1], [], []>} : vector<96x128xf32>, vector<128x128xf32>, vector<96x128xf32> -> vector<96x128xf32>
    %28 = arith.addf %23, %27 : vector<96x128xf32>
    %29 = vector.extract_strided_slice %12 {offsets = [3, 0], sizes = [96, 128], strides = [1, 1]} : vector<168x128xf32> to vector<96x128xf32>
    %c3 = arith.constant 3 : index
    %c0_24 = arith.constant 0 : index
    %c0_25 = arith.constant 0 : index
    %30 = vector.load %arg4[%c3, %c0_24, %c0_25] : memref<25x128x128xf32, #tpu.memory_space<vmem>>, vector<1x128x128xf32>
    %31 = vector.shape_cast %30 : vector<1x128x128xf32> to vector<128x128xf32>
    %cst_26 = arith.constant dense<0.000000e+00> : vector<96x128xf32>
    %32 = tpu.matmul %29, %31, %cst_26 {dimension_numbers = #tpu.dot_dimension_numbers<[1], [0], [0], [1], [0, 0, 1, 1], [], []>} : vector<96x128xf32>, vector<128x128xf32>, vector<96x128xf32> -> vector<96x128xf32>
    %33 = arith.addf %28, %32 : vector<96x128xf32>
    %34 = vector.extract_strided_slice %12 {offsets = [4, 0], sizes = [96, 128], strides = [1, 1]} : vector<168x128xf32> to vector<96x128xf32>
    %c4 = arith.constant 4 : index
    %c0_27 = arith.constant 0 : index
    %c0_28 = arith.constant 0 : index
    %35 = vector.load %arg4[%c4, %c0_27, %c0_28] : memref<25x128x128xf32, #tpu.memory_space<vmem>>, vector<1x128x128xf32>
    %36 = vector.shape_cast %35 : vector<1x128x128xf32> to vector<128x128xf32>
    %cst_29 = arith.constant dense<0.000000e+00> : vector<96x128xf32>
    %37 = tpu.matmul %34, %36, %cst_29 {dimension_numbers = #tpu.dot_dimension_numbers<[1], [0], [0], [1], [0, 0, 1, 1], [], []>} : vector<96x128xf32>, vector<128x128xf32>, vector<96x128xf32> -> vector<96x128xf32>
    %38 = arith.addf %33, %37 : vector<96x128xf32>
    %39 = vector.extract_strided_slice %12 {offsets = [16, 0], sizes = [96, 128], strides = [1, 1]} : vector<168x128xf32> to vector<96x128xf32>
    %c5 = arith.constant 5 : index
    %c0_30 = arith.constant 0 : index
    %c0_31 = arith.constant 0 : index
    %40 = vector.load %arg4[%c5, %c0_30, %c0_31] : memref<25x128x128xf32, #tpu.memory_space<vmem>>, vector<1x128x128xf32>
    %41 = vector.shape_cast %40 : vector<1x128x128xf32> to vector<128x128xf32>
    %cst_32 = arith.constant dense<0.000000e+00> : vector<96x128xf32>
    %42 = tpu.matmul %39, %41, %cst_32 {dimension_numbers = #tpu.dot_dimension_numbers<[1], [0], [0], [1], [0, 0, 1, 1], [], []>} : vector<96x128xf32>, vector<128x128xf32>, vector<96x128xf32> -> vector<96x128xf32>
    %43 = arith.addf %38, %42 : vector<96x128xf32>
    %44 = vector.extract_strided_slice %12 {offsets = [17, 0], sizes = [96, 128], strides = [1, 1]} : vector<168x128xf32> to vector<96x128xf32>
    %c6 = arith.constant 6 : index
    %c0_33 = arith.constant 0 : index
    %c0_34 = arith.constant 0 : index
    %45 = vector.load %arg4[%c6, %c0_33, %c0_34] : memref<25x128x128xf32, #tpu.memory_space<vmem>>, vector<1x128x128xf32>
    %46 = vector.shape_cast %45 : vector<1x128x128xf32> to vector<128x128xf32>
    %cst_35 = arith.constant dense<0.000000e+00> : vector<96x128xf32>
    %47 = tpu.matmul %44, %46, %cst_35 {dimension_numbers = #tpu.dot_dimension_numbers<[1], [0], [0], [1], [0, 0, 1, 1], [], []>} : vector<96x128xf32>, vector<128x128xf32>, vector<96x128xf32> -> vector<96x128xf32>
    %48 = arith.addf %43, %47 : vector<96x128xf32>
    %49 = vector.extract_strided_slice %12 {offsets = [18, 0], sizes = [96, 128], strides = [1, 1]} : vector<168x128xf32> to vector<96x128xf32>
    %c7 = arith.constant 7 : index
    %c0_36 = arith.constant 0 : index
    %c0_37 = arith.constant 0 : index
    %50 = vector.load %arg4[%c7, %c0_36, %c0_37] : memref<25x128x128xf32, #tpu.memory_space<vmem>>, vector<1x128x128xf32>
    %51 = vector.shape_cast %50 : vector<1x128x128xf32> to vector<128x128xf32>
    %cst_38 = arith.constant dense<0.000000e+00> : vector<96x128xf32>
    %52 = tpu.matmul %49, %51, %cst_38 {dimension_numbers = #tpu.dot_dimension_numbers<[1], [0], [0], [1], [0, 0, 1, 1], [], []>} : vector<96x128xf32>, vector<128x128xf32>, vector<96x128xf32> -> vector<96x128xf32>
    %53 = arith.addf %48, %52 : vector<96x128xf32>
    %54 = vector.extract_strided_slice %12 {offsets = [19, 0], sizes = [96, 128], strides = [1, 1]} : vector<168x128xf32> to vector<96x128xf32>
    %c8 = arith.constant 8 : index
    %c0_39 = arith.constant 0 : index
    %c0_40 = arith.constant 0 : index
    %55 = vector.load %arg4[%c8, %c0_39, %c0_40] : memref<25x128x128xf32, #tpu.memory_space<vmem>>, vector<1x128x128xf32>
    %56 = vector.shape_cast %55 : vector<1x128x128xf32> to vector<128x128xf32>
    %cst_41 = arith.constant dense<0.000000e+00> : vector<96x128xf32>
    %57 = tpu.matmul %54, %56, %cst_41 {dimension_numbers = #tpu.dot_dimension_numbers<[1], [0], [0], [1], [0, 0, 1, 1], [], []>} : vector<96x128xf32>, vector<128x128xf32>, vector<96x128xf32> -> vector<96x128xf32>
    %58 = arith.addf %53, %57 : vector<96x128xf32>
    %59 = vector.extract_strided_slice %12 {offsets = [20, 0], sizes = [96, 128], strides = [1, 1]} : vector<168x128xf32> to vector<96x128xf32>
    %c9 = arith.constant 9 : index
    %c0_42 = arith.constant 0 : index
    %c0_43 = arith.constant 0 : index
    %60 = vector.load %arg4[%c9, %c0_42, %c0_43] : memref<25x128x128xf32, #tpu.memory_space<vmem>>, vector<1x128x128xf32>
    %61 = vector.shape_cast %60 : vector<1x128x128xf32> to vector<128x128xf32>
    %cst_44 = arith.constant dense<0.000000e+00> : vector<96x128xf32>
    %62 = tpu.matmul %59, %61, %cst_44 {dimension_numbers = #tpu.dot_dimension_numbers<[1], [0], [0], [1], [0, 0, 1, 1], [], []>} : vector<96x128xf32>, vector<128x128xf32>, vector<96x128xf32> -> vector<96x128xf32>
    %63 = arith.addf %58, %62 : vector<96x128xf32>
    %64 = vector.extract_strided_slice %12 {offsets = [32, 0], sizes = [96, 128], strides = [1, 1]} : vector<168x128xf32> to vector<96x128xf32>
    %c10 = arith.constant 10 : index
    %c0_45 = arith.constant 0 : index
    %c0_46 = arith.constant 0 : index
    %65 = vector.load %arg4[%c10, %c0_45, %c0_46] : memref<25x128x128xf32, #tpu.memory_space<vmem>>, vector<1x128x128xf32>
    %66 = vector.shape_cast %65 : vector<1x128x128xf32> to vector<128x128xf32>
    %cst_47 = arith.constant dense<0.000000e+00> : vector<96x128xf32>
    %67 = tpu.matmul %64, %66, %cst_47 {dimension_numbers = #tpu.dot_dimension_numbers<[1], [0], [0], [1], [0, 0, 1, 1], [], []>} : vector<96x128xf32>, vector<128x128xf32>, vector<96x128xf32> -> vector<96x128xf32>
    %68 = arith.addf %63, %67 : vector<96x128xf32>
    %69 = vector.extract_strided_slice %12 {offsets = [33, 0], sizes = [96, 128], strides = [1, 1]} : vector<168x128xf32> to vector<96x128xf32>
    %c11 = arith.constant 11 : index
    %c0_48 = arith.constant 0 : index
    %c0_49 = arith.constant 0 : index
    %70 = vector.load %arg4[%c11, %c0_48, %c0_49] : memref<25x128x128xf32, #tpu.memory_space<vmem>>, vector<1x128x128xf32>
    %71 = vector.shape_cast %70 : vector<1x128x128xf32> to vector<128x128xf32>
    %cst_50 = arith.constant dense<0.000000e+00> : vector<96x128xf32>
    %72 = tpu.matmul %69, %71, %cst_50 {dimension_numbers = #tpu.dot_dimension_numbers<[1], [0], [0], [1], [0, 0, 1, 1], [], []>} : vector<96x128xf32>, vector<128x128xf32>, vector<96x128xf32> -> vector<96x128xf32>
    %73 = arith.addf %68, %72 : vector<96x128xf32>
    %74 = vector.extract_strided_slice %12 {offsets = [34, 0], sizes = [96, 128], strides = [1, 1]} : vector<168x128xf32> to vector<96x128xf32>
    %c12 = arith.constant 12 : index
    %c0_51 = arith.constant 0 : index
    %c0_52 = arith.constant 0 : index
    %75 = vector.load %arg4[%c12, %c0_51, %c0_52] : memref<25x128x128xf32, #tpu.memory_space<vmem>>, vector<1x128x128xf32>
    %76 = vector.shape_cast %75 : vector<1x128x128xf32> to vector<128x128xf32>
    %cst_53 = arith.constant dense<0.000000e+00> : vector<96x128xf32>
    %77 = tpu.matmul %74, %76, %cst_53 {dimension_numbers = #tpu.dot_dimension_numbers<[1], [0], [0], [1], [0, 0, 1, 1], [], []>} : vector<96x128xf32>, vector<128x128xf32>, vector<96x128xf32> -> vector<96x128xf32>
    %78 = arith.addf %73, %77 : vector<96x128xf32>
    %79 = vector.extract_strided_slice %12 {offsets = [35, 0], sizes = [96, 128], strides = [1, 1]} : vector<168x128xf32> to vector<96x128xf32>
    %c13 = arith.constant 13 : index
    %c0_54 = arith.constant 0 : index
    %c0_55 = arith.constant 0 : index
    %80 = vector.load %arg4[%c13, %c0_54, %c0_55] : memref<25x128x128xf32, #tpu.memory_space<vmem>>, vector<1x128x128xf32>
    %81 = vector.shape_cast %80 : vector<1x128x128xf32> to vector<128x128xf32>
    %cst_56 = arith.constant dense<0.000000e+00> : vector<96x128xf32>
    %82 = tpu.matmul %79, %81, %cst_56 {dimension_numbers = #tpu.dot_dimension_numbers<[1], [0], [0], [1], [0, 0, 1, 1], [], []>} : vector<96x128xf32>, vector<128x128xf32>, vector<96x128xf32> -> vector<96x128xf32>
    %83 = arith.addf %78, %82 : vector<96x128xf32>
    %84 = vector.extract_strided_slice %12 {offsets = [36, 0], sizes = [96, 128], strides = [1, 1]} : vector<168x128xf32> to vector<96x128xf32>
    %c14 = arith.constant 14 : index
    %c0_57 = arith.constant 0 : index
    %c0_58 = arith.constant 0 : index
    %85 = vector.load %arg4[%c14, %c0_57, %c0_58] : memref<25x128x128xf32, #tpu.memory_space<vmem>>, vector<1x128x128xf32>
    %86 = vector.shape_cast %85 : vector<1x128x128xf32> to vector<128x128xf32>
    %cst_59 = arith.constant dense<0.000000e+00> : vector<96x128xf32>
    %87 = tpu.matmul %84, %86, %cst_59 {dimension_numbers = #tpu.dot_dimension_numbers<[1], [0], [0], [1], [0, 0, 1, 1], [], []>} : vector<96x128xf32>, vector<128x128xf32>, vector<96x128xf32> -> vector<96x128xf32>
    %88 = arith.addf %83, %87 : vector<96x128xf32>
    %89 = vector.extract_strided_slice %12 {offsets = [48, 0], sizes = [96, 128], strides = [1, 1]} : vector<168x128xf32> to vector<96x128xf32>
    %c15 = arith.constant 15 : index
    %c0_60 = arith.constant 0 : index
    %c0_61 = arith.constant 0 : index
    %90 = vector.load %arg4[%c15, %c0_60, %c0_61] : memref<25x128x128xf32, #tpu.memory_space<vmem>>, vector<1x128x128xf32>
    %91 = vector.shape_cast %90 : vector<1x128x128xf32> to vector<128x128xf32>
    %cst_62 = arith.constant dense<0.000000e+00> : vector<96x128xf32>
    %92 = tpu.matmul %89, %91, %cst_62 {dimension_numbers = #tpu.dot_dimension_numbers<[1], [0], [0], [1], [0, 0, 1, 1], [], []>} : vector<96x128xf32>, vector<128x128xf32>, vector<96x128xf32> -> vector<96x128xf32>
    %93 = arith.addf %88, %92 : vector<96x128xf32>
    %94 = vector.extract_strided_slice %12 {offsets = [49, 0], sizes = [96, 128], strides = [1, 1]} : vector<168x128xf32> to vector<96x128xf32>
    %c16 = arith.constant 16 : index
    %c0_63 = arith.constant 0 : index
    %c0_64 = arith.constant 0 : index
    %95 = vector.load %arg4[%c16, %c0_63, %c0_64] : memref<25x128x128xf32, #tpu.memory_space<vmem>>, vector<1x128x128xf32>
    %96 = vector.shape_cast %95 : vector<1x128x128xf32> to vector<128x128xf32>
    %cst_65 = arith.constant dense<0.000000e+00> : vector<96x128xf32>
    %97 = tpu.matmul %94, %96, %cst_65 {dimension_numbers = #tpu.dot_dimension_numbers<[1], [0], [0], [1], [0, 0, 1, 1], [], []>} : vector<96x128xf32>, vector<128x128xf32>, vector<96x128xf32> -> vector<96x128xf32>
    %98 = arith.addf %93, %97 : vector<96x128xf32>
    %99 = vector.extract_strided_slice %12 {offsets = [50, 0], sizes = [96, 128], strides = [1, 1]} : vector<168x128xf32> to vector<96x128xf32>
    %c17 = arith.constant 17 : index
    %c0_66 = arith.constant 0 : index
    %c0_67 = arith.constant 0 : index
    %100 = vector.load %arg4[%c17, %c0_66, %c0_67] : memref<25x128x128xf32, #tpu.memory_space<vmem>>, vector<1x128x128xf32>
    %101 = vector.shape_cast %100 : vector<1x128x128xf32> to vector<128x128xf32>
    %cst_68 = arith.constant dense<0.000000e+00> : vector<96x128xf32>
    %102 = tpu.matmul %99, %101, %cst_68 {dimension_numbers = #tpu.dot_dimension_numbers<[1], [0], [0], [1], [0, 0, 1, 1], [], []>} : vector<96x128xf32>, vector<128x128xf32>, vector<96x128xf32> -> vector<96x128xf32>
    %103 = arith.addf %98, %102 : vector<96x128xf32>
    %104 = vector.extract_strided_slice %12 {offsets = [51, 0], sizes = [96, 128], strides = [1, 1]} : vector<168x128xf32> to vector<96x128xf32>
    %c18 = arith.constant 18 : index
    %c0_69 = arith.constant 0 : index
    %c0_70 = arith.constant 0 : index
    %105 = vector.load %arg4[%c18, %c0_69, %c0_70] : memref<25x128x128xf32, #tpu.memory_space<vmem>>, vector<1x128x128xf32>
    %106 = vector.shape_cast %105 : vector<1x128x128xf32> to vector<128x128xf32>
    %cst_71 = arith.constant dense<0.000000e+00> : vector<96x128xf32>
    %107 = tpu.matmul %104, %106, %cst_71 {dimension_numbers = #tpu.dot_dimension_numbers<[1], [0], [0], [1], [0, 0, 1, 1], [], []>} : vector<96x128xf32>, vector<128x128xf32>, vector<96x128xf32> -> vector<96x128xf32>
    %108 = arith.addf %103, %107 : vector<96x128xf32>
    %109 = vector.extract_strided_slice %12 {offsets = [52, 0], sizes = [96, 128], strides = [1, 1]} : vector<168x128xf32> to vector<96x128xf32>
    %c19 = arith.constant 19 : index
    %c0_72 = arith.constant 0 : index
    %c0_73 = arith.constant 0 : index
    %110 = vector.load %arg4[%c19, %c0_72, %c0_73] : memref<25x128x128xf32, #tpu.memory_space<vmem>>, vector<1x128x128xf32>
    %111 = vector.shape_cast %110 : vector<1x128x128xf32> to vector<128x128xf32>
    %cst_74 = arith.constant dense<0.000000e+00> : vector<96x128xf32>
    %112 = tpu.matmul %109, %111, %cst_74 {dimension_numbers = #tpu.dot_dimension_numbers<[1], [0], [0], [1], [0, 0, 1, 1], [], []>} : vector<96x128xf32>, vector<128x128xf32>, vector<96x128xf32> -> vector<96x128xf32>
    %113 = arith.addf %108, %112 : vector<96x128xf32>
    %114 = vector.extract_strided_slice %12 {offsets = [64, 0], sizes = [96, 128], strides = [1, 1]} : vector<168x128xf32> to vector<96x128xf32>
    %c20 = arith.constant 20 : index
    %c0_75 = arith.constant 0 : index
    %c0_76 = arith.constant 0 : index
    %115 = vector.load %arg4[%c20, %c0_75, %c0_76] : memref<25x128x128xf32, #tpu.memory_space<vmem>>, vector<1x128x128xf32>
    %116 = vector.shape_cast %115 : vector<1x128x128xf32> to vector<128x128xf32>
    %cst_77 = arith.constant dense<0.000000e+00> : vector<96x128xf32>
    %117 = tpu.matmul %114, %116, %cst_77 {dimension_numbers = #tpu.dot_dimension_numbers<[1], [0], [0], [1], [0, 0, 1, 1], [], []>} : vector<96x128xf32>, vector<128x128xf32>, vector<96x128xf32> -> vector<96x128xf32>
    %118 = arith.addf %113, %117 : vector<96x128xf32>
    %119 = vector.extract_strided_slice %12 {offsets = [65, 0], sizes = [96, 128], strides = [1, 1]} : vector<168x128xf32> to vector<96x128xf32>
    %c21 = arith.constant 21 : index
    %c0_78 = arith.constant 0 : index
    %c0_79 = arith.constant 0 : index
    %120 = vector.load %arg4[%c21, %c0_78, %c0_79] : memref<25x128x128xf32, #tpu.memory_space<vmem>>, vector<1x128x128xf32>
    %121 = vector.shape_cast %120 : vector<1x128x128xf32> to vector<128x128xf32>
    %cst_80 = arith.constant dense<0.000000e+00> : vector<96x128xf32>
    %122 = tpu.matmul %119, %121, %cst_80 {dimension_numbers = #tpu.dot_dimension_numbers<[1], [0], [0], [1], [0, 0, 1, 1], [], []>} : vector<96x128xf32>, vector<128x128xf32>, vector<96x128xf32> -> vector<96x128xf32>
    %123 = arith.addf %118, %122 : vector<96x128xf32>
    %124 = vector.extract_strided_slice %12 {offsets = [66, 0], sizes = [96, 128], strides = [1, 1]} : vector<168x128xf32> to vector<96x128xf32>
    %c22 = arith.constant 22 : index
    %c0_81 = arith.constant 0 : index
    %c0_82 = arith.constant 0 : index
    %125 = vector.load %arg4[%c22, %c0_81, %c0_82] : memref<25x128x128xf32, #tpu.memory_space<vmem>>, vector<1x128x128xf32>
    %126 = vector.shape_cast %125 : vector<1x128x128xf32> to vector<128x128xf32>
    %cst_83 = arith.constant dense<0.000000e+00> : vector<96x128xf32>
    %127 = tpu.matmul %124, %126, %cst_83 {dimension_numbers = #tpu.dot_dimension_numbers<[1], [0], [0], [1], [0, 0, 1, 1], [], []>} : vector<96x128xf32>, vector<128x128xf32>, vector<96x128xf32> -> vector<96x128xf32>
    %128 = arith.addf %123, %127 : vector<96x128xf32>
    %129 = vector.extract_strided_slice %12 {offsets = [67, 0], sizes = [96, 128], strides = [1, 1]} : vector<168x128xf32> to vector<96x128xf32>
    %c23 = arith.constant 23 : index
    %c0_84 = arith.constant 0 : index
    %c0_85 = arith.constant 0 : index
    %130 = vector.load %arg4[%c23, %c0_84, %c0_85] : memref<25x128x128xf32, #tpu.memory_space<vmem>>, vector<1x128x128xf32>
    %131 = vector.shape_cast %130 : vector<1x128x128xf32> to vector<128x128xf32>
    %cst_86 = arith.constant dense<0.000000e+00> : vector<96x128xf32>
    %132 = tpu.matmul %129, %131, %cst_86 {dimension_numbers = #tpu.dot_dimension_numbers<[1], [0], [0], [1], [0, 0, 1, 1], [], []>} : vector<96x128xf32>, vector<128x128xf32>, vector<96x128xf32> -> vector<96x128xf32>
    %133 = arith.addf %128, %132 : vector<96x128xf32>
    %134 = vector.extract_strided_slice %12 {offsets = [68, 0], sizes = [96, 128], strides = [1, 1]} : vector<168x128xf32> to vector<96x128xf32>
    %c24 = arith.constant 24 : index
    %c0_87 = arith.constant 0 : index
    %c0_88 = arith.constant 0 : index
    %135 = vector.load %arg4[%c24, %c0_87, %c0_88] : memref<25x128x128xf32, #tpu.memory_space<vmem>>, vector<1x128x128xf32>
    %136 = vector.shape_cast %135 : vector<1x128x128xf32> to vector<128x128xf32>
    %cst_89 = arith.constant dense<0.000000e+00> : vector<96x128xf32>
    %137 = tpu.matmul %134, %136, %cst_89 {dimension_numbers = #tpu.dot_dimension_numbers<[1], [0], [0], [1], [0, 0, 1, 1], [], []>} : vector<96x128xf32>, vector<128x128xf32>, vector<96x128xf32> -> vector<96x128xf32>
    %138 = arith.addf %133, %137 : vector<96x128xf32>
    %c0_90 = arith.constant 0 : index
    %c0_91 = arith.constant 0 : index
    %139 = vector.load %arg5[%c0_90, %c0_91] : memref<1x128xf32, #tpu.memory_space<vmem>>, vector<1x128xf32>
    %140 = vector.broadcast %139 : vector<1x128xf32> to vector<96x128xf32>
    %141 = arith.addf %138, %140 : vector<96x128xf32>
    %cst_92 = arith.constant 0.000000e+00 : f32
    %142 = vector.broadcast %cst_92 : f32 to vector<96x128xf32>
    %143 = arith.maximumf %141, %142 : vector<96x128xf32>
    %c0_93 = arith.constant 0 : index
    %c0_94 = arith.constant 0 : index
    %144 = vector.load %arg12[%c0_93, %c0_94] : memref<104x128xf32, #tpu.memory_space<vmem>>, vector<96x128xf32>
    tpu.vector_store %arg12[%c0_93, %c0_94], %143 {strides = array<i32>} : memref<104x128xf32, #tpu.memory_space<vmem>>, vector<96x128xf32>,
    %cst_95 = arith.constant 0.000000e+00 : f32
    %145 = vector.broadcast %cst_95 : f32 to vector<8x128xf32>
    %c96 = arith.constant 96 : index
    %c0_96 = arith.constant 0 : index
    %146 = vector.load %arg12[%c96, %c0_96] : memref<104x128xf32, #tpu.memory_space<vmem>>, vector<8x128xf32>
    tpu.vector_store %arg12[%c96, %c0_96], %145 {strides = array<i32>} : memref<104x128xf32, #tpu.memory_space<vmem>>, vector<8x128xf32>,
    %c0_97 = arith.constant 0 : index
    %c0_98 = arith.constant 0 : index
    %147 = vector.load %arg12[%c0_97, %c0_98] : memref<104x128xf32, #tpu.memory_space<vmem>>, vector<104x128xf32>
    %cst_99 = arith.constant 0.000000e+00 : f32
    %148 = vector.broadcast %cst_99 : f32 to vector<64x128xf32>
    %149 = vector.extract_strided_slice %147 {offsets = [0, 0], sizes = [64, 128], strides = [1, 1]} : vector<104x128xf32> to vector<64x128xf32>
    %c0_100 = arith.constant 0 : index
    %c0_101 = arith.constant 0 : index
    %c0_102 = arith.constant 0 : index
    %150 = vector.load %arg6[%c0_100, %c0_101, %c0_102] : memref<9x128x128xf32, #tpu.memory_space<vmem>>, vector<1x128x128xf32>
    %151 = vector.shape_cast %150 : vector<1x128x128xf32> to vector<128x128xf32>
    %cst_103 = arith.constant dense<0.000000e+00> : vector<64x128xf32>
    %152 = tpu.matmul %149, %151, %cst_103 {dimension_numbers = #tpu.dot_dimension_numbers<[1], [0], [0], [1], [0, 0, 1, 1], [], []>} : vector<64x128xf32>, vector<128x128xf32>, vector<64x128xf32> -> vector<64x128xf32>
    %153 = arith.addf %148, %152 : vector<64x128xf32>
    %154 = vector.extract_strided_slice %147 {offsets = [1, 0], sizes = [64, 128], strides = [1, 1]} : vector<104x128xf32> to vector<64x128xf32>
    %c1_104 = arith.constant 1 : index
    %c0_105 = arith.constant 0 : index
    %c0_106 = arith.constant 0 : index
    %155 = vector.load %arg6[%c1_104, %c0_105, %c0_106] : memref<9x128x128xf32, #tpu.memory_space<vmem>>, vector<1x128x128xf32>
    %156 = vector.shape_cast %155 : vector<1x128x128xf32> to vector<128x128xf32>
    %cst_107 = arith.constant dense<0.000000e+00> : vector<64x128xf32>
    %157 = tpu.matmul %154, %156, %cst_107 {dimension_numbers = #tpu.dot_dimension_numbers<[1], [0], [0], [1], [0, 0, 1, 1], [], []>} : vector<64x128xf32>, vector<128x128xf32>, vector<64x128xf32> -> vector<64x128xf32>
    %158 = arith.addf %153, %157 : vector<64x128xf32>
    %159 = vector.extract_strided_slice %147 {offsets = [2, 0], sizes = [64, 128], strides = [1, 1]} : vector<104x128xf32> to vector<64x128xf32>
    %c2_108 = arith.constant 2 : index
    %c0_109 = arith.constant 0 : index
    %c0_110 = arith.constant 0 : index
    %160 = vector.load %arg6[%c2_108, %c0_109, %c0_110] : memref<9x128x128xf32, #tpu.memory_space<vmem>>, vector<1x128x128xf32>
    %161 = vector.shape_cast %160 : vector<1x128x128xf32> to vector<128x128xf32>
    %cst_111 = arith.constant dense<0.000000e+00> : vector<64x128xf32>
    %162 = tpu.matmul %159, %161, %cst_111 {dimension_numbers = #tpu.dot_dimension_numbers<[1], [0], [0], [1], [0, 0, 1, 1], [], []>} : vector<64x128xf32>, vector<128x128xf32>, vector<64x128xf32> -> vector<64x128xf32>
    %163 = arith.addf %158, %162 : vector<64x128xf32>
    %164 = vector.extract_strided_slice %147 {offsets = [16, 0], sizes = [64, 128], strides = [1, 1]} : vector<104x128xf32> to vector<64x128xf32>
    %c3_112 = arith.constant 3 : index
    %c0_113 = arith.constant 0 : index
    %c0_114 = arith.constant 0 : index
    %165 = vector.load %arg6[%c3_112, %c0_113, %c0_114] : memref<9x128x128xf32, #tpu.memory_space<vmem>>, vector<1x128x128xf32>
    %166 = vector.shape_cast %165 : vector<1x128x128xf32> to vector<128x128xf32>
    %cst_115 = arith.constant dense<0.000000e+00> : vector<64x128xf32>
    %167 = tpu.matmul %164, %166, %cst_115 {dimension_numbers = #tpu.dot_dimension_numbers<[1], [0], [0], [1], [0, 0, 1, 1], [], []>} : vector<64x128xf32>, vector<128x128xf32>, vector<64x128xf32> -> vector<64x128xf32>
    %168 = arith.addf %163, %167 : vector<64x128xf32>
    %169 = vector.extract_strided_slice %147 {offsets = [17, 0], sizes = [64, 128], strides = [1, 1]} : vector<104x128xf32> to vector<64x128xf32>
    %c4_116 = arith.constant 4 : index
    %c0_117 = arith.constant 0 : index
    %c0_118 = arith.constant 0 : index
    %170 = vector.load %arg6[%c4_116, %c0_117, %c0_118] : memref<9x128x128xf32, #tpu.memory_space<vmem>>, vector<1x128x128xf32>
    %171 = vector.shape_cast %170 : vector<1x128x128xf32> to vector<128x128xf32>
    %cst_119 = arith.constant dense<0.000000e+00> : vector<64x128xf32>
    %172 = tpu.matmul %169, %171, %cst_119 {dimension_numbers = #tpu.dot_dimension_numbers<[1], [0], [0], [1], [0, 0, 1, 1], [], []>} : vector<64x128xf32>, vector<128x128xf32>, vector<64x128xf32> -> vector<64x128xf32>
    %173 = arith.addf %168, %172 : vector<64x128xf32>
    %174 = vector.extract_strided_slice %147 {offsets = [18, 0], sizes = [64, 128], strides = [1, 1]} : vector<104x128xf32> to vector<64x128xf32>
    %c5_120 = arith.constant 5 : index
    %c0_121 = arith.constant 0 : index
    %c0_122 = arith.constant 0 : index
    %175 = vector.load %arg6[%c5_120, %c0_121, %c0_122] : memref<9x128x128xf32, #tpu.memory_space<vmem>>, vector<1x128x128xf32>
    %176 = vector.shape_cast %175 : vector<1x128x128xf32> to vector<128x128xf32>
    %cst_123 = arith.constant dense<0.000000e+00> : vector<64x128xf32>
    %177 = tpu.matmul %174, %176, %cst_123 {dimension_numbers = #tpu.dot_dimension_numbers<[1], [0], [0], [1], [0, 0, 1, 1], [], []>} : vector<64x128xf32>, vector<128x128xf32>, vector<64x128xf32> -> vector<64x128xf32>
    %178 = arith.addf %173, %177 : vector<64x128xf32>
    %179 = vector.extract_strided_slice %147 {offsets = [32, 0], sizes = [64, 128], strides = [1, 1]} : vector<104x128xf32> to vector<64x128xf32>
    %c6_124 = arith.constant 6 : index
    %c0_125 = arith.constant 0 : index
    %c0_126 = arith.constant 0 : index
    %180 = vector.load %arg6[%c6_124, %c0_125, %c0_126] : memref<9x128x128xf32, #tpu.memory_space<vmem>>, vector<1x128x128xf32>
    %181 = vector.shape_cast %180 : vector<1x128x128xf32> to vector<128x128xf32>
    %cst_127 = arith.constant dense<0.000000e+00> : vector<64x128xf32>
    %182 = tpu.matmul %179, %181, %cst_127 {dimension_numbers = #tpu.dot_dimension_numbers<[1], [0], [0], [1], [0, 0, 1, 1], [], []>} : vector<64x128xf32>, vector<128x128xf32>, vector<64x128xf32> -> vector<64x128xf32>
    %183 = arith.addf %178, %182 : vector<64x128xf32>
    %184 = vector.extract_strided_slice %147 {offsets = [33, 0], sizes = [64, 128], strides = [1, 1]} : vector<104x128xf32> to vector<64x128xf32>
    %c7_128 = arith.constant 7 : index
    %c0_129 = arith.constant 0 : index
    %c0_130 = arith.constant 0 : index
    %185 = vector.load %arg6[%c7_128, %c0_129, %c0_130] : memref<9x128x128xf32, #tpu.memory_space<vmem>>, vector<1x128x128xf32>
    %186 = vector.shape_cast %185 : vector<1x128x128xf32> to vector<128x128xf32>
    %cst_131 = arith.constant dense<0.000000e+00> : vector<64x128xf32>
    %187 = tpu.matmul %184, %186, %cst_131 {dimension_numbers = #tpu.dot_dimension_numbers<[1], [0], [0], [1], [0, 0, 1, 1], [], []>} : vector<64x128xf32>, vector<128x128xf32>, vector<64x128xf32> -> vector<64x128xf32>
    %188 = arith.addf %183, %187 : vector<64x128xf32>
    %189 = vector.extract_strided_slice %147 {offsets = [34, 0], sizes = [64, 128], strides = [1, 1]} : vector<104x128xf32> to vector<64x128xf32>
    %c8_132 = arith.constant 8 : index
    %c0_133 = arith.constant 0 : index
    %c0_134 = arith.constant 0 : index
    %190 = vector.load %arg6[%c8_132, %c0_133, %c0_134] : memref<9x128x128xf32, #tpu.memory_space<vmem>>, vector<1x128x128xf32>
    %191 = vector.shape_cast %190 : vector<1x128x128xf32> to vector<128x128xf32>
    %cst_135 = arith.constant dense<0.000000e+00> : vector<64x128xf32>
    %192 = tpu.matmul %189, %191, %cst_135 {dimension_numbers = #tpu.dot_dimension_numbers<[1], [0], [0], [1], [0, 0, 1, 1], [], []>} : vector<64x128xf32>, vector<128x128xf32>, vector<64x128xf32> -> vector<64x128xf32>
    %193 = arith.addf %188, %192 : vector<64x128xf32>
    %c0_136 = arith.constant 0 : index
    %c0_137 = arith.constant 0 : index
    %194 = vector.load %arg7[%c0_136, %c0_137] : memref<1x128xf32, #tpu.memory_space<vmem>>, vector<1x128xf32>
    %195 = vector.broadcast %194 : vector<1x128xf32> to vector<64x128xf32>
    %196 = arith.addf %193, %195 : vector<64x128xf32>
    %cst_138 = arith.constant 0.000000e+00 : f32
    %197 = vector.broadcast %cst_138 : f32 to vector<64x128xf32>
    %198 = arith.maximumf %196, %197 : vector<64x128xf32>
    %c0_139 = arith.constant 0 : index
    %c0_140 = arith.constant 0 : index
    %199 = vector.load %arg8[%c0_139, %c0_140] : memref<128x128xf32, #tpu.memory_space<vmem>>, vector<128x128xf32>
    %cst_141 = arith.constant dense<0.000000e+00> : vector<64x128xf32>
    %200 = tpu.matmul %198, %199, %cst_141 {dimension_numbers = #tpu.dot_dimension_numbers<[1], [0], [0], [1], [0, 0, 1, 1], [], []>} : vector<64x128xf32>, vector<128x128xf32>, vector<64x128xf32> -> vector<64x128xf32>
    %c0_142 = arith.constant 0 : index
    %c0_143 = arith.constant 0 : index
    %201 = vector.load %arg9[%c0_142, %c0_143] : memref<1x128xf32, #tpu.memory_space<vmem>>, vector<1x128xf32>
    %202 = vector.broadcast %201 : vector<1x128xf32> to vector<64x128xf32>
    %203 = arith.addf %200, %202 : vector<64x128xf32>
    %c0_144 = arith.constant 0 : index
    %c0_145 = arith.constant 0 : index
    %c0_146 = arith.constant 0 : index
    %204 = vector.load %arg10[%c0_144, %c0_145, %c0_146] : memref<1x64x128xf32, #tpu.memory_space<vmem>>, vector<1x64x128xf32>
    %205 = vector.shape_cast %204 : vector<1x64x128xf32> to vector<64x128xf32>
    %206 = vector.shape_cast %203 : vector<64x128xf32> to vector<1x64x128xf32>
    tpu.vector_store %arg10[%c0_144, %c0_145, %c0_146], %206 {strides = array<i32>} : memref<1x64x128xf32, #tpu.memory_space<vmem>>, vector<1x64x128xf32>,
    return
  }
  func.func @transform_0(%arg0: i32) -> (i32, i32, i32) {
    %c0_i32 = arith.constant 0 : i32
    %c0_i32_0 = arith.constant 0 : i32
    %c0_i32_1 = arith.constant 0 : i32
    return %arg0, %c0_i32, %c0_i32_0 : i32, i32, i32
  }
  func.func @transform_1(%arg0: i32) -> (i32, i32) {
    %c0_i32 = arith.constant 0 : i32
    %c0_i32_0 = arith.constant 0 : i32
    %c0_i32_1 = arith.constant 0 : i32
    return %c0_i32, %c0_i32_0 : i32, i32
  }
  func.func @transform_2(%arg0: i32) -> (i32, i32) {
    %c0_i32 = arith.constant 0 : i32
    %c0_i32_0 = arith.constant 0 : i32
    %c0_i32_1 = arith.constant 0 : i32
    return %c0_i32, %c0_i32_0 : i32, i32
  }
  func.func @transform_3(%arg0: i32) -> (i32, i32, i32) {
    %c0_i32 = arith.constant 0 : i32
    %c0_i32_0 = arith.constant 0 : i32
    %c0_i32_1 = arith.constant 0 : i32
    %c0_i32_2 = arith.constant 0 : i32
    return %c0_i32, %c0_i32_0, %c0_i32_1 : i32, i32, i32
  }
  func.func @transform_4(%arg0: i32) -> (i32, i32) {
    %c0_i32 = arith.constant 0 : i32
    %c0_i32_0 = arith.constant 0 : i32
    %c0_i32_1 = arith.constant 0 : i32
    return %c0_i32, %c0_i32_0 : i32, i32
  }
  func.func @transform_5(%arg0: i32) -> (i32, i32, i32) {
    %c0_i32 = arith.constant 0 : i32
    %c0_i32_0 = arith.constant 0 : i32
    %c0_i32_1 = arith.constant 0 : i32
    %c0_i32_2 = arith.constant 0 : i32
    return %c0_i32, %c0_i32_0, %c0_i32_1 : i32, i32, i32
  }
  func.func @transform_6(%arg0: i32) -> (i32, i32) {
    %c0_i32 = arith.constant 0 : i32
    %c0_i32_0 = arith.constant 0 : i32
    %c0_i32_1 = arith.constant 0 : i32
    return %c0_i32, %c0_i32_0 : i32, i32
  }
  func.func @transform_7(%arg0: i32) -> (i32, i32) {
    %c0_i32 = arith.constant 0 : i32
    %c0_i32_0 = arith.constant 0 : i32
    %c0_i32_1 = arith.constant 0 : i32
    return %c0_i32, %c0_i32_0 : i32, i32
  }
  func.func @transform_8(%arg0: i32) -> (i32, i32) {
    %c0_i32 = arith.constant 0 : i32
    %c0_i32_0 = arith.constant 0 : i32
    %c0_i32_1 = arith.constant 0 : i32
    return %c0_i32, %c0_i32_0 : i32, i32
  }
  func.func @transform_9(%arg0: i32) -> (i32, i32, i32) {
    %c0_i32 = arith.constant 0 : i32
    %c0_i32_0 = arith.constant 0 : i32
    %c0_i32_1 = arith.constant 0 : i32
    return %arg0, %c0_i32, %c0_i32_0 : i32, i32, i32
  }
}

</mosaic_0001>

<bundles_post_ra>
// kernel: colornet_forward.1
= control target key start
LH: loop header
LB: loop body
LE: loop exit
PB: predicated region body
PF: predicated region fallthrough
CT: control target
= control target key end

     0   :  { %s9944_s30 = smov 0   ;;  %s13937_s0 = inlined_call_operand.vmem [shape: f32[2,160,768], index: 0, kind: input, shape index: {}]   ;;  %s13938_s1 = inlined_call_operand.vmem [shape: f32[768,128], index: 1, kind: input, shape index: {}]   ;;  %s13939_s2 = inlined_call_operand.vmem [shape: f32[1,128], index: 2, kind: input, shape index: {}]   ;;  %s13940_s3 = inlined_call_operand.vmem [shape: f32[25,128,128], index: 3, kind: input, shape index: {}]   ;;  %s13941_s4 = inlined_call_operand.vmem [shape: f32[1,128], index: 4, kind: input, shape index: {}]   ;;  %s13942_s5 = inlined_call_operand.vmem [shape: f32[9,128,128], index: 5, kind: input, shape index: {}]   ;;  %s13943_s6 = inlined_call_operand.vmem [shape: f32[1,128], index: 6, kind: input, shape index: {}]   ;;  %s13944_s7 = inlined_call_operand.vmem [shape: f32[128,128], index: 7, kind: input, shape index: {}]   ;;  %s13945_s8 = inlined_call_operand.vmem [shape: f32[1,128], index: 8, kind: input, shape index: {}]   ;;  %s13946_s9 = inlined_call_operand.vmem [shape: f32[2,64,128], index: 9, kind: output, shape index: {}]  }
   0x1 LB: > { %s6718_s10 = sadd.s32 4294967295, %s9891_s30   ;;  %p6722_p0 = scmp.ge.s32.totalorder %s9891_s30, 1  ;;  %s9891_s30 = sphi %s9944_s30, %s19_s30  }
   0x2   : > { %p287_p1 = scmp.lt.s32.totalorder %s9891_s30, 3 }
   0x4   : > { %p288_p2 = pnand %p6722_p0, %p287_p1 }
   0x6   : > { %291 = sbr.rel (%p288_p2) target bundleno = 1674 (0x68a), region = 56 }
   0xb   : > { %v468_v0 = vld [vmem:[%s13938_s1 + $0x78] sm:$0xff]  ;;  %v13947_v2 = vmov 0.0   ;;  %v467_v3 = vld [vmem:[%s13938_s1 + $0x70] sm:$0xff]  ;;  %v466_v5 = vld [vmem:[%s13938_s1 + $0x68] sm:$0xff]  ;;  %p323_p3 = scmp.lt.s32.totalorder %s6718_s10, 1  ;;  %vm1159_vm0 = vcmask 1046528  }
   0xc   : > { %v500_v1 = vld [vmem:[%s13938_s1 + $0x178] sm:$0xff]  ;;  %556 = vmatprep.subr.mxu0 %v13947_v2  ;;  %721 = vmatprep.subr.mxu1 %v13947_v2  ;;  %v499_v4 = vld [vmem:[%s13938_s1 + $0x170] sm:$0xff]  ;;  %v498_v6 = vld [vmem:[%s13938_s1 + $0x168] sm:$0xff]  ;;  %vm1656_vm1 = vcmask 1044480   ;;  %vm1464_vm2 = vcmask 1045504   ;;  %vm1848_vm3 = vcmask 1043456  }
   0xd   : > { %557 = vmatpush1.msra.mxu0 %v468_v0  ;;  %722 = vmatpush1.msra.mxu1 %v500_v1  ;;  %v465_v7 = vld [vmem:[%s13938_s1 + $0x60] sm:$0xff]  ;;  %v464_v9 = vld [vmem:[%s13938_s1 + $0x58] sm:$0xff]  ;;  %v463_v11 = vld [vmem:[%s13938_s1 + $0x50] sm:$0xff]  ;;  %s14196_s10 = smov (!%p323_p3, %s6718_s10), 1 }
   0xe   : > { %558 = vmatprep.subr.mxu0 %v13947_v2  ;;  %723 = vmatprep.subr.mxu1 %v13947_v2  ;;  %v497_v8 = vld [vmem:[%s13938_s1 + $0x160] sm:$0xff]  ;;  %v496_v10 = vld [vmem:[%s13938_s1 + $0x158] sm:$0xff]  ;;  %v495_v12 = vld [vmem:[%s13938_s1 + $0x150] sm:$0xff]  ;;  %s9875_s24 = smul.u32 960, %s14196_s10  ;;  %s7244_s28 = sshll.u32 %s14196_s10, 6 }
   0xf   : > { %559 = vmatpush1.msra.mxu0 %v467_v3  ;;  %724 = vmatpush1.msra.mxu1 %v499_v4  ;;  %v462_v13 = vld [vmem:[%s13938_s1 + $0x48] sm:$0xff]  ;;  %v461_v15 = vld [vmem:[%s13938_s1 + $0x40] sm:$0xff]  ;;  %v460_v17 = vld [vmem:[%s13938_s1 + $0x38] sm:$0xff]  ;;  %s332_s14 = scalar_lea.vmem %s13946_s9, %s7244_s28 }
  0x10   : > { %560 = vmatprep.subr.mxu0 %v13947_v2  ;;  %725 = vmatprep.subr.mxu1 %v13947_v2  ;;  %v494_v14 = vld [vmem:[%s13938_s1 + $0x148] sm:$0xff]  ;;  %v493_v16 = vld [vmem:[%s13938_s1 + $0x140] sm:$0xff]  ;;  %v492_v18 = vld [vmem:[%s13938_s1 + $0x138] sm:$0xff]  ;;  %s10192_s16 = scalar_lea.vmem %s13937_s0, %s9875_s24 }
  0x11   : > { %561 = vmatpush1.msra.mxu0 %v466_v5  ;;  %726 = vmatpush1.msra.mxu1 %v498_v6  ;;  %v459_v19 = vld [vmem:[%s13938_s1 + $0x30] sm:$0xff]  ;;  %v458_v21 = vld [vmem:[%s13938_s1 + $0x28] sm:$0xff]  ;;  %v457_v23 = vld [vmem:[%s13938_s1 + $0x20] sm:$0xff] }
  0x12   : > { %562 = vmatprep.subr.mxu0 %v13947_v2  ;;  %727 = vmatprep.subr.mxu1 %v13947_v2  ;;  %v491_v20 = vld [vmem:[%s13938_s1 + $0x130] sm:$0xff]  ;;  %v490_v22 = vld [vmem:[%s13938_s1 + $0x128] sm:$0xff]  ;;  %v489_v24 = vld [vmem:[%s13938_s1 + $0x120] sm:$0xff] }
  0x13   : > { %563 = vmatpush1.msra.mxu0 %v465_v7  ;;  %728 = vmatpush1.msra.mxu1 %v497_v8  ;;  %v456_v25 = vld [vmem:[%s13938_s1 + $0x18] sm:$0xff]  ;;  %v455_v27 = vld [vmem:[%s13938_s1 + $0x10] sm:$0xff]  ;;  %v454_v29 = vld [vmem:[%s13938_s1 + $0x8] sm:$0xff] }
  0x14   : > { %564 = vmatprep.subr.mxu0 %v13947_v2  ;;  %729 = vmatprep.subr.mxu1 %v13947_v2  ;;  %v488_v26 = vld [vmem:[%s13938_s1 + $0x118] sm:$0xff]  ;;  %v487_v28 = vld [vmem:[%s13938_s1 + $0x110] sm:$0xff]  ;;  %v486_v30 = vld [vmem:[%s13938_s1 + $0x108] sm:$0xff] }
  0x15   : > { %565 = vmatpush1.msra.mxu0 %v464_v9  ;;  %730 = vmatpush1.msra.mxu1 %v496_v10  ;;  %v453_v31 = vld [vmem:[%s13938_s1] sm:$0xff]  ;;  %v484_v33 = vld [vmem:[%s13938_s1 + $0xf8] sm:$0xff]  ;;  %v483_v35 = vld [vmem:[%s13938_s1 + $0xf0] sm:$0xff] }
  0x16   : > { %566 = vmatprep.subr.mxu0 %v13947_v2  ;;  %731 = vmatprep.subr.mxu1 %v13947_v2  ;;  %v485_v32 = vld [vmem:[%s13938_s1 + $0x100] sm:$0xff]  ;;  %v516_v34 = vld [vmem:[%s13938_s1 + $0x1f8] sm:$0xff]  ;;  %v515_v36 = vld [vmem:[%s13938_s1 + $0x1f0] sm:$0xff] }
  0x17   : > { %567 = vmatpush1.msra.mxu0 %v463_v11  ;;  %732 = vmatpush1.msra.mxu1 %v495_v12  ;;  %v482_v37 = vld [vmem:[%s13938_s1 + $0xe8] sm:$0xff]  ;;  %v481_v39 = vld [vmem:[%s13938_s1 + $0xe0] sm:$0xff]  ;;  %v480_v41 = vld [vmem:[%s13938_s1 + $0xd8] sm:$0xff] }
  0x18   : > { %568 = vmatprep.subr.mxu0 %v13947_v2  ;;  %733 = vmatprep.subr.mxu1 %v13947_v2  ;;  %v514_v38 = vld [vmem:[%s13938_s1 + $0x1e8] sm:$0xff]  ;;  %v513_v40 = vld [vmem:[%s13938_s1 + $0x1e0] sm:$0xff]  ;;  %v512_v42 = vld [vmem:[%s13938_s1 + $0x1d8] sm:$0xff] }
  0x19   : > { %569 = vmatpush1.msra.mxu0 %v462_v13  ;;  %734 = vmatpush1.msra.mxu1 %v494_v14  ;;  %v479_v43 = vld [vmem:[%s13938_s1 + $0xd0] sm:$0xff]  ;;  %v478_v45 = vld [vmem:[%s13938_s1 + $0xc8] sm:$0xff]  ;;  %v477_v47 = vld [vmem:[%s13938_s1 + $0xc0] sm:$0xff] }
  0x1a   : > { %570 = vmatprep.subr.mxu0 %v13947_v2  ;;  %735 = vmatprep.subr.mxu1 %v13947_v2  ;;  %v511_v44 = vld [vmem:[%s13938_s1 + $0x1d0] sm:$0xff]  ;;  %v510_v46 = vld [vmem:[%s13938_s1 + $0x1c8] sm:$0xff]  ;;  %v509_v48 = vld [vmem:[%s13938_s1 + $0x1c0] sm:$0xff] }
  0x1b   : > { %571 = vmatpush1.msra.mxu0 %v461_v15  ;;  %736 = vmatpush1.msra.mxu1 %v493_v16  ;;  %v476_v49 = vld [vmem:[%s13938_s1 + $0xb8] sm:$0xff]  ;;  %v475_v51 = vld [vmem:[%s13938_s1 + $0xb0] sm:$0xff]  ;;  %v474_v53 = vld [vmem:[%s13938_s1 + $0xa8] sm:$0xff] }
  0x1c   : > { %572 = vmatprep.subr.mxu0 %v13947_v2  ;;  %737 = vmatprep.subr.mxu1 %v13947_v2  ;;  %v508_v50 = vld [vmem:[%s13938_s1 + $0x1b8] sm:$0xff]  ;;  %v507_v52 = vld [vmem:[%s13938_s1 + $0x1b0] sm:$0xff]  ;;  %v506_v54 = vld [vmem:[%s13938_s1 + $0x1a8] sm:$0xff] }
  0x1d   : > { %573 = vmatpush1.msra.mxu0 %v460_v17  ;;  %738 = vmatpush1.msra.mxu1 %v492_v18  ;;  %v473_v55 = vld [vmem:[%s13938_s1 + $0xa0] sm:$0xff]  ;;  %v472_v57 = vld [vmem:[%s13938_s1 + $0x98] sm:$0xff]  ;;  %v471_v59 = vld [vmem:[%s13938_s1 + $0x90] sm:$0xff] }
  0x1e   : > { %574 = vmatprep.subr.mxu0 %v13947_v2  ;;  %739 = vmatprep.subr.mxu1 %v13947_v2  ;;  %v505_v56 = vld [vmem:[%s13938_s1 + $0x1a0] sm:$0xff]  ;;  %v504_v58 = vld [vmem:[%s13938_s1 + $0x198] sm:$0xff]  ;;  %v503_v60 = vld [vmem:[%s13938_s1 + $0x190] sm:$0xff] }
  0x1f   : > { %575 = vmatpush1.msra.mxu0 %v459_v19  ;;  %740 = vmatpush1.msra.mxu1 %v491_v20  ;;  %v334_v61 = vld [vmem:[%s10192_s16 + $0x8] sm:$0xff]  ;;  %v469_v0 = vld [vmem:[%s13938_s1 + $0x80] sm:$0xff]  ;;  %v532_v3 = vld [vmem:[%s13938_s1 + $0x278] sm:$0xff] }
  0x20   : > { %576 = vmatprep.subr.mxu0 %v13947_v2  ;;  %741 = vmatprep.subr.mxu1 %v13947_v2  ;;  %v470_v62 = vld [vmem:[%s13938_s1 + $0x88] sm:$0xff]  ;;  %v333_v1 = vld [vmem:[%s10192_s16] sm:$0xff]  ;;  %v336_v5 = vld [vmem:[%s10192_s16 + $0x18] sm:$0xff] }
  0x21   : > { %577 = vmatpush1.msra.mxu0 %v458_v21  ;;  %742 = vmatpush1.msra.mxu1 %v490_v22  ;;  %v502_v63 = vld [vmem:[%s13938_s1 + $0x188] sm:$0xff]  ;;  %v501_v4 = vld [vmem:[%s13938_s1 + $0x180] sm:$0xff]  ;;  %v340_v6 = vld [vmem:[%s10192_s16 + $0x38] sm:$0xff] }
  0x22   : > { %578 = vmatprep.subr.mxu0 %v13947_v2  ;;  %743 = vmatprep.subr.mxu1 %v13947_v2  ;;  %v335_v7 = vld [vmem:[%s10192_s16 + $0x10] sm:$0xff]  ;;  %v342_v9 = vld [vmem:[%s10192_s16 + $0x48] sm:$0xff]  ;;  %v341_v13 = vld [vmem:[%s10192_s16 + $0x40] sm:$0xff] }
  0x23   : > { %579 = vmatpush1.msra.mxu0 %v457_v23  ;;  %744 = vmatpush1.msra.mxu1 %v489_v24  ;;  %v339_v8 = vld [vmem:[%s10192_s16 + $0x30] sm:$0xff]  ;;  %v346_v11 = vld [vmem:[%s10192_s16 + $0x68] sm:$0xff]  ;;  %v345_v14 = vld [vmem:[%s10192_s16 + $0x60] sm:$0xff] }
  0x24   : > { %580 = vmatprep.subr.mxu0 %v13947_v2  ;;  %745 = vmatprep.subr.mxu1 %v13947_v2  ;;  %v531_v10 = vld [vmem:[%s13938_s1 + $0x270] sm:$0xff]  ;;  %v530_v12 = vld [vmem:[%s13938_s1 + $0x268] sm:$0xff]  ;;  %v529_v15 = vld [vmem:[%s13938_s1 + $0x260] sm:$0xff] }
  0x25   : > { %581 = vmatpush1.msra.mxu0 %v456_v25  ;;  %746 = vmatpush1.msra.mxu1 %v488_v26  ;;  %v348_v16 = vld [vmem:[%s10192_s16 + $0x78] sm:$0xff]  ;;  %v347_v18 = vld [vmem:[%s10192_s16 + $0x70] sm:$0xff]  ;;  %v354_v21 = vld [vmem:[%s10192_s16 + $0xa8] sm:$0xff] }
  0x26   : > { %582 = vmatprep.subr.mxu0 %v13947_v2  ;;  %747 = vmatprep.subr.mxu1 %v13947_v2  ;;  %v352_v17 = vld [vmem:[%s10192_s16 + $0x98] sm:$0xff]  ;;  %v351_v20 = vld [vmem:[%s10192_s16 + $0x90] sm:$0xff]  ;;  %v358_v23 = vld [vmem:[%s10192_s16 + $0xc8] sm:$0xff] }
  0x27   : > { %583 = vmatpush1.msra.mxu0 %v455_v27  ;;  %748 = vmatpush1.msra.mxu1 %v487_v28  ;;  %v528_v19 = vld [vmem:[%s13938_s1 + $0x258] sm:$0xff]  ;;  %v527_v22 = vld [vmem:[%s13938_s1 + $0x250] sm:$0xff]  ;;  %v353_v24 = vld [vmem:[%s10192_s16 + $0xa0] sm:$0xff] }
  0x28   : > { %584 = vmatprep.subr.mxu0 %v13947_v2  ;;  %749 = vmatprep.subr.mxu1 %v13947_v2  ;;  %v526_v25 = vld [vmem:[%s13938_s1 + $0x248] sm:$0xff]  ;;  %v357_v26 = vld [vmem:[%s10192_s16 + $0xc0] sm:$0xff]  ;;  %v360_v27 = vld [vmem:[%s10192_s16 + $0xd8] sm:$0xff] }
  0x29   : > { %585 = vmatpush1.msra.mxu0 %v454_v29  ;;  %750 = vmatpush1.msra.mxu1 %v486_v30  ;;  %v364_v28 = vld [vmem:[%s10192_s16 + $0xf8] sm:$0xff]  ;;  %v525_v29 = vld [vmem:[%s13938_s1 + $0x240] sm:$0xff]  ;;  %v359_v30 = vld [vmem:[%s10192_s16 + $0xd0] sm:$0xff] }
  0x2a   : > { %586 = vmatprep.subr.mxu0 %v13947_v2  ;;  %751 = vmatprep.subr.mxu1 %v13947_v2 }
  0x2b   : > { %587 = vmatpush1.msra.mxu0 %v453_v31  ;;  %752 = vmatpush1.msra.mxu1 %v485_v32  ;;  %v363_v31 = vld [vmem:[%s10192_s16 + $0xf0] sm:$0xff]  ;;  %v366_v32 = vld [vmem:[%s10192_s16 + $0x108] sm:$0xff] }
  0x2c   : > { %588 = vmatprep.subr.mxu0 %v13947_v2  ;;  %753 = vmatprep.subr.mxu1 %v13947_v2 }
  0x2d   : > { %589 = vmatpush2.msra.mxu0 %v484_v33  ;;  %754 = vmatpush2.msra.mxu1 %v516_v34  ;;  %v524_v33 = vld [vmem:[%s13938_s1 + $0x238] sm:$0xff]  ;;  %v370_v34 = vld [vmem:[%s10192_s16 + $0x128] sm:$0xff] }
  0x2e   : > { %590 = vmatprep.subr.mxu0 %v13947_v2  ;;  %755 = vmatprep.subr.mxu1 %v13947_v2 }
  0x2f   : > { %591 = vmatpush2.msra.mxu0 %v483_v35  ;;  %756 = vmatpush2.msra.mxu1 %v515_v36  ;;  %v365_v35 = vld [vmem:[%s10192_s16 + $0x100] sm:$0xff]  ;;  %v523_v36 = vld [vmem:[%s13938_s1 + $0x230] sm:$0xff] }
  0x30   : > { %592 = vmatprep.subr.mxu0 %v13947_v2  ;;  %757 = vmatprep.subr.mxu1 %v13947_v2 }
  0x31   : > { %593 = vmatpush2.msra.mxu0 %v482_v37  ;;  %758 = vmatpush2.msra.mxu1 %v514_v38  ;;  %v369_v37 = vld [vmem:[%s10192_s16 + $0x120] sm:$0xff]  ;;  %v372_v38 = vld [vmem:[%s10192_s16 + $0x138] sm:$0xff] }
  0x32   : > { %594 = vmatprep.subr.mxu0 %v13947_v2  ;;  %759 = vmatprep.subr.mxu1 %v13947_v2 }
  0x33   : > { %595 = vmatpush2.msra.mxu0 %v481_v39  ;;  %760 = vmatpush2.msra.mxu1 %v513_v40  ;;  %v522_v39 = vld [vmem:[%s13938_s1 + $0x228] sm:$0xff]  ;;  %v376_v40 = vld [vmem:[%s10192_s16 + $0x158] sm:$0xff] }
  0x34   : > { %596 = vmatprep.subr.mxu0 %v13947_v2  ;;  %761 = vmatprep.subr.mxu1 %v13947_v2 }
  0x35   : > { %597 = vmatpush2.msra.mxu0 %v480_v41  ;;  %762 = vmatpush2.msra.mxu1 %v512_v42  ;;  %v371_v41 = vld [vmem:[%s10192_s16 + $0x130] sm:$0xff]  ;;  %v521_v42 = vld [vmem:[%s13938_s1 + $0x220] sm:$0xff] }
  0x36   : > { %598 = vmatprep.subr.mxu0 %v13947_v2  ;;  %763 = vmatprep.subr.mxu1 %v13947_v2 }
  0x37   : > { %599 = vmatpush2.msra.mxu0 %v479_v43  ;;  %764 = vmatpush2.msra.mxu1 %v511_v44  ;;  %v375_v43 = vld [vmem:[%s10192_s16 + $0x150] sm:$0xff]  ;;  %v378_v44 = vld [vmem:[%s10192_s16 + $0x168] sm:$0xff] }
  0x38   : > { %600 = vmatprep.subr.mxu0 %v13947_v2  ;;  %765 = vmatprep.subr.mxu1 %v13947_v2 }
  0x39   : > { %601 = vmatpush2.msra.mxu0 %v478_v45  ;;  %766 = vmatpush2.msra.mxu1 %v510_v46  ;;  %v382_v45 = vld [vmem:[%s10192_s16 + $0x188] sm:$0xff]  ;;  %v520_v46 = vld [vmem:[%s13938_s1 + $0x218] sm:$0xff] }
  0x3a   : > { %602 = vmatprep.subr.mxu0 %v13947_v2  ;;  %767 = vmatprep.subr.mxu1 %v13947_v2 }
  0x3b   : > { %603 = vmatpush2.msra.mxu0 %v477_v47  ;;  %768 = vmatpush2.msra.mxu1 %v509_v48  ;;  %v377_v47 = vld [vmem:[%s10192_s16 + $0x160] sm:$0xff] }
  0x3c   : > { %604 = vmatprep.subr.mxu0 %v13947_v2  ;;  %769 = vmatprep.subr.mxu1 %v13947_v2  ;;  %v381_v48 = vld [vmem:[%s10192_s16 + $0x180] sm:$0xff] }
  0x3d   : > { %605 = vmatpush2.msra.mxu0 %v476_v49  ;;  %770 = vmatpush2.msra.mxu1 %v508_v50  ;;  %v384_v49 = vld [vmem:[%s10192_s16 + $0x198] sm:$0xff]  ;;  %v519_v50 = vld [vmem:[%s13938_s1 + $0x210] sm:$0xff] }
  0x3e   : > { %606 = vmatprep.subr.mxu0 %v13947_v2  ;;  %771 = vmatprep.subr.mxu1 %v13947_v2 }
  0x3f   : > { %607 = vmatpush2.msra.mxu0 %v475_v51  ;;  %772 = vmatpush2.msra.mxu1 %v507_v52  ;;  %v388_v51 = vld [vmem:[%s10192_s16 + $0x1b8] sm:$0xff]  ;;  %v383_v52 = vld [vmem:[%s10192_s16 + $0x190] sm:$0xff] }
  0x40   : > { %608 = vmatprep.subr.mxu0 %v13947_v2  ;;  %773 = vmatprep.subr.mxu1 %v13947_v2 }
  0x41   : > { %609 = vmatpush2.msra.mxu0 %v474_v53  ;;  %774 = vmatpush2.msra.mxu1 %v506_v54  ;;  %v518_v53 = vld [vmem:[%s13938_s1 + $0x208] sm:$0xff]  ;;  %v387_v54 = vld [vmem:[%s10192_s16 + $0x1b0] sm:$0xff] }
  0x42   : > { %610 = vmatprep.subr.mxu0 %v13947_v2  ;;  %775 = vmatprep.subr.mxu1 %v13947_v2 }
  0x43   : > { %611 = vmatpush2.msra.mxu0 %v473_v55  ;;  %776 = vmatpush2.msra.mxu1 %v505_v56  ;;  %v390_v55 = vld [vmem:[%s10192_s16 + $0x1c8] sm:$0xff] }
  0x44   : > { %612 = vmatprep.subr.mxu0 %v13947_v2  ;;  %777 = vmatprep.subr.mxu1 %v13947_v2  ;;  %v394_v56 = vld [vmem:[%s10192_s16 + $0x1e8] sm:$0xff] }
  0x45   : > { %613 = vmatpush2.msra.mxu0 %v472_v57  ;;  %778 = vmatpush2.msra.mxu1 %v504_v58  ;;  %v517_v57 = vld [vmem:[%s13938_s1 + $0x200] sm:$0xff] }
  0x46   : > { %614 = vmatprep.subr.mxu0 %v13947_v2  ;;  %779 = vmatprep.subr.mxu1 %v13947_v2  ;;  %v389_v58 = vld [vmem:[%s10192_s16 + $0x1c0] sm:$0xff] }
  0x47   : > { %615 = vmatpush2.msra.mxu0 %v471_v59  ;;  %780 = vmatpush2.msra.mxu1 %v503_v60  ;;  %v393_v59 = vld [vmem:[%s10192_s16 + $0x1e0] sm:$0xff]  ;;  %v396_v60 = vld [vmem:[%s10192_s16 + $0x1f8] sm:$0xff] }
  0x48   : > { %616 = vmatprep.subr.mxu0 %v13947_v2  ;;  %620 = vmatprep.mubr.f32.mxu0 %v334_v61  ;;  %v548_v61 = vld [vmem:[%s13938_s1 + $0x2f8] sm:$0xff] }
  0x49   : > { %617 = vmatpush2.msra.mxu0 %v470_v62  ;;  %781 = vmatprep.subr.mxu1 %v13947_v2  ;;  %v400_v62 = vld [vmem:[%s10192_s16 + $0x218] sm:$0xff] }
  0x4a   : > { %618 = vmatprep.subr.mxu0 %v13947_v2  ;;  %782 = vmatpush2.msra.mxu1 %v502_v63  ;;  %v395_v63 = vld [vmem:[%s10192_s16 + $0x1f0] sm:$0xff] }
  0x4b   : > { %619 = vmatpush2.msra.mxu0 %v469_v0  ;;  %783 = vmatprep.subr.mxu1 %v13947_v2  ;;  %v547_v0 = vld [vmem:[%s13938_s1 + $0x2f0] sm:$0xff] }
  0x4c   : > { %621 = vmatmul.mubr.f32.vlgmr.msra.gmra.mxu0 %v333_v1  ;;  %886 = vmatprep.subr.mxu0 %v13947_v2  ;;  %v399_v1 = vld [vmem:[%s10192_s16 + $0x210] sm:$0xff] }
  0x4d   : > { %887 = vmatpush1.msra.mxu0 %v532_v3  ;;  %784 = vmatpush2.msra.mxu1 %v501_v4  ;;  %v402_v3 = vld [vmem:[%s10192_s16 + $0x228] sm:$0xff] }
  0x4e   : > { %785 = vmatprep.mubr.f32.mxu1 %v336_v5  ;;  %625 = vmatprep.mubr.f32.mxu0 %v340_v6  ;;  %v546_v4 = vld [vmem:[%s13938_s1 + $0x2e8] sm:$0xff]  ;;  %v401_v6 = vld [vmem:[%s10192_s16 + $0x220] sm:$0xff] }
  0x4f   : > { %786 = vmatmul.mubr.f32.vlgmr.msra.gmra.mxu1 %v335_v7  ;;  %888 = vmatprep.subr.mxu0 %v13947_v2  ;;  %v406_v5 = vld [vmem:[%s10192_s16 + $0x248] sm:$0xff]  ;;  %v545_v7 = vld [vmem:[%s13938_s1 + $0x2e0] sm:$0xff] }
  0x50   : > { %626 = vmatmul.mubr.f32.gmra.mxu0 %v339_v8  ;;  %790 = vmatprep.mubr.f32.mxu1 %v342_v9  ;;  %v405_v8 = vld [vmem:[%s10192_s16 + $0x240] sm:$0xff]  ;;  %v408_v9 = vld [vmem:[%s10192_s16 + $0x258] sm:$0xff] }
  0x51   : > { %889 = vmatpush1.msra.mxu0 %v531_v10  ;;  %630 = vmatprep.mubr.f32.mxu0 %v346_v11  ;;  %v412_v10 = vld [vmem:[%s10192_s16 + $0x278] sm:$0xff] }
  0x52   : > { %890 = vmatprep.subr.mxu0 %v13947_v2  ;;  %v544_v11 = vld [vmem:[%s13938_s1 + $0x2d8] sm:$0xff] }
  0x53   : > { %891 = vmatpush1.msra.mxu0 %v530_v12  ;;  %791 = vmatmul.mubr.f32.gmra.mxu1 %v341_v13  ;;  %v407_v12 = vld [vmem:[%s10192_s16 + $0x250] sm:$0xff] }
  0x54   : > { %631 = vmatmul.mubr.f32.gmra.mxu0 %v345_v14  ;;  %892 = vmatprep.subr.mxu0 %v13947_v2  ;;  %v411_v13 = vld [vmem:[%s10192_s16 + $0x270] sm:$0xff]  ;;  %v414_v14 = vld [vmem:[%s10192_s16 + $0x288] sm:$0xff] }
  0x55   : > { %893 = vmatpush1.msra.mxu0 %v529_v15  ;;  %795 = vmatprep.mubr.f32.mxu1 %v348_v16  ;;  %v543_v15 = vld [vmem:[%s13938_s1 + $0x2d0] sm:$0xff]  ;;  %v418_v16 = vld [vmem:[%s10192_s16 + $0x2a8] sm:$0xff] }
  0x56   : > { %894 = vmatprep.subr.mxu0 %v13947_v2  ;;  %635 = vmatprep.mubr.f32.mxu0 %v352_v17  ;;  %v413_v17 = vld [vmem:[%s10192_s16 + $0x280] sm:$0xff] }
  0x57   : > { %796 = vmatmul.mubr.f32.gmra.mxu1 %v347_v18  ;;  %895 = vmatpush1.msra.mxu0 %v528_v19  ;;  %v542_v18 = vld [vmem:[%s13938_s1 + $0x2c8] sm:$0xff]  ;;  %v417_v19 = vld [vmem:[%s10192_s16 + $0x2a0] sm:$0xff] }
  0x58   : > { %636 = vmatmul.mubr.f32.gmra.mxu0 %v351_v20  ;;  %896 = vmatprep.subr.mxu0 %v13947_v2  ;;  %v420_v20 = vld [vmem:[%s10192_s16 + $0x2b8] sm:$0xff] }
  0x59   : > { %800 = vmatprep.mubr.f32.mxu1 %v354_v21  ;;  %897 = vmatpush1.msra.mxu0 %v527_v22  ;;  %v424_v21 = vld [vmem:[%s10192_s16 + $0x2d8] sm:$0xff]  ;;  %v541_v22 = vld [vmem:[%s13938_s1 + $0x2c0] sm:$0xff] }
  0x5a   : > { %640 = vmatprep.mubr.f32.mxu0 %v358_v23  ;;  %898 = vmatprep.subr.mxu0 %v13947_v2  ;;  %v419_v23 = vld [vmem:[%s10192_s16 + $0x2b0] sm:$0xff] }
  0x5b   : > { %801 = vmatmul.mubr.f32.gmra.mxu1 %v353_v24  ;;  %899 = vmatpush1.msra.mxu0 %v526_v25  ;;  %v423_v24 = vld [vmem:[%s10192_s16 + $0x2d0] sm:$0xff]  ;;  %v426_v25 = vld [vmem:[%s10192_s16 + $0x2e8] sm:$0xff] }
  0x5c   : > { %641 = vmatmul.mubr.f32.gmra.mxu0 %v357_v26  ;;  %805 = vmatprep.mubr.f32.mxu1 %v360_v27  ;;  %v540_v26 = vld [vmem:[%s13938_s1 + $0x2b8] sm:$0xff]  ;;  %v430_v27 = vld [vmem:[%s10192_s16 + $0x308] sm:$0xff] }
  0x5d   : > { %900 = vmatprep.subr.mxu0 %v13947_v2  ;;  %645 = vmatprep.mubr.f32.mxu0 %v364_v28  ;;  %v425_v28 = vld [vmem:[%s10192_s16 + $0x2e0] sm:$0xff] }
  0x5e   : > { %901 = vmatpush1.msra.mxu0 %v525_v29  ;;  %v539_v29 = vld [vmem:[%s13938_s1 + $0x2b0] sm:$0xff] }
  0x5f   : > { %806 = vmatmul.mubr.f32.gmra.mxu1 %v359_v30  ;;  %902 = vmatprep.subr.mxu0 %v13947_v2  ;;  %v429_v30 = vld [vmem:[%s10192_s16 + $0x300] sm:$0xff] }
  0x60   : > { %646 = vmatmul.mubr.f32.gmra.mxu0 %v363_v31  ;;  %810 = vmatprep.mubr.f32.mxu1 %v366_v32  ;;  %v432_v31 = vld [vmem:[%s10192_s16 + $0x318] sm:$0xff]  ;;  %v538_v32 = vld [vmem:[%s13938_s1 + $0x2a8] sm:$0xff] }
  0x61   : > { %903 = vmatpush1.msra.mxu0 %v524_v33  ;;  %650 = vmatprep.mubr.f32.mxu0 %v370_v34  ;;  %v436_v33 = vld [vmem:[%s10192_s16 + $0x338] sm:$0xff]  ;;  %v431_v34 = vld [vmem:[%s10192_s16 + $0x310] sm:$0xff] }
  0x62   : > { %904 = vmatprep.subr.mxu0 %v13947_v2 }
  0x63   : > { %811 = vmatmul.mubr.f32.gmra.mxu1 %v365_v35  ;;  %905 = vmatpush1.msra.mxu0 %v523_v36  ;;  %v537_v35 = vld [vmem:[%s13938_s1 + $0x2a0] sm:$0xff]  ;;  %v435_v36 = vld [vmem:[%s10192_s16 + $0x330] sm:$0xff] }
  0x64   : > { %651 = vmatmul.mubr.f32.gmra.mxu0 %v369_v37  ;;  %906 = vmatprep.subr.mxu0 %v13947_v2  ;;  %v438_v37 = vld [vmem:[%s10192_s16 + $0x348] sm:$0xff] }
  0x65   : > { %815 = vmatprep.mubr.f32.mxu1 %v372_v38  ;;  %907 = vmatpush1.msra.mxu0 %v522_v39  ;;  %v442_v38 = vld [vmem:[%s10192_s16 + $0x368] sm:$0xff]  ;;  %v536_v39 = vld [vmem:[%s13938_s1 + $0x298] sm:$0xff] }
  0x66   : > { %655 = vmatprep.mubr.f32.mxu0 %v376_v40  ;;  %908 = vmatprep.subr.mxu0 %v13947_v2  ;;  %v437_v40 = vld [vmem:[%s10192_s16 + $0x340] sm:$0xff] }
  0x67   : > { %816 = vmatmul.mubr.f32.gmra.mxu1 %v371_v41  ;;  %909 = vmatpush1.msra.mxu0 %v521_v42  ;;  %v441_v41 = vld [vmem:[%s10192_s16 + $0x360] sm:$0xff]  ;;  %v444_v42 = vld [vmem:[%s10192_s16 + $0x378] sm:$0xff] }
  0x68   : > { %656 = vmatmul.mubr.f32.gmra.mxu0 %v375_v43  ;;  %820 = vmatprep.mubr.f32.mxu1 %v378_v44  ;;  %v535_v43 = vld [vmem:[%s13938_s1 + $0x290] sm:$0xff]  ;;  %v448_v44 = vld [vmem:[%s10192_s16 + $0x398] sm:$0xff] }
  0x69   : > { %910 = vmatprep.subr.mxu0 %v13947_v2  ;;  %660 = vmatprep.mubr.f32.mxu0 %v382_v45  ;;  %v443_v45 = vld [vmem:[%s10192_s16 + $0x370] sm:$0xff] }
  0x6a   : > { %911 = vmatpush1.msra.mxu0 %v520_v46  ;;  %v534_v46 = vld [vmem:[%s13938_s1 + $0x288] sm:$0xff] }
  0x6b   : > { %821 = vmatmul.mubr.f32.gmra.mxu1 %v377_v47  ;;  %912 = vmatprep.subr.mxu0 %v13947_v2  ;;  %v447_v47 = vld [vmem:[%s10192_s16 + $0x390] sm:$0xff] }
  0x6c   : > { %661 = vmatmul.mubr.f32.gmra.mxu0 %v381_v48  ;;  %825 = vmatprep.mubr.f32.mxu1 %v384_v49  ;;  %v450_v48 = vld [vmem:[%s10192_s16 + $0x3a8] sm:$0xff] }
  0x6d   : > { %913 = vmatpush1.msra.mxu0 %v519_v50  ;;  %665 = vmatprep.mubr.f32.mxu0 %v388_v51  ;;  %v338_v49 = vld [vmem:[%s10192_s16 + $0x28] sm:$0xff]  ;;  %v533_v50 = vld [vmem:[%s13938_s1 + $0x280] sm:$0xff] }
  0x6e   : > { %914 = vmatprep.subr.mxu0 %v13947_v2  ;;  %v449_v51 = vld [vmem:[%s10192_s16 + $0x3a0] sm:$0xff] }
  0x6f   : > { %826 = vmatmul.mubr.f32.gmra.mxu1 %v383_v52  ;;  %915 = vmatpush1.msra.mxu0 %v518_v53  ;;  %v337_v52 = vld [vmem:[%s10192_s16 + $0x20] sm:$0xff]  ;;  %v344_v53 = vld [vmem:[%s10192_s16 + $0x58] sm:$0xff] }
  0x70   : > { %666 = vmatmul.mubr.f32.gmra.mxu0 %v387_v54  ;;  %830 = vmatprep.mubr.f32.mxu1 %v390_v55  ;;  %v343_v54 = vld [vmem:[%s10192_s16 + $0x50] sm:$0xff]  ;;  %v350_v55 = vld [vmem:[%s10192_s16 + $0x88] sm:$0xff] }
  0x71   : > { %916 = vmatprep.subr.mxu0 %v13947_v2  ;;  %670 = vmatprep.mubr.f32.mxu0 %v394_v56  ;;  %v349_v56 = vld [vmem:[%s10192_s16 + $0x80] sm:$0xff] }
  0x72   : > { %917 = vmatpush1.msra.mxu0 %v517_v57  ;;  %v356_v57 = vld [vmem:[%s10192_s16 + $0xb8] sm:$0xff] }
  0x73   : > { %831 = vmatmul.mubr.f32.gmra.mxu1 %v389_v58  ;;  %918 = vmatprep.subr.mxu0 %v13947_v2  ;;  %v355_v58 = vld [vmem:[%s10192_s16 + $0xb0] sm:$0xff] }
  0x74   : > { %671 = vmatmul.mubr.f32.gmra.mxu0 %v393_v59  ;;  %835 = vmatprep.mubr.f32.mxu1 %v396_v60  ;;  %v362_v59 = vld [vmem:[%s10192_s16 + $0xe8] sm:$0xff]  ;;  %v361_v60 = vld [vmem:[%s10192_s16 + $0xe0] sm:$0xff] }
  0x75   : > { %919 = vmatpush2.msra.mxu0 %v548_v61  ;;  %675 = vmatprep.mubr.f32.mxu0 %v400_v62  ;;  %v6742_v61 = vld [vmem:[%s13940_s3 + $0xf8] sm:$0xff] }
  0x76   : > { %920 = vmatprep.subr.mxu0 %v13947_v2  ;;  %v368_v62 = vld [vmem:[%s10192_s16 + $0x118] sm:$0xff]  ;;  %8185 = vmatprep.subr.mxu1 %v6742_v61 }
  0x77   : > { %836 = vmatmul.mubr.f32.gmra.mxu1 %v395_v63  ;;  %921 = vmatpush2.msra.mxu0 %v547_v0  ;;  %v367_v63 = vld [vmem:[%s10192_s16 + $0x110] sm:$0xff] }
  0x78   : > { %676 = vmatmul.mubr.f32.gmra.mxu0 %v399_v1  ;;  %922 = vmatprep.subr.mxu0 %v13947_v2  ;;  %v6741_v0 = vld [vmem:[%s13940_s3 + $0xf0] sm:$0xff]  ;;  %v374_v1 = vld [vmem:[%s10192_s16 + $0x148] sm:$0xff] }
  0x79   : > { %840 = vmatprep.mubr.f32.mxu1 %v402_v3  ;;  %923 = vmatpush2.msra.mxu0 %v546_v4  ;;  %v373_v3 = vld [vmem:[%s10192_s16 + $0x140] sm:$0xff]  ;;  %v380_v4 = vld [vmem:[%s10192_s16 + $0x178] sm:$0xff] }
  0x7a   : > { %680 = vmatprep.mubr.f32.mxu0 %v406_v5  ;;  %924 = vmatprep.subr.mxu0 %v13947_v2  ;;  %v6740_v5 = vld [vmem:[%s13940_s3 + $0xe8] sm:$0xff] }
  0x7b   : > { %841 = vmatmul.mubr.f32.gmra.mxu1 %v401_v6  ;;  %925 = vmatpush2.msra.mxu0 %v545_v7  ;;  %v379_v6 = vld [vmem:[%s10192_s16 + $0x170] sm:$0xff]  ;;  %v386_v7 = vld [vmem:[%s10192_s16 + $0x1a8] sm:$0xff] }
  0x7c   : > { %681 = vmatmul.mubr.f32.gmra.mxu0 %v405_v8  ;;  %845 = vmatprep.mubr.f32.mxu1 %v408_v9  ;;  %v6739_v8 = vld [vmem:[%s13940_s3 + $0xe0] sm:$0xff] }
  0x7d   : > { %926 = vmatprep.subr.mxu0 %v13947_v2  ;;  %685 = vmatprep.mubr.f32.mxu0 %v412_v10  ;;  %v385_v9 = vld [vmem:[%s10192_s16 + $0x1a0] sm:$0xff]  ;;  %v392_v10 = vld [vmem:[%s10192_s16 + $0x1d8] sm:$0xff] }
  0x7e   : > { %927 = vmatpush2.msra.mxu0 %v544_v11  ;;  %8186 = vmatpush3.msra.mxu1 %v6742_v61  ;;  %v391_v11 = vld [vmem:[%s10192_s16 + $0x1d0] sm:$0xff]  ;;  %v10572_v61 = vld [vmem:[%s13940_s3 + $0x2f8] sm:$0xff] }
  0x7f   : > { %846 = vmatmul.mubr.f32.gmra.mxu1 %v407_v12  ;;  %928 = vmatprep.subr.mxu0 %v13947_v2  ;;  %v6738_v12 = vld [vmem:[%s13940_s3 + $0xd8] sm:$0xff] }
  0x80   : > { %686 = vmatmul.mubr.f32.gmra.mxu0 %v411_v13  ;;  %850 = vmatprep.mubr.f32.mxu1 %v414_v14  ;;  %v398_v13 = vld [vmem:[%s10192_s16 + $0x208] sm:$0xff]  ;;  %v397_v14 = vld [vmem:[%s10192_s16 + $0x200] sm:$0xff] }
  0x81   : > { %929 = vmatpush2.msra.mxu0 %v543_v15  ;;  %690 = vmatprep.mubr.f32.mxu0 %v418_v16  ;;  %v6737_v15 = vld [vmem:[%s13940_s3 + $0xd0] sm:$0xff]  ;;  %v404_v16 = vld [vmem:[%s10192_s16 + $0x238] sm:$0xff] }
  0x82   : > { %930 = vmatprep.subr.mxu0 %v13947_v2  ;;  %8187 = vmatprep.subr.mxu1 %v6741_v0 }
  0x83   : > { %851 = vmatmul.mubr.f32.gmra.mxu1 %v413_v17  ;;  %931 = vmatpush2.msra.mxu0 %v542_v18  ;;  %v403_v17 = vld [vmem:[%s10192_s16 + $0x230] sm:$0xff]  ;;  %v410_v18 = vld [vmem:[%s10192_s16 + $0x268] sm:$0xff] }
  0x84   : > { %691 = vmatmul.mubr.f32.gmra.mxu0 %v417_v19  ;;  %855 = vmatprep.mubr.f32.mxu1 %v420_v20  ;;  %v6736_v19 = vld [vmem:[%s13940_s3 + $0xc8] sm:$0xff]  ;;  %v409_v20 = vld [vmem:[%s10192_s16 + $0x260] sm:$0xff] }
  0x85   : > { %932 = vmatprep.subr.mxu0 %v13947_v2  ;;  %695 = vmatprep.mubr.f32.mxu0 %v424_v21  ;;  %v416_v21 = vld [vmem:[%s10192_s16 + $0x298] sm:$0xff] }
  0x86   : > { %933 = vmatpush2.msra.mxu0 %v541_v22  ;;  %8188 = vmatpush3.msra.mxu1 %v6741_v0  ;;  %v6735_v22 = vld [vmem:[%s13940_s3 + $0xc0] sm:$0xff] }
  0x87   : > { %856 = vmatmul.mubr.f32.gmra.mxu1 %v419_v23  ;;  %934 = vmatprep.subr.mxu0 %v13947_v2  ;;  %v6774_v23 = vld [vmem:[%s13940_s3 + $0x1f8] sm:$0xff] }
  0x88   : > { %696 = vmatmul.mubr.f32.gmra.mxu0 %v423_v24  ;;  %860 = vmatprep.mubr.f32.mxu1 %v426_v25  ;;  %v415_v24 = vld [vmem:[%s10192_s16 + $0x290] sm:$0xff]  ;;  %v422_v25 = vld [vmem:[%s10192_s16 + $0x2c8] sm:$0xff] }
  0x89   : > { %935 = vmatpush2.msra.mxu0 %v540_v26  ;;  %700 = vmatprep.mubr.f32.mxu0 %v430_v27  ;;  %v6773_v26 = vld [vmem:[%s13940_s3 + $0x1f0] sm:$0xff]  ;;  %v6772_v27 = vld [vmem:[%s13940_s3 + $0x1e8] sm:$0xff] }
  0x8a   : > { %936 = vmatprep.subr.mxu0 %v13947_v2  ;;  %8189 = vmatprep.subr.mxu1 %v6740_v5 }
  0x8b   : > { %861 = vmatmul.mubr.f32.gmra.mxu1 %v425_v28  ;;  %937 = vmatpush2.msra.mxu0 %v539_v29  ;;  %v421_v28 = vld [vmem:[%s10192_s16 + $0x2c0] sm:$0xff]  ;;  %v6734_v29 = vld [vmem:[%s13940_s3 + $0xb8] sm:$0xff] }
  0x8c   : > { %701 = vmatmul.mubr.f32.gmra.mxu0 %v429_v30  ;;  %938 = vmatprep.subr.mxu0 %v13947_v2  ;;  %v428_v30 = vld [vmem:[%s10192_s16 + $0x2f8] sm:$0xff] }
  0x8d   : > { %865 = vmatprep.mubr.f32.mxu1 %v432_v31  ;;  %939 = vmatpush2.msra.mxu0 %v538_v32  ;;  %v6771_v31 = vld [vmem:[%s13940_s3 + $0x1e0] sm:$0xff]  ;;  %v6770_v32 = vld [vmem:[%s13940_s3 + $0x1d8] sm:$0xff] }
  0x8e   : > { %705 = vmatprep.mubr.f32.mxu0 %v436_v33  ;;  %940 = vmatprep.subr.mxu0 %v13947_v2  ;;  %v427_v33 = vld [vmem:[%s10192_s16 + $0x2f0] sm:$0xff] }
  0x8f   : > { %866 = vmatmul.mubr.f32.gmra.mxu1 %v431_v34  ;;  %941 = vmatpush2.msra.mxu0 %v537_v35  ;;  %v6733_v34 = vld [vmem:[%s13940_s3 + $0xb0] sm:$0xff]  ;;  %v434_v35 = vld [vmem:[%s10192_s16 + $0x328] sm:$0xff] }
  0x90   : > { %706 = vmatmul.mubr.f32.gmra.mxu0 %v435_v36  ;;  %870 = vmatprep.mubr.f32.mxu1 %v438_v37  ;;  %v6769_v36 = vld [vmem:[%s13940_s3 + $0x1d0] sm:$0xff]  ;;  %v6768_v37 = vld [vmem:[%s13940_s3 + $0x1c8] sm:$0xff] }
  0x91   : > { %942 = vmatprep.subr.mxu0 %v13947_v2  ;;  %710 = vmatprep.mubr.f32.mxu0 %v442_v38  ;;  %v433_v38 = vld [vmem:[%s10192_s16 + $0x320] sm:$0xff] }
  0x92   : > { %943 = vmatpush2.msra.mxu0 %v536_v39  ;;  %8190 = vmatpush3.msra.mxu1 %v6740_v5  ;;  %v440_v39 = vld [vmem:[%s10192_s16 + $0x358] sm:$0xff] }
  0x93   : > { %871 = vmatmul.mubr.f32.gmra.mxu1 %v437_v40  ;;  %944 = vmatprep.subr.mxu0 %v13947_v2  ;;  %v6732_v40 = vld [vmem:[%s13940_s3 + $0xa8] sm:$0xff] }
  0x94   : > { %711 = vmatmul.mubr.f32.gmra.mxu0 %v441_v41  ;;  %875 = vmatprep.mubr.f32.mxu1 %v444_v42  ;;  %v6767_v41 = vld [vmem:[%s13940_s3 + $0x1c0] sm:$0xff]  ;;  %v6766_v42 = vld [vmem:[%s13940_s3 + $0x1b8] sm:$0xff] }
  0x95   : > { %945 = vmatpush2.msra.mxu0 %v535_v43  ;;  %715 = vmatprep.mubr.f32.mxu0 %v448_v44  ;;  %v439_v43 = vld [vmem:[%s10192_s16 + $0x350] sm:$0xff]  ;;  %v446_v44 = vld [vmem:[%s10192_s16 + $0x388] sm:$0xff] }
  0x96   : > { %946 = vmatprep.subr.mxu0 %v13947_v2  ;;  %8191 = vmatprep.subr.mxu1 %v6739_v8 }
  0x97   : > { %876 = vmatmul.mubr.f32.gmra.mxu1 %v443_v45  ;;  %947 = vmatpush2.msra.mxu0 %v534_v46  ;;  %v6765_v45 = vld [vmem:[%s13940_s3 + $0x1b0] sm:$0xff]  ;;  %v6731_v46 = vld [vmem:[%s13940_s3 + $0xa0] sm:$0xff] }
  0x98   : > { %716 = vmatmul.mubr.f32.gmra.mxu0 %v447_v47  ;;  %880 = vmatprep.mubr.f32.mxu1 %v450_v48  ;;  %v445_v47 = vld [vmem:[%s10192_s16 + $0x380] sm:$0xff]  ;;  %v6764_v48 = vld [vmem:[%s13940_s3 + $0x1a8] sm:$0xff] }
  0x99   : > { %948 = vmatprep.subr.mxu0 %v13947_v2  ;;  %950 = vmatprep.mubr.f32.mxu0 %v338_v49  ;;  %v452_v49 = vld [vmem:[%s10192_s16 + $0x3b8] sm:$0xff]  ;;  %v6895_v2 = vld [vmem:[%s13940_s3 + $0x5c0] sm:$0xff] }
  0x9a   : > { %949 = vmatpush2.msra.mxu0 %v533_v50  ;;  %8192 = vmatpush3.msra.mxu1 %v6739_v8  ;;  %v6763_v50 = vld [vmem:[%s13940_s3 + $0x1a0] sm:$0xff] }
  0x9b   : > { %881 = vmatmul.mubr.f32.gmra.mxu1 %v449_v51  ;;  %8193 = vmatprep.subr.mxu1 %v6738_v12  ;;  %v6730_v51 = vld [vmem:[%s13940_s3 + $0x98] sm:$0xff] }
  0x9c   : > { %951 = vmatmul.mubr.f32.vlgmr.msra.gmra.mxu0 %v337_v52  ;;  %8194 = vmatpush3.msra.mxu1 %v6738_v12  ;;  %v451_v52 = vld [vmem:[%s10192_s16 + $0x3b0] sm:$0xff] }
  0x9d   : > { %955 = vmatprep.mubr.f32.mxu0 %v344_v53  ;;  %8195 = vmatprep.subr.mxu1 %v6737_v15  ;;  %v6762_v53 = vld [vmem:[%s13940_s3 + $0x198] sm:$0xff] }
  0x9e   : > { %8196 = vmatpush3.msra.mxu1 %v6737_v15  ;;  %8335 = vmatprep.subr.mxu0 %v6774_v23 }
  0x9f   : > { %8197 = vmatprep.subr.mxu1 %v6736_v19  ;;  %8336 = vmatpush3.msra.mxu0 %v6774_v23 }
  0xa0   : > { %956 = vmatmul.mubr.f32.gmra.mxu0 %v343_v54  ;;  %8198 = vmatpush3.msra.mxu1 %v6736_v19  ;;  %v6729_v54 = vld [vmem:[%s13940_s3 + $0x90] sm:$0xff] }
  0xa1   : > { %960 = vmatprep.mubr.f32.mxu0 %v350_v55  ;;  %8199 = vmatprep.subr.mxu1 %v6735_v22  ;;  %v6761_v55 = vld [vmem:[%s13940_s3 + $0x190] sm:$0xff] }
  0xa2   : > { %8200 = vmatpush3.msra.mxu1 %v6735_v22  ;;  %8337 = vmatprep.subr.mxu0 %v6773_v26 }
  0xa3   : > { %8338 = vmatpush3.msra.mxu0 %v6773_v26  ;;  %8201 = vmatprep.subr.mxu1 %v6734_v29 }
  0xa4   : > { %961 = vmatmul.mubr.f32.gmra.mxu0 %v349_v56  ;;  %8339 = vmatprep.subr.mxu0 %v6772_v27  ;;  %v6728_v56 = vld [vmem:[%s13940_s3 + $0x88] sm:$0xff] }
  0xa5   : > { %965 = vmatprep.mubr.f32.mxu0 %v356_v57  ;;  %8202 = vmatpush3.msra.mxu1 %v6734_v29  ;;  %v6760_v57 = vld [vmem:[%s13940_s3 + $0x188] sm:$0xff] }
  0xa6   : > { %8340 = vmatpush3.msra.mxu0 %v6772_v27  ;;  %8203 = vmatprep.subr.mxu1 %v6733_v34 }
  0xa7   : > { %8341 = vmatprep.subr.mxu0 %v6771_v31  ;;  %8204 = vmatpush3.msra.mxu1 %v6733_v34 }
  0xa8   : > { %966 = vmatmul.mubr.f32.gmra.mxu0 %v355_v58  ;;  %8205 = vmatprep.subr.mxu1 %v6732_v40  ;;  %v6727_v58 = vld [vmem:[%s13940_s3 + $0x80] sm:$0xff] }
  0xa9   : > { %970 = vmatprep.mubr.f32.mxu0 %v362_v59  ;;  %8342 = vmatpush3.msra.mxu0 %v6771_v31  ;;  %v6759_v59 = vld [vmem:[%s13940_s3 + $0x180] sm:$0xff] }
  0xaa   : > { %8343 = vmatprep.subr.mxu0 %v6770_v32  ;;  %8206 = vmatpush3.msra.mxu1 %v6732_v40 }
  0xab   : > { %8344 = vmatpush3.msra.mxu0 %v6770_v32  ;;  %8207 = vmatprep.subr.mxu1 %v6731_v46 }
  0xac   : > { %971 = vmatmul.mubr.f32.gmra.mxu0 %v361_v60  ;;  %8345 = vmatprep.subr.mxu0 %v6769_v36  ;;  %v10567_v60 = vld [vmem:[%s13940_s3 + $0x78] sm:$0xff] }
  0xad   : > { %975 = vmatprep.mubr.f32.mxu0 %v368_v62  ;;  %8346 = vmatpush3.msra.mxu0 %v6769_v36  ;;  %v10579_v62 = vld [vmem:[%s13939_s2] ss:$0 sm:$0xff] }
  0xae   : > { %8347 = vmatprep.subr.mxu0 %v6768_v37  ;;  %8208 = vmatpush3.msra.mxu1 %v6731_v46 }
  0xaf   : > { %8348 = vmatpush3.msra.mxu0 %v6768_v37  ;;  %8209 = vmatprep.subr.mxu1 %v6730_v51 }
  0xb0   : > { %976 = vmatmul.mubr.f32.gmra.mxu0 %v367_v63  ;;  %8349 = vmatprep.subr.mxu0 %v6767_v41 }
  0xb1   : > { %980 = vmatprep.mubr.f32.mxu0 %v374_v1  ;;  %8350 = vmatpush3.msra.mxu0 %v6767_v41 }
  0xb2   : > { %8351 = vmatprep.subr.mxu0 %v6766_v42  ;;  %8210 = vmatpush3.msra.mxu1 %v6730_v51 }
  0xb3   : > { %8352 = vmatpush3.msra.mxu0 %v6766_v42  ;;  %8211 = vmatprep.subr.mxu1 %v6729_v54 }
  0xb4   : > { %981 = vmatmul.mubr.f32.gmra.mxu0 %v373_v3  ;;  %8353 = vmatprep.subr.mxu0 %v6765_v45 }
  0xb5   : > { %985 = vmatprep.mubr.f32.mxu0 %v380_v4  ;;  %8354 = vmatpush3.msra.mxu0 %v6765_v45 }
  0xb6   : > { %8355 = vmatprep.subr.mxu0 %v6764_v48  ;;  %8212 = vmatpush3.msra.mxu1 %v6729_v54 }
  0xb7   : > { %8356 = vmatpush3.msra.mxu0 %v6764_v48  ;;  %8213 = vmatprep.subr.mxu1 %v6728_v56 }
  0xb8   : > { %986 = vmatmul.mubr.f32.gmra.mxu0 %v379_v6  ;;  %8357 = vmatprep.subr.mxu0 %v6763_v50 }
  0xb9   : > { %990 = vmatprep.mubr.f32.mxu0 %v386_v7  ;;  %8358 = vmatpush3.msra.mxu0 %v6763_v50 }
  0xba   : > { %8359 = vmatprep.subr.mxu0 %v6762_v53  ;;  %8214 = vmatpush3.msra.mxu1 %v6728_v56 }
  0xbb   : > { %8360 = vmatpush3.msra.mxu0 %v6762_v53  ;;  %8215 = vmatprep.subr.mxu1 %v6727_v58 }
  0xbc   : > { %991 = vmatmul.mubr.f32.gmra.mxu0 %v385_v9  ;;  %8361 = vmatprep.subr.mxu0 %v6761_v55 }
  0xbd   : > { %995 = vmatprep.mubr.f32.mxu0 %v392_v10  ;;  %8362 = vmatpush3.msra.mxu0 %v6761_v55 }
  0xbe   : > { %8363 = vmatprep.subr.mxu0 %v6760_v57  ;;  %8216 = vmatpush3.msra.mxu1 %v6727_v58 }
  0xbf   : > { %8364 = vmatpush3.msra.mxu0 %v6760_v57  ;;  %8235 = vmatprep.subr.mxu1 %v10567_v60 }
  0xc0   : > { %996 = vmatmul.mubr.f32.gmra.mxu0 %v391_v11  ;;  %8365 = vmatprep.subr.mxu0 %v6759_v59 }
  0xc1   : > { %1000 = vmatprep.mubr.f32.mxu0 %v398_v13  ;;  %8366 = vmatpush3.msra.mxu0 %v6759_v59 }
  0xc2   : > { %8435 = vmatprep.subr.mxu0 %v10572_v61 }
  0xc4   : > { %1001 = vmatmul.mubr.f32.gmra.mxu0 %v397_v14 }
  0xc5   : > { %1005 = vmatprep.mubr.f32.mxu0 %v404_v16 }
  0xc8   : > { %1006 = vmatmul.mubr.f32.gmra.mxu0 %v403_v17 }
  0xc9   : > { %1010 = vmatprep.mubr.f32.mxu0 %v410_v18 }
  0xcc   : > { %1011 = vmatmul.mubr.f32.gmra.mxu0 %v409_v20 }
  0xcd   : > { %1015 = vmatprep.mubr.f32.mxu0 %v416_v21 }
  0xd0   : > { %1016 = vmatmul.mubr.f32.gmra.mxu0 %v415_v24 }
  0xd1   : > { %1020 = vmatprep.mubr.f32.mxu0 %v422_v25 }
  0xd4   : > { %1021 = vmatmul.mubr.f32.gmra.mxu0 %v421_v28 }
  0xd5   : > { %1025 = vmatprep.mubr.f32.mxu0 %v428_v30 }
  0xd8   : > { %1026 = vmatmul.mubr.f32.gmra.mxu0 %v427_v33 }
  0xd9   : > { %1030 = vmatprep.mubr.f32.mxu0 %v434_v35 }
  0xdc   : > { %1031 = vmatmul.mubr.f32.gmra.mxu0 %v433_v38 }
  0xdd   : > { %1035 = vmatprep.mubr.f32.mxu0 %v440_v39 }
  0xe0   : > { %1036 = vmatmul.mubr.f32.gmra.mxu0 %v439_v43 }
  0xe1   : > { %1040 = vmatprep.mubr.f32.mxu0 %v446_v44 }
  0xe4   : > { %1041 = vmatmul.mubr.f32.gmra.mxu0 %v445_v47 }
  0xe5   : > { %1045 = vmatprep.mubr.f32.mxu0 %v452_v49 }
  0xe8   : > { %1046 = vmatmul.mubr.f32.gmra.mxu0 %v451_v52 }
 0x10c   : > { %v622_v63 = vpop.f32.mrf.mxu0 }
 0x10d   : > { %v623_v0 = vadd.f32 %v10579_v62, %v622_v63 }
 0x10e   : > { %v624_v1 = vpop.f32.mrf.mxu0 }
 0x10f   : > { %v787_v3 = vpop.f32.mrf.mxu1 }
 0x110   : > { %v10582_v4 = vadd.f32 %v787_v3, %v623_v0  ;;  %v627_v5 = vpop.f32.mrf.mxu0 }
 0x111   : > { %v628_v6 = vadd.f32 %v10579_v62, %v627_v5  ;;  %v789_v7 = vpop.f32.mrf.mxu1 }
 0x112   : > { %v629_v8 = vpop.f32.mrf.mxu0 }
 0x113   : > { %v792_v9 = vpop.f32.mrf.mxu1 }
 0x114   : > { %v10585_v10 = vadd.f32 %v792_v9, %v628_v6  ;;  %v632_v11 = vpop.f32.mrf.mxu0 }
 0x115   : > { %v633_v12 = vadd.f32 %v10579_v62, %v632_v11  ;;  %v794_v13 = vpop.f32.mrf.mxu1 }
 0x116   : > { %v634_v14 = vpop.f32.mrf.mxu0 }
 0x117   : > { %v797_v15 = vpop.f32.mrf.mxu1 }
 0x118   : > { %v10588_v16 = vadd.f32 %v797_v15, %v633_v12  ;;  %v637_v17 = vpop.f32.mrf.mxu0 }
 0x119   : > { %v638_v18 = vadd.f32 %v10579_v62, %v637_v17  ;;  %v799_v19 = vpop.f32.mrf.mxu1 }
 0x11a   : > { %v639_v20 = vpop.f32.mrf.mxu0 }
 0x11b   : > { %v802_v21 = vpop.f32.mrf.mxu1 }
 0x11c   : > { %v10591_v22 = vadd.f32 %v802_v21, %v638_v18  ;;  %v642_v23 = vpop.f32.mrf.mxu0 }
 0x11d   : > { %v643_v24 = vadd.f32 %v10579_v62, %v642_v23  ;;  %v804_v25 = vpop.f32.mrf.mxu1 }
 0x11e   : > { %v644_v26 = vpop.f32.mrf.mxu0 }
 0x11f   : > { %v807_v27 = vpop.f32.mrf.mxu1 }
 0x120   : > { %v10594_v28 = vadd.f32 %v807_v27, %v643_v24  ;;  %v647_v29 = vpop.f32.mrf.mxu0 }
 0x121   : > { %v648_v30 = vadd.f32 %v10579_v62, %v647_v29  ;;  %v809_v31 = vpop.f32.mrf.mxu1 }
 0x122   : > { %v649_v32 = vpop.f32.mrf.mxu0 }
 0x123   : > { %v812_v33 = vpop.f32.mrf.mxu1 }
 0x124   : > { %v10597_v34 = vadd.f32 %v812_v33, %v648_v30  ;;  %v652_v35 = vpop.f32.mrf.mxu0 }
 0x125   : > { %v653_v36 = vadd.f32 %v10579_v62, %v652_v35  ;;  %v814_v37 = vpop.f32.mrf.mxu1 }
 0x126   : > { %v654_v38 = vpop.f32.mrf.mxu0 }
 0x127   : > { %v817_v39 = vpop.f32.mrf.mxu1 }
 0x128   : > { %v10600_v40 = vadd.f32 %v817_v39, %v653_v36  ;;  %v657_v41 = vpop.f32.mrf.mxu0 }
 0x129   : > { %v658_v42 = vadd.f32 %v10579_v62, %v657_v41  ;;  %v819_v43 = vpop.f32.mrf.mxu1 }
 0x12a   : > { %v659_v44 = vpop.f32.mrf.mxu0 }
 0x12b   : > { %v822_v45 = vpop.f32.mrf.mxu1 }
 0x12c   : > { %v10603_v46 = vadd.f32 %v822_v45, %v658_v42  ;;  %v662_v47 = vpop.f32.mrf.mxu0 }
 0x12d   : > { %v663_v48 = vadd.f32 %v10579_v62, %v662_v47  ;;  %v824_v49 = vpop.f32.mrf.mxu1 }
 0x12e   : > { %v664_v50 = vpop.f32.mrf.mxu0 }
 0x12f   : > { %v827_v51 = vpop.f32.mrf.mxu1 }
 0x130   : > { %v10606_v52 = vadd.f32 %v827_v51, %v663_v48  ;;  %v667_v53 = vpop.f32.mrf.mxu0 }
 0x131   : > { %v668_v54 = vadd.f32 %v10579_v62, %v667_v53  ;;  %v829_v55 = vpop.f32.mrf.mxu1 }
 0x132   : > { %v669_v56 = vpop.f32.mrf.mxu0 }
 0x133   : > { %v832_v57 = vpop.f32.mrf.mxu1 }
 0x134   : > { %v10609_v58 = vadd.f32 %v832_v57, %v668_v54  ;;  %v672_v59 = vpop.f32.mrf.mxu0 }
 0x135   : > { %v673_v63 = vadd.f32 %v10579_v62, %v672_v59  ;;  %v834_v0 = vpop.f32.mrf.mxu1 }
 0x136   : > { %v674_v1 = vpop.f32.mrf.mxu0 }
 0x137   : > { %v837_v3 = vpop.f32.mrf.mxu1 }
 0x138   : > { %v10612_v5 = vadd.f32 %v837_v3, %v673_v63  ;;  %v677_v6 = vpop.f32.mrf.mxu0 }
 0x139   : > { %v678_v7 = vadd.f32 %v10579_v62, %v677_v6  ;;  %v839_v8 = vpop.f32.mrf.mxu1 }
 0x13a   : > { %v679_v9 = vpop.f32.mrf.mxu0 }
 0x13b   : > { %v842_v11 = vpop.f32.mrf.mxu1 }
 0x13c   : > { %v10615_v12 = vadd.f32 %v842_v11, %v678_v7  ;;  %v682_v13 = vpop.f32.mrf.mxu0 }
 0x13d   : > { %v683_v14 = vadd.f32 %v10579_v62, %v682_v13  ;;  %v844_v15 = vpop.f32.mrf.mxu1 }
 0x13e   : > { %v684_v17 = vpop.f32.mrf.mxu0 }
 0x13f   : > { %v847_v18 = vpop.f32.mrf.mxu1 }
 0x140   : > { %v10618_v19 = vadd.f32 %v847_v18, %v683_v14  ;;  %v687_v20 = vpop.f32.mrf.mxu0 }
 0x141   : > { %v688_v21 = vadd.f32 %v10579_v62, %v687_v20  ;;  %v849_v23 = vpop.f32.mrf.mxu1 }
 0x142   : > { %v689_v24 = vpop.f32.mrf.mxu0 }
 0x143   : > { %v852_v25 = vpop.f32.mrf.mxu1 }
 0x144   : > { %v10621_v26 = vadd.f32 %v852_v25, %v688_v21  ;;  %v692_v27 = vpop.f32.mrf.mxu0 }
 0x145   : > { %v693_v29 = vadd.f32 %v10579_v62, %v692_v27  ;;  %v854_v30 = vpop.f32.mrf.mxu1 }
 0x146   : > { %v694_v31 = vpop.f32.mrf.mxu0 }
 0x147   : > { %v857_v32 = vpop.f32.mrf.mxu1 }
 0x148   : > { %v10624_v33 = vadd.f32 %v857_v32, %v693_v29  ;;  %v697_v35 = vpop.f32.mrf.mxu0 }
 0x149   : > { %v698_v36 = vadd.f32 %v10579_v62, %v697_v35  ;;  %v859_v37 = vpop.f32.mrf.mxu1 }
 0x14a   : > { %v699_v38 = vpop.f32.mrf.mxu0 }
 0x14b   : > { %v862_v39 = vpop.f32.mrf.mxu1 }
 0x14c   : > { %v10627_v41 = vadd.f32 %v862_v39, %v698_v36  ;;  %v702_v42 = vpop.f32.mrf.mxu0 }
 0x14d   : > { %v703_v43 = vadd.f32 %v10579_v62, %v702_v42  ;;  %v864_v44 = vpop.f32.mrf.mxu1 }
 0x14e   : > { %v704_v45 = vpop.f32.mrf.mxu0 }
 0x14f   : > { %v867_v47 = vpop.f32.mrf.mxu1 }
 0x150   : > { %v10630_v48 = vadd.f32 %v867_v47, %v703_v43  ;;  %v707_v49 = vpop.f32.mrf.mxu0 }
 0x151   : > { %v708_v50 = vadd.f32 %v10579_v62, %v707_v49  ;;  %v869_v51 = vpop.f32.mrf.mxu1 }
 0x152   : > { %v709_v53 = vpop.f32.mrf.mxu0 }
 0x153   : > { %v872_v54 = vpop.f32.mrf.mxu1 }
 0x154   : > { %v10633_v55 = vadd.f32 %v872_v54, %v708_v50  ;;  %v712_v56 = vpop.f32.mrf.mxu0 }
 0x155   : > { %v713_v57 = vadd.f32 %v10579_v62, %v712_v56  ;;  %v874_v59 = vpop.f32.mrf.mxu1 }
 0x156   : > { %v714_v63 = vpop.f32.mrf.mxu0 }
 0x157   : > { %v877_v0 = vpop.f32.mrf.mxu1 }
 0x158   : > { %v10636_v1 = vadd.f32 %v877_v0, %v713_v57  ;;  %v717_v3 = vpop.f32.mrf.mxu0  ;;  %v1127_v57 = vld [vmem:[%s13940_s3 + $0x70] sm:$0xff] }
 0x159   : > { %v718_v6 = vadd.f32 %v10579_v62, %v717_v3  ;;  %v879_v7 = vpop.f32.mrf.mxu1 }
 0x15a   : > { %v719_v8 = vpop.f32.mrf.mxu0 }
 0x15b   : > { %v882_v9 = vpop.f32.mrf.mxu1 }
 0x15c   : > { %v10639_v11 = vadd.f32 %v882_v9, %v718_v6  ;;  %v952_v13 = vpop.f32.mrf.mxu0 }
 0x15d   : > { %v953_v14 = vadd.f32 %v952_v13, %v10582_v4  ;;  %v884_v15 = vpop.f32.mrf.mxu1  ;;  %v1126_v13 = vld [vmem:[%s13940_s3 + $0x68] sm:$0xff] }
 0x15e   : > { %v954_v17 = vpop.f32.mrf.mxu0 }
 0x15f   : > { %v10642_v18 = vmax.f32 %v953_v14, 0.0 }
 0x160   : > { %v957_v20 = vpop.f32.mrf.mxu0 }
 0x161   : > { %v958_v21 = vadd.f32 %v957_v20, %v10585_v10  ;;  %v1160_v25 = vrot.slane %v10642_v18, 1  ;;  %v1657_v27 = vrot.slane %v10642_v18, 3  ;;  %v1465_v4 = vrot.slane %v10642_v18, 2 }
 0x162   : > { %v959_v23 = vpop.f32.mrf.mxu0  ;;  %v1849_v35 = vrot.slane %v10642_v18, 4 }
 0x163   : > { %v10645_v24 = vmax.f32 %v958_v21, 0.0  ;;  %v1125_v21 = vld [vmem:[%s13940_s3 + $0x60] sm:$0xff] }
 0x164   : > { %v962_v62 = vpop.f32.mrf.mxu0  ;;  %v6803_v23 = vld [vmem:[%s13940_s3 + $0x2e0] sm:$0xff] }
 0x165   : > { %v963_v29 = vadd.f32 %v962_v62, %v10588_v16  ;;  %v1161_v30 = vrot.slane %v10645_v24, 1  ;;  %v1658_v10 = vrot.slane %v10645_v24, 3  ;;  %v1466_v31 = vrot.slane %v10645_v24, 2 }
 0x166   : > { %v964_v32 = vpop.f32.mrf.mxu0  ;;  %v1850_v36 = vrot.slane %v10645_v24, 4 }
 0x167   : > { %v10656_v37 = vmax.f32 %v963_v29, 0.0  ;;  %v1162_v38 = vsel %vm1159_vm0, %v1160_v25, %v1161_v30  ;;  %v1659_v39 = vsel %vm1656_vm1, %v1657_v27, %v1658_v10  ;;  %v10661_v42 = vsel %vm1464_vm2, %v1465_v4, %v1466_v31  ;;  %v6802_v32 = vld [vmem:[%s13940_s3 + $0x2d8] sm:$0xff] }
 0x168   : > { %v967_v16 = vpop.f32.mrf.mxu0  ;;  %8217 = vmatprep.mubr.f32.mxu1 %v1162_v38  ;;  %8367 = vmatprep.mubr.f32.mxu0 %v1659_v39  ;;  %v10664_v43 = vsel %vm1848_vm3, %v1849_v35, %v1850_v36 }
 0x169   : > { %v968_v44 = vadd.f32 %v967_v16, %v10591_v22  ;;  %v1163_v45 = vrot.slane %v10656_v37, 1  ;;  %v1660_v47 = vrot.slane %v10656_v37, 3  ;;  %v1468_v49 = vrot.slane %v10656_v37, 2  ;;  %v6805_v22 = vld [vmem:[%s13940_s3 + $0x2f0] sm:$0xff] }
 0x16a   : > { %v969_v50 = vpop.f32.mrf.mxu0  ;;  %v1852_v51 = vrot.slane %v10656_v37, 4 }
 0x16b   : > { %v10671_v53 = vmax.f32 %v968_v44, 0.0  ;;  %v1164_v54 = vsel %vm1159_vm0, %v1161_v30, %v1163_v45  ;;  %v1661_v56 = vsel %vm1656_vm1, %v1658_v10, %v1660_v47  ;;  %v10682_v59 = vsel %vm1464_vm2, %v1466_v31, %v1468_v49  ;;  %v1123_v44 = vld [vmem:[%s13940_s3 + $0x50] sm:$0xff] }
 0x16c   : > { %v972_v63 = vpop.f32.mrf.mxu0  ;;  %8218 = vmatmul.mubr.f32.vlgmr.msra.gmra.mxu1 %v1164_v54  ;;  %8368 = vmatmul.mubr.f32.vlgmr.msra.gmra.mxu0 %v1661_v56  ;;  %v10685_v0 = vsel %vm1848_vm3, %v1850_v36, %v1852_v51  ;;  %v6800_v54 = vld [vmem:[%s13940_s3 + $0x2c8] sm:$0xff] }
 0x16d   : > { %v973_v3 = vadd.f32 %v972_v63, %v10594_v28  ;;  %v1165_v6 = vrot.slane %v10671_v53, 1  ;;  %v1662_v7 = vrot.slane %v10671_v53, 3  ;;  %8236 = vmatpush3.msra.mxu1 %v10567_v60  ;;  %8436 = vmatpush3.msra.mxu0 %v10572_v61  ;;  %v1470_v8 = vrot.slane %v10671_v53, 2  ;;  %v6804_v28 = vld [vmem:[%s13940_s3 + $0x2e8] sm:$0xff] }
 0x16e   : > { %v974_v9 = vpop.f32.mrf.mxu0  ;;  %8237 = vmatprep.subr.mxu1 %v1127_v57  ;;  %8437 = vmatprep.subr.mxu0 %v6805_v22  ;;  %v1854_v14 = vrot.slane %v10671_v53, 4 }
 0x16f   : > { %v10700_v15 = vmax.f32 %v973_v3, 0.0  ;;  %v10703_v60 = vsel %vm1159_vm0, %v1163_v45, %v1165_v6  ;;  %v10706_v61 = vsel %vm1656_vm1, %v1660_v47, %v1662_v7  ;;  %8238 = vmatpush3.msra.mxu1 %v1127_v57  ;;  %8438 = vmatpush3.msra.mxu0 %v6805_v22  ;;  %v10711_v17 = vsel %vm1464_vm2, %v1468_v49, %v1470_v8  ;;  %v6801_v45 = vld [vmem:[%s13940_s3 + $0x2d0] sm:$0xff]  ;;  %v6799_v9 = vld [vmem:[%s13940_s3 + $0x2c0] sm:$0xff] }
 0x170   : > { %v977_v20 = vpop.f32.mrf.mxu0  ;;  %8220 = vmatprep.mubr.f32.mxu1 %v10703_v60  ;;  %8370 = vmatprep.mubr.f32.mxu0 %v10706_v61  ;;  %v10724_v62 = vsel %vm1848_vm3, %v1852_v51, %v1854_v14  ;;  %v1122_v51 = vld [vmem:[%s13940_s3 + $0x48] sm:$0xff] }
 0x171   : > { %v978_v25 = vadd.f32 %v977_v20, %v10597_v34  ;;  %v1167_v27 = vrot.slane %v10700_v15, 1  ;;  %v1664_v4 = vrot.slane %v10700_v15, 3  ;;  %8239 = vmatprep.subr.mxu1 %v1126_v13  ;;  %8439 = vmatprep.subr.mxu0 %v6804_v28  ;;  %v1124_v34 = vld [vmem:[%s13940_s3 + $0x58] sm:$0xff] }
 0x172   : > { %v979_v29 = vpop.f32.mrf.mxu0  ;;  %8240 = vmatpush3.msra.mxu1 %v1126_v13  ;;  %8440 = vmatpush3.msra.mxu0 %v6804_v28 }
 0x173   : > { %v10729_v30 = vmax.f32 %v978_v25, 0.0  ;;  %v10732_v10 = vsel %vm1159_vm0, %v1165_v6, %v1167_v27  ;;  %v10735_v31 = vsel %vm1656_vm1, %v1662_v7, %v1664_v4  ;;  %8241 = vmatprep.subr.mxu1 %v1125_v21  ;;  %8441 = vmatprep.subr.mxu0 %v6803_v23  ;;  %v1120_v25 = vld [vmem:[%s13940_s3 + $0x38] sm:$0xff] }
 0x174   : > { %v982_v35 = vpop.f32.mrf.mxu0  ;;  %8221 = vmatmul.mubr.f32.gmra.mxu1 %v10732_v10  ;;  %8371 = vmatmul.mubr.f32.gmra.mxu0 %v10735_v31 }
 0x175   : > { %v983_v36 = vadd.f32 %v982_v35, %v10600_v40  ;;  %v1169_v38 = vrot.slane %v10729_v30, 1  ;;  %v1666_v39 = vrot.slane %v10729_v30, 3  ;;  %8242 = vmatpush3.msra.mxu1 %v1125_v21  ;;  %8442 = vmatpush3.msra.mxu0 %v6803_v23  ;;  %v6797_v35 = vld [vmem:[%s13940_s3 + $0x2b0] sm:$0xff] }
 0x176   : > { %v984_v16 = vpop.f32.mrf.mxu0  ;;  %8243 = vmatprep.subr.mxu1 %v1124_v34  ;;  %8443 = vmatprep.subr.mxu0 %v6802_v32 }
 0x177   : > { %v10754_v47 = vmax.f32 %v983_v36, 0.0  ;;  %v10757_v40 = vsel %vm1159_vm0, %v1167_v27, %v1169_v38  ;;  %v10760_v49 = vsel %vm1656_vm1, %v1664_v4, %v1666_v39  ;;  %8244 = vmatpush3.msra.mxu1 %v1124_v34  ;;  %8444 = vmatpush3.msra.mxu0 %v6802_v32  ;;  %v6798_v27 = vld [vmem:[%s13940_s3 + $0x2b8] sm:$0xff]  ;;  %v1119_v32 = vld [vmem:[%s13940_s3 + $0x30] sm:$0xff] }
 0x178   : > { %v987_v50 = vpop.f32.mrf.mxu0  ;;  %8223 = vmatprep.mubr.f32.mxu1 %v10757_v40  ;;  %8373 = vmatprep.mubr.f32.mxu0 %v10760_v49 }
 0x179   : > { %v988_v56 = vadd.f32 %v987_v50, %v10603_v46  ;;  %v1171_v57 = vrot.slane %v10754_v47, 1  ;;  %v1668_v22 = vrot.slane %v10754_v47, 3  ;;  %8245 = vmatprep.subr.mxu1 %v1123_v44  ;;  %8445 = vmatprep.subr.mxu0 %v6801_v45  ;;  %v1121_v46 = vld [vmem:[%s13940_s3 + $0x40] sm:$0xff] }
 0x17a   : > { %v989_v63 = vpop.f32.mrf.mxu0  ;;  %8246 = vmatpush3.msra.mxu1 %v1123_v44  ;;  %8446 = vmatpush3.msra.mxu0 %v6801_v45 }
 0x17b   : > { %v10773_v3 = vmax.f32 %v988_v56, 0.0  ;;  %v10776_v6 = vsel %vm1159_vm0, %v1169_v38, %v1171_v57  ;;  %v10779_v7 = vsel %vm1656_vm1, %v1666_v39, %v1668_v22  ;;  %8247 = vmatprep.subr.mxu1 %v1122_v51  ;;  %8447 = vmatprep.subr.mxu0 %v6800_v54 }
 0x17c   : > { %v992_v13 = vpop.f32.mrf.mxu0  ;;  %8224 = vmatmul.mubr.f32.gmra.mxu1 %v10776_v6  ;;  %8374 = vmatmul.mubr.f32.gmra.mxu0 %v10779_v7 }
 0x17d   : > { %v993_v28 = vadd.f32 %v992_v13, %v10606_v52  ;;  %v1173_v20 = vrot.slane %v10773_v3, 1  ;;  %v1670_v21 = vrot.slane %v10773_v3, 3  ;;  %8248 = vmatpush3.msra.mxu1 %v1122_v51  ;;  %8448 = vmatpush3.msra.mxu0 %v6800_v54  ;;  %v6796_v51 = vld [vmem:[%s13940_s3 + $0x2a8] sm:$0xff] }
 0x17e   : > { %v994_v23 = vpop.f32.mrf.mxu0  ;;  %8249 = vmatprep.subr.mxu1 %v1121_v46  ;;  %8449 = vmatprep.subr.mxu0 %v6799_v9 }
 0x17f   : > { %v10798_v4 = vmax.f32 %v993_v28, 0.0  ;;  %v10801_v52 = vsel %vm1159_vm0, %v1171_v57, %v1173_v20  ;;  %v10804_v29 = vsel %vm1656_vm1, %v1668_v22, %v1670_v21  ;;  %8250 = vmatpush3.msra.mxu1 %v1121_v46  ;;  %8450 = vmatpush3.msra.mxu0 %v6799_v9  ;;  %v1117_v46 = vld [vmem:[%s13940_s3 + $0x20] sm:$0xff]  ;;  %v6794_v23 = vld [vmem:[%s13940_s3 + $0x298] sm:$0xff] }
 0x180   : > { %13979 = vst [vmem:[#allocation4_spill] sm:$0xff] %v10804_v29  ;;  %v997_v34 = vpop.f32.mrf.mxu0  ;;  %8226 = vmatprep.mubr.f32.mxu1 %v10801_v52  ;;  %8376 = vmatprep.mubr.f32.mxu0 %v10804_v29  ;;  %v6795_v9 = vld [vmem:[%s13940_s3 + $0x2a0] sm:$0xff] }
 0x181   : > { %v998_v36 = vadd.f32 %v997_v34, %v10609_v58  ;;  %v1175_v38 = vrot.slane %v10798_v4, 1  ;;  %v1672_v39 = vrot.slane %v10798_v4, 3  ;;  %8251 = vmatprep.subr.mxu1 %v1120_v25  ;;  %8451 = vmatprep.subr.mxu0 %v6798_v27  ;;  %v1118_v58 = vld [vmem:[%s13940_s3 + $0x28] sm:$0xff] }
 0x182   : > { %v999_v16 = vpop.f32.mrf.mxu0  ;;  %8252 = vmatpush3.msra.mxu1 %v1120_v25  ;;  %8452 = vmatpush3.msra.mxu0 %v6798_v27 }
 0x183   : > { %v10817_v44 = vmax.f32 %v998_v36, 0.0  ;;  %v10820_v45 = vsel %vm1159_vm0, %v1173_v20, %v1175_v38  ;;  %v10823_v50 = vsel %vm1656_vm1, %v1670_v21, %v1672_v39  ;;  %8253 = vmatprep.subr.mxu1 %v1119_v32  ;;  %8453 = vmatprep.subr.mxu0 %v6797_v35  ;;  %v1116_v21 = vld [vmem:[%s13940_s3 + $0x18] sm:$0xff] }
 0x184   : > { %13980 = vst [vmem:[#allocation5_spill] sm:$0xff] %v10823_v50  ;;  %v1002_v54 = vpop.f32.mrf.mxu0  ;;  %8227 = vmatmul.mubr.f32.gmra.mxu1 %v10820_v45  ;;  %8377 = vmatmul.mubr.f32.gmra.mxu0 %v10823_v50 }
 0x185   : > { %v1003_v56 = vadd.f32 %v1002_v54, %v10612_v5  ;;  %v1177_v57 = vrot.slane %v10817_v44, 1  ;;  %v1674_v22 = vrot.slane %v10817_v44, 3  ;;  %8254 = vmatpush3.msra.mxu1 %v1119_v32  ;;  %8454 = vmatpush3.msra.mxu0 %v6797_v35 }
 0x186   : > { %v1004_v63 = vpop.f32.mrf.mxu0  ;;  %8255 = vmatprep.subr.mxu1 %v1118_v58  ;;  %8455 = vmatprep.subr.mxu0 %v6796_v51 }
 0x187   : > { %v10842_v13 = vmax.f32 %v1003_v56, 0.0  ;;  %v10845_v5 = vsel %vm1159_vm0, %v1175_v38, %v1177_v57  ;;  %v10848_v28 = vsel %vm1656_vm1, %v1672_v39, %v1674_v22  ;;  %8256 = vmatpush3.msra.mxu1 %v1118_v58  ;;  %8456 = vmatpush3.msra.mxu0 %v6796_v51  ;;  %v6793_v39 = vld [vmem:[%s13940_s3 + $0x290] sm:$0xff] }
 0x188   : > { %13981 = vst [vmem:[#allocation6_spill] sm:$0xff] %v10848_v28  ;;  %v1007_v20 = vpop.f32.mrf.mxu0  ;;  %8229 = vmatprep.mubr.f32.mxu1 %v10845_v5  ;;  %8379 = vmatprep.mubr.f32.mxu0 %v10848_v28 }
 0x189   : > { %v1008_v25 = vadd.f32 %v1007_v20, %v10615_v12  ;;  %v1179_v27 = vrot.slane %v10842_v13, 1  ;;  %v1676_v34 = vrot.slane %v10842_v13, 3  ;;  %8257 = vmatprep.subr.mxu1 %v1117_v46  ;;  %8457 = vmatprep.subr.mxu0 %v6795_v9  ;;  %v1115_v12 = vld [vmem:[%s13940_s3 + $0x10] sm:$0xff]  ;;  %v1113_v20 = vld [vmem:[%s13940_s3] sm:$0xff] }
 0x18a   : > { %v1009_v32 = vpop.f32.mrf.mxu0  ;;  %8258 = vmatpush3.msra.mxu1 %v1117_v46  ;;  %8458 = vmatpush3.msra.mxu0 %v6795_v9 }
 0x18b   : > { %v10861_v35 = vmax.f32 %v1008_v25, 0.0  ;;  %v10864_v36 = vsel %vm1159_vm0, %v1177_v57, %v1179_v27  ;;  %v10867_v38 = vsel %vm1656_vm1, %v1674_v22, %v1676_v34  ;;  %8259 = vmatprep.subr.mxu1 %v1116_v21  ;;  %8459 = vmatprep.subr.mxu0 %v6794_v23  ;;  %v1114_v57 = vld [vmem:[%s13940_s3 + $0x8] sm:$0xff] }
 0x18c   : > { %13982 = vst [vmem:[#allocation7_spill] sm:$0xff] %v10867_v38  ;;  %v1012_v16 = vpop.f32.mrf.mxu0  ;;  %8230 = vmatmul.mubr.f32.gmra.mxu1 %v10864_v36  ;;  %8380 = vmatmul.mubr.f32.gmra.mxu0 %v10867_v38  ;;  %v6792_v22 = vld [vmem:[%s13940_s3 + $0x288] sm:$0xff] }
 0x18d   : > { %v1013_v58 = vadd.f32 %v1012_v16, %v10618_v19  ;;  %v1181_v51 = vrot.slane %v10861_v35, 1  ;;  %8260 = vmatpush3.msra.mxu1 %v1116_v21  ;;  %v1678_v54 = vrot.slane %v10861_v35, 3  ;;  %8460 = vmatpush3.msra.mxu0 %v6794_v23  ;;  %v6791_v21 = vld [vmem:[%s13940_s3 + $0x280] sm:$0xff]  ;;  %v6838_v16 = vld [vmem:[%s13940_s3 + $0x3f8] sm:$0xff] }
 0x18e   : > { %v1014_v56 = vpop.f32.mrf.mxu0  ;;  %8261 = vmatprep.subr.mxu1 %v1115_v12  ;;  %8461 = vmatprep.subr.mxu0 %v6793_v39 }
 0x18f   : > { %v10886_v63 = vmax.f32 %v1013_v58, 0.0  ;;  %v10889_v19 = vsel %vm1159_vm0, %v1179_v27, %v1181_v51  ;;  %v10892_v46 = vsel %vm1656_vm1, %v1676_v34, %v1678_v54  ;;  %8262 = vmatpush3.msra.mxu1 %v1115_v12  ;;  %8462 = vmatpush3.msra.mxu0 %v6793_v39  ;;  %v6758_v39 = vld [vmem:[%s13940_s3 + $0x178] sm:$0xff] }
 0x190   : > { %13984 = vst [vmem:[#allocation9_spill] sm:$0xff] %v10892_v46  ;;  %v10894_v9 = vpop.f32.mrf.mxu0  ;;  %8232 = vmatprep.mubr.f32.mxu1 %v10889_v19  ;;  %8382 = vmatprep.mubr.f32.mxu0 %v10892_v46 }
 0x191   : > { %13983 = vst [vmem:[#allocation8_spill] sm:$0xff] %v10886_v63  ;;  %8263 = vmatprep.subr.mxu1 %v1114_v57  ;;  %8463 = vmatprep.subr.mxu0 %v6792_v22  ;;  %v13951_v23 = vrot.slane %v10886_v63, 1  ;;  %v13950_v25 = vrot.slane %v10886_v63, 3 }
 0x192   : > { %v1019_v27 = vpop.f32.mrf.mxu0  ;;  %8264 = vmatpush3.msra.mxu1 %v1114_v57  ;;  %8464 = vmatpush3.msra.mxu0 %v6792_v22  ;;  %v6756_v22 = vld [vmem:[%s13940_s3 + $0x168] sm:$0xff] }
 0x193   : > { %v10909_v34 = vsel %vm1159_vm0, %v1181_v51, %v13951_v23  ;;  %v10914_v32 = vsel %vm1656_vm1, %v1678_v54, %v13950_v25  ;;  %8265 = vmatprep.subr.mxu1 %v1113_v20  ;;  %8465 = vmatprep.subr.mxu0 %v6791_v21  ;;  %v6757_v54 = vld [vmem:[%s13940_s3 + $0x170] sm:$0xff]  ;;  %v6892_v23 = vld [vmem:[%s13940_s3 + $0x5a8] sm:$0xff] }
 0x194   : > { %13985 = vst [vmem:[#allocation10_spill] sm:$0xff] %v10914_v32  ;;  %v1022_v12 = vpop.f32.mrf.mxu0  ;;  %8233 = vmatmul.mubr.f32.gmra.mxu1 %v10909_v34  ;;  %8383 = vmatmul.mubr.f32.gmra.mxu0 %v10914_v32  ;;  %v6893_v25 = vld [vmem:[%s13940_s3 + $0x5b0] sm:$0xff] }
 0x195   : > { %v10925_v58 = vadd.f32 %v1022_v12, %v10624_v33  ;;  %8267 = vmatprep.mubr.f32.mxu1 %v10642_v18  ;;  %8467 = vmatprep.mubr.f32.mxu0 %v10656_v37  ;;  %v6837_v33 = vld [vmem:[%s13940_s3 + $0x3f0] sm:$0xff]  ;;  %v6834_v12 = vld [vmem:[%s13940_s3 + $0x3d8] sm:$0xff] }
 0x196   : > { %v1024_v51 = vpop.f32.mrf.mxu0  ;;  %8266 = vmatpush3.msra.mxu1 %v1113_v20  ;;  %8466 = vmatpush3.msra.mxu0 %v6791_v21  ;;  %v6755_v20 = vld [vmem:[%s13940_s3 + $0x160] sm:$0xff] }
 0x197   : > { %8285 = vmatprep.subr.mxu1 %v6758_v39  ;;  %8535 = vmatprep.subr.mxu0 %v6838_v16  ;;  %v6835_v21 = vld [vmem:[%s13940_s3 + $0x3e0] sm:$0xff] }
 0x198   : > { %v1027_v56 = vpop.f32.mrf.mxu0  ;;  %8268 = vmatmul.mubr.f32.vlgmr.msra.gmra.mxu1 %v10645_v24  ;;  %8468 = vmatmul.mubr.f32.vlgmr.msra.gmra.mxu0 %v10671_v53  ;;  %v6836_v24 = vld [vmem:[%s13940_s3 + $0x3e8] sm:$0xff] }
 0x199   : > { %v10938_v18 = vadd.f32 %v1027_v56, %v10627_v41  ;;  %8286 = vmatpush3.msra.mxu1 %v6758_v39  ;;  %8536 = vmatpush3.msra.mxu0 %v6838_v16  ;;  %v6833_v56 = vld [vmem:[%s13940_s3 + $0x3d0] sm:$0xff] }
 0x19a   : > { %8270 = vmatprep.mubr.f32.mxu1 %v10656_v37  ;;  %8287 = vmatprep.subr.mxu1 %v6757_v54  ;;  %v1029_v57 = vpop.f32.mrf.mxu0 }
 0x19b   : > { %8470 = vmatprep.mubr.f32.mxu0 %v10700_v15  ;;  %8537 = vmatprep.subr.mxu0 %v6837_v33  ;;  %v6752_v57 = vld [vmem:[%s13940_s3 + $0x148] sm:$0xff] }
 0x19c   : > { %8288 = vmatpush3.msra.mxu1 %v6757_v54  ;;  %8538 = vmatpush3.msra.mxu0 %v6837_v33  ;;  %v1032_v41 = vpop.f32.mrf.mxu0  ;;  %v6753_v54 = vld [vmem:[%s13940_s3 + $0x150] sm:$0xff] }
 0x19d   : > { %8289 = vmatprep.subr.mxu1 %v6756_v22  ;;  %8539 = vmatprep.subr.mxu0 %v6836_v24  ;;  %v10949_v37 = vadd.f32 %v1032_v41, %v10630_v48  ;;  %v6754_v48 = vld [vmem:[%s13940_s3 + $0x158] sm:$0xff] }
 0x19e   : > { %8271 = vmatmul.mubr.f32.gmra.mxu1 %v10671_v53  ;;  %8471 = vmatmul.mubr.f32.gmra.mxu0 %v10729_v30  ;;  %v1034_v27 = vpop.f32.mrf.mxu0  ;;  %v1860_v53 = vrot.slane %v10754_v47, 4 }
 0x19f   : > { %8290 = vmatpush3.msra.mxu1 %v6756_v22  ;;  %8540 = vmatpush3.msra.mxu0 %v6836_v24  ;;  %v6832_v22 = vld [vmem:[%s13940_s3 + $0x3c8] sm:$0xff] }
 0x1a0   : > { %8273 = vmatprep.mubr.f32.mxu1 %v10700_v15  ;;  %8291 = vmatprep.subr.mxu1 %v6755_v20  ;;  %v1037_v39 = vpop.f32.mrf.mxu0 }
 0x1a1   : > { %8473 = vmatprep.mubr.f32.mxu0 %v10754_v47  ;;  %8541 = vmatprep.subr.mxu0 %v6835_v21  ;;  %v10968_v16 = vadd.f32 %v1037_v39, %v10633_v55  ;;  %v1018_v39 = vadd.f32 %v10894_v9, %v10621_v26  ;;  %v6828_v26 = vld [vmem:[%s13940_s3 + $0x3a8] sm:$0xff] }
 0x1a2   : > { %8292 = vmatpush3.msra.mxu1 %v6755_v20  ;;  %8542 = vmatpush3.msra.mxu0 %v6835_v21  ;;  %v1039_v51 = vpop.f32.mrf.mxu0  ;;  %v6831_v21 = vld [vmem:[%s13940_s3 + $0x3c0] sm:$0xff] }
 0x1a3   : > { %8293 = vmatprep.subr.mxu1 %v6754_v48  ;;  %8543 = vmatprep.subr.mxu0 %v6834_v12  ;;  %v6829_v51 = vld [vmem:[%s13940_s3 + $0x3b0] sm:$0xff]  ;;  %v11026_v9 = vmax.f32 %v1018_v39, 0.0  ;;  %v1474_v39 = vrot.slane %v10729_v30, 2 }
 0x1a4   : > { %8274 = vmatmul.mubr.f32.gmra.mxu1 %v10729_v30  ;;  %8474 = vmatmul.mubr.f32.gmra.mxu0 %v10773_v3  ;;  %v1042_v33 = vpop.f32.mrf.mxu0 }
 0x1a5   : > { %8294 = vmatpush3.msra.mxu1 %v6754_v48  ;;  %8544 = vmatpush3.msra.mxu0 %v6834_v12  ;;  %v10979_v55 = vadd.f32 %v1042_v33, %v10636_v1  ;;  %v6751_v1 = vld [vmem:[%s13940_s3 + $0x140] sm:$0xff]  ;;  %v6750_v48 = vld [vmem:[%s13940_s3 + $0x138] sm:$0xff]  ;;  %v6749_v12 = vld [vmem:[%s13940_s3 + $0x130] sm:$0xff]  ;;  %13987 = vst [vmem:[#allocation12_spill] sm:$0xff] %v11026_v9 }
 0x1a6   : > { %8276 = vmatprep.mubr.f32.mxu1 %v10754_v47  ;;  %8295 = vmatprep.subr.mxu1 %v6753_v54  ;;  %v1044_v24 = vpop.f32.mrf.mxu0  ;;  %v6827_v33 = vld [vmem:[%s13940_s3 + $0x3a0] sm:$0xff] }
 0x1a7   : > { %8476 = vmatprep.mubr.f32.mxu0 %v10798_v4  ;;  %8545 = vmatprep.subr.mxu0 %v6833_v56  ;;  %v6745_v24 = vld [vmem:[%s13940_s3 + $0x110] sm:$0xff] }
 0x1a8   : > { %8296 = vmatpush3.msra.mxu1 %v6753_v54  ;;  %8546 = vmatpush3.msra.mxu0 %v6833_v56  ;;  %v1047_v41 = vpop.f32.mrf.mxu0  ;;  %v6748_v54 = vld [vmem:[%s13940_s3 + $0x128] sm:$0xff]  ;;  %v6747_v56 = vld [vmem:[%s13940_s3 + $0x120] sm:$0xff] }
 0x1a9   : > { %8297 = vmatprep.subr.mxu1 %v6752_v57  ;;  %8547 = vmatprep.subr.mxu0 %v6832_v22  ;;  %v10993_v20 = vadd.f32 %v1047_v41, %v10639_v11  ;;  %v6830_v11 = vld [vmem:[%s13940_s3 + $0x3b8] sm:$0xff]  ;;  %v6744_v41 = vld [vmem:[%s13940_s3 + $0x108] sm:$0xff] }
 0x1aa   : > { %8277 = vmatmul.mubr.f32.gmra.mxu1 %v10773_v3  ;;  %8477 = vmatmul.mubr.f32.gmra.mxu0 %v10817_v44  ;;  %v1049_v27 = vpop.f32.mrf.mxu0 }
 0x1ab   : > { %13986 = vst [vmem:[#allocation11_spill] sm:$0xff] %v10993_v20  ;;  %8298 = vmatpush3.msra.mxu1 %v6752_v57  ;;  %8548 = vmatpush3.msra.mxu0 %v6832_v22  ;;  %v6746_v57 = vld [vmem:[%s13940_s3 + $0x118] sm:$0xff]  ;;  %v6823_v27 = vld [vmem:[%s13940_s3 + $0x380] sm:$0xff] }
 0x1ac   : > { %8279 = vmatprep.mubr.f32.mxu1 %v10798_v4  ;;  %8299 = vmatprep.subr.mxu1 %v6751_v1  ;;  %v6826_v22 = vld [vmem:[%s13940_s3 + $0x398] sm:$0xff] }
 0x1ad   : > { %8479 = vmatprep.mubr.f32.mxu0 %v10842_v13  ;;  %8549 = vmatprep.subr.mxu0 %v6831_v21 }
 0x1ae   : > { %8300 = vmatpush3.msra.mxu1 %v6751_v1  ;;  %8550 = vmatpush3.msra.mxu0 %v6831_v21  ;;  %v6824_v1 = vld [vmem:[%s13940_s3 + $0x388] sm:$0xff]  ;;  %v6743_v21 = vld [vmem:[%s13940_s3 + $0x100] sm:$0xff] }
 0x1af   : > { %8301 = vmatprep.subr.mxu1 %v6750_v48  ;;  %8551 = vmatprep.subr.mxu0 %v6830_v11 }
 0x1b0   : > { %8280 = vmatmul.mubr.f32.gmra.mxu1 %v10817_v44  ;;  %8480 = vmatmul.mubr.f32.gmra.mxu0 %v10861_v35 }
 0x1b1   : > { %8302 = vmatpush3.msra.mxu1 %v6750_v48  ;;  %8552 = vmatpush3.msra.mxu0 %v6830_v11  ;;  %v1472_v48 = vrot.slane %v10700_v15, 2  ;;  %v6790_v11 = vld [vmem:[%s13940_s3 + $0x278] sm:$0xff] }
 0x1b2   : > { %8282 = vmatprep.mubr.f32.mxu1 %v10842_v13  ;;  %8303 = vmatprep.subr.mxu1 %v6749_v12 }
 0x1b3   : > { %8482 = vmatprep.mubr.f32.mxu0 %v10886_v63  ;;  %8553 = vmatprep.subr.mxu0 %v6829_v51 }
 0x1b4   : > { %8304 = vmatpush3.msra.mxu1 %v6749_v12  ;;  %8554 = vmatpush3.msra.mxu0 %v6829_v51  ;;  %v6870_v12 = vld [vmem:[%s13940_s3 + $0x4f8] sm:$0xff]  ;;  %v1473_v51 = vsel %vm1464_vm2, %v1470_v8, %v1472_v48  ;;  %v6788_v8 = vld [vmem:[%s13940_s3 + $0x268] sm:$0xff] }
 0x1b5   : > { %8305 = vmatprep.subr.mxu1 %v6748_v54  ;;  %8555 = vmatprep.subr.mxu0 %v6828_v26 }
 0x1b6   : > { %8283 = vmatmul.mubr.f32.gmra.mxu1 %v10861_v35  ;;  %8483 = vmatmul.mubr.f32.gmra.mxu0 %v11026_v9 }
 0x1b7   : > { %8306 = vmatpush3.msra.mxu1 %v6748_v54  ;;  %8556 = vmatpush3.msra.mxu0 %v6828_v26  ;;  %v6789_v54 = vld [vmem:[%s13940_s3 + $0x270] sm:$0xff] }
 0x1b8   : > { %8307 = vmatprep.subr.mxu1 %v6747_v56  ;;  %8317 = vmatprep.mubr.f32.mxu1 %v10661_v42  ;;  %v6825_v42 = vld [vmem:[%s13940_s3 + $0x390] sm:$0xff] }
 0x1b9   : > { %8557 = vmatprep.subr.mxu0 %v6827_v33  ;;  %8567 = vmatprep.mubr.f32.mxu0 %v10711_v17  ;;  %v6869_v26 = vld [vmem:[%s13940_s3 + $0x4f0] sm:$0xff] }
 0x1ba   : > { %8308 = vmatpush3.msra.mxu1 %v6747_v56  ;;  %8558 = vmatpush3.msra.mxu0 %v6827_v33  ;;  %v1476_v56 = vrot.slane %v10754_v47, 2  ;;  %v6868_v33 = vld [vmem:[%s13940_s3 + $0x4e8] sm:$0xff] }
 0x1bb   : > { %8309 = vmatprep.subr.mxu1 %v6746_v57  ;;  %8559 = vmatprep.subr.mxu0 %v6826_v22 }
 0x1bc   : > { %8310 = vmatpush3.msra.mxu1 %v6746_v57  ;;  %8560 = vmatpush3.msra.mxu0 %v6826_v22  ;;  %v11094_v57 = vsel %vm1464_vm2, %v1474_v39, %v1476_v56  ;;  %v6787_v22 = vld [vmem:[%s13940_s3 + $0x260] sm:$0xff] }
 0x1bd   : > { %8311 = vmatprep.subr.mxu1 %v6745_v24  ;;  %8561 = vmatprep.subr.mxu0 %v6825_v42 }
 0x1be   : > { %8312 = vmatpush3.msra.mxu1 %v6745_v24  ;;  %8562 = vmatpush3.msra.mxu0 %v6825_v42  ;;  %v6867_v24 = vld [vmem:[%s13940_s3 + $0x4e0] sm:$0xff] }
 0x1bf   : > { %8313 = vmatprep.subr.mxu1 %v6744_v41  ;;  %8563 = vmatprep.subr.mxu0 %v6824_v1 }
 0x1c0   : > { %8314 = vmatpush3.msra.mxu1 %v6744_v41  ;;  %8564 = vmatpush3.msra.mxu0 %v6824_v1  ;;  %v1480_v41 = vrot.slane %v10798_v4, 2  ;;  %v6786_v1 = vld [vmem:[%s13940_s3 + $0x258] sm:$0xff] }
 0x1c1   : > { %8315 = vmatprep.subr.mxu1 %v6743_v21  ;;  %8565 = vmatprep.subr.mxu0 %v6823_v27 }
 0x1c2   : > { %8316 = vmatpush3.msra.mxu1 %v6743_v21  ;;  %8566 = vmatpush3.msra.mxu0 %v6823_v27  ;;  %v6866_v21 = vld [vmem:[%s13940_s3 + $0x4d8] sm:$0xff]  ;;  %v1482_v27 = vrot.slane %v10817_v44, 2 }
 0x1c3   : > { %8318 = vmatmul.mubr.f32.vlgmr.msra.gmra.mxu1 %v10682_v59  ;;  %8385 = vmatprep.subr.mxu1 %v6790_v11  ;;  %v11082_v59 = vsel %vm1464_vm2, %v1472_v48, %v1474_v39 }
 0x1c4   : > { %8568 = vmatmul.mubr.f32.vlgmr.msra.gmra.mxu0 %v1473_v51  ;;  %8635 = vmatprep.subr.mxu0 %v6870_v12  ;;  %v11129_v39 = vsel %vm1464_vm2, %v1480_v41, %v1482_v27 }
 0x1c5   : > { %8320 = vmatprep.mubr.f32.mxu1 %v10711_v17  ;;  %8386 = vmatpush3.msra.mxu1 %v6790_v11  ;;  %v1478_v17 = vrot.slane %v10773_v3, 2  ;;  %v6785_v11 = vld [vmem:[%s13940_s3 + $0x250] sm:$0xff] }
 0x1c6   : > { %8570 = vmatprep.mubr.f32.mxu0 %v11082_v59  ;;  %8636 = vmatpush3.msra.mxu0 %v6870_v12  ;;  %v6865_v12 = vld [vmem:[%s13940_s3 + $0x4d0] sm:$0xff] }
 0x1c7   : > { %8387 = vmatprep.subr.mxu1 %v6789_v54  ;;  %8637 = vmatprep.subr.mxu0 %v6869_v26  ;;  %v11105_v42 = vsel %vm1464_vm2, %v1476_v56, %v1478_v17  ;;  %v11118_v48 = vsel %vm1464_vm2, %v1478_v17, %v1480_v41  ;;  %v1486_v56 = vrot.slane %v10861_v35, 2  ;;  %v6863_v17 = vld [vmem:[%s13940_s3 + $0x4c0] sm:$0xff]  ;;  %v6782_v41 = vld [vmem:[%s13940_s3 + $0x238] sm:$0xff] }
 0x1c8   : > { %8388 = vmatpush3.msra.mxu1 %v6789_v54  ;;  %8638 = vmatpush3.msra.mxu0 %v6869_v26  ;;  %v6784_v54 = vld [vmem:[%s13940_s3 + $0x248] sm:$0xff] }
 0x1c9   : > { %8321 = vmatmul.mubr.f32.gmra.mxu1 %v1473_v51  ;;  %8389 = vmatprep.subr.mxu1 %v6788_v8  ;;  %v1484_v51 = vrot.slane %v10842_v13, 2  ;;  %v6864_v26 = vld [vmem:[%s13940_s3 + $0x4c8] sm:$0xff] }
 0x1ca   : > { %8571 = vmatmul.mubr.f32.gmra.mxu0 %v11094_v57  ;;  %8639 = vmatprep.subr.mxu0 %v6868_v33 }
 0x1cb   : > { %8323 = vmatprep.mubr.f32.mxu1 %v11082_v59  ;;  %8390 = vmatpush3.msra.mxu1 %v6788_v8  ;;  %v11142_v8 = vsel %vm1464_vm2, %v1482_v27, %v1484_v51  ;;  %v2356_v27 = vrot.slane %v11026_v9, 2 }
 0x1cc   : > { %8573 = vmatprep.mubr.f32.mxu0 %v11105_v42  ;;  %8640 = vmatpush3.msra.mxu0 %v6868_v33  ;;  %v6783_v33 = vld [vmem:[%s13940_s3 + $0x240] sm:$0xff] }
 0x1cd   : > { %8391 = vmatprep.subr.mxu1 %v6787_v22  ;;  %8641 = vmatprep.subr.mxu0 %v6867_v24 }
 0x1ce   : > { %8392 = vmatpush3.msra.mxu1 %v6787_v22  ;;  %8642 = vmatpush3.msra.mxu0 %v6867_v24  ;;  %v11153_v22 = vsel %vm1464_vm2, %v1484_v51, %v1486_v56  ;;  %v1488_v24 = vrot.slane %v10886_v63, 2 }
 0x1cf   : > { %8324 = vmatmul.mubr.f32.gmra.mxu1 %v11094_v57  ;;  %8393 = vmatprep.subr.mxu1 %v6786_v1  ;;  %13988 = vst [vmem:[#allocation13_spill] sm:$0xff] %v11153_v22 }
 0x1d0   : > { %8574 = vmatmul.mubr.f32.gmra.mxu0 %v11118_v48  ;;  %8643 = vmatprep.subr.mxu0 %v6866_v21  ;;  %v11180_v51 = vsel %vm1464_vm2, %v1488_v24, %v2356_v27 }
 0x1d1   : > { %8326 = vmatprep.mubr.f32.mxu1 %v11105_v42  ;;  %8394 = vmatpush3.msra.mxu1 %v6786_v1  ;;  %v11161_v1 = vmax.f32 %v10925_v58, 0.0  ;;  %v6781_v58 = vld [vmem:[%s13940_s3 + $0x230] sm:$0xff]  ;;  %13990 = vst [vmem:[#allocation15_spill] sm:$0xff] %v11180_v51 }
 0x1d2   : > { %8576 = vmatprep.mubr.f32.mxu0 %v11129_v39  ;;  %8644 = vmatpush3.msra.mxu0 %v6866_v21  ;;  %v6862_v21 = vld [vmem:[%s13940_s3 + $0x4b8] sm:$0xff] }
 0x1d3   : > { %8395 = vmatprep.subr.mxu1 %v6785_v11  ;;  %8645 = vmatprep.subr.mxu0 %v6865_v12 }
 0x1d4   : > { %8396 = vmatpush3.msra.mxu1 %v6785_v11  ;;  %8646 = vmatpush3.msra.mxu0 %v6865_v12  ;;  %v11169_v11 = vsel %vm1464_vm2, %v1486_v56, %v1488_v24  ;;  %v6861_v12 = vld [vmem:[%s13940_s3 + $0x4b0] sm:$0xff]  ;;  %v6860_v56 = vld [vmem:[%s13940_s3 + $0x4a8] sm:$0xff]  ;;  %v6859_v24 = vld [vmem:[%s13940_s3 + $0x4a0] sm:$0xff] }
 0x1d5   : > { %8327 = vmatmul.mubr.f32.gmra.mxu1 %v11118_v48  ;;  %8397 = vmatprep.subr.mxu1 %v6784_v54  ;;  %13989 = vst [vmem:[#allocation14_spill] sm:$0xff] %v11169_v11 }
 0x1d6   : > { %8577 = vmatmul.mubr.f32.gmra.mxu0 %v11142_v8  ;;  %8647 = vmatprep.subr.mxu0 %v6864_v26 }
 0x1d7   : > { %8329 = vmatprep.mubr.f32.mxu1 %v11129_v39  ;;  %8398 = vmatpush3.msra.mxu1 %v6784_v54  ;;  %v13949_v54 = vrot.slane %v11161_v1, 2 }
 0x1d8   : > { %8579 = vmatprep.mubr.f32.mxu0 %v11153_v22  ;;  %8648 = vmatpush3.msra.mxu0 %v6864_v26  ;;  %v6780_v26 = vld [vmem:[%s13940_s3 + $0x228] sm:$0xff] }
 0x1d9   : > { %8399 = vmatprep.subr.mxu1 %v6783_v33  ;;  %8649 = vmatprep.subr.mxu0 %v6863_v17 }
 0x1da   : > { %8400 = vmatpush3.msra.mxu1 %v6783_v33  ;;  %8650 = vmatpush3.msra.mxu0 %v6863_v17  ;;  %v11194_v33 = vsel %vm1464_vm2, %v2356_v27, %v13949_v54  ;;  %v6779_v17 = vld [vmem:[%s13940_s3 + $0x220] sm:$0xff]  ;;  %v6777_v27 = vld [vmem:[%s13940_s3 + $0x210] sm:$0xff]  ;;  %v6894_v54 = vld [vmem:[%s13940_s3 + $0x5b8] sm:$0xff] }
 0x1db   : > { %8330 = vmatmul.mubr.f32.gmra.mxu1 %v11142_v8  ;;  %8401 = vmatprep.subr.mxu1 %v6782_v41 }
 0x1dc   : > { %8580 = vmatmul.mubr.f32.gmra.mxu0 %v11169_v11  ;;  %8651 = vmatprep.subr.mxu0 %v6862_v21 }
 0x1dd   : > { %8332 = vmatprep.mubr.f32.mxu1 %v11153_v22  ;;  %8402 = vmatpush3.msra.mxu1 %v6782_v41  ;;  %v6778_v41 = vld [vmem:[%s13940_s3 + $0x218] sm:$0xff] }
 0x1de   : > { %8582 = vmatprep.mubr.f32.mxu0 %v11180_v51  ;;  %8652 = vmatpush3.msra.mxu0 %v6862_v21  ;;  %v6858_v21 = vld [vmem:[%s13940_s3 + $0x498] sm:$0xff] }
 0x1df   : > { %8403 = vmatprep.subr.mxu1 %v6781_v58  ;;  %8653 = vmatprep.subr.mxu0 %v6861_v12 }
 0x1e0   : > { %8404 = vmatpush3.msra.mxu1 %v6781_v58  ;;  %8654 = vmatpush3.msra.mxu0 %v6861_v12  ;;  %v6776_v58 = vld [vmem:[%s13940_s3 + $0x208] sm:$0xff] }
 0x1e1   : > { %8333 = vmatmul.mubr.f32.gmra.mxu1 %v11169_v11  ;;  %8405 = vmatprep.subr.mxu1 %v6780_v26  ;;  %v6856_v12 = vld [vmem:[%s13940_s3 + $0x488] sm:$0xff] }
 0x1e2   : > { %8583 = vmatmul.mubr.f32.gmra.mxu0 %v11194_v33  ;;  %8655 = vmatprep.subr.mxu0 %v6860_v56 }
 0x1e3   : > { %8406 = vmatpush3.msra.mxu1 %v6780_v26  ;;  %8417 = vmatprep.mubr.f32.mxu1 %v10664_v43  ;;  %v6857_v43 = vld [vmem:[%s13940_s3 + $0x490] sm:$0xff]  ;;  %v6775_v26 = vld [vmem:[%s13940_s3 + $0x200] sm:$0xff] }
 0x1e4   : > { %8656 = vmatpush3.msra.mxu0 %v6860_v56  ;;  %8667 = vmatprep.mubr.f32.mxu0 %v10724_v62  ;;  %v6855_v56 = vld [vmem:[%s13940_s3 + $0x480] sm:$0xff] }
 0x1e5   : > { %8407 = vmatprep.subr.mxu1 %v6779_v17  ;;  %8657 = vmatprep.subr.mxu0 %v6859_v24 }
 0x1e6   : > { %8408 = vmatpush3.msra.mxu1 %v6779_v17  ;;  %8658 = vmatpush3.msra.mxu0 %v6859_v24  ;;  %v1856_v17 = vrot.slane %v10700_v15, 4  ;;  %v6822_v24 = vld [vmem:[%s13940_s3 + $0x378] sm:$0xff] }
 0x1e7   : > { %8409 = vmatprep.subr.mxu1 %v6778_v41  ;;  %8659 = vmatprep.subr.mxu0 %v6858_v21 }
 0x1e8   : > { %8410 = vmatpush3.msra.mxu1 %v6778_v41  ;;  %8660 = vmatpush3.msra.mxu0 %v6858_v21  ;;  %v6902_v41 = vld [vmem:[%s13940_s3 + $0x5f8] sm:$0xff]  ;;  %v1858_v21 = vrot.slane %v10729_v30, 4 }
 0x1e9   : > { %8411 = vmatprep.subr.mxu1 %v6777_v27  ;;  %8661 = vmatprep.subr.mxu0 %v6857_v43 }
 0x1ea   : > { %8412 = vmatpush3.msra.mxu1 %v6777_v27  ;;  %8662 = vmatpush3.msra.mxu0 %v6857_v43  ;;  %v1857_v27 = vsel %vm1848_vm3, %v1854_v14, %v1856_v17  ;;  %v6821_v43 = vld [vmem:[%s13940_s3 + $0x370] sm:$0xff]  ;;  %v6820_v14 = vld [vmem:[%s13940_s3 + $0x368] sm:$0xff] }
 0x1eb   : > { %8413 = vmatprep.subr.mxu1 %v6776_v58  ;;  %8663 = vmatprep.subr.mxu0 %v6856_v12 }
 0x1ec   : > { %8414 = vmatpush3.msra.mxu1 %v6776_v58  ;;  %8664 = vmatpush3.msra.mxu0 %v6856_v12  ;;  %v6901_v58 = vld [vmem:[%s13940_s3 + $0x5f0] sm:$0xff]  ;;  %v6900_v12 = vld [vmem:[%s13940_s3 + $0x5e8] sm:$0xff] }
 0x1ed   : > { %8415 = vmatprep.subr.mxu1 %v6775_v26  ;;  %8665 = vmatprep.subr.mxu0 %v6855_v56 }
 0x1ee   : > { %8416 = vmatpush3.msra.mxu1 %v6775_v26  ;;  %8666 = vmatpush3.msra.mxu0 %v6855_v56  ;;  %v11261_v26 = vsel %vm1848_vm3, %v1858_v21, %v1860_v53  ;;  %v6819_v56 = vld [vmem:[%s13940_s3 + $0x360] sm:$0xff] }
 0x1ef   : > { %8418 = vmatmul.mubr.f32.vlgmr.msra.gmra.mxu1 %v10685_v0  ;;  %8485 = vmatprep.subr.mxu1 %v6822_v24  ;;  %v11249_v0 = vsel %vm1848_vm3, %v1856_v17, %v1858_v21  ;;  %v6899_v17 = vld [vmem:[%s13940_s3 + $0x5e0] sm:$0xff]  ;;  %v6818_v21 = vld [vmem:[%s13940_s3 + $0x358] sm:$0xff] }
 0x1f0   : > { %8668 = vmatmul.mubr.f32.vlgmr.msra.gmra.mxu0 %v1857_v27  ;;  %8735 = vmatprep.subr.mxu0 %v6902_v41 }
 0x1f1   : > { %8420 = vmatprep.mubr.f32.mxu1 %v10724_v62  ;;  %8486 = vmatpush3.msra.mxu1 %v6822_v24  ;;  %v1862_v62 = vrot.slane %v10773_v3, 4 }
 0x1f2   : > { %8670 = vmatprep.mubr.f32.mxu0 %v11249_v0  ;;  %8736 = vmatpush3.msra.mxu0 %v6902_v41  ;;  %v1864_v41 = vrot.slane %v10798_v4, 4 }
 0x1f3   : > { %8487 = vmatprep.subr.mxu1 %v6821_v43  ;;  %8737 = vmatprep.subr.mxu0 %v6901_v58  ;;  %v11272_v24 = vsel %vm1848_vm3, %v1860_v53, %v1862_v62  ;;  %v6817_v53 = vld [vmem:[%s13940_s3 + $0x350] sm:$0xff] }
 0x1f4   : > { %8488 = vmatpush3.msra.mxu1 %v6821_v43  ;;  %8738 = vmatpush3.msra.mxu0 %v6901_v58  ;;  %v1866_v43 = vrot.slane %v10817_v44, 4  ;;  %v11285_v58 = vsel %vm1848_vm3, %v1862_v62, %v1864_v41  ;;  %v1868_v62 = vrot.slane %v10842_v13, 4 }
 0x1f5   : > { %8421 = vmatmul.mubr.f32.gmra.mxu1 %v1857_v27  ;;  %8489 = vmatprep.subr.mxu1 %v6820_v14  ;;  %v6898_v27 = vld [vmem:[%s13940_s3 + $0x5d8] sm:$0xff] }
 0x1f6   : > { %8671 = vmatmul.mubr.f32.gmra.mxu0 %v11261_v26  ;;  %8739 = vmatprep.subr.mxu0 %v6900_v12 }
 0x1f7   : > { %8423 = vmatprep.mubr.f32.mxu1 %v11249_v0  ;;  %8490 = vmatpush3.msra.mxu1 %v6820_v14  ;;  %v6897_v14 = vld [vmem:[%s13940_s3 + $0x5d0] sm:$0xff] }
 0x1f8   : > { %8673 = vmatprep.mubr.f32.mxu0 %v11272_v24  ;;  %8740 = vmatpush3.msra.mxu0 %v6900_v12  ;;  %v11296_v12 = vsel %vm1848_vm3, %v1864_v41, %v1866_v43  ;;  %v11309_v41 = vsel %vm1848_vm3, %v1866_v43, %v1868_v62  ;;  %v1872_v43 = vrot.slane %v10886_v63, 4 }
 0x1f9   : > { %8491 = vmatprep.subr.mxu1 %v6819_v56  ;;  %8741 = vmatprep.subr.mxu0 %v6899_v17 }
 0x1fa   : > { %8492 = vmatpush3.msra.mxu1 %v6819_v56  ;;  %8742 = vmatpush3.msra.mxu0 %v6899_v17  ;;  %v6816_v56 = vld [vmem:[%s13940_s3 + $0x348] sm:$0xff] }
 0x1fb   : > { %8424 = vmatmul.mubr.f32.gmra.mxu1 %v11261_v26  ;;  %8493 = vmatprep.subr.mxu1 %v6818_v21  ;;  %v6896_v17 = vld [vmem:[%s13940_s3 + $0x5c8] sm:$0xff] }
 0x1fc   : > { %8674 = vmatmul.mubr.f32.gmra.mxu0 %v11285_v58  ;;  %8743 = vmatprep.subr.mxu0 %v6898_v27 }
 0x1fd   : > { %8426 = vmatprep.mubr.f32.mxu1 %v11272_v24  ;;  %8494 = vmatpush3.msra.mxu1 %v6818_v21  ;;  %v1870_v21 = vrot.slane %v10861_v35, 4 }
 0x1fe   : > { %8676 = vmatprep.mubr.f32.mxu0 %v11296_v12  ;;  %8744 = vmatpush3.msra.mxu0 %v6898_v27  ;;  %v6815_v27 = vld [vmem:[%s13940_s3 + $0x340] sm:$0xff] }
 0x1ff   : > { %8495 = vmatprep.subr.mxu1 %v6817_v53  ;;  %8745 = vmatprep.subr.mxu0 %v6897_v14 }
 0x200   : > { %8496 = vmatpush3.msra.mxu1 %v6817_v53  ;;  %8746 = vmatpush3.msra.mxu0 %v6897_v14  ;;  %v11320_v53 = vsel %vm1848_vm3, %v1868_v62, %v1870_v21  ;;  %v6814_v14 = vld [vmem:[%s13940_s3 + $0x338] sm:$0xff]  ;;  %v11333_v62 = vsel %vm1848_vm3, %v1870_v21, %v1872_v43  ;;  %v13952_v21 = vrot.slane %v11161_v1, 4 }
 0x201   : > { %8427 = vmatmul.mubr.f32.gmra.mxu1 %v11285_v58  ;;  %8497 = vmatprep.subr.mxu1 %v6816_v56 }
 0x202   : > { %8677 = vmatmul.mubr.f32.gmra.mxu0 %v11309_v41  ;;  %8747 = vmatprep.subr.mxu0 %v6896_v17 }
 0x203   : > { %8429 = vmatprep.mubr.f32.mxu1 %v11296_v12  ;;  %8498 = vmatpush3.msra.mxu1 %v6816_v56  ;;  %v2676_v56 = vrot.slane %v11026_v9, 4 }
 0x204   : > { %8679 = vmatprep.mubr.f32.mxu0 %v11320_v53  ;;  %8748 = vmatpush3.msra.mxu0 %v6896_v17  ;;  %v6813_v17 = vld [vmem:[%s13940_s3 + $0x330] sm:$0xff] }
 0x205   : > { %8499 = vmatprep.subr.mxu1 %v6815_v27  ;;  %8749 = vmatprep.subr.mxu0 %v6895_v2 }
 0x206   : > { %8500 = vmatpush3.msra.mxu1 %v6815_v27  ;;  %8750 = vmatpush3.msra.mxu0 %v6895_v2  ;;  %v11344_v2 = vsel %vm1848_vm3, %v1872_v43, %v2676_v56  ;;  %v6812_v27 = vld [vmem:[%s13940_s3 + $0x328] sm:$0xff]  ;;  %v11358_v43 = vsel %vm1848_vm3, %v2676_v56, %v13952_v21  ;;  %v6890_v56 = vld [vmem:[%s13940_s3 + $0x598] sm:$0xff] }
 0x207   : > { %8430 = vmatmul.mubr.f32.gmra.mxu1 %v11309_v41  ;;  %8501 = vmatprep.subr.mxu1 %v6814_v14 }
 0x208   : > { %8680 = vmatmul.mubr.f32.gmra.mxu0 %v11333_v62  ;;  %8751 = vmatprep.subr.mxu0 %v6894_v54 }
 0x209   : > { %8432 = vmatprep.mubr.f32.mxu1 %v11320_v53  ;;  %8502 = vmatpush3.msra.mxu1 %v6814_v14  ;;  %v6891_v14 = vld [vmem:[%s13940_s3 + $0x5a0] sm:$0xff] }
 0x20a   : > { %8682 = vmatprep.mubr.f32.mxu0 %v11344_v2  ;;  %8752 = vmatpush3.msra.mxu0 %v6894_v54  ;;  %v6811_v54 = vld [vmem:[%s13940_s3 + $0x320] sm:$0xff] }
 0x20b   : > { %8503 = vmatprep.subr.mxu1 %v6813_v17  ;;  %8753 = vmatprep.subr.mxu0 %v6893_v25 }
 0x20c   : > { %8504 = vmatpush3.msra.mxu1 %v6813_v17  ;;  %8754 = vmatpush3.msra.mxu0 %v6893_v25  ;;  %v6810_v25 = vld [vmem:[%s13940_s3 + $0x318] sm:$0xff]  ;;  %v6809_v17 = vld [vmem:[%s13940_s3 + $0x310] sm:$0xff] }
 0x20d   : > { %8433 = vmatmul.mubr.f32.gmra.mxu1 %v11333_v62  ;;  %8505 = vmatprep.subr.mxu1 %v6812_v27 }
 0x20e   : > { %8683 = vmatmul.mubr.f32.gmra.mxu0 %v11358_v43  ;;  %8755 = vmatprep.subr.mxu0 %v6892_v23 }
 0x20f   : > { %8506 = vmatpush3.msra.mxu1 %v6812_v27  ;;  %8517 = vmatprep.mubr.f32.mxu1 %v10703_v60  ;;  %v6889_v60 = vld [vmem:[%s13940_s3 + $0x590] sm:$0xff]  ;;  %v6888_v27 = vld [vmem:[%s13940_s3 + $0x588] sm:$0xff] }
 0x210   : > { %8756 = vmatpush3.msra.mxu0 %v6892_v23  ;;  %8767 = vmatprep.mubr.f32.mxu0 %v10757_v40  ;;  %v6808_v23 = vld [vmem:[%s13940_s3 + $0x308] sm:$0xff] }
 0x211   : > { %8507 = vmatprep.subr.mxu1 %v6811_v54  ;;  %8757 = vmatprep.subr.mxu0 %v6891_v14 }
 0x212   : > { %8508 = vmatpush3.msra.mxu1 %v6811_v54  ;;  %8758 = vmatpush3.msra.mxu0 %v6891_v14  ;;  %v6807_v54 = vld [vmem:[%s13940_s3 + $0x300] sm:$0xff] }
 0x213   : > { %8509 = vmatprep.subr.mxu1 %v6810_v25  ;;  %8759 = vmatprep.subr.mxu0 %v6890_v56  ;;  %v6887_v14 = vld [vmem:[%s13940_s3 + $0x580] sm:$0xff] }
 0x214   : > { %8510 = vmatpush3.msra.mxu1 %v6810_v25  ;;  %8760 = vmatpush3.msra.mxu0 %v6890_v56  ;;  %v6854_v25 = vld [vmem:[%s13940_s3 + $0x478] sm:$0xff] }
 0x215   : > { %8511 = vmatprep.subr.mxu1 %v6809_v17  ;;  %8761 = vmatprep.subr.mxu0 %v6889_v60  ;;  %v6934_v56 = vld [vmem:[%s13940_s3 + $0x6f8] sm:$0xff] }
 0x216   : > { %8512 = vmatpush3.msra.mxu1 %v6809_v17  ;;  %8762 = vmatpush3.msra.mxu0 %v6889_v60  ;;  %v6853_v17 = vld [vmem:[%s13940_s3 + $0x470] sm:$0xff] }
 0x217   : > { %8513 = vmatprep.subr.mxu1 %v6808_v23  ;;  %8763 = vmatprep.subr.mxu0 %v6888_v27  ;;  %v6933_v60 = vld [vmem:[%s13940_s3 + $0x6f0] sm:$0xff] }
 0x218   : > { %8514 = vmatpush3.msra.mxu1 %v6808_v23  ;;  %8764 = vmatpush3.msra.mxu0 %v6888_v27  ;;  %v6932_v23 = vld [vmem:[%s13940_s3 + $0x6e8] sm:$0xff]  ;;  %v6931_v27 = vld [vmem:[%s13940_s3 + $0x6e0] sm:$0xff] }
 0x219   : > { %8515 = vmatprep.subr.mxu1 %v6807_v54  ;;  %8765 = vmatprep.subr.mxu0 %v6887_v14 }
 0x21a   : > { %8516 = vmatpush3.msra.mxu1 %v6807_v54  ;;  %8766 = vmatpush3.msra.mxu0 %v6887_v14  ;;  %v6930_v54 = vld [vmem:[%s13940_s3 + $0x6d8] sm:$0xff]  ;;  %v6849_v14 = vld [vmem:[%s13940_s3 + $0x450] sm:$0xff] }
 0x21b   : > { %8518 = vmatmul.mubr.f32.vlgmr.msra.gmra.mxu1 %v10732_v10  ;;  %8585 = vmatprep.subr.mxu1 %v6854_v25  ;;  %v6852_v10 = vld [vmem:[%s13940_s3 + $0x468] sm:$0xff] }
 0x21c   : > { %8768 = vmatmul.mubr.f32.vlgmr.msra.gmra.mxu0 %v10776_v6  ;;  %8835 = vmatprep.subr.mxu0 %v6934_v56 }
 0x21d   : > { %8520 = vmatprep.mubr.f32.mxu1 %v10757_v40  ;;  %8586 = vmatpush3.msra.mxu1 %v6854_v25  ;;  %v6851_v40 = vld [vmem:[%s13940_s3 + $0x460] sm:$0xff]  ;;  %v6929_v25 = vld [vmem:[%s13940_s3 + $0x6d0] sm:$0xff] }
 0x21e   : > { %8770 = vmatprep.mubr.f32.mxu0 %v10801_v52  ;;  %8836 = vmatpush3.msra.mxu0 %v6934_v56  ;;  %v6848_v56 = vld [vmem:[%s13940_s3 + $0x448] sm:$0xff] }
 0x21f   : > { %8587 = vmatprep.subr.mxu1 %v6853_v17  ;;  %8837 = vmatprep.subr.mxu0 %v6933_v60 }
 0x220   : > { %8588 = vmatpush3.msra.mxu1 %v6853_v17  ;;  %8838 = vmatpush3.msra.mxu0 %v6933_v60  ;;  %v6928_v17 = vld [vmem:[%s13940_s3 + $0x6c8] sm:$0xff]  ;;  %v2196_v60 = vrot.slane %v11026_v9, 1 }
 0x221   : > { %8521 = vmatmul.mubr.f32.gmra.mxu1 %v10776_v6  ;;  %8589 = vmatprep.subr.mxu1 %v6852_v10  ;;  %v6850_v6 = vld [vmem:[%s13940_s3 + $0x458] sm:$0xff] }
 0x222   : > { %8771 = vmatmul.mubr.f32.gmra.mxu0 %v10820_v45  ;;  %8839 = vmatprep.subr.mxu0 %v6932_v23 }
 0x223   : > { %8523 = vmatprep.mubr.f32.mxu1 %v10801_v52  ;;  %8590 = vmatpush3.msra.mxu1 %v6852_v10  ;;  %v11449_v10 = vmax.f32 %v10938_v18, 0.0  ;;  %v13991_v18 = vrot.slane %v10886_v63, 1 }
 0x224   : > { %8773 = vmatprep.mubr.f32.mxu0 %v10845_v5  ;;  %8840 = vmatpush3.msra.mxu0 %v6932_v23  ;;  %v6847_v23 = vld [vmem:[%s13940_s3 + $0x440] sm:$0xff] }
 0x225   : > { %8591 = vmatprep.subr.mxu1 %v6851_v40  ;;  %8841 = vmatprep.subr.mxu0 %v6931_v27 }
 0x226   : > { %8592 = vmatpush3.msra.mxu1 %v6851_v40  ;;  %8842 = vmatpush3.msra.mxu0 %v6931_v27  ;;  %v6927_v40 = vld [vmem:[%s13940_s3 + $0x6c0] sm:$0xff]  ;;  %v11463_v27 = vsel %vm1159_vm0, %v13991_v18, %v2196_v60  ;;  %v6925_v18 = vld [vmem:[%s13940_s3 + $0x6b0] sm:$0xff] }
 0x227   : > { %8524 = vmatmul.mubr.f32.gmra.mxu1 %v10820_v45  ;;  %8593 = vmatprep.subr.mxu1 %v6850_v6 }
 0x228   : > { %8774 = vmatmul.mubr.f32.gmra.mxu0 %v10864_v36  ;;  %8843 = vmatprep.subr.mxu0 %v6930_v54 }
 0x229   : > { %8526 = vmatprep.mubr.f32.mxu1 %v10845_v5  ;;  %8594 = vmatpush3.msra.mxu1 %v6850_v6  ;;  %v2198_v6 = vrot.slane %v11161_v1, 1 }
 0x22a   : > { %8776 = vmatprep.mubr.f32.mxu0 %v10889_v19  ;;  %8844 = vmatpush3.msra.mxu0 %v6930_v54  ;;  %v6846_v54 = vld [vmem:[%s13940_s3 + $0x438] sm:$0xff] }
 0x22b   : > { %8595 = vmatprep.subr.mxu1 %v6849_v14  ;;  %8845 = vmatprep.subr.mxu0 %v6929_v25 }
 0x22c   : > { %8596 = vmatpush3.msra.mxu1 %v6849_v14  ;;  %8846 = vmatpush3.msra.mxu0 %v6929_v25  ;;  %v11471_v14 = vmax.f32 %v10949_v37, 0.0  ;;  %v6926_v25 = vld [vmem:[%s13940_s3 + $0x6b8] sm:$0xff]  ;;  %v6845_v37 = vld [vmem:[%s13940_s3 + $0x430] sm:$0xff]  ;;  %v11497_v21 = vpop.f32.mrf.mxu1 }
 0x22d   : > { %8527 = vmatmul.mubr.f32.gmra.mxu1 %v10864_v36  ;;  %8597 = vmatprep.subr.mxu1 %v6848_v56 }
 0x22e   : > { %8777 = vmatmul.mubr.f32.gmra.mxu0 %v10909_v34  ;;  %8847 = vmatprep.subr.mxu0 %v6928_v17 }
 0x22f   : > { %8529 = vmatprep.mubr.f32.mxu1 %v10889_v19  ;;  %8598 = vmatpush3.msra.mxu1 %v6848_v56  ;;  %v2992_v56 = vrot.slane %v11449_v10, 1 }
 0x230   : > { %8779 = vmatprep.mubr.f32.mxu0 %v11463_v27  ;;  %8848 = vmatpush3.msra.mxu0 %v6928_v17  ;;  %v11479_v17 = vsel %vm1159_vm0, %v2196_v60, %v2198_v6  ;;  %v13953_v60 = vrot.slane %v11471_v14, 1 }
 0x231   : > { %8599 = vmatprep.subr.mxu1 %v6847_v23  ;;  %8849 = vmatprep.subr.mxu0 %v6927_v40 }
 0x232   : > { %8600 = vmatpush3.msra.mxu1 %v6847_v23  ;;  %8850 = vmatpush3.msra.mxu0 %v6927_v40  ;;  %v11490_v23 = vsel %vm1159_vm0, %v2198_v6, %v2992_v56  ;;  %v6844_v40 = vld [vmem:[%s13940_s3 + $0x428] sm:$0xff]  ;;  %v11506_v6 = vsel %vm1159_vm0, %v2992_v56, %v13953_v60  ;;  %v6842_v56 = vld [vmem:[%s13940_s3 + $0x418] sm:$0xff] }
 0x233   : > { %8530 = vmatmul.mubr.f32.gmra.mxu1 %v10909_v34  ;;  %8601 = vmatprep.subr.mxu1 %v6846_v54  ;;  %13992 = vst [vmem:[#allocation16_spill] sm:$0xff] %v11506_v6  ;;  %v6922_v60 = vld [vmem:[%s13940_s3 + $0x698] sm:$0xff] }
 0x234   : > { %8780 = vmatmul.mubr.f32.gmra.mxu0 %v11479_v17  ;;  %8851 = vmatprep.subr.mxu0 %v6926_v25 }
 0x235   : > { %8532 = vmatprep.mubr.f32.mxu1 %v11463_v27  ;;  %8602 = vmatpush3.msra.mxu1 %v6846_v54  ;;  %v6924_v54 = vld [vmem:[%s13940_s3 + $0x6a8] sm:$0xff] }
 0x236   : > { %8782 = vmatprep.mubr.f32.mxu0 %v11490_v23  ;;  %8852 = vmatpush3.msra.mxu0 %v6926_v25  ;;  %v6843_v25 = vld [vmem:[%s13940_s3 + $0x420] sm:$0xff] }
 0x237   : > { %8603 = vmatprep.subr.mxu1 %v6845_v37  ;;  %8853 = vmatprep.subr.mxu0 %v6925_v18 }
 0x238   : > { %8604 = vmatpush3.msra.mxu1 %v6845_v37  ;;  %8854 = vmatpush3.msra.mxu0 %v6925_v18  ;;  %v6923_v37 = vld [vmem:[%s13940_s3 + $0x6a0] sm:$0xff]  ;;  %v11515_v18 = vpop.f32.mrf.mxu1 }
 0x239   : > { %8533 = vmatmul.mubr.f32.gmra.mxu1 %v11479_v17  ;;  %8605 = vmatprep.subr.mxu1 %v6844_v40  ;;  %13993 = vst [vmem:[#allocation17_spill] sm:$0xff] %v11515_v18  ;;  %v6839_v18 = vld [vmem:[%s13940_s3 + $0x400] sm:$0xff] }
 0x23a   : > { %8783 = vmatmul.mubr.f32.gmra.mxu0 %v11506_v6  ;;  %8855 = vmatprep.subr.mxu0 %v6924_v54  ;;  %v11525_v6 = vpop.f32.mrf.mxu1 }
 0x23b   : > { %8606 = vmatpush3.msra.mxu1 %v6844_v40  ;;  %8617 = vmatprep.mubr.f32.mxu1 %v10706_v61  ;;  %v6841_v61 = vld [vmem:[%s13940_s3 + $0x410] sm:$0xff] }
 0x23c   : > { %8856 = vmatpush3.msra.mxu0 %v6924_v54  ;;  %8867 = vmatprep.mubr.f32.mxu0 %v10760_v49  ;;  %v6921_v40 = vld [vmem:[%s13940_s3 + $0x690] sm:$0xff]  ;;  %v6840_v54 = vld [vmem:[%s13940_s3 + $0x408] sm:$0xff] }
 0x23d   : > { %8607 = vmatprep.subr.mxu1 %v6843_v25  ;;  %8857 = vmatprep.subr.mxu0 %v6923_v37 }
 0x23e   : > { %8608 = vmatpush3.msra.mxu1 %v6843_v25  ;;  %8858 = vmatpush3.msra.mxu0 %v6923_v37  ;;  %v6920_v25 = vld [vmem:[%s13940_s3 + $0x688] sm:$0xff]  ;;  %v11539_v37 = vpop.f32.mrf.mxu1 }
 0x23f   : > { %8609 = vmatprep.subr.mxu1 %v6842_v56  ;;  %8859 = vmatprep.subr.mxu0 %v6922_v60  ;;  %13994 = vst [vmem:[#allocation18_spill] sm:$0xff] %v11539_v37  ;;  %v6886_v37 = vld [vmem:[%s13940_s3 + $0x578] sm:$0xff] }
 0x240   : > { %8610 = vmatpush3.msra.mxu1 %v6842_v56  ;;  %8860 = vmatpush3.msra.mxu0 %v6922_v60  ;;  %v6919_v60 = vld [vmem:[%s13940_s3 + $0x680] sm:$0xff]  ;;  %v11547_v56 = vpop.f32.mrf.mxu1 }
 0x241   : > { %8611 = vmatprep.subr.mxu1 %v6841_v61  ;;  %8861 = vmatprep.subr.mxu0 %v6921_v40 }
 0x242   : > { %8612 = vmatpush3.msra.mxu1 %v6841_v61  ;;  %8862 = vmatpush3.msra.mxu0 %v6921_v40  ;;  %v6966_v61 = vld [vmem:[%s13940_s3 + $0x7f8] sm:$0xff]  ;;  %v11555_v40 = vpop.f32.mrf.mxu1 }
 0x243   : > { %8613 = vmatprep.subr.mxu1 %v6840_v54  ;;  %8863 = vmatprep.subr.mxu0 %v6920_v25  ;;  %13995 = vst [vmem:[#allocation19_spill] sm:$0xff] %v11555_v40  ;;  %v2516_v40 = vrot.slane %v11026_v9, 3 }
 0x244   : > { %8614 = vmatpush3.msra.mxu1 %v6840_v54  ;;  %8864 = vmatpush3.msra.mxu0 %v6920_v25  ;;  %v6885_v54 = vld [vmem:[%s13940_s3 + $0x570] sm:$0xff]  ;;  %v11565_v20 = vpop.f32.mrf.mxu1 }
 0x245   : > { %8615 = vmatprep.subr.mxu1 %v6839_v18  ;;  %8865 = vmatprep.subr.mxu0 %v6919_v60  ;;  %v6965_v25 = vld [vmem:[%s13940_s3 + $0x7f0] sm:$0xff] }
 0x246   : > { %8616 = vmatpush3.msra.mxu1 %v6839_v18  ;;  %8866 = vmatpush3.msra.mxu0 %v6919_v60  ;;  %v6964_v18 = vld [vmem:[%s13940_s3 + $0x7e8] sm:$0xff]  ;;  %v11575_v60 = vpop.f32.mrf.mxu1 }
 0x247   : > { %8618 = vmatmul.mubr.f32.vlgmr.msra.gmra.mxu1 %v10735_v31  ;;  %8685 = vmatprep.subr.mxu1 %v6886_v37  ;;  %v6884_v31 = vld [vmem:[%s13940_s3 + $0x568] sm:$0xff]  ;;  %13996 = vst [vmem:[#allocation20_spill] sm:$0xff] %v11575_v60 }
 0x248   : > { %8868 = vmatmul.mubr.f32.vlgmr.msra.gmra.mxu0 %v10779_v7  ;;  %8935 = vmatprep.subr.mxu0 %v6966_v61 }
 0x249   : > { %8620 = vmatprep.mubr.f32.mxu1 %v10760_v49  ;;  %8686 = vmatpush3.msra.mxu1 %v6886_v37  ;;  %v6883_v49 = vld [vmem:[%s13940_s3 + $0x560] sm:$0xff] }
 0x24a   : > { %8870 = vmatprep.mubr.f32.mxu0 %v10804_v29  ;;  %8936 = vmatpush3.msra.mxu0 %v6966_v61  ;;  %v6963_v37 = vld [vmem:[%s13940_s3 + $0x7e0] sm:$0xff] }
 0x24b   : > { %8687 = vmatprep.subr.mxu1 %v6885_v54  ;;  %8937 = vmatprep.subr.mxu0 %v6965_v25 }
 0x24c   : > { %8688 = vmatpush3.msra.mxu1 %v6885_v54  ;;  %8938 = vmatpush3.msra.mxu0 %v6965_v25  ;;  %v11585_v61 = vpop.f32.mrf.mxu1  ;;  %v6962_v54 = vld [vmem:[%s13940_s3 + $0x7d8] sm:$0xff] }
 0x24d   : > { %8621 = vmatmul.mubr.f32.gmra.mxu1 %v10779_v7  ;;  %8689 = vmatprep.subr.mxu1 %v6884_v31  ;;  %v6882_v7 = vld [vmem:[%s13940_s3 + $0x558] sm:$0xff] }
 0x24e   : > { %8871 = vmatmul.mubr.f32.gmra.mxu0 %v10823_v50  ;;  %8939 = vmatprep.subr.mxu0 %v6964_v18  ;;  %v11595_v25 = vpop.f32.mrf.mxu1 }
 0x24f   : > { %8623 = vmatprep.mubr.f32.mxu1 %v10804_v29  ;;  %8690 = vmatpush3.msra.mxu1 %v6884_v31  ;;  %13997 = vst [vmem:[#allocation21_spill] sm:$0xff] %v11595_v25  ;;  %v6881_v31 = vld [vmem:[%s13940_s3 + $0x550] sm:$0xff]  ;;  %v6960_v25 = vld [vmem:[%s13940_s3 + $0x7c8] sm:$0xff] }
 0x250   : > { %8873 = vmatprep.mubr.f32.mxu0 %v10848_v28  ;;  %8940 = vmatpush3.msra.mxu0 %v6964_v18  ;;  %v6961_v18 = vld [vmem:[%s13940_s3 + $0x7d0] sm:$0xff] }
 0x251   : > { %8691 = vmatprep.subr.mxu1 %v6883_v49  ;;  %8941 = vmatprep.subr.mxu0 %v6963_v37 }
 0x252   : > { %8692 = vmatpush3.msra.mxu1 %v6883_v49  ;;  %8942 = vmatpush3.msra.mxu0 %v6963_v37  ;;  %v6880_v49 = vld [vmem:[%s13940_s3 + $0x548] sm:$0xff] }
 0x253   : > { %8624 = vmatmul.mubr.f32.gmra.mxu1 %v10823_v50  ;;  %8693 = vmatprep.subr.mxu1 %v6882_v7  ;;  %v6959_v50 = vld [vmem:[%s13940_s3 + $0x7c0] sm:$0xff] }
 0x254   : > { %8874 = vmatmul.mubr.f32.gmra.mxu0 %v10867_v38  ;;  %8943 = vmatprep.subr.mxu0 %v6962_v54  ;;  %v11605_v60 = vpop.f32.mrf.mxu1 }
 0x255   : > { %8626 = vmatprep.mubr.f32.mxu1 %v10848_v28  ;;  %8694 = vmatpush3.msra.mxu1 %v6882_v7 }
 0x256   : > { %8876 = vmatprep.mubr.f32.mxu0 %v10892_v46  ;;  %8944 = vmatpush3.msra.mxu0 %v6962_v54  ;;  %v11612_v37 = vpop.f32.mrf.mxu1 }
 0x257   : > { %13998 = vst [vmem:[#allocation22_spill] sm:$0xff] %v11612_v37  ;;  %8695 = vmatprep.subr.mxu1 %v6881_v31  ;;  %8945 = vmatprep.subr.mxu0 %v6961_v18  ;;  %v6879_v37 = vld [vmem:[%s13940_s3 + $0x540] sm:$0xff] }
 0x258   : > { %8696 = vmatpush3.msra.mxu1 %v6881_v31  ;;  %8946 = vmatpush3.msra.mxu0 %v6961_v18  ;;  %v8269_v7 = vpop.f32.mrf.mxu1  ;;  %v14000_v18 = vrot.slane %v10886_v63, 3 }
 0x259   : > { %8627 = vmatmul.mubr.f32.gmra.mxu1 %v10867_v38  ;;  %8697 = vmatprep.subr.mxu1 %v6880_v49  ;;  %v11620_v54 = vadd.f32 %v8269_v7, %v11497_v21  ;;  %v2518_v7 = vrot.slane %v11161_v1, 3  ;;  %v6878_v38 = vld [vmem:[%s13940_s3 + $0x538] sm:$0xff] }
 0x25a   : > { %8877 = vmatmul.mubr.f32.gmra.mxu0 %v10914_v32  ;;  %8947 = vmatprep.subr.mxu0 %v6960_v25  ;;  %v11629_v31 = vpop.f32.mrf.mxu1  ;;  %v11635_v21 = vsel %vm1656_vm1, %v14000_v18, %v2516_v40  ;;  %v11646_v18 = vpop.f32.mrf.mxu0 }
 0x25b   : > { %13999 = vst [vmem:[#allocation23_spill] sm:$0xff] %v11629_v31  ;;  %8629 = vmatprep.mubr.f32.mxu1 %v10892_v46  ;;  %8698 = vmatpush3.msra.mxu1 %v6880_v49  ;;  %v6958_v49 = vld [vmem:[%s13940_s3 + $0x7b8] sm:$0xff]  ;;  %v3312_v31 = vrot.slane %v11449_v10, 3 }
 0x25c   : > { %8879 = vmatprep.mubr.f32.mxu0 %v11635_v21  ;;  %8948 = vmatpush3.msra.mxu0 %v6960_v25  ;;  %v11650_v25 = vsel %vm1656_vm1, %v2516_v40, %v2518_v7 }
 0x25d   : > { %8699 = vmatprep.subr.mxu1 %v6879_v37  ;;  %8949 = vmatprep.subr.mxu0 %v6959_v50  ;;  %v11666_v40 = vsel %vm1656_vm1, %v2518_v7, %v3312_v31 }
 0x25e   : > { %8700 = vmatpush3.msra.mxu1 %v6879_v37  ;;  %8950 = vmatpush3.msra.mxu0 %v6959_v50  ;;  %v8272_v46 = vpop.f32.mrf.mxu1  ;;  %v6877_v37 = vld [vmem:[%s13940_s3 + $0x530] sm:$0xff]  ;;  %14002 = vst [vmem:[#allocation25_spill] sm:$0xff] %v11666_v40 }
 0x25f   : > { %8630 = vmatmul.mubr.f32.gmra.mxu1 %v10914_v32  ;;  %8701 = vmatprep.subr.mxu1 %v6878_v38  ;;  %v11653_v28 = vadd.f32 %v8272_v46, %v11525_v6  ;;  %v6957_v50 = vld [vmem:[%s13940_s3 + $0x7b0] sm:$0xff]  ;;  %v6876_v6 = vld [vmem:[%s13940_s3 + $0x528] sm:$0xff]  ;;  %v11673_v32 = vpop.f32.mrf.mxu0 }
 0x260   : > { %8880 = vmatmul.mubr.f32.gmra.mxu0 %v11650_v25  ;;  %8951 = vmatprep.subr.mxu0 %v6958_v49  ;;  %v11662_v29 = vpop.f32.mrf.mxu1  ;;  %14003 = vst [vmem:[#allocation26_spill] sm:$0xff] %v11673_v32 }
 0x261   : > { %14001 = vst [vmem:[#allocation24_spill] sm:$0xff] %v11662_v29  ;;  %8632 = vmatprep.mubr.f32.mxu1 %v11635_v21  ;;  %8702 = vmatpush3.msra.mxu1 %v6878_v38  ;;  %v6956_v38 = vld [vmem:[%s13940_s3 + $0x7a8] sm:$0xff]  ;;  %v11678_v7 = vpop.f32.mrf.mxu0 }
 0x262   : > { %8882 = vmatprep.mubr.f32.mxu0 %v11666_v40  ;;  %8952 = vmatpush3.msra.mxu0 %v6958_v49  ;;  %v14004_v49 = vrot.slane %v11471_v14, 3 }
 0x263   : > { %8703 = vmatprep.subr.mxu1 %v6877_v37  ;;  %8953 = vmatprep.subr.mxu0 %v6957_v50 }
 0x264   : > { %8704 = vmatpush3.msra.mxu1 %v6877_v37  ;;  %8954 = vmatpush3.msra.mxu0 %v6957_v50  ;;  %v8275_v46 = vpop.f32.mrf.mxu1  ;;  %v11684_v29 = vsel %vm1656_vm1, %v3312_v31, %v14004_v49  ;;  %v6875_v37 = vld [vmem:[%s13940_s3 + $0x520] sm:$0xff]  ;;  %v6954_v31 = vld [vmem:[%s13940_s3 + $0x798] sm:$0xff] }
 0x265   : > { %8633 = vmatmul.mubr.f32.gmra.mxu1 %v11650_v25  ;;  %8705 = vmatprep.subr.mxu1 %v6876_v6  ;;  %14005 = vst [vmem:[#allocation27_spill] sm:$0xff] %v11684_v29  ;;  %v11687_v32 = vadd.f32 %v8275_v46, %v11547_v56  ;;  %v6955_v50 = vld [vmem:[%s13940_s3 + $0x7a0] sm:$0xff]  ;;  %v6874_v56 = vld [vmem:[%s13940_s3 + $0x518] sm:$0xff]  ;;  %v11706_v46 = vpop.f32.mrf.mxu0 }
 0x266   : > { %8883 = vmatmul.mubr.f32.gmra.mxu0 %v11684_v29  ;;  %8955 = vmatprep.subr.mxu0 %v6956_v38  ;;  %v11696_v40 = vpop.f32.mrf.mxu1  ;;  %14007 = vst [vmem:[#allocation29_spill] sm:$0xff] %v11706_v46 }
 0x267   : > { %14006 = vst [vmem:[#allocation28_spill] sm:$0xff] %v11696_v40  ;;  %8706 = vmatpush3.msra.mxu1 %v6876_v6  ;;  %8717 = vmatprep.mubr.f32.mxu1 %v10700_v15  ;;  %v6873_v15 = vld [vmem:[%s13940_s3 + $0x510] sm:$0xff] }
 0x268   : > { %8956 = vmatpush3.msra.mxu0 %v6956_v38  ;;  %8967 = vmatprep.mubr.f32.mxu0 %v10754_v47  ;;  %v6953_v6 = vld [vmem:[%s13940_s3 + $0x790] sm:$0xff]  ;;  %v11714_v38 = vpop.f32.mrf.mxu0 }
 0x269   : > { %8707 = vmatprep.subr.mxu1 %v6875_v37  ;;  %8957 = vmatprep.subr.mxu0 %v6955_v50 }
 0x26a   : > { %8708 = vmatpush3.msra.mxu1 %v6875_v37  ;;  %8958 = vmatpush3.msra.mxu0 %v6955_v50  ;;  %v8278_v49 = vpop.f32.mrf.mxu1  ;;  %v6872_v37 = vld [vmem:[%s13940_s3 + $0x508] sm:$0xff] }
 0x26b   : > { %8709 = vmatprep.subr.mxu1 %v6874_v56  ;;  %8959 = vmatprep.subr.mxu0 %v6954_v31  ;;  %v11717_v40 = vadd.f32 %v8278_v49, %v11565_v20  ;;  %v6952_v50 = vld [vmem:[%s13940_s3 + $0x788] sm:$0xff]  ;;  %v6871_v20 = vld [vmem:[%s13940_s3 + $0x500] sm:$0xff]  ;;  %v6918_v49 = vld [vmem:[%s13940_s3 + $0x678] sm:$0xff] }
 0x26c   : > { %8710 = vmatpush3.msra.mxu1 %v6874_v56  ;;  %8960 = vmatpush3.msra.mxu0 %v6954_v31  ;;  %v11725_v46 = vpop.f32.mrf.mxu1  ;;  %v6951_v56 = vld [vmem:[%s13940_s3 + $0x780] sm:$0xff]  ;;  %v11733_v31 = vpop.f32.mrf.mxu0 }
 0x26d   : > { %14008 = vst [vmem:[#allocation30_spill] sm:$0xff] %v11725_v46  ;;  %8711 = vmatprep.subr.mxu1 %v6873_v15  ;;  %8961 = vmatprep.subr.mxu0 %v6953_v6  ;;  %14009 = vst [vmem:[#allocation31_spill] sm:$0xff] %v11733_v31  ;;  %v6998_v46 = vld [vmem:[%s13940_s3 + $0x8f8] sm:$0xff]  ;;  %v6997_v31 = vld [vmem:[%s13940_s3 + $0x8f0] sm:$0xff] }
 0x26e   : > { %8712 = vmatpush3.msra.mxu1 %v6873_v15  ;;  %8962 = vmatpush3.msra.mxu0 %v6953_v6  ;;  %v11738_v15 = vpop.f32.mrf.mxu0 }
 0x26f   : > { %8713 = vmatprep.subr.mxu1 %v6872_v37  ;;  %8963 = vmatprep.subr.mxu0 %v6952_v50 }
 0x270   : > { %8714 = vmatpush3.msra.mxu1 %v6872_v37  ;;  %8964 = vmatpush3.msra.mxu0 %v6952_v50  ;;  %v8281_v6 = vpop.f32.mrf.mxu1  ;;  %v6917_v50 = vld [vmem:[%s13940_s3 + $0x670] sm:$0xff] }
 0x271   : > { %8715 = vmatprep.subr.mxu1 %v6871_v20  ;;  %8965 = vmatprep.subr.mxu0 %v6951_v56  ;;  %v11744_v29 = vadd.f32 %v8281_v6, %v11585_v61  ;;  %v11756_v61 = vpop.f32.mrf.mxu0  ;;  %v6996_v6 = vld [vmem:[%s13940_s3 + $0x8e8] sm:$0xff] }
 0x272   : > { %8716 = vmatpush3.msra.mxu1 %v6871_v20  ;;  %8966 = vmatpush3.msra.mxu0 %v6951_v56  ;;  %v11746_v37 = vpop.f32.mrf.mxu1  ;;  %14011 = vst [vmem:[#allocation33_spill] sm:$0xff] %v11756_v61 }
 0x273   : > { %14010 = vst [vmem:[#allocation32_spill] sm:$0xff] %v11746_v37  ;;  %8718 = vmatmul.mubr.f32.vlgmr.msra.gmra.mxu1 %v10729_v30  ;;  %8785 = vmatprep.subr.mxu1 %v6918_v49  ;;  %v6916_v30 = vld [vmem:[%s13940_s3 + $0x668] sm:$0xff]  ;;  %v11763_v20 = vpop.f32.mrf.mxu0 }
 0x274   : > { %8968 = vmatmul.mubr.f32.vlgmr.msra.gmra.mxu0 %v10773_v3  ;;  %9035 = vmatprep.subr.mxu0 %v6998_v46 }
 0x275   : > { %8720 = vmatprep.mubr.f32.mxu1 %v10754_v47  ;;  %8786 = vmatpush3.msra.mxu1 %v6918_v49  ;;  %v6915_v47 = vld [vmem:[%s13940_s3 + $0x660] sm:$0xff]  ;;  %v11779_v49 = vpop.f32.mrf.mxu0 }
 0x276   : > { %8970 = vmatprep.mubr.f32.mxu0 %v10798_v4  ;;  %9036 = vmatpush3.msra.mxu0 %v6998_v46  ;;  %v8284_v56 = vpop.f32.mrf.mxu1  ;;  %v6995_v46 = vld [vmem:[%s13940_s3 + $0x8e0] sm:$0xff]  ;;  %14012 = vst [vmem:[#allocation34_spill] sm:$0xff] %v11779_v49 }
 0x277   : > { %8787 = vmatprep.subr.mxu1 %v6917_v50  ;;  %9037 = vmatprep.subr.mxu0 %v6997_v31  ;;  %v11769_v61 = vadd.f32 %v8284_v56, %v11605_v60  ;;  %v11786_v60 = vpop.f32.mrf.mxu0 }
 0x278   : > { %8788 = vmatpush3.msra.mxu1 %v6917_v50  ;;  %9038 = vmatpush3.msra.mxu0 %v6997_v31  ;;  %v6994_v31 = vld [vmem:[%s13940_s3 + $0x8d8] sm:$0xff]  ;;  %v6913_v50 = vld [vmem:[%s13940_s3 + $0x650] sm:$0xff] }
 0x279   : > { %8721 = vmatmul.mubr.f32.gmra.mxu1 %v10773_v3  ;;  %8789 = vmatprep.subr.mxu1 %v6916_v30  ;;  %v6914_v3 = vld [vmem:[%s13940_s3 + $0x658] sm:$0xff]  ;;  %v11799_v56 = vpop.f32.mrf.mxu0 }
 0x27a   : > { %8971 = vmatmul.mubr.f32.gmra.mxu0 %v10817_v44  ;;  %9039 = vmatprep.subr.mxu0 %v6996_v6  ;;  %14013 = vst [vmem:[#allocation35_spill] sm:$0xff] %v11799_v56 }
 0x27b   : > { %8723 = vmatprep.mubr.f32.mxu1 %v10798_v4  ;;  %8790 = vmatpush3.msra.mxu1 %v6916_v30  ;;  %v6993_v30 = vld [vmem:[%s13940_s3 + $0x8d0] sm:$0xff]  ;;  %v11811_v56 = vpop.f32.mrf.mxu0 }
 0x27c   : > { %8973 = vmatprep.mubr.f32.mxu0 %v10842_v13  ;;  %9040 = vmatpush3.msra.mxu0 %v6996_v6  ;;  %v11802_v6 = vpop.f32.mrf.mxu1 }
 0x27d   : > { %8791 = vmatprep.subr.mxu1 %v6915_v47  ;;  %9041 = vmatprep.subr.mxu0 %v6995_v46  ;;  %14014 = vst [vmem:[#allocation36_spill] sm:$0xff] %v11802_v6  ;;  %v6911_v6 = vld [vmem:[%s13940_s3 + $0x640] sm:$0xff] }
 0x27e   : > { %8792 = vmatpush3.msra.mxu1 %v6915_v47  ;;  %9042 = vmatpush3.msra.mxu0 %v6995_v46  ;;  %v6912_v47 = vld [vmem:[%s13940_s3 + $0x648] sm:$0xff] }
 0x27f   : > { %8724 = vmatmul.mubr.f32.gmra.mxu1 %v10817_v44  ;;  %8793 = vmatprep.subr.mxu1 %v6914_v3  ;;  %v6992_v46 = vld [vmem:[%s13940_s3 + $0x8c8] sm:$0xff] }
 0x280   : > { %8974 = vmatmul.mubr.f32.gmra.mxu0 %v10861_v35  ;;  %9043 = vmatprep.subr.mxu0 %v6994_v31 }
 0x281   : > { %8726 = vmatprep.mubr.f32.mxu1 %v10842_v13  ;;  %8794 = vmatpush3.msra.mxu1 %v6914_v3 }
 0x282   : > { %8976 = vmatprep.mubr.f32.mxu0 %v10886_v63  ;;  %9044 = vmatpush3.msra.mxu0 %v6994_v31 }
 0x283   : > { %8795 = vmatprep.subr.mxu1 %v6913_v50  ;;  %9045 = vmatprep.subr.mxu0 %v6993_v30  ;;  %v8319_v49 = vpop.f32.mrf.mxu1 }
 0x284   : > { %8796 = vmatpush3.msra.mxu1 %v6913_v50  ;;  %9046 = vmatpush3.msra.mxu0 %v6993_v30  ;;  %v11814_v3 = vadd.f32 %v8319_v49, %v11620_v54  ;;  %v6991_v50 = vld [vmem:[%s13940_s3 + $0x8c0] sm:$0xff]  ;;  %v6910_v54 = vld [vmem:[%s13940_s3 + $0x638] sm:$0xff]  ;;  %v11831_v49 = vpop.f32.mrf.mxu0 }
 0x285   : > { %8727 = vmatmul.mubr.f32.gmra.mxu1 %v10861_v35  ;;  %8797 = vmatprep.subr.mxu1 %v6912_v47  ;;  %v11817_v31 = vpop.f32.mrf.mxu1  ;;  %14016 = vst [vmem:[#allocation38_spill] sm:$0xff] %v11831_v49  ;;  %v6990_v30 = vld [vmem:[%s13940_s3 + $0x8b8] sm:$0xff]  ;;  %v6909_v49 = vld [vmem:[%s13940_s3 + $0x630] sm:$0xff] }
 0x286   : > { %14015 = vst [vmem:[#allocation37_spill] sm:$0xff] %v11817_v31  ;;  %8977 = vmatmul.mubr.f32.gmra.mxu0 %v11026_v9  ;;  %9047 = vmatprep.subr.mxu0 %v6992_v46  ;;  %v11860_v31 = vmax.f32 %v10968_v16, 0.0  ;;  %v6907_v16 = vld [vmem:[%s13940_s3 + $0x620] sm:$0xff] }
 0x287   : > { %8729 = vmatprep.mubr.f32.mxu1 %v10886_v63  ;;  %8798 = vmatpush3.msra.mxu1 %v6912_v47 }
 0x288   : > { %8979 = vmatprep.mubr.f32.mxu0 %v11161_v1  ;;  %9048 = vmatpush3.msra.mxu0 %v6992_v46 }
 0x289   : > { %8799 = vmatprep.subr.mxu1 %v6911_v6  ;;  %9049 = vmatprep.subr.mxu0 %v6991_v50  ;;  %v8322_v37 = vpop.f32.mrf.mxu1 }
 0x28a   : > { %8800 = vmatpush3.msra.mxu1 %v6911_v6  ;;  %9050 = vmatpush3.msra.mxu0 %v6991_v50  ;;  %v11837_v47 = vadd.f32 %v8322_v37, %v11653_v28  ;;  %v6989_v6 = vld [vmem:[%s13940_s3 + $0x8b0] sm:$0xff]  ;;  %v11849_v50 = vpop.f32.mrf.mxu0  ;;  %v6908_v28 = vld [vmem:[%s13940_s3 + $0x628] sm:$0xff] }
 0x28b   : > { %8730 = vmatmul.mubr.f32.gmra.mxu1 %v11026_v9  ;;  %8801 = vmatprep.subr.mxu1 %v6910_v54  ;;  %v11840_v46 = vpop.f32.mrf.mxu1  ;;  %v6988_v37 = vld [vmem:[%s13940_s3 + $0x8a8] sm:$0xff] }
 0x28c   : > { %14017 = vst [vmem:[#allocation39_spill] sm:$0xff] %v11840_v46  ;;  %8980 = vmatmul.mubr.f32.gmra.mxu0 %v11449_v10  ;;  %9051 = vmatprep.subr.mxu0 %v6990_v30 }
 0x28d   : > { %8732 = vmatprep.mubr.f32.mxu1 %v11161_v1  ;;  %8802 = vmatpush3.msra.mxu1 %v6910_v54  ;;  %v11862_v54 = vpop.f32.mrf.mxu0 }
 0x28e   : > { %8982 = vmatprep.mubr.f32.mxu0 %v11471_v14  ;;  %9052 = vmatpush3.msra.mxu0 %v6990_v30  ;;  %14018 = vst [vmem:[#allocation40_spill] sm:$0xff] %v11862_v54 }
 0x28f   : > { %8803 = vmatprep.subr.mxu1 %v6909_v49  ;;  %9053 = vmatprep.subr.mxu0 %v6989_v6  ;;  %v8325_v46 = vpop.f32.mrf.mxu1 }
 0x290   : > { %8804 = vmatpush3.msra.mxu1 %v6909_v49  ;;  %9054 = vmatpush3.msra.mxu0 %v6989_v6  ;;  %v11865_v30 = vadd.f32 %v8325_v46, %v11687_v32  ;;  %v6987_v49 = vld [vmem:[%s13940_s3 + $0x8a0] sm:$0xff]  ;;  %v6906_v32 = vld [vmem:[%s13940_s3 + $0x618] sm:$0xff]  ;;  %v11885_v6 = vpop.f32.mrf.mxu0 }
 0x291   : > { %8733 = vmatmul.mubr.f32.gmra.mxu1 %v11449_v10  ;;  %8805 = vmatprep.subr.mxu1 %v6908_v28  ;;  %v11868_v9 = vpop.f32.mrf.mxu1  ;;  %v6986_v46 = vld [vmem:[%s13940_s3 + $0x898] sm:$0xff] }
 0x292   : > { %14019 = vst [vmem:[#allocation41_spill] sm:$0xff] %v11868_v9  ;;  %8983 = vmatmul.mubr.f32.gmra.mxu0 %v11860_v31  ;;  %9055 = vmatprep.subr.mxu0 %v6988_v37  ;;  %v11904_v63 = vpop.f32.mrf.mxu0 }
 0x293   : > { %8806 = vmatpush3.msra.mxu1 %v6908_v28  ;;  %8817 = vmatprep.mubr.f32.mxu1 %v11082_v59  ;;  %v6905_v59 = vld [vmem:[%s13940_s3 + $0x610] sm:$0xff]  ;;  %14021 = vst [vmem:[#allocation43_spill] sm:$0xff] %v11904_v63 }
 0x294   : > { %9056 = vmatpush3.msra.mxu0 %v6988_v37  ;;  %9067 = vmatprep.mubr.f32.mxu0 %v11105_v42  ;;  %v6985_v28 = vld [vmem:[%s13940_s3 + $0x890] sm:$0xff]  ;;  %v11915_v63 = vpop.f32.mrf.mxu0 }
 0x295   : > { %8807 = vmatprep.subr.mxu1 %v6907_v16  ;;  %9057 = vmatprep.subr.mxu0 %v6987_v49  ;;  %v8328_v54 = vpop.f32.mrf.mxu1 }
 0x296   : > { %8808 = vmatpush3.msra.mxu1 %v6907_v16  ;;  %9058 = vmatpush3.msra.mxu0 %v6987_v49  ;;  %v11894_v37 = vadd.f32 %v8328_v54, %v11717_v40  ;;  %v6904_v16 = vld [vmem:[%s13940_s3 + $0x608] sm:$0xff]  ;;  %v6903_v40 = vld [vmem:[%s13940_s3 + $0x600] sm:$0xff] }
 0x297   : > { %8809 = vmatprep.subr.mxu1 %v6906_v32  ;;  %9059 = vmatprep.subr.mxu0 %v6986_v46  ;;  %v11896_v9 = vpop.f32.mrf.mxu1  ;;  %v6984_v49 = vld [vmem:[%s13940_s3 + $0x888] sm:$0xff]  ;;  %v6983_v54 = vld [vmem:[%s13940_s3 + $0x880] sm:$0xff] }
 0x298   : > { %14020 = vst [vmem:[#allocation42_spill] sm:$0xff] %v11896_v9  ;;  %8810 = vmatpush3.msra.mxu1 %v6906_v32  ;;  %9060 = vmatpush3.msra.mxu0 %v6986_v46  ;;  %v6950_v46 = vld [vmem:[%s13940_s3 + $0x778] sm:$0xff] }
 0x299   : > { %8811 = vmatprep.subr.mxu1 %v6905_v59  ;;  %9061 = vmatprep.subr.mxu0 %v6985_v28 }
 0x29a   : > { %8812 = vmatpush3.msra.mxu1 %v6905_v59  ;;  %9062 = vmatpush3.msra.mxu0 %v6985_v28  ;;  %v7030_v28 = vld [vmem:[%s13940_s3 + $0x9f8] sm:$0xff] }
 0x29b   : > { %8813 = vmatprep.subr.mxu1 %v6904_v16  ;;  %9063 = vmatprep.subr.mxu0 %v6984_v49  ;;  %v8331_v32 = vpop.f32.mrf.mxu1 }
 0x29c   : > { %8814 = vmatpush3.msra.mxu1 %v6904_v16  ;;  %9064 = vmatpush3.msra.mxu0 %v6984_v49  ;;  %v11918_v59 = vadd.f32 %v8331_v32, %v11744_v29  ;;  %v6949_v29 = vld [vmem:[%s13940_s3 + $0x770] sm:$0xff]  ;;  %v11933_v49 = vpop.f32.mrf.mxu0  ;;  %v7028_v32 = vld [vmem:[%s13940_s3 + $0x9e8] sm:$0xff] }
 0x29d   : > { %8815 = vmatprep.subr.mxu1 %v6903_v40  ;;  %9065 = vmatprep.subr.mxu0 %v6983_v54  ;;  %v11923_v9 = vpop.f32.mrf.mxu1  ;;  %v7029_v16 = vld [vmem:[%s13940_s3 + $0x9f0] sm:$0xff]  ;;  %14023 = vst [vmem:[#allocation45_spill] sm:$0xff] %v11933_v49 }
 0x29e   : > { %14022 = vst [vmem:[#allocation44_spill] sm:$0xff] %v11923_v9  ;;  %8816 = vmatpush3.msra.mxu1 %v6903_v40  ;;  %9066 = vmatpush3.msra.mxu0 %v6983_v54 }
 0x29f   : > { %8818 = vmatmul.mubr.f32.vlgmr.msra.gmra.mxu1 %v11094_v57  ;;  %8885 = vmatprep.subr.mxu1 %v6950_v46  ;;  %v6948_v57 = vld [vmem:[%s13940_s3 + $0x768] sm:$0xff] }
 0x2a0   : > { %9068 = vmatmul.mubr.f32.vlgmr.msra.gmra.mxu0 %v11118_v48  ;;  %9135 = vmatprep.subr.mxu0 %v7030_v28 }
 0x2a1   : > { %8820 = vmatprep.mubr.f32.mxu1 %v11105_v42  ;;  %8886 = vmatpush3.msra.mxu1 %v6950_v46  ;;  %v8334_v40 = vpop.f32.mrf.mxu1  ;;  %v11946_v42 = vpop.f32.mrf.mxu0  ;;  %v7027_v46 = vld [vmem:[%s13940_s3 + $0x9e0] sm:$0xff] }
 0x2a2   : > { %9070 = vmatprep.mubr.f32.mxu0 %v11129_v39  ;;  %9136 = vmatpush3.msra.mxu0 %v7030_v28  ;;  %v11941_v54 = vadd.f32 %v8334_v40, %v11769_v61  ;;  %v6947_v61 = vld [vmem:[%s13940_s3 + $0x760] sm:$0xff]  ;;  %v7025_v40 = vld [vmem:[%s13940_s3 + $0x9d0] sm:$0xff] }
 0x2a3   : > { %8887 = vmatprep.subr.mxu1 %v6949_v29  ;;  %9137 = vmatprep.subr.mxu0 %v7029_v16  ;;  %v11961_v28 = vpop.f32.mrf.mxu0 }
 0x2a4   : > { %8888 = vmatpush3.msra.mxu1 %v6949_v29  ;;  %9138 = vmatpush3.msra.mxu0 %v7029_v16  ;;  %14024 = vst [vmem:[#allocation46_spill] sm:$0xff] %v11961_v28  ;;  %v7026_v29 = vld [vmem:[%s13940_s3 + $0x9d8] sm:$0xff]  ;;  %v6945_v16 = vld [vmem:[%s13940_s3 + $0x750] sm:$0xff]  ;;  %v7024_v28 = vld [vmem:[%s13940_s3 + $0x9c8] sm:$0xff] }
 0x2a5   : > { %8821 = vmatmul.mubr.f32.gmra.mxu1 %v11118_v48  ;;  %8889 = vmatprep.subr.mxu1 %v6948_v57  ;;  %v6946_v48 = vld [vmem:[%s13940_s3 + $0x758] sm:$0xff] }
 0x2a6   : > { %9071 = vmatmul.mubr.f32.gmra.mxu0 %v11142_v8  ;;  %9139 = vmatprep.subr.mxu0 %v7028_v32 }
 0x2a7   : > { %8823 = vmatprep.mubr.f32.mxu1 %v11129_v39  ;;  %8890 = vmatpush3.msra.mxu1 %v6948_v57  ;;  %v11974_v57 = vpop.f32.mrf.mxu0 }
 0x2a8   : > { %9073 = vmatprep.mubr.f32.mxu0 %v11153_v22  ;;  %9140 = vmatpush3.msra.mxu0 %v7028_v32  ;;  %v11977_v32 = vpop.f32.mrf.mxu1 }
 0x2a9   : > { %8891 = vmatprep.subr.mxu1 %v6947_v61  ;;  %9141 = vmatprep.subr.mxu0 %v7027_v46  ;;  %14025 = vst [vmem:[#allocation47_spill] sm:$0xff] %v11977_v32  ;;  %v11989_v32 = vpop.f32.mrf.mxu0 }
 0x2aa   : > { %8892 = vmatpush3.msra.mxu1 %v6947_v61  ;;  %9142 = vmatpush3.msra.mxu0 %v7027_v46  ;;  %v6944_v61 = vld [vmem:[%s13940_s3 + $0x748] sm:$0xff]  ;;  %v1820_v46 = vadd.f32 %v11646_v18, %v11814_v3  ;;  %14026 = vst [vmem:[#allocation48_spill] sm:$0xff] %v11989_v32  ;;  %v6943_v18 = vld [vmem:[%s13940_s3 + $0x740] sm:$0xff]  ;;  %v6942_v32 = vld [vmem:[%s13940_s3 + $0x738] sm:$0xff] }
 0x2ab   : > { %8824 = vmatmul.mubr.f32.gmra.mxu1 %v11142_v8  ;;  %8893 = vmatprep.subr.mxu1 %v6946_v48  ;;  %v7023_v3 = vld [vmem:[%s13940_s3 + $0x9c0] sm:$0xff] }
 0x2ac   : > { %9074 = vmatmul.mubr.f32.gmra.mxu0 %v11169_v11  ;;  %9143 = vmatprep.subr.mxu0 %v7026_v29 }
 0x2ad   : > { %8826 = vmatprep.mubr.f32.mxu1 %v11153_v22  ;;  %8894 = vmatpush3.msra.mxu1 %v6946_v48  ;;  %v3152_v48 = vrot.slane %v11449_v10, 2 }
 0x2ae   : > { %9076 = vmatprep.mubr.f32.mxu0 %v11180_v51  ;;  %9144 = vmatpush3.msra.mxu0 %v7026_v29 }
 0x2af   : > { %8895 = vmatprep.subr.mxu1 %v6945_v16  ;;  %9145 = vmatprep.subr.mxu0 %v7025_v40  ;;  %v8419_v49 = vpop.f32.mrf.mxu1 }
 0x2b0   : > { %8896 = vmatpush3.msra.mxu1 %v6945_v16  ;;  %9146 = vmatpush3.msra.mxu0 %v7025_v40  ;;  %v11991_v29 = vadd.f32 %v8419_v49, %v1820_v46  ;;  %v12003_v16 = vpop.f32.mrf.mxu0  ;;  %v14028_v49 = vrot.slane %v11161_v1, 2  ;;  %v3154_v46 = vrot.slane %v11471_v14, 2 }
 0x2b1   : > { %8827 = vmatmul.mubr.f32.gmra.mxu1 %v11169_v11  ;;  %8897 = vmatprep.subr.mxu1 %v6944_v61  ;;  %v11994_v9 = vpop.f32.mrf.mxu1 }
 0x2b2   : > { %14027 = vst [vmem:[#allocation49_spill] sm:$0xff] %v11994_v9  ;;  %9077 = vmatmul.mubr.f32.gmra.mxu0 %v11194_v33  ;;  %9147 = vmatprep.subr.mxu0 %v7024_v28  ;;  %v12009_v40 = vsel %vm1464_vm2, %v14028_v49, %v3152_v48  ;;  %v1822_v9 = vadd.f32 %v11678_v7, %v11837_v47  ;;  %v3948_v49 = vrot.slane %v11860_v31, 2  ;;  %v6941_v47 = vld [vmem:[%s13940_s3 + $0x730] sm:$0xff] }
 0x2b3   : > { %8829 = vmatprep.mubr.f32.mxu1 %v11180_v51  ;;  %8898 = vmatpush3.msra.mxu1 %v6944_v61  ;;  %v12019_v51 = vmax.f32 %v10979_v55, 0.0  ;;  %v7022_v61 = vld [vmem:[%s13940_s3 + $0x9b8] sm:$0xff]  ;;  %v12031_v55 = vsel %vm1464_vm2, %v3152_v48, %v3154_v46 }
 0x2b4   : > { %9079 = vmatprep.mubr.f32.mxu0 %v12009_v40  ;;  %9148 = vmatpush3.msra.mxu0 %v7024_v28  ;;  %v12025_v28 = vpop.f32.mrf.mxu0 }
 0x2b5   : > { %8899 = vmatprep.subr.mxu1 %v6943_v18  ;;  %9149 = vmatprep.subr.mxu0 %v7023_v3  ;;  %v8422_v11 = vpop.f32.mrf.mxu1  ;;  %14029 = vst [vmem:[#allocation50_spill] sm:$0xff] %v12025_v28  ;;  %v1824_v28 = vadd.f32 %v11714_v38, %v11865_v30  ;;  %v6939_v30 = vld [vmem:[%s13940_s3 + $0x720] sm:$0xff] }
 0x2b6   : > { %8900 = vmatpush3.msra.mxu1 %v6943_v18  ;;  %9150 = vmatpush3.msra.mxu0 %v7023_v3  ;;  %v12027_v22 = vadd.f32 %v8422_v11, %v1822_v9  ;;  %v7021_v9 = vld [vmem:[%s13940_s3 + $0x9b0] sm:$0xff]  ;;  %v12044_v11 = vsel %vm1464_vm2, %v3154_v46, %v3948_v49  ;;  %v6940_v18 = vld [vmem:[%s13940_s3 + $0x728] sm:$0xff]  ;;  %v12051_v3 = vpop.f32.mrf.mxu0 }
 0x2b7   : > { %8830 = vmatmul.mubr.f32.gmra.mxu1 %v11194_v33  ;;  %8901 = vmatprep.subr.mxu1 %v6942_v32  ;;  %v12033_v7 = vpop.f32.mrf.mxu1 }
 0x2b8   : > { %14030 = vst [vmem:[#allocation51_spill] sm:$0xff] %v12033_v7  ;;  %9080 = vmatmul.mubr.f32.gmra.mxu0 %v12031_v55  ;;  %9151 = vmatprep.subr.mxu0 %v7022_v61 }
 0x2b9   : > { %8832 = vmatprep.mubr.f32.mxu1 %v12009_v40  ;;  %8902 = vmatpush3.msra.mxu1 %v6942_v32  ;;  %v7020_v32 = vld [vmem:[%s13940_s3 + $0x9a8] sm:$0xff] }
 0x2ba   : > { %9082 = vmatprep.mubr.f32.mxu0 %v12044_v11  ;;  %9152 = vmatpush3.msra.mxu0 %v7022_v61  ;;  %v14031_v61 = vrot.slane %v12019_v51, 2 }
 0x2bb   : > { %8903 = vmatprep.subr.mxu1 %v6941_v47  ;;  %9153 = vmatprep.subr.mxu0 %v7021_v9  ;;  %v8425_v46 = vpop.f32.mrf.mxu1 }
 0x2bc   : > { %8904 = vmatpush3.msra.mxu1 %v6941_v47  ;;  %9154 = vmatpush3.msra.mxu0 %v7021_v9  ;;  %v12058_v48 = vadd.f32 %v8425_v46, %v1824_v28  ;;  %v12064_v7 = vsel %vm1464_vm2, %v3948_v49, %v14031_v61  ;;  %v7019_v28 = vld [vmem:[%s13940_s3 + $0x9a0] sm:$0xff]  ;;  %v12075_v47 = vpop.f32.mrf.mxu0  ;;  %v6938_v49 = vld [vmem:[%s13940_s3 + $0x718] sm:$0xff]  ;;  %v1826_v46 = vadd.f32 %v11738_v15, %v11894_v37  ;;  %v6936_v37 = vld [vmem:[%s13940_s3 + $0x708] sm:$0xff] }
 0x2bd   : > { %8833 = vmatmul.mubr.f32.gmra.mxu1 %v12031_v55  ;;  %8905 = vmatprep.subr.mxu1 %v6940_v18  ;;  %v12066_v38 = vpop.f32.mrf.mxu1  ;;  %14033 = vst [vmem:[#allocation53_spill] sm:$0xff] %v12075_v47  ;;  %v7018_v9 = vld [vmem:[%s13940_s3 + $0x998] sm:$0xff] }
 0x2be   : > { %14032 = vst [vmem:[#allocation52_spill] sm:$0xff] %v12066_v38  ;;  %9083 = vmatmul.mubr.f32.gmra.mxu0 %v12064_v7  ;;  %9155 = vmatprep.subr.mxu0 %v7020_v32 }
 0x2bf   : > { %8906 = vmatpush3.msra.mxu1 %v6940_v18  ;;  %8917 = vmatprep.mubr.f32.mxu1 %v11249_v0  ;;  %v6937_v0 = vld [vmem:[%s13940_s3 + $0x710] sm:$0xff] }
 0x2c0   : > { %9156 = vmatpush3.msra.mxu0 %v7020_v32  ;;  %9167 = vmatprep.mubr.f32.mxu0 %v11272_v24  ;;  %v7017_v18 = vld [vmem:[%s13940_s3 + $0x990] sm:$0xff]  ;;  %v12093_v32 = vpop.f32.mrf.mxu0 }
 0x2c1   : > { %8907 = vmatprep.subr.mxu1 %v6939_v30  ;;  %9157 = vmatprep.subr.mxu0 %v7019_v28  ;;  %v8428_v61 = vpop.f32.mrf.mxu1 }
 0x2c2   : > { %8908 = vmatpush3.msra.mxu1 %v6939_v30  ;;  %9158 = vmatpush3.msra.mxu0 %v7019_v28  ;;  %v12095_v47 = vadd.f32 %v8428_v61, %v1826_v46  ;;  %v7016_v30 = vld [vmem:[%s13940_s3 + $0x988] sm:$0xff]  ;;  %v6935_v28 = vld [vmem:[%s13940_s3 + $0x700] sm:$0xff]  ;;  %v1828_v46 = vadd.f32 %v11763_v20, %v11918_v59  ;;  %v6981_v59 = vld [vmem:[%s13940_s3 + $0x870] sm:$0xff] }
 0x2c3   : > { %8909 = vmatprep.subr.mxu1 %v6938_v49  ;;  %9159 = vmatprep.subr.mxu0 %v7018_v9  ;;  %v12097_v15 = vpop.f32.mrf.mxu1 }
 0x2c4   : > { %14034 = vst [vmem:[#allocation54_spill] sm:$0xff] %v12097_v15  ;;  %8910 = vmatpush3.msra.mxu1 %v6938_v49  ;;  %9160 = vmatpush3.msra.mxu0 %v7018_v9  ;;  %v7015_v49 = vld [vmem:[%s13940_s3 + $0x980] sm:$0xff]  ;;  %v12111_v9 = vpop.f32.mrf.mxu0 }
 0x2c5   : > { %8911 = vmatprep.subr.mxu1 %v6937_v0  ;;  %9161 = vmatprep.subr.mxu0 %v7017_v18  ;;  %14035 = vst [vmem:[#allocation55_spill] sm:$0xff] %v12111_v9  ;;  %v7062_v9 = vld [vmem:[%s13940_s3 + $0xaf8] sm:$0xff] }
 0x2c6   : > { %8912 = vmatpush3.msra.mxu1 %v6937_v0  ;;  %9162 = vmatpush3.msra.mxu0 %v7017_v18  ;;  %v6982_v0 = vld [vmem:[%s13940_s3 + $0x878] sm:$0xff]  ;;  %v12125_v20 = vpop.f32.mrf.mxu0 }
 0x2c7   : > { %8913 = vmatprep.subr.mxu1 %v6936_v37  ;;  %9163 = vmatprep.subr.mxu0 %v7016_v30  ;;  %v8431_v61 = vpop.f32.mrf.mxu1 }
 0x2c8   : > { %8914 = vmatpush3.msra.mxu1 %v6936_v37  ;;  %9164 = vmatpush3.msra.mxu0 %v7016_v30  ;;  %v12118_v18 = vadd.f32 %v8431_v61, %v1828_v46  ;;  %v7061_v37 = vld [vmem:[%s13940_s3 + $0xaf0] sm:$0xff]  ;;  %v1830_v30 = vadd.f32 %v11786_v60, %v11941_v54  ;;  %v7060_v60 = vld [vmem:[%s13940_s3 + $0xae8] sm:$0xff]  ;;  %v7059_v54 = vld [vmem:[%s13940_s3 + $0xae0] sm:$0xff] }
 0x2c9   : > { %8915 = vmatprep.subr.mxu1 %v6935_v28  ;;  %9165 = vmatprep.subr.mxu0 %v7015_v49  ;;  %v12123_v15 = vpop.f32.mrf.mxu1  ;;  %v7058_v61 = vld [vmem:[%s13940_s3 + $0xad8] sm:$0xff] }
 0x2ca   : > { %14036 = vst [vmem:[#allocation56_spill] sm:$0xff] %v12123_v15  ;;  %8916 = vmatpush3.msra.mxu1 %v6935_v28  ;;  %9166 = vmatpush3.msra.mxu0 %v7015_v49  ;;  %v12142_v49 = vpop.f32.mrf.mxu0 }
 0x2cb   : > { %8918 = vmatmul.mubr.f32.vlgmr.msra.gmra.mxu1 %v11261_v26  ;;  %8985 = vmatprep.subr.mxu1 %v6982_v0  ;;  %v6980_v26 = vld [vmem:[%s13940_s3 + $0x868] sm:$0xff]  ;;  %14037 = vst [vmem:[#allocation57_spill] sm:$0xff] %v12142_v49 }
 0x2cc   : > { %9168 = vmatmul.mubr.f32.vlgmr.msra.gmra.mxu0 %v11285_v58  ;;  %9235 = vmatprep.subr.mxu0 %v7062_v9 }
 0x2cd   : > { %8920 = vmatprep.mubr.f32.mxu1 %v11272_v24  ;;  %8986 = vmatpush3.msra.mxu1 %v6982_v0  ;;  %v8434_v28 = vpop.f32.mrf.mxu1  ;;  %v6979_v24 = vld [vmem:[%s13940_s3 + $0x860] sm:$0xff] }
 0x2ce   : > { %9170 = vmatprep.mubr.f32.mxu0 %v11296_v12  ;;  %9236 = vmatpush3.msra.mxu0 %v7062_v9  ;;  %v12144_v46 = vadd.f32 %v8434_v28, %v1830_v30  ;;  %v12157_v9 = vpop.f32.mrf.mxu0  ;;  %v6976_v28 = vld [vmem:[%s13940_s3 + $0x848] sm:$0xff] }
 0x2cf   : > { %8987 = vmatprep.subr.mxu1 %v6981_v59  ;;  %9237 = vmatprep.subr.mxu0 %v7061_v37  ;;  %v12178_v30 = vpop.f32.mrf.mxu1 }
 0x2d0   : > { %8988 = vmatpush3.msra.mxu1 %v6981_v59  ;;  %9238 = vmatpush3.msra.mxu0 %v7061_v37  ;;  %v12167_v0 = vpop.f32.mrf.mxu0  ;;  %v6977_v59 = vld [vmem:[%s13940_s3 + $0x850] sm:$0xff]  ;;  %14039 = vst [vmem:[#allocation59_spill] sm:$0xff] %v12178_v30  ;;  %v6974_v30 = vld [vmem:[%s13940_s3 + $0x838] sm:$0xff] }
 0x2d1   : > { %8921 = vmatmul.mubr.f32.gmra.mxu1 %v11285_v58  ;;  %8989 = vmatprep.subr.mxu1 %v6980_v26  ;;  %v6978_v58 = vld [vmem:[%s13940_s3 + $0x858] sm:$0xff]  ;;  %14038 = vst [vmem:[#allocation58_spill] sm:$0xff] %v12167_v0  ;;  %v7057_v37 = vld [vmem:[%s13940_s3 + $0xad0] sm:$0xff] }
 0x2d2   : > { %9171 = vmatmul.mubr.f32.gmra.mxu0 %v11309_v41  ;;  %9239 = vmatprep.subr.mxu0 %v7060_v60 }
 0x2d3   : > { %8923 = vmatprep.mubr.f32.mxu1 %v11296_v12  ;;  %8990 = vmatpush3.msra.mxu1 %v6980_v26  ;;  %v12184_v26 = vpop.f32.mrf.mxu0 }
 0x2d4   : > { %9173 = vmatprep.mubr.f32.mxu0 %v11320_v53  ;;  %9240 = vmatpush3.msra.mxu0 %v7060_v60  ;;  %v2166_v60 = vadd.f32 %v11811_v56, %v11991_v29  ;;  %v6975_v56 = vld [vmem:[%s13940_s3 + $0x840] sm:$0xff] }
 0x2d5   : > { %8991 = vmatprep.subr.mxu1 %v6979_v24  ;;  %9241 = vmatprep.subr.mxu0 %v7059_v54  ;;  %v7055_v29 = vld [vmem:[%s13940_s3 + $0xac0] sm:$0xff] }
 0x2d6   : > { %8992 = vmatpush3.msra.mxu1 %v6979_v24  ;;  %9242 = vmatpush3.msra.mxu0 %v7059_v54  ;;  %v7056_v24 = vld [vmem:[%s13940_s3 + $0xac8] sm:$0xff]  ;;  %v3472_v54 = vrot.slane %v11449_v10, 4 }
 0x2d7   : > { %8924 = vmatmul.mubr.f32.gmra.mxu1 %v11309_v41  ;;  %8993 = vmatprep.subr.mxu1 %v6978_v58 }
 0x2d8   : > { %9174 = vmatmul.mubr.f32.gmra.mxu0 %v11333_v62  ;;  %9243 = vmatprep.subr.mxu0 %v7058_v61 }
 0x2d9   : > { %8926 = vmatprep.mubr.f32.mxu1 %v11320_v53  ;;  %8994 = vmatpush3.msra.mxu1 %v6978_v58 }
 0x2da   : > { %9176 = vmatprep.mubr.f32.mxu0 %v11344_v2  ;;  %9244 = vmatpush3.msra.mxu0 %v7058_v61 }
 0x2db   : > { %8995 = vmatprep.subr.mxu1 %v6977_v59  ;;  %9245 = vmatprep.subr.mxu0 %v7057_v37  ;;  %v8519_v58 = vpop.f32.mrf.mxu1 }
 0x2dc   : > { %8996 = vmatpush3.msra.mxu1 %v6977_v59  ;;  %9246 = vmatpush3.msra.mxu0 %v7057_v37  ;;  %v12192_v61 = vadd.f32 %v8519_v58, %v2166_v60  ;;  %v12204_v59 = vpop.f32.mrf.mxu0  ;;  %v14041_v37 = vrot.slane %v11161_v1, 4  ;;  %v3474_v58 = vrot.slane %v11471_v14, 4 }
 0x2dd   : > { %8927 = vmatmul.mubr.f32.gmra.mxu1 %v11333_v62  ;;  %8997 = vmatprep.subr.mxu1 %v6976_v28  ;;  %v12195_v0 = vpop.f32.mrf.mxu1  ;;  %14040 = vst [vmem:[#allocation60_spill] sm:$0xff] %v12204_v59  ;;  %v2168_v59 = vadd.f32 %v11849_v50, %v12027_v22  ;;  %v6973_v50 = vld [vmem:[%s13940_s3 + $0x830] sm:$0xff] }
 0x2de   : > { %9177 = vmatmul.mubr.f32.gmra.mxu0 %v11358_v43  ;;  %9247 = vmatprep.subr.mxu0 %v7056_v24  ;;  %v12210_v60 = vsel %vm1848_vm3, %v14041_v37, %v3472_v54  ;;  %v12217_v49 = vpop.f32.mrf.mxu0  ;;  %v4268_v37 = vrot.slane %v11860_v31, 4  ;;  %v12229_v38 = vsel %vm1848_vm3, %v3472_v54, %v3474_v58 }
 0x2df   : > { %8929 = vmatprep.mubr.f32.mxu1 %v11344_v2  ;;  %8998 = vmatpush3.msra.mxu1 %v6976_v28  ;;  %v7054_v28 = vld [vmem:[%s13940_s3 + $0xab8] sm:$0xff] }
 0x2e0   : > { %9179 = vmatprep.mubr.f32.mxu0 %v12210_v60  ;;  %9248 = vmatpush3.msra.mxu0 %v7056_v24  ;;  %v12244_v54 = vsel %vm1848_vm3, %v3474_v58, %v4268_v37 }
 0x2e1   : > { %8999 = vmatprep.subr.mxu1 %v6975_v56  ;;  %9249 = vmatprep.subr.mxu0 %v7055_v29  ;;  %v8522_v15 = vpop.f32.mrf.mxu1 }
 0x2e2   : > { %9000 = vmatpush3.msra.mxu1 %v6975_v56  ;;  %9250 = vmatpush3.msra.mxu0 %v7055_v29  ;;  %v12225_v24 = vadd.f32 %v8522_v15, %v2168_v59  ;;  %v7053_v15 = vld [vmem:[%s13940_s3 + $0xab0] sm:$0xff]  ;;  %v12240_v56 = vpop.f32.mrf.mxu0  ;;  %v6972_v59 = vld [vmem:[%s13940_s3 + $0x828] sm:$0xff] }
 0x2e3   : > { %8930 = vmatmul.mubr.f32.gmra.mxu1 %v11358_v43  ;;  %9001 = vmatprep.subr.mxu1 %v6974_v30  ;;  %v12231_v22 = vpop.f32.mrf.mxu1  ;;  %14043 = vst [vmem:[#allocation62_spill] sm:$0xff] %v12240_v56 }
 0x2e4   : > { %14042 = vst [vmem:[#allocation61_spill] sm:$0xff] %v12231_v22  ;;  %9180 = vmatmul.mubr.f32.gmra.mxu0 %v12229_v38  ;;  %9251 = vmatprep.subr.mxu0 %v7054_v28  ;;  %v2170_v22 = vadd.f32 %v11885_v6, %v12058_v48  ;;  %v12256_v29 = vpop.f32.mrf.mxu0 }
 0x2e5   : > { %8932 = vmatprep.mubr.f32.mxu1 %v12210_v60  ;;  %9002 = vmatpush3.msra.mxu1 %v6974_v30  ;;  %v7052_v30 = vld [vmem:[%s13940_s3 + $0xaa8] sm:$0xff] }
 0x2e6   : > { %9182 = vmatprep.mubr.f32.mxu0 %v12244_v54  ;;  %9252 = vmatpush3.msra.mxu0 %v7054_v28  ;;  %v14044_v28 = vrot.slane %v12019_v51, 4 }
 0x2e7   : > { %9003 = vmatprep.subr.mxu1 %v6973_v50  ;;  %9253 = vmatprep.subr.mxu0 %v7053_v15  ;;  %v8525_v58 = vpop.f32.mrf.mxu1 }
 0x2e8   : > { %9004 = vmatpush3.msra.mxu1 %v6973_v50  ;;  %9254 = vmatpush3.msra.mxu0 %v7053_v15  ;;  %v12258_v56 = vadd.f32 %v8525_v58, %v2170_v22  ;;  %v12264_v6 = vsel %vm1848_vm3, %v4268_v37, %v14044_v28  ;;  %v6971_v50 = vld [vmem:[%s13940_s3 + $0x820] sm:$0xff]  ;;  %v6970_v37 = vld [vmem:[%s13940_s3 + $0x818] sm:$0xff]  ;;  %v12283_v58 = vpop.f32.mrf.mxu0  ;;  %v2172_v28 = vadd.f32 %v11915_v63, %v12095_v47  ;;  %v6968_v63 = vld [vmem:[%s13940_s3 + $0x808] sm:$0xff] }
 0x2e9   : > { %8933 = vmatmul.mubr.f32.gmra.mxu1 %v12229_v38  ;;  %9005 = vmatprep.subr.mxu1 %v6972_v59  ;;  %v12266_v48 = vpop.f32.mrf.mxu1  ;;  %v7051_v22 = vld [vmem:[%s13940_s3 + $0xaa0] sm:$0xff]  ;;  %v7050_v15 = vld [vmem:[%s13940_s3 + $0xa98] sm:$0xff]  ;;  %14046 = vst [vmem:[#allocation64_spill] sm:$0xff] %v12283_v58  ;;  %v7048_v47 = vld [vmem:[%s13940_s3 + $0xa88] sm:$0xff] }
 0x2ea   : > { %14045 = vst [vmem:[#allocation63_spill] sm:$0xff] %v12266_v48  ;;  %9183 = vmatmul.mubr.f32.gmra.mxu0 %v12264_v6  ;;  %9255 = vmatprep.subr.mxu0 %v7052_v30 }
 0x2eb   : > { %9006 = vmatpush3.msra.mxu1 %v6972_v59  ;;  %9017 = vmatprep.mubr.f32.mxu1 %v10801_v52  ;;  %v6969_v52 = vld [vmem:[%s13940_s3 + $0x810] sm:$0xff] }
 0x2ec   : > { %9256 = vmatpush3.msra.mxu0 %v7052_v30  ;;  %9267 = vmatprep.mubr.f32.mxu0 %v10845_v5  ;;  %v7049_v30 = vld [vmem:[%s13940_s3 + $0xa90] sm:$0xff] }
 0x2ed   : > { %9007 = vmatprep.subr.mxu1 %v6971_v50  ;;  %9257 = vmatprep.subr.mxu0 %v7051_v22  ;;  %v8528_v59 = vpop.f32.mrf.mxu1 }
 0x2ee   : > { %9008 = vmatpush3.msra.mxu1 %v6971_v50  ;;  %9258 = vmatpush3.msra.mxu0 %v7051_v22  ;;  %v12293_v48 = vadd.f32 %v8528_v59, %v2172_v28  ;;  %v12303_v50 = vpop.f32.mrf.mxu0  ;;  %v6967_v22 = vld [vmem:[%s13940_s3 + $0x800] sm:$0xff]  ;;  %v7014_v59 = vld [vmem:[%s13940_s3 + $0x978] sm:$0xff] }
 0x2ef   : > { %9009 = vmatprep.subr.mxu1 %v6970_v37  ;;  %9259 = vmatprep.subr.mxu0 %v7050_v15  ;;  %v12295_v58 = vpop.f32.mrf.mxu1 }
 0x2f0   : > { %14047 = vst [vmem:[#allocation65_spill] sm:$0xff] %v12295_v58  ;;  %9010 = vmatpush3.msra.mxu1 %v6970_v37  ;;  %9260 = vmatpush3.msra.mxu0 %v7050_v15  ;;  %v7047_v37 = vld [vmem:[%s13940_s3 + $0xa80] sm:$0xff]  ;;  %v2174_v15 = vadd.f32 %v11946_v42, %v12118_v18  ;;  %v7094_v58 = vld [vmem:[%s13940_s3 + $0xbf8] sm:$0xff]  ;;  %v7013_v18 = vld [vmem:[%s13940_s3 + $0x970] sm:$0xff] }
 0x2f1   : > { %9011 = vmatprep.subr.mxu1 %v6969_v52  ;;  %9261 = vmatprep.subr.mxu0 %v7049_v30 }
 0x2f2   : > { %9012 = vmatpush3.msra.mxu1 %v6969_v52  ;;  %9262 = vmatpush3.msra.mxu0 %v7049_v30  ;;  %v12316_v52 = vpop.f32.mrf.mxu0 }
 0x2f3   : > { %9013 = vmatprep.subr.mxu1 %v6968_v63  ;;  %9263 = vmatprep.subr.mxu0 %v7048_v47  ;;  %v8531_v28 = vpop.f32.mrf.mxu1  ;;  %14048 = vst [vmem:[#allocation66_spill] sm:$0xff] %v12316_v52 }
 0x2f4   : > { %9014 = vmatpush3.msra.mxu1 %v6968_v63  ;;  %9264 = vmatpush3.msra.mxu0 %v7048_v47  ;;  %v12318_v30 = vadd.f32 %v8531_v28, %v2174_v15  ;;  %v7093_v63 = vld [vmem:[%s13940_s3 + $0xbf0] sm:$0xff]  ;;  %v12333_v47 = vpop.f32.mrf.mxu0  ;;  %v7092_v28 = vld [vmem:[%s13940_s3 + $0xbe8] sm:$0xff] }
 0x2f5   : > { %9015 = vmatprep.subr.mxu1 %v6967_v22  ;;  %9265 = vmatprep.subr.mxu0 %v7047_v37  ;;  %v12323_v42 = vpop.f32.mrf.mxu1 }
 0x2f6   : > { %14049 = vst [vmem:[#allocation67_spill] sm:$0xff] %v12323_v42  ;;  %9016 = vmatpush3.msra.mxu1 %v6967_v22  ;;  %9266 = vmatpush3.msra.mxu0 %v7047_v37  ;;  %v2176_v22 = vadd.f32 %v11974_v57, %v12144_v46  ;;  %v7012_v37 = vld [vmem:[%s13940_s3 + $0x968] sm:$0xff]  ;;  %v7011_v57 = vld [vmem:[%s13940_s3 + $0x960] sm:$0xff]  ;;  %v2492_v42 = vadd.f32 %v12093_v32, %v12258_v56 }
 0x2f7   : > { %9018 = vmatmul.mubr.f32.vlgmr.msra.gmra.mxu1 %v10820_v45  ;;  %9085 = vmatprep.subr.mxu1 %v7014_v59  ;;  %v7091_v46 = vld [vmem:[%s13940_s3 + $0xbe0] sm:$0xff] }
 0x2f8   : > { %9268 = vmatmul.mubr.f32.vlgmr.msra.gmra.mxu0 %v10864_v36  ;;  %9335 = vmatprep.subr.mxu0 %v7094_v58  ;;  %v7003_v32 = vld [vmem:[%s13940_s3 + $0x920] sm:$0xff] }
 0x2f9   : > { %9020 = vmatprep.mubr.f32.mxu1 %v10845_v5  ;;  %9086 = vmatpush3.msra.mxu1 %v7014_v59  ;;  %v8534_v45 = vpop.f32.mrf.mxu1  ;;  %v12347_v5 = vpop.f32.mrf.mxu0  ;;  %v7090_v59 = vld [vmem:[%s13940_s3 + $0xbd8] sm:$0xff]  ;;  %v7083_v56 = vld [vmem:[%s13940_s3 + $0xba0] sm:$0xff] }
 0x2fa   : > { %9270 = vmatprep.mubr.f32.mxu0 %v10889_v19  ;;  %9336 = vmatpush3.msra.mxu0 %v7094_v58  ;;  %v12342_v15 = vadd.f32 %v8534_v45, %v2176_v22  ;;  %14050 = vst [vmem:[#allocation68_spill] sm:$0xff] %v12347_v5  ;;  %v2488_v45 = vadd.f32 %v12003_v16, %v12192_v61  ;;  %v14054_v61 = vld [vmem:[#allocation16_spill] sm:$0xff] }
 0x2fb   : > { %9087 = vmatprep.subr.mxu1 %v7013_v18  ;;  %9337 = vmatprep.subr.mxu0 %v7093_v63  ;;  %v12362_v58 = vpop.f32.mrf.mxu0  ;;  %v12378_v22 = vpop.f32.mrf.mxu1 }
 0x2fc   : > { %9088 = vmatpush3.msra.mxu1 %v7013_v18  ;;  %9338 = vmatpush3.msra.mxu0 %v7093_v63  ;;  %v7089_v18 = vld [vmem:[%s13940_s3 + $0xbd0] sm:$0xff]  ;;  %14052 = vst [vmem:[#allocation70_spill] sm:$0xff] %v12378_v22  ;;  %v2490_v22 = vadd.f32 %v12051_v3, %v12225_v24 }
 0x2fd   : > { %9021 = vmatmul.mubr.f32.gmra.mxu1 %v10864_v36  ;;  %9089 = vmatprep.subr.mxu1 %v7012_v37  ;;  %v7010_v36 = vld [vmem:[%s13940_s3 + $0x958] sm:$0xff]  ;;  %v12375_v63 = vpop.f32.mrf.mxu0 }
 0x2fe   : > { %9271 = vmatmul.mubr.f32.gmra.mxu0 %v10909_v34  ;;  %9339 = vmatprep.subr.mxu0 %v7092_v28  ;;  %14051 = vst [vmem:[#allocation69_spill] sm:$0xff] %v12375_v63 }
 0x2ff   : > { %9023 = vmatprep.mubr.f32.mxu1 %v10889_v19  ;;  %9090 = vmatpush3.msra.mxu1 %v7012_v37  ;;  %v7009_v19 = vld [vmem:[%s13940_s3 + $0x950] sm:$0xff]  ;;  %v7088_v37 = vld [vmem:[%s13940_s3 + $0xbc8] sm:$0xff] }
 0x300   : > { %9273 = vmatprep.mubr.f32.mxu0 %v11463_v27  ;;  %9340 = vmatpush3.msra.mxu0 %v7092_v28 }
 0x301   : > { %9091 = vmatprep.subr.mxu1 %v7011_v57  ;;  %9341 = vmatprep.subr.mxu0 %v7091_v46 }
 0x302   : > { %9092 = vmatpush3.msra.mxu1 %v7011_v57  ;;  %9342 = vmatpush3.msra.mxu0 %v7091_v46  ;;  %v12390_v57 = vpop.f32.mrf.mxu0 }
 0x303   : > { %9024 = vmatmul.mubr.f32.gmra.mxu1 %v10909_v34  ;;  %9093 = vmatprep.subr.mxu1 %v7010_v36  ;;  %v7008_v34 = vld [vmem:[%s13940_s3 + $0x948] sm:$0xff] }
 0x304   : > { %9274 = vmatmul.mubr.f32.gmra.mxu0 %v11479_v17  ;;  %9343 = vmatprep.subr.mxu0 %v7090_v59  ;;  %v12415_v63 = vpop.f32.mrf.mxu0 }
 0x305   : > { %9026 = vmatprep.mubr.f32.mxu1 %v11463_v27  ;;  %9094 = vmatpush3.msra.mxu1 %v7010_v36  ;;  %v3788_v27 = vrot.slane %v11860_v31, 1  ;;  %v14053_v36 = vld [vmem:[#allocation11_spill] sm:$0xff] }
 0x306   : > { %9276 = vmatprep.mubr.f32.mxu0 %v11490_v23  ;;  %9344 = vmatpush3.msra.mxu0 %v7090_v59  ;;  %v12395_v59 = vmax.f32 %v14053_v36, 0.0  ;;  %v7006_v36 = vld [vmem:[%s13940_s3 + $0x938] sm:$0xff]  ;;  %14056 = vst [vmem:[#allocation11_spill] sm:$0xff] %v12415_v63  ;;  %v7005_v63 = vld [vmem:[%s13940_s3 + $0x930] sm:$0xff] }
 0x307   : > { %9095 = vmatprep.subr.mxu1 %v7009_v19  ;;  %9345 = vmatprep.subr.mxu0 %v7089_v18  ;;  %v8619_v28 = vpop.f32.mrf.mxu1 }
 0x308   : > { %9096 = vmatpush3.msra.mxu1 %v7009_v19  ;;  %9346 = vmatpush3.msra.mxu0 %v7089_v18  ;;  %v12392_v46 = vadd.f32 %v8619_v28, %v2488_v45  ;;  %v7007_v19 = vld [vmem:[%s13940_s3 + $0x940] sm:$0xff]  ;;  %v14055_v45 = vrot.slane %v11471_v14, 1  ;;  %v3790_v28 = vrot.slane %v12019_v51, 1 }
 0x309   : > { %9027 = vmatmul.mubr.f32.gmra.mxu1 %v11479_v17  ;;  %9097 = vmatprep.subr.mxu1 %v7008_v34  ;;  %v12398_v16 = vpop.f32.mrf.mxu1  ;;  %v7087_v18 = vld [vmem:[%s13940_s3 + $0xbc0] sm:$0xff] }
 0x30a   : > { %9277 = vmatmul.mubr.f32.gmra.mxu0 %v14054_v61  ;;  %9347 = vmatprep.subr.mxu0 %v7088_v37  ;;  %v3789_v17 = vsel %vm1159_vm0, %v14055_v45, %v3788_v27  ;;  %v3791_v3 = vsel %vm1159_vm0, %v3788_v27, %v3790_v28  ;;  %v7004_v27 = vld [vmem:[%s13940_s3 + $0x928] sm:$0xff] }
 0x30b   : > { %9029 = vmatprep.mubr.f32.mxu1 %v11490_v23  ;;  %9098 = vmatpush3.msra.mxu1 %v7008_v34  ;;  %v7086_v23 = vld [vmem:[%s13940_s3 + $0xbb8] sm:$0xff]  ;;  %v4584_v34 = vrot.slane %v12395_v59, 1 }
 0x30c   : > { %9279 = vmatprep.mubr.f32.mxu0 %v3789_v17  ;;  %9348 = vmatpush3.msra.mxu0 %v7088_v37  ;;  %v12423_v37 = vpop.f32.mrf.mxu0 }
 0x30d   : > { %9099 = vmatprep.subr.mxu1 %v7007_v19  ;;  %9349 = vmatprep.subr.mxu0 %v7087_v18  ;;  %v8622_v45 = vpop.f32.mrf.mxu1 }
 0x30e   : > { %9100 = vmatpush3.msra.mxu1 %v7007_v19  ;;  %9350 = vmatpush3.msra.mxu0 %v7087_v18  ;;  %v12425_v5 = vadd.f32 %v8622_v45, %v2490_v22  ;;  %v7085_v19 = vld [vmem:[%s13940_s3 + $0xbb0] sm:$0xff]  ;;  %v4585_v22 = vsel %vm1159_vm0, %v3790_v28, %v4584_v34  ;;  %v12444_v45 = vpop.f32.mrf.mxu0 }
 0x30f   : > { %9030 = vmatmul.mubr.f32.gmra.mxu1 %v14054_v61  ;;  %9101 = vmatprep.subr.mxu1 %v7006_v36  ;;  %v12429_v24 = vpop.f32.mrf.mxu1  ;;  %v14057_v61 = vmov 0.0  }
 0x310   : > { %9280 = vmatmul.mubr.f32.gmra.mxu0 %v3791_v3  ;;  %9351 = vmatprep.subr.mxu0 %v7086_v23  ;;  %v12439_v18 = vrot.slane %v14057_v61, 1 }
 0x311   : > { %9032 = vmatprep.mubr.f32.mxu1 %v3789_v17  ;;  %9102 = vmatpush3.msra.mxu1 %v7006_v36  ;;  %v7084_v17 = vld [vmem:[%s13940_s3 + $0xba8] sm:$0xff] }
 0x312   : > { %14058 = vst [vmem:[#allocation16_spill] sm:$0xff] %v12439_v18  ;;  %9282 = vmatprep.mubr.f32.mxu0 %v4585_v22  ;;  %9352 = vmatpush3.msra.mxu0 %v7086_v23  ;;  %v4587_v23 = vsel %vm1159_vm0, %v4584_v34, %v12439_v18  ;;  %v7002_v34 = vld [vmem:[%s13940_s3 + $0x918] sm:$0xff] }
 0x313   : > { %9103 = vmatprep.subr.mxu1 %v7005_v63  ;;  %9353 = vmatprep.subr.mxu0 %v7085_v19  ;;  %v8625_v28 = vpop.f32.mrf.mxu1 }
 0x314   : > { %9104 = vmatpush3.msra.mxu1 %v7005_v63  ;;  %9354 = vmatpush3.msra.mxu0 %v7085_v19  ;;  %v12451_v36 = vadd.f32 %v8625_v28, %v2492_v42  ;;  %v12463_v63 = vpop.f32.mrf.mxu0  ;;  %v14059_v42 = vld [vmem:[#allocation4_spill] sm:$0xff]  ;;  %v7082_v19 = vld [vmem:[%s13940_s3 + $0xb98] sm:$0xff]  ;;  %v2494_v28 = vadd.f32 %v12125_v20, %v12293_v48  ;;  %v7000_v48 = vld [vmem:[%s13940_s3 + $0x908] sm:$0xff] }
 0x315   : > { %9033 = vmatmul.mubr.f32.gmra.mxu1 %v3791_v3  ;;  %9105 = vmatprep.subr.mxu1 %v7004_v27  ;;  %v12455_v22 = vpop.f32.mrf.mxu1  ;;  %v14060_v3 = vld [vmem:[#allocation6_spill] sm:$0xff] }
 0x316   : > { %9283 = vmatmul.mubr.f32.gmra.mxu0 %v4587_v23  ;;  %9355 = vmatprep.subr.mxu0 %v7084_v17 }
 0x317   : > { %9106 = vmatpush3.msra.mxu1 %v7004_v27  ;;  %9117 = vmatprep.mubr.f32.mxu1 %v14059_v42  ;;  %v7001_v27 = vld [vmem:[%s13940_s3 + $0x910] sm:$0xff]  ;;  %v12481_v42 = vpop.f32.mrf.mxu0 }
 0x318   : > { %9356 = vmatpush3.msra.mxu0 %v7084_v17  ;;  %9367 = vmatprep.mubr.f32.mxu0 %v14060_v3  ;;  %v7081_v17 = vld [vmem:[%s13940_s3 + $0xb90] sm:$0xff]  ;;  %14061 = vst [vmem:[#allocation4_spill] sm:$0xff] %v12481_v42 }
 0x319   : > { %9107 = vmatprep.subr.mxu1 %v7003_v32  ;;  %9357 = vmatprep.subr.mxu0 %v7083_v56  ;;  %v8628_v23 = vpop.f32.mrf.mxu1 }
 0x31a   : > { %9108 = vmatpush3.msra.mxu1 %v7003_v32  ;;  %9358 = vmatpush3.msra.mxu0 %v7083_v56  ;;  %v12483_v18 = vadd.f32 %v8628_v23, %v2494_v28  ;;  %v7080_v32 = vld [vmem:[%s13940_s3 + $0xb88] sm:$0xff]  ;;  %v6999_v56 = vld [vmem:[%s13940_s3 + $0x900] sm:$0xff]  ;;  %v2496_v28 = vadd.f32 %v12157_v9, %v12318_v30  ;;  %v7045_v30 = vld [vmem:[%s13940_s3 + $0xa70] sm:$0xff] }
 0x31b   : > { %9109 = vmatprep.subr.mxu1 %v7002_v34  ;;  %9359 = vmatprep.subr.mxu0 %v7082_v19  ;;  %v12485_v20 = vpop.f32.mrf.mxu1  ;;  %v14065_v9 = vld [vmem:[#allocation5_spill] sm:$0xff] }
 0x31c   : > { %14062 = vst [vmem:[#allocation6_spill] sm:$0xff] %v12485_v20  ;;  %9110 = vmatpush3.msra.mxu1 %v7002_v34  ;;  %9360 = vmatpush3.msra.mxu0 %v7082_v19  ;;  %v7079_v34 = vld [vmem:[%s13940_s3 + $0xb80] sm:$0xff]  ;;  %v12499_v19 = vpop.f32.mrf.mxu0 }
 0x31d   : > { %9111 = vmatprep.subr.mxu1 %v7001_v27  ;;  %9361 = vmatprep.subr.mxu0 %v7081_v17 }
 0x31e   : > { %9112 = vmatpush3.msra.mxu1 %v7001_v27  ;;  %9362 = vmatpush3.msra.mxu0 %v7081_v17  ;;  %v7046_v27 = vld [vmem:[%s13940_s3 + $0xa78] sm:$0xff]  ;;  %v12510_v42 = vpop.f32.mrf.mxu0 }
 0x31f   : > { %9113 = vmatprep.subr.mxu1 %v7000_v48  ;;  %9363 = vmatprep.subr.mxu0 %v7080_v32  ;;  %v8631_v23 = vpop.f32.mrf.mxu1  ;;  %14064 = vst [vmem:[#allocation72_spill] sm:$0xff] %v12510_v42 }
 0x320   : > { %9114 = vmatpush3.msra.mxu1 %v7000_v48  ;;  %9364 = vmatpush3.msra.mxu0 %v7080_v32  ;;  %v12506_v17 = vadd.f32 %v8631_v23, %v2496_v28  ;;  %v14066_v48 = vld [vmem:[#allocation7_spill] sm:$0xff]  ;;  %v2498_v32 = vadd.f32 %v12184_v26, %v12342_v15  ;;  %v14067_v28 = vld [vmem:[#allocation9_spill] sm:$0xff]  ;;  %v12524_v23 = vpop.f32.mrf.mxu0  ;;  %v7043_v26 = vld [vmem:[%s13940_s3 + $0xa60] sm:$0xff] }
 0x321   : > { %9115 = vmatprep.subr.mxu1 %v6999_v56  ;;  %9365 = vmatprep.subr.mxu0 %v7079_v34  ;;  %v12508_v20 = vpop.f32.mrf.mxu1  ;;  %v14068_v15 = vld [vmem:[#allocation10_spill] sm:$0xff] }
 0x322   : > { %14063 = vst [vmem:[#allocation71_spill] sm:$0xff] %v12508_v20  ;;  %9116 = vmatpush3.msra.mxu1 %v6999_v56  ;;  %9366 = vmatpush3.msra.mxu0 %v7079_v34  ;;  %v7044_v56 = vld [vmem:[%s13940_s3 + $0xa68] sm:$0xff]  ;;  %v4904_v20 = vrot.slane %v12395_v59, 3 }
 0x323   : > { %9118 = vmatmul.mubr.f32.vlgmr.msra.gmra.mxu1 %v14065_v9  ;;  %9185 = vmatprep.subr.mxu1 %v7046_v27 }
 0x324   : > { %9368 = vmatmul.mubr.f32.vlgmr.msra.gmra.mxu0 %v14066_v48  ;;  %9120 = vmatprep.mubr.f32.mxu1 %v14060_v3  ;;  %v7042_v3 = vld [vmem:[%s13940_s3 + $0xa58] sm:$0xff] }
 0x325   : > { %9186 = vmatpush3.msra.mxu1 %v7046_v27  ;;  %9370 = vmatprep.mubr.f32.mxu0 %v14067_v28  ;;  %v8634_v34 = vpop.f32.mrf.mxu1  ;;  %v12538_v27 = vpop.f32.mrf.mxu0 }
 0x326   : > { %9187 = vmatprep.subr.mxu1 %v7045_v30  ;;  %v12526_v9 = vadd.f32 %v8634_v34, %v2498_v32  ;;  %14069 = vst [vmem:[#allocation5_spill] sm:$0xff] %v12538_v27  ;;  %v14070_v32 = vld [vmem:[#allocation25_spill] sm:$0xff] }
 0x327   : > { %9188 = vmatpush3.msra.mxu1 %v7045_v30  ;;  %v7041_v30 = vld [vmem:[%s13940_s3 + $0xa50] sm:$0xff]  ;;  %v12553_v34 = vpop.f32.mrf.mxu1 }
 0x328   : > { %9121 = vmatmul.mubr.f32.gmra.mxu1 %v14066_v48  ;;  %9189 = vmatprep.subr.mxu1 %v7044_v56  ;;  %v12546_v48 = vpop.f32.mrf.mxu0  ;;  %14071 = vst [vmem:[#allocation7_spill] sm:$0xff] %v12553_v34 }
 0x329   : > { %9371 = vmatmul.mubr.f32.gmra.mxu0 %v14068_v15  ;;  %9123 = vmatprep.mubr.f32.mxu1 %v14067_v28  ;;  %v7040_v28 = vld [vmem:[%s13940_s3 + $0xa48] sm:$0xff] }
 0x32a   : > { %9190 = vmatpush3.msra.mxu1 %v7044_v56  ;;  %9373 = vmatprep.mubr.f32.mxu0 %v11635_v21  ;;  %v4108_v56 = vrot.slane %v11860_v31, 3 }
 0x32b   : > { %9191 = vmatprep.subr.mxu1 %v7043_v26 }
 0x32c   : > { %9192 = vmatpush3.msra.mxu1 %v7043_v26  ;;  %v12559_v26 = vpop.f32.mrf.mxu0 }
 0x32d   : > { %9124 = vmatmul.mubr.f32.gmra.mxu1 %v14068_v15  ;;  %9193 = vmatprep.subr.mxu1 %v7042_v3  ;;  %14072 = vst [vmem:[#allocation9_spill] sm:$0xff] %v12559_v26  ;;  %v2808_v15 = vadd.f32 %v12217_v49, %v12392_v46  ;;  %v7038_v26 = vld [vmem:[%s13940_s3 + $0xa38] sm:$0xff] }
 0x32e   : > { %9374 = vmatmul.mubr.f32.gmra.mxu0 %v11650_v25  ;;  %9126 = vmatprep.mubr.f32.mxu1 %v11635_v21  ;;  %v7039_v21 = vld [vmem:[%s13940_s3 + $0xa40] sm:$0xff] }
 0x32f   : > { %9194 = vmatpush3.msra.mxu1 %v7042_v3  ;;  %9376 = vmatprep.mubr.f32.mxu0 %v14070_v32  ;;  %v14073_v3 = vld [vmem:[#allocation27_spill] sm:$0xff] }
 0x330   : > { %9195 = vmatprep.subr.mxu1 %v7041_v30 }
 0x331   : > { %9196 = vmatpush3.msra.mxu1 %v7041_v30  ;;  %v14074_v30 = vrot.slane %v11471_v14, 3 }
 0x332   : > { %9127 = vmatmul.mubr.f32.gmra.mxu1 %v11650_v25  ;;  %9197 = vmatprep.subr.mxu1 %v7040_v28  ;;  %v4110_v25 = vrot.slane %v12019_v51, 3 }
 0x333   : > { %9377 = vmatmul.mubr.f32.gmra.mxu0 %v14073_v3  ;;  %9129 = vmatprep.mubr.f32.mxu1 %v14070_v32  ;;  %v4109_v34 = vsel %vm1656_vm1, %v14074_v30, %v4108_v56  ;;  %v8719_v27 = vpop.f32.mrf.mxu1  ;;  %v12577_v32 = vpop.f32.mrf.mxu0  ;;  %v7037_v30 = vld [vmem:[%s13940_s3 + $0xa30] sm:$0xff] }
 0x334   : > { %9198 = vmatpush3.msra.mxu1 %v7040_v28  ;;  %9379 = vmatprep.mubr.f32.mxu0 %v4109_v34  ;;  %v12573_v49 = vadd.f32 %v8719_v27, %v2808_v15  ;;  %v4111_v28 = vsel %vm1656_vm1, %v4108_v56, %v4110_v25  ;;  %v4905_v27 = vsel %vm1656_vm1, %v4110_v25, %v4904_v20  ;;  %v4906_v15 = vrot.slane %v14057_v61, 3 }
 0x335   : > { %9199 = vmatprep.subr.mxu1 %v7039_v21  ;;  %v12575_v46 = vpop.f32.mrf.mxu1  ;;  %v12591_v42 = vpop.f32.mrf.mxu0 }
 0x336   : > { %9200 = vmatpush3.msra.mxu1 %v7039_v21  ;;  %v2810_v21 = vadd.f32 %v12256_v29, %v12425_v5  ;;  %v4907_v29 = vsel %vm1656_vm1, %v4904_v20, %v4906_v15 }
 0x337   : > { %9130 = vmatmul.mubr.f32.gmra.mxu1 %v14073_v3  ;;  %9201 = vmatprep.subr.mxu1 %v7038_v26  ;;  %v7036_v3 = vld [vmem:[%s13940_s3 + $0xa28] sm:$0xff]  ;;  %v12601_v5 = vpop.f32.mrf.mxu0 }
 0x338   : > { %9380 = vmatmul.mubr.f32.gmra.mxu0 %v4111_v28  ;;  %9132 = vmatprep.mubr.f32.mxu1 %v4109_v34  ;;  %v7035_v34 = vld [vmem:[%s13940_s3 + $0xa20] sm:$0xff] }
 0x339   : > { %9202 = vmatpush3.msra.mxu1 %v7038_v26  ;;  %9382 = vmatprep.mubr.f32.mxu0 %v4905_v27  ;;  %v8722_v56 = vpop.f32.mrf.mxu1  ;;  %v7034_v26 = vld [vmem:[%s13940_s3 + $0xa18] sm:$0xff]  ;;  %v12612_v27 = vpop.f32.mrf.mxu0 }
 0x33a   : > { %9203 = vmatprep.subr.mxu1 %v7037_v30  ;;  %v12593_v52 = vadd.f32 %v8722_v56, %v2810_v21  ;;  %v7078_v56 = vld [vmem:[%s13940_s3 + $0xb78] sm:$0xff] }
 0x33b   : > { %9204 = vmatpush3.msra.mxu1 %v7037_v30  ;;  %v12598_v25 = vpop.f32.mrf.mxu1  ;;  %v2812_v30 = vadd.f32 %v12303_v50, %v12451_v36  ;;  %v7031_v50 = vld [vmem:[%s13940_s3 + $0xa00] sm:$0xff]  ;;  %v12624_v36 = vpop.f32.mrf.mxu0 }
 0x33c   : > { %9133 = vmatmul.mubr.f32.gmra.mxu1 %v4111_v28  ;;  %9205 = vmatprep.subr.mxu1 %v7036_v3  ;;  %v7033_v28 = vld [vmem:[%s13940_s3 + $0xa10] sm:$0xff] }
 0x33d   : > { %9383 = vmatmul.mubr.f32.gmra.mxu0 %v4907_v29  ;;  %9206 = vmatpush3.msra.mxu1 %v7036_v3  ;;  %v2814_v3 = vadd.f32 %v12333_v47, %v12483_v18  ;;  %v12639_v47 = vpop.f32.mrf.mxu0  ;;  %v7076_v18 = vld [vmem:[%s13940_s3 + $0xb68] sm:$0xff] }
 0x33e   : > { %9217 = vmatprep.mubr.f32.mxu1 %v10798_v4  ;;  %9207 = vmatprep.subr.mxu1 %v7035_v34  ;;  %v7032_v4 = vld [vmem:[%s13940_s3 + $0xa08] sm:$0xff] }
 0x33f   : > { %9208 = vmatpush3.msra.mxu1 %v7035_v34  ;;  %v8725_v20 = vpop.f32.mrf.mxu1 }
 0x340   : > { %9209 = vmatprep.subr.mxu1 %v7034_v26  ;;  %v12614_v15 = vadd.f32 %v8725_v20, %v2812_v30  ;;  %v7075_v20 = vld [vmem:[%s13940_s3 + $0xb60] sm:$0xff] }
 0x341   : > { %9210 = vmatpush3.msra.mxu1 %v7034_v26  ;;  %v12619_v21 = vpop.f32.mrf.mxu1  ;;  %v7077_v26 = vld [vmem:[%s13940_s3 + $0xb70] sm:$0xff] }
 0x342   : > { %9211 = vmatprep.subr.mxu1 %v7033_v28 }
 0x343   : > { %9212 = vmatpush3.msra.mxu1 %v7033_v28  ;;  %v2816_v28 = vadd.f32 %v12362_v58, %v12506_v17  ;;  %v7074_v58 = vld [vmem:[%s13940_s3 + $0xb58] sm:$0xff] }
 0x344   : > { %9213 = vmatprep.subr.mxu1 %v7032_v4 }
 0x345   : > { %9214 = vmatpush3.msra.mxu1 %v7032_v4  ;;  %v8728_v34 = vpop.f32.mrf.mxu1  ;;  %v12651_v4 = vpop.f32.mrf.mxu0 }
 0x346   : > { %9215 = vmatprep.subr.mxu1 %v7031_v50  ;;  %v12631_v29 = vadd.f32 %v8728_v34, %v2814_v3  ;;  %v14076_v3 = vld [vmem:[#allocation12_spill] sm:$0xff]  ;;  %v2818_v34 = vadd.f32 %v12390_v57, %v12526_v9  ;;  %v7069_v57 = vld [vmem:[%s13940_s3 + $0xb30] sm:$0xff] }
 0x347   : > { %9216 = vmatpush3.msra.mxu1 %v7031_v50  ;;  %v12636_v30 = vpop.f32.mrf.mxu1  ;;  %v14075_v50 = vld [vmem:[#allocation8_spill] sm:$0xff] }
 0x348   : > { %9218 = vmatmul.mubr.f32.vlgmr.msra.gmra.mxu1 %v10817_v44  ;;  %9285 = vmatprep.subr.mxu1 %v7078_v56 }
 0x349   : > { %9220 = vmatprep.mubr.f32.mxu1 %v10842_v13  ;;  %9286 = vmatpush3.msra.mxu1 %v7078_v56  ;;  %v12665_v56 = vpop.f32.mrf.mxu0 }
 0x34a   : > { %9287 = vmatprep.subr.mxu1 %v7077_v26 }
 0x34b   : > { %9288 = vmatpush3.msra.mxu1 %v7077_v26  ;;  %v8731_v44 = vpop.f32.mrf.mxu1  ;;  %v7072_v26 = vld [vmem:[%s13940_s3 + $0xb48] sm:$0xff] }
 0x34c   : > { %9221 = vmatmul.mubr.f32.gmra.mxu1 %v10861_v35  ;;  %9289 = vmatprep.subr.mxu1 %v7076_v18  ;;  %v12653_v13 = vadd.f32 %v8731_v44, %v2816_v28  ;;  %v7073_v35 = vld [vmem:[%s13940_s3 + $0xb50] sm:$0xff]  ;;  %v12678_v44 = vpop.f32.mrf.mxu0 }
 0x34d   : > { %9223 = vmatprep.mubr.f32.mxu1 %v14075_v50  ;;  %9290 = vmatpush3.msra.mxu1 %v7076_v18  ;;  %v12659_v17 = vpop.f32.mrf.mxu1 }
 0x34e   : > { %9291 = vmatprep.subr.mxu1 %v7075_v20  ;;  %v12688_v9 = vpop.f32.mrf.mxu0 }
 0x34f   : > { %9292 = vmatpush3.msra.mxu1 %v7075_v20  ;;  %v7071_v20 = vld [vmem:[%s13940_s3 + $0xb40] sm:$0xff] }
 0x350   : > { %9224 = vmatmul.mubr.f32.gmra.mxu1 %v14076_v3  ;;  %9293 = vmatprep.subr.mxu1 %v7074_v58  ;;  %v12698_v50 = vpop.f32.mrf.mxu0  ;;  %v7065_v3 = vld [vmem:[%s13940_s3 + $0xb10] sm:$0xff] }
 0x351   : > { %9226 = vmatprep.mubr.f32.mxu1 %v11161_v1  ;;  %9294 = vmatpush3.msra.mxu1 %v7074_v58  ;;  %v8734_v18 = vpop.f32.mrf.mxu1  ;;  %v7070_v1 = vld [vmem:[%s13940_s3 + $0xb38] sm:$0xff] }
 0x352   : > { %9295 = vmatprep.subr.mxu1 %v7073_v35  ;;  %v12673_v28 = vadd.f32 %v8734_v18, %v2818_v34  ;;  %v7064_v18 = vld [vmem:[%s13940_s3 + $0xb08] sm:$0xff] }
 0x353   : > { %9296 = vmatpush3.msra.mxu1 %v7073_v35  ;;  %v12705_v58 = vpop.f32.mrf.mxu1  ;;  %v3124_v35 = vadd.f32 %v12423_v37, %v12573_v49  ;;  %v7063_v37 = vld [vmem:[%s13940_s3 + $0xb00] sm:$0xff] }
 0x354   : > { %9227 = vmatmul.mubr.f32.gmra.mxu1 %v11449_v10  ;;  %9297 = vmatprep.subr.mxu1 %v7072_v26  ;;  %v7068_v10 = vld [vmem:[%s13940_s3 + $0xb28] sm:$0xff] }
 0x355   : > { %9229 = vmatprep.mubr.f32.mxu1 %v11471_v14  ;;  %9298 = vmatpush3.msra.mxu1 %v7072_v26  ;;  %v7067_v14 = vld [vmem:[%s13940_s3 + $0xb20] sm:$0xff]  ;;  %v12712_v26 = vpop.f32.mrf.mxu0 }
 0x356   : > { %9299 = vmatprep.subr.mxu1 %v7071_v20 }
 0x357   : > { %9300 = vmatpush3.msra.mxu1 %v7071_v20  ;;  %v12724_v49 = vpop.f32.mrf.mxu0 }
 0x358   : > { %9230 = vmatmul.mubr.f32.gmra.mxu1 %v11860_v31  ;;  %9301 = vmatprep.subr.mxu1 %v7070_v1  ;;  %v7066_v31 = vld [vmem:[%s13940_s3 + $0xb18] sm:$0xff] }
 0x359   : > { %9232 = vmatprep.mubr.f32.mxu1 %v12019_v51  ;;  %9302 = vmatpush3.msra.mxu1 %v7070_v1  ;;  %v3126_v1 = vadd.f32 %v12463_v63, %v12593_v52  ;;  %v14078_v52 = vld [vmem:[#allocation13_spill] sm:$0xff] }
 0x35a   : > { %9303 = vmatprep.subr.mxu1 %v7069_v57  ;;  %v7108_v63 = vld [vmem:[%s13940_s3 + $0xc68] sm:$0xff] }
 0x35b   : > { %9304 = vmatpush3.msra.mxu1 %v7069_v57  ;;  %v7110_v57 = vld [vmem:[%s13940_s3 + $0xc78] sm:$0xff] }
 0x35c   : > { %9233 = vmatmul.mubr.f32.gmra.mxu1 %v12395_v59  ;;  %9305 = vmatprep.subr.mxu1 %v7068_v10 }
 0x35d   : > { %9306 = vmatpush3.msra.mxu1 %v7068_v10  ;;  %9317 = vmatprep.mubr.f32.mxu1 %v11129_v39 }
 0x35e   : > { %9307 = vmatprep.subr.mxu1 %v7067_v14 }
 0x35f   : > { %9308 = vmatpush3.msra.mxu1 %v7067_v14  ;;  %v8819_v34 = vpop.f32.mrf.mxu1 }
 0x360   : > { %9309 = vmatprep.subr.mxu1 %v7066_v31  ;;  %v12714_v39 = vadd.f32 %v8819_v34, %v3124_v35 }
 0x361   : > { %9310 = vmatpush3.msra.mxu1 %v7066_v31  ;;  %v12719_v20 = vpop.f32.mrf.mxu1  ;;  %v7109_v31 = vld [vmem:[%s13940_s3 + $0xc70] sm:$0xff] }
 0x362   : > { %9311 = vmatprep.subr.mxu1 %v7065_v3 }
 0x363   : > { %9312 = vmatpush3.msra.mxu1 %v7065_v3  ;;  %v12738_v3 = vpop.f32.mrf.mxu0 }
 0x364   : > { %9313 = vmatprep.subr.mxu1 %v7064_v18  ;;  %14077 = vst [vmem:[#allocation10_spill] sm:$0xff] %v12738_v3 }
 0x365   : > { %9314 = vmatpush3.msra.mxu1 %v7064_v18  ;;  %v8822_v10 = vpop.f32.mrf.mxu1  ;;  %v12745_v34 = vpop.f32.mrf.mxu0  ;;  %v3128_v18 = vadd.f32 %v12499_v19, %v12614_v15  ;;  %v7105_v15 = vld [vmem:[%s13940_s3 + $0xc50] sm:$0xff] }
 0x366   : > { %9315 = vmatprep.subr.mxu1 %v7063_v37  ;;  %v12731_v14 = vadd.f32 %v8822_v10, %v3126_v1  ;;  %v14079_v1 = vld [vmem:[#allocation14_spill] sm:$0xff]  ;;  %v14080_v10 = vld [vmem:[#allocation15_spill] sm:$0xff] }
 0x367   : > { %9316 = vmatpush3.msra.mxu1 %v7063_v37  ;;  %v12736_v35 = vpop.f32.mrf.mxu1  ;;  %v7107_v37 = vld [vmem:[%s13940_s3 + $0xc60] sm:$0xff]  ;;  %v12761_v19 = vpop.f32.mrf.mxu0 }
 0x368   : > { %9318 = vmatmul.mubr.f32.vlgmr.msra.gmra.mxu1 %v11142_v8  ;;  %9385 = vmatprep.subr.mxu1 %v7110_v57 }
 0x369   : > { %9320 = vmatprep.mubr.f32.mxu1 %v14078_v52  ;;  %9386 = vmatpush3.msra.mxu1 %v7110_v57  ;;  %v7106_v52 = vld [vmem:[%s13940_s3 + $0xc58] sm:$0xff] }
 0x36a   : > { %9387 = vmatprep.subr.mxu1 %v7109_v31 }
 0x36b   : > { %9388 = vmatpush3.msra.mxu1 %v7109_v31  ;;  %v8825_v8 = vpop.f32.mrf.mxu1  ;;  %v3130_v31 = vadd.f32 %v12524_v23, %v12631_v29  ;;  %v7102_v23 = vld [vmem:[%s13940_s3 + $0xc38] sm:$0xff] }
 0x36c   : > { %9321 = vmatmul.mubr.f32.gmra.mxu1 %v14079_v1  ;;  %9389 = vmatprep.subr.mxu1 %v7108_v63  ;;  %v12753_v57 = vadd.f32 %v8825_v8, %v3128_v18  ;;  %v12773_v8 = vpop.f32.mrf.mxu0 }
 0x36d   : > { %9323 = vmatprep.mubr.f32.mxu1 %v14080_v10  ;;  %9390 = vmatpush3.msra.mxu1 %v7108_v63  ;;  %v12759_v3 = vpop.f32.mrf.mxu1  ;;  %v7104_v63 = vld [vmem:[%s13940_s3 + $0xc48] sm:$0xff]  ;;  %v3132_v10 = vadd.f32 %v12546_v48, %v12653_v13 }
 0x36e   : > { %9391 = vmatprep.subr.mxu1 %v7107_v37  ;;  %v12788_v29 = vpop.f32.mrf.mxu0  ;;  %v7100_v48 = vld [vmem:[%s13940_s3 + $0xc28] sm:$0xff] }
 0x36f   : > { %9392 = vmatpush3.msra.mxu1 %v7107_v37 }
 0x370   : > { %9324 = vmatmul.mubr.f32.gmra.mxu1 %v11194_v33  ;;  %9393 = vmatprep.subr.mxu1 %v7106_v52  ;;  %v7103_v33 = vld [vmem:[%s13940_s3 + $0xc40] sm:$0xff] }
 0x371   : > { %9326 = vmatprep.mubr.f32.mxu1 %v12009_v40  ;;  %9394 = vmatpush3.msra.mxu1 %v7106_v52  ;;  %v8828_v18 = vpop.f32.mrf.mxu1  ;;  %v4744_v40 = vrot.slane %v12395_v59, 2  ;;  %v12796_v52 = vrot.slane %v14057_v61, 2 }
 0x372   : > { %9395 = vmatprep.subr.mxu1 %v7105_v15  ;;  %v12775_v37 = vadd.f32 %v8828_v18, %v3130_v31  ;;  %v12809_v18 = vpop.f32.mrf.mxu0 }
 0x373   : > { %9396 = vmatpush3.msra.mxu1 %v7105_v15  ;;  %v12780_v1 = vpop.f32.mrf.mxu1  ;;  %14081 = vst [vmem:[#allocation25_spill] sm:$0xff] %v12796_v52  ;;  %v14082_v15 = vrot.slane %v12019_v51, 2 }
 0x374   : > { %9327 = vmatmul.mubr.f32.gmra.mxu1 %v12031_v55  ;;  %9397 = vmatprep.subr.mxu1 %v7104_v63  ;;  %v7101_v55 = vld [vmem:[%s13940_s3 + $0xc30] sm:$0xff] }
 0x375   : > { %9329 = vmatprep.mubr.f32.mxu1 %v12044_v11  ;;  %9398 = vmatpush3.msra.mxu1 %v7104_v63  ;;  %v4745_v31 = vsel %vm1464_vm2, %v14082_v15, %v4744_v40  ;;  %v7097_v15 = vld [vmem:[%s13940_s3 + $0xc10] sm:$0xff] }
 0x376   : > { %9399 = vmatprep.subr.mxu1 %v7103_v33 }
 0x377   : > { %9400 = vmatpush3.msra.mxu1 %v7103_v33  ;;  %v8831_v11 = vpop.f32.mrf.mxu1  ;;  %v7099_v33 = vld [vmem:[%s13940_s3 + $0xc20] sm:$0xff] }
 0x378   : > { %9330 = vmatmul.mubr.f32.gmra.mxu1 %v12064_v7  ;;  %9401 = vmatprep.subr.mxu1 %v7102_v23  ;;  %v12802_v63 = vadd.f32 %v8831_v11, %v3132_v10  ;;  %v4747_v7 = vsel %vm1464_vm2, %v4744_v40, %v12796_v52  ;;  %v7098_v10 = vld [vmem:[%s13940_s3 + $0xc18] sm:$0xff]  ;;  %v12822_v11 = vpop.f32.mrf.mxu0 }
 0x379   : > { %9332 = vmatprep.mubr.f32.mxu1 %v4745_v31  ;;  %9402 = vmatpush3.msra.mxu1 %v7102_v23  ;;  %v12807_v13 = vpop.f32.mrf.mxu1  ;;  %v3134_v23 = vadd.f32 %v12577_v32, %v12673_v28  ;;  %v7095_v28 = vld [vmem:[%s13940_s3 + $0xc00] sm:$0xff] }
 0x37a   : > { %9403 = vmatprep.subr.mxu1 %v7101_v55  ;;  %v12832_v32 = vpop.f32.mrf.mxu0 }
 0x37b   : > { %9404 = vmatpush3.msra.mxu1 %v7101_v55 }
 0x37c   : > { %9333 = vmatmul.mubr.f32.gmra.mxu1 %v4747_v7  ;;  %9405 = vmatprep.subr.mxu1 %v7100_v48  ;;  %v12837_v31 = vpop.f32.mrf.mxu0 }
 0x37d   : > { %9406 = vmatpush3.msra.mxu1 %v7100_v48  ;;  %9417 = vmatprep.mubr.f32.mxu1 %v11296_v12  ;;  %v8834_v55 = vpop.f32.mrf.mxu1  ;;  %v7096_v12 = vld [vmem:[%s13940_s3 + $0xc08] sm:$0xff] }
 0x37e   : > { %9407 = vmatprep.subr.mxu1 %v7099_v33  ;;  %v12824_v40 = vadd.f32 %v8834_v55, %v3134_v23  ;;  %v12843_v7 = vpop.f32.mrf.mxu0 }
 0x37f   : > { %9408 = vmatpush3.msra.mxu1 %v7099_v33  ;;  %v12841_v48 = vpop.f32.mrf.mxu1  ;;  %14083 = vst [vmem:[#allocation27_spill] sm:$0xff] %v12843_v7  ;;  %v3444_v33 = vadd.f32 %v12601_v5, %v12714_v39  ;;  %v3446_v5 = vadd.f32 %v12624_v36, %v12731_v14  ;;  %v14091_v36 = vld [vmem:[#allocation39_spill] sm:$0xff]  ;;  %v14092_v14 = vld [vmem:[#allocation49_spill] sm:$0xff] }
 0x380   : > { %9409 = vmatprep.subr.mxu1 %v7098_v10 }
 0x381   : > { %9410 = vmatpush3.msra.mxu1 %v7098_v10 }
 0x382   : > { %9411 = vmatprep.subr.mxu1 %v7097_v15 }
 0x383   : > { %9412 = vmatpush3.msra.mxu1 %v7097_v15  ;;  %v14084_v15 = vld [vmem:[#allocation17_spill] sm:$0xff] }
 0x384   : > { %9413 = vmatprep.subr.mxu1 %v7096_v12 }
 0x385   : > { %9414 = vmatpush3.msra.mxu1 %v7096_v12 }
 0x386   : > { %9415 = vmatprep.subr.mxu1 %v7095_v28 }
 0x387   : > { %9416 = vmatpush3.msra.mxu1 %v7095_v28  ;;  %v14087_v28 = vld [vmem:[#allocation37_spill] sm:$0xff] }
 0x388   : > { %9418 = vmatmul.mubr.f32.vlgmr.msra.gmra.mxu1 %v11309_v41  ;;  %v14085_v41 = vld [vmem:[#allocation23_spill] sm:$0xff] }
 0x389   : > { %9420 = vmatprep.mubr.f32.mxu1 %v11320_v53  ;;  %v1389_v12 = vadd.f32 %v14085_v41, %v14084_v15  ;;  %v12855_v53 = vpop.f32.mrf.mxu0  ;;  %v14089_v15 = vld [vmem:[#allocation24_spill] sm:$0xff] }
 0x38a   : > { %14086 = vst [vmem:[#allocation8_spill] sm:$0xff] %v12855_v53  ;;  %v14090_v53 = vld [vmem:[#allocation26_spill] sm:$0xff] }
 0x38b   : > { %v8919_v23 = vpop.f32.mrf.mxu1  ;;  %v1627_v52 = vadd.f32 %v14087_v28, %v1389_v12  ;;  %v12862_v39 = vpop.f32.mrf.mxu0 }
 0x38c   : > { %9421 = vmatmul.mubr.f32.gmra.mxu1 %v11333_v62  ;;  %v12848_v10 = vadd.f32 %v8919_v23, %v3444_v33  ;;  %v14088_v23 = vld [vmem:[#allocation18_spill] sm:$0xff] }
 0x38d   : > { %9423 = vmatprep.mubr.f32.mxu1 %v11344_v2  ;;  %v12851_v55 = vpop.f32.mrf.mxu1  ;;  %v1399_v41 = vadd.f32 %v14089_v15, %v14088_v23  ;;  %v1819_v7 = vadd.f32 %v14090_v53, %v1627_v52  ;;  %v12876_v28 = vpop.f32.mrf.mxu0  ;;  %v14096_v52 = vld [vmem:[#allocation19_spill] sm:$0xff] }
 0x38e   : > { %14093 = vst [vmem:[#allocation12_spill] sm:$0xff] %v12876_v28  ;;  %v14101_v28 = vld [vmem:[#allocation51_spill] sm:$0xff] }
 0x38f   : > { %v2011_v12 = vadd.f32 %v14092_v14, %v1819_v7  ;;  %v12881_v15 = vpop.f32.mrf.mxu0  ;;  %v14097_v7 = vld [vmem:[#allocation28_spill] sm:$0xff]  ;;  %v14100_v14 = vld [vmem:[#allocation41_spill] sm:$0xff] }
 0x390   : > { %9424 = vmatmul.mubr.f32.gmra.mxu1 %v11358_v43  ;;  %v5064_v43 = vrot.slane %v12395_v59, 4  ;;  %14094 = vst [vmem:[#allocation13_spill] sm:$0xff] %v12881_v15  ;;  %v1409_v53 = vadd.f32 %v14097_v7, %v14096_v52  ;;  %v14104_v7 = vld [vmem:[#allocation30_spill] sm:$0xff] }
 0x391   : > { %9426 = vmatprep.mubr.f32.mxu1 %v12210_v60  ;;  %v8922_v62 = vpop.f32.mrf.mxu1  ;;  %v1629_v60 = vadd.f32 %v14091_v36, %v1399_v41 }
 0x392   : > { %v12864_v2 = vadd.f32 %v8922_v62, %v3446_v5  ;;  %v3448_v5 = vadd.f32 %v12651_v4, %v12753_v57  ;;  %v5066_v62 = vrot.slane %v14057_v61, 4  ;;  %v14098_v4 = vld [vmem:[#allocation29_spill] sm:$0xff]  ;;  %v14099_v61 = vld [vmem:[#allocation38_spill] sm:$0xff]  ;;  %v1631_v15 = vadd.f32 %v14100_v14, %v1409_v53 }
 0x393   : > { %v12866_v33 = vpop.f32.mrf.mxu1  ;;  %v1821_v57 = vadd.f32 %v14098_v4, %v1629_v60  ;;  %v2165_v36 = vadd.f32 %v14099_v61, %v2011_v12  ;;  %v14103_v60 = vld [vmem:[#allocation20_spill] sm:$0xff]  ;;  %v14105_v4 = vld [vmem:[#allocation31_spill] sm:$0xff] }
 0x394   : > { %9427 = vmatmul.mubr.f32.gmra.mxu1 %v12229_v38  ;;  %v14095_v38 = vrot.slane %v12019_v51, 4  ;;  %v1419_v12 = vadd.f32 %v14104_v7, %v14103_v60  ;;  %v1823_v53 = vadd.f32 %v14105_v4, %v1631_v15  ;;  %v3452_v60 = vadd.f32 %v12698_v50, %v12802_v63  ;;  %v14120_v63 = vld [vmem:[#allocation54_spill] sm:$0xff] }
 0x395   : > { %9429 = vmatprep.mubr.f32.mxu1 %v12244_v54  ;;  %v2013_v51 = vadd.f32 %v14101_v28, %v1821_v57 }
 0x396   : > { %v5065_v54 = vsel %vm1848_vm3, %v14095_v38, %v5064_v43  ;;  %v2327_v38 = vadd.f32 %v12195_v0, %v2165_v36  ;;  %v14109_v36 = vld [vmem:[#allocation42_spill] sm:$0xff] }
 0x397   : > { %v8925_v23 = vpop.f32.mrf.mxu1  ;;  %v1633_v14 = vadd.f32 %v14109_v36, %v1419_v12  ;;  %v14116_v12 = vld [vmem:[#allocation43_spill] sm:$0xff] }
 0x398   : > { %9430 = vmatmul.mubr.f32.gmra.mxu1 %v12264_v6  ;;  %v12887_v59 = vadd.f32 %v8925_v23, %v3448_v5  ;;  %v5067_v6 = vsel %vm1848_vm3, %v5064_v43, %v5066_v62  ;;  %v12899_v5 = vpop.f32.mrf.mxu0  ;;  %v3450_v23 = vadd.f32 %v12678_v44, %v12775_v37  ;;  %v14106_v43 = vld [vmem:[#allocation40_spill] sm:$0xff]  ;;  %v14107_v62 = vld [vmem:[#allocation50_spill] sm:$0xff]  ;;  %v14111_v37 = vld [vmem:[#allocation61_spill] sm:$0xff] }
 0x399   : > { %9432 = vmatprep.mubr.f32.mxu1 %v5065_v54  ;;  %v12891_v41 = vpop.f32.mrf.mxu1  ;;  %14102 = vst [vmem:[#allocation14_spill] sm:$0xff] %v12899_v5  ;;  %v2167_v28 = vadd.f32 %v14106_v43, %v2013_v51  ;;  %v2487_v0 = vadd.f32 %v14107_v62, %v2327_v38  ;;  %v14113_v51 = vld [vmem:[#allocation21_spill] sm:$0xff]  ;;  %v14114_v38 = vld [vmem:[#allocation32_spill] sm:$0xff] }
 0x39a   : > { %v12912_v57 = vpop.f32.mrf.mxu0  ;;  %v1429_v43 = vadd.f32 %v14114_v38, %v14113_v51  ;;  %v14115_v62 = vld [vmem:[#allocation33_spill] sm:$0xff] }
 0x39b   : > { %14108 = vst [vmem:[#allocation15_spill] sm:$0xff] %v12912_v57  ;;  %v1825_v57 = vadd.f32 %v14115_v62, %v1633_v14  ;;  %v3454_v14 = vadd.f32 %v12724_v49, %v12824_v40  ;;  %v14129_v40 = vld [vmem:[#allocation56_spill] sm:$0xff] }
 0x39c   : > { %9433 = vmatmul.mubr.f32.gmra.mxu1 %v5067_v6  ;;  %v14110_v6 = vld [vmem:[#allocation52_spill] sm:$0xff]  ;;  %v12920_v7 = vpop.f32.mrf.mxu0 }
 0x39d   : > { %v8928_v54 = vpop.f32.mrf.mxu1  ;;  %v2015_v44 = vadd.f32 %v14110_v6, %v1823_v53  ;;  %14112 = vst [vmem:[#allocation17_spill] sm:$0xff] %v12920_v7  ;;  %v2017_v5 = vadd.f32 %v14120_v63, %v1825_v57  ;;  %v14121_v7 = vld [vmem:[#allocation63_spill] sm:$0xff]  ;;  %v14125_v57 = vld [vmem:[#allocation45_spill] sm:$0xff] }
 0x39e   : > { %v12903_v52 = vadd.f32 %v8928_v54, %v3450_v23  ;;  %v2329_v23 = vadd.f32 %v14111_v37, %v2167_v28  ;;  %v2647_v54 = vadd.f32 %v12398_v16, %v2487_v0  ;;  %v14117_v28 = vld [vmem:[#allocation53_spill] sm:$0xff]  ;;  %v14118_v16 = vld [vmem:[#allocation62_spill] sm:$0xff]  ;;  %v14119_v37 = vld [vmem:[#allocation44_spill] sm:$0xff]  ;;  %v12937_v38 = vpop.f32.mrf.mxu0 }
 0x39f   : > { %v12908_v61 = vpop.f32.mrf.mxu1  ;;  %v2169_v36 = vadd.f32 %v14116_v12, %v2015_v44  ;;  %v1635_v50 = vadd.f32 %v14119_v37, %v1429_v43  ;;  %v14124_v43 = vld [vmem:[#allocation34_spill] sm:$0xff]  ;;  %v14128_v37 = vld [vmem:[#allocation47_spill] sm:$0xff] }
 0x3a0   : > { %v2489_v6 = vadd.f32 %v14117_v28, %v2329_v23  ;;  %v2807_v0 = vadd.f32 %v14118_v16, %v2647_v54  ;;  %v14122_v23 = vld [vmem:[#allocation22_spill] sm:$0xff]  ;;  %v14123_v54 = vld [vmem:[#allocation36_spill] sm:$0xff]  ;;  %v2171_v16 = vadd.f32 %v14125_v57, %v2017_v5 }
 0x3a1   : > { %v1439_v12 = vadd.f32 %v14123_v54, %v14122_v23  ;;  %v1827_v28 = vadd.f32 %v14124_v43, %v1635_v50  ;;  %v14132_v43 = vld [vmem:[#allocation46_spill] sm:$0xff] }
 0x3a2   : > { %v2961_v51 = vadd.f32 %v12575_v46, %v2807_v0  ;;  %v12950_v0 = vpop.f32.mrf.mxu0 }
 0x3a3   : > { %v8931_v15 = vpop.f32.mrf.mxu1  ;;  %v1637_v49 = vadd.f32 %v14128_v37, %v1439_v12  ;;  %v2019_v63 = vadd.f32 %v14129_v40, %v1827_v28  ;;  %v5279_v28 = vld [vmem:[%s13942_s5 + $0x78] sm:$0xff]  ;;  %v5278_v40 = vld [vmem:[%s13942_s5 + $0x70] sm:$0xff] }
 0x3a4   : > { %v12922_v4 = vadd.f32 %v8931_v15, %v3452_v60  ;;  %v2331_v60 = vadd.f32 %v14121_v7, %v2169_v36  ;;  %v2649_v15 = vadd.f32 %v12429_v24, %v2489_v6  ;;  %v14126_v7 = vld [vmem:[#allocation55_spill] sm:$0xff]  ;;  %v14127_v24 = vld [vmem:[#allocation64_spill] sm:$0xff]  ;;  %v3123_v46 = vadd.f32 %v12444_v45, %v2961_v51  ;;  %v12958_v54 = vpop.f32.mrf.mxu0  ;;  %v14133_v51 = vld [vmem:[#allocation57_spill] sm:$0xff]  ;;  %9479 = vmatprep.subr.mxu1 %v5279_v28 }
 0x3a5   : > { %v12928_v53 = vpop.f32.mrf.mxu1  ;;  %v2173_v45 = vadd.f32 %v14132_v43, %v2019_v63  ;;  %9480 = vmatpush3.msra.mxu1 %v5279_v28 }
 0x3a6   : > { %v2491_v36 = vadd.f32 %v14126_v7, %v2331_v60  ;;  %v2809_v6 = vadd.f32 %v14127_v24, %v2649_v15  ;;  %v3283_v5 = vadd.f32 %v12719_v20, %v3123_v46  ;;  %v14131_v60 = vld [vmem:[#allocation35_spill] sm:$0xff]  ;;  %v14134_v7 = vld [vmem:[#allocation66_spill] sm:$0xff]  ;;  %9481 = vmatprep.subr.mxu1 %v5278_v40 }
 0x3a7   : > { %v1829_v15 = vadd.f32 %v14131_v60, %v1637_v49  ;;  %v14136_v20 = vld [vmem:[#allocation59_spill] sm:$0xff]  ;;  %v14138_v46 = vld [vmem:[#allocation6_spill] sm:$0xff]  ;;  %9482 = vmatpush3.msra.mxu1 %v5278_v40 }
 0x3a8   : > { %v2651_v23 = vadd.f32 %v12455_v22, %v2491_v36  ;;  %v2963_v50 = vadd.f32 %v12598_v25, %v2809_v6  ;;  %v3443_v25 = vadd.f32 %v12612_v27, %v3283_v5  ;;  %v14137_v24 = vld [vmem:[#allocation67_spill] sm:$0xff]  ;;  %v14140_v60 = vld [vmem:[#allocation58_spill] sm:$0xff] }
 0x3a9   : > { %v8934_v44 = vpop.f32.mrf.mxu1  ;;  %v2021_v36 = vadd.f32 %v14136_v20, %v1829_v15  ;;  %v2335_v6 = vadd.f32 %v14137_v24, %v2173_v45  ;;  %v14141_v15 = vld [vmem:[#allocation68_spill] sm:$0xff] }
 0x3aa   : > { %v12941_v62 = vadd.f32 %v8934_v44, %v3454_v14  ;;  %v14130_v14 = vld [vmem:[#allocation65_spill] sm:$0xff]  ;;  %v2811_v12 = vadd.f32 %v14134_v7, %v2651_v23  ;;  %v3603_v27 = vadd.f32 %v12851_v55, %v3443_v25  ;;  %v14142_v45 = vld [vmem:[#allocation72_spill] sm:$0xff]  ;;  %v14144_v25 = vld [vmem:[#allocation71_spill] sm:$0xff] }
 0x3ab   : > { %v2333_v44 = vadd.f32 %v14130_v14, %v2171_v16  ;;  %v14135_v16 = vld [vmem:[#allocation4_spill] sm:$0xff]  ;;  %v12977_v14 = vpop.f32.mrf.mxu0  ;;  %v5277_v23 = vld [vmem:[%s13942_s5 + $0x68] sm:$0xff] }
 0x3ac   : > { %v3125_v22 = vadd.f32 %v14135_v16, %v2963_v50  ;;  %v2965_v49 = vadd.f32 %v12619_v21, %v2811_v12  ;;  %v3758_v21 = vadd.f32 %v12745_v34, %v12848_v10  ;;  %9483 = vmatprep.subr.mxu1 %v5277_v23  ;;  %v14139_v50 = vld [vmem:[#allocation48_spill] sm:$0xff]  ;;  %v3757_v28 = vadd.f32 %v12761_v19, %v3603_v27  ;;  %v14143_v16 = vld [vmem:[#allocation70_spill] sm:$0xff]  ;;  %v14146_v27 = vld [vmem:[#allocation69_spill] sm:$0xff] }
 0x3ad   : > { %v2493_v57 = vadd.f32 %v14133_v51, %v2333_v44  ;;  %v12980_v44 = vpop.f32.mrf.mxu1  ;;  %v2175_v5 = vadd.f32 %v14139_v50, %v2021_v36  ;;  %9484 = vmatpush3.msra.mxu1 %v5277_v23  ;;  %v5276_v7 = vld [vmem:[%s13942_s5 + $0x60] sm:$0xff]  ;;  %v12997_v34 = vpop.f32.mrf.mxu0 }
 0x3ae   : > { %v3285_v63 = vadd.f32 %v12736_v35, %v3125_v22  ;;  %v2495_v35 = vadd.f32 %v14140_v60, %v2335_v6  ;;  %v3127_v55 = vadd.f32 %v14142_v45, %v2965_v49  ;;  %9485 = vmatprep.subr.mxu1 %v5276_v7  ;;  %v7126_v6 = vld [vmem:[%s13942_s5 + $0xf0] sm:$0xff]  ;;  %v7124_v60 = vld [vmem:[%s13942_s5 + $0xe0] sm:$0xff] }
 0x3af   : > { %v2653_v37 = vadd.f32 %v14138_v46, %v2493_v57  ;;  %v7127_v57 = vld [vmem:[%s13942_s5 + $0xf8] sm:$0xff]  ;;  %v2337_v22 = vadd.f32 %v14143_v16, %v2175_v5  ;;  %9486 = vmatpush3.msra.mxu1 %v5276_v7  ;;  %v5274_v49 = vld [vmem:[%s13942_s5 + $0x50] sm:$0xff]  ;;  %v13022_v40 = vpop.f32.mrf.mxu0 }
 0x3b0   : > { %v3445_v10 = vadd.f32 %v12639_v47, %v3285_v63  ;;  %9435 = vmatprep.subr.mxu0 %v7127_v57  ;;  %v2655_v20 = vadd.f32 %v14144_v25, %v2495_v35  ;;  %v5275_v47 = vld [vmem:[%s13942_s5 + $0x58] sm:$0xff]  ;;  %v3287_v19 = vadd.f32 %v12759_v3, %v3127_v55  ;;  %v3760_v3 = vadd.f32 %v12773_v8, %v12864_v2  ;;  %v5273_v35 = vld [vmem:[%s13942_s5 + $0x48] sm:$0xff] }
 0x3b1   : > { %v2813_v43 = vadd.f32 %v14141_v15, %v2653_v37  ;;  %9436 = vmatpush3.msra.mxu0 %v7127_v57  ;;  %9487 = vmatprep.subr.mxu1 %v5275_v47  ;;  %v7123_v57 = vld [vmem:[%s13942_s5 + $0xd8] sm:$0xff] }
 0x3b2   : > { %v3605_v46 = vadd.f32 %v12866_v33, %v3445_v10  ;;  %9437 = vmatprep.subr.mxu0 %v7126_v6  ;;  %9488 = vmatpush3.msra.mxu1 %v5275_v47  ;;  %v14145_v33 = vld [vmem:[#allocation60_spill] sm:$0xff]  ;;  %v2815_v23 = vadd.f32 %v14146_v27, %v2655_v20  ;;  %v3447_v8 = vadd.f32 %v12665_v56, %v3287_v19  ;;  %v13051_v10 = vpop.f32.mrf.mxu0  ;;  %v5271_v16 = vld [vmem:[%s13942_s5 + $0x38] sm:$0xff]  ;;  %v5269_v19 = vld [vmem:[%s13942_s5 + $0x28] sm:$0xff] }
 0x3b3   : > { %v2967_v36 = vadd.f32 %v12636_v30, %v2813_v43  ;;  %9438 = vmatpush3.msra.mxu0 %v7126_v6  ;;  %v7125_v30 = vld [vmem:[%s13942_s5 + $0xe8] sm:$0xff]  ;;  %9489 = vmatprep.subr.mxu1 %v5274_v49  ;;  %v2497_v63 = vadd.f32 %v14145_v33, %v2337_v22  ;;  %v14148_v43 = vld [vmem:[#allocation7_spill] sm:$0xff]  ;;  %v5272_v56 = vld [vmem:[%s13942_s5 + $0x40] sm:$0xff] }
 0x3b4   : > { %9439 = vmatprep.subr.mxu0 %v7125_v30  ;;  %9490 = vmatpush3.msra.mxu1 %v5274_v49  ;;  %v3759_v15 = vadd.f32 %v12788_v29, %v3605_v46  ;;  %v2969_v55 = vadd.f32 %v12659_v17, %v2815_v23  ;;  %v7122_v29 = vld [vmem:[%s13942_s5 + $0xd0] sm:$0xff]  ;;  %v3607_v17 = vadd.f32 %v12891_v41, %v3447_v8  ;;  %v7121_v22 = vld [vmem:[%s13942_s5 + $0xc8] sm:$0xff]  ;;  %v14149_v25 = vld [vmem:[#allocation11_spill] sm:$0xff]  ;;  %v13075_v46 = vpop.f32.mrf.mxu0 }
 0x3b5   : > { %9440 = vmatpush3.msra.mxu0 %v7125_v30  ;;  %9491 = vmatprep.subr.mxu1 %v5273_v35  ;;  %v2657_v45 = vadd.f32 %v14148_v43, %v2497_v63  ;;  %v3762_v41 = vadd.f32 %v12809_v18, %v12887_v59  ;;  %v7120_v47 = vld [vmem:[%s13942_s5 + $0xc0] sm:$0xff]  ;;  %v7119_v63 = vld [vmem:[%s13942_s5 + $0xb8] sm:$0xff]  ;;  %v5266_v8 = vld [vmem:[%s13942_s5 + $0x10] sm:$0xff] }
 0x3b6   : > { %9441 = vmatprep.subr.mxu0 %v7124_v60  ;;  %9492 = vmatpush3.msra.mxu1 %v5273_v35  ;;  %v3761_v30 = vadd.f32 %v12822_v11, %v3607_v17  ;;  %v13087_v27 = vpop.f32.mrf.mxu0  ;;  %v7117_v35 = vld [vmem:[%s13942_s5 + $0xa8] sm:$0xff] }
 0x3b7   : > { %v9019_v51 = vpop.f32.mrf.mxu1  ;;  %9442 = vmatpush3.msra.mxu0 %v7124_v60  ;;  %9493 = vmatprep.subr.mxu1 %v5272_v56  ;;  %v2817_v20 = vadd.f32 %v14149_v25, %v2657_v45  ;;  %v5265_v45 = vld [vmem:[%s13942_s5 + $0x8] sm:$0xff] }
 0x3b8   : > { %v13000_v12 = vadd.f32 %v9019_v51, %v3758_v21  ;;  %v14147_v21 = vld [vmem:[#allocation5_spill] sm:$0xff]  ;;  %9443 = vmatprep.subr.mxu0 %v7123_v57  ;;  %9494 = vmatpush3.msra.mxu1 %v5272_v56  ;;  %v5264_v56 = vld [vmem:[%s13942_s5] sm:$0xff] }
 0x3b9   : > { %v3860_v24 = vpop.f32.mrf.mxu1  ;;  %v3129_v50 = vadd.f32 %v14147_v21, %v2967_v36  ;;  %9444 = vmatpush3.msra.mxu0 %v7123_v57  ;;  %9495 = vmatprep.subr.mxu1 %v5271_v16  ;;  %v14150_v36 = vld [vmem:[#allocation9_spill] sm:$0xff]  ;;  %v2971_v49 = vadd.f32 %v12705_v58, %v2817_v20  ;;  %v7115_v57 = vld [vmem:[%s13942_s5 + $0x98] sm:$0xff] }
 0x3ba   : > { %v13014_v37 = vadd.f32 %v3860_v24, %v3757_v28  ;;  %9445 = vmatprep.subr.mxu0 %v7122_v29  ;;  %v3131_v24 = vadd.f32 %v14150_v36, %v2969_v55  ;;  %9496 = vmatpush3.msra.mxu1 %v5271_v16  ;;  %v14153_v16 = vld [vmem:[#allocation8_spill] sm:$0xff] }
 0x3bb   : > { %v3289_v7 = vadd.f32 %v12780_v1, %v3129_v50  ;;  %v5270_v1 = vld [vmem:[%s13942_s5 + $0x30] sm:$0xff]  ;;  %9446 = vmatpush3.msra.mxu0 %v7122_v29  ;;  %v3133_v21 = vadd.f32 %v12591_v42, %v2971_v49 }
 0x3bc   : > { %9447 = vmatprep.subr.mxu0 %v7121_v22  ;;  %9497 = vmatprep.subr.mxu1 %v5270_v1  ;;  %v14152_v29 = vld [vmem:[#allocation10_spill] sm:$0xff] }
 0x3bd   : > { %v9022_v5 = vpop.f32.mrf.mxu1  ;;  %v3449_v18 = vadd.f32 %v12688_v9, %v3289_v7  ;;  %9448 = vmatpush3.msra.mxu0 %v7121_v22  ;;  %9498 = vmatpush3.msra.mxu1 %v5270_v1  ;;  %v5268_v9 = vld [vmem:[%s13942_s5 + $0x20] sm:$0xff]  ;;  %v7114_v1 = vld [vmem:[%s13942_s5 + $0x90] sm:$0xff] }
 0x3be   : > { %v13036_v2 = vadd.f32 %v9022_v5, %v3760_v3  ;;  %v3291_v3 = vadd.f32 %v12807_v13, %v3131_v24  ;;  %9449 = vmatprep.subr.mxu0 %v7120_v47  ;;  %9499 = vmatprep.subr.mxu1 %v5269_v19  ;;  %v3764_v13 = vadd.f32 %v12832_v32, %v12903_v52  ;;  %v13104_v5 = vpop.f32.mrf.mxu0  ;;  %v7113_v24 = vld [vmem:[%s13942_s5 + $0x88] sm:$0xff] }
 0x3bf   : > { %v3870_v51 = vpop.f32.mrf.mxu1  ;;  %v3609_v11 = vadd.f32 %v12908_v61, %v3449_v18  ;;  %9450 = vmatpush3.msra.mxu0 %v7120_v47  ;;  %9500 = vmatpush3.msra.mxu1 %v5269_v19  ;;  %v7118_v61 = vld [vmem:[%s13942_s5 + $0xb0] sm:$0xff]  ;;  %v7112_v19 = vld [vmem:[%s13942_s5 + $0x80] sm:$0xff] }
 0x3c0   : > { %v13054_v28 = vadd.f32 %v3870_v51, %v3759_v15  ;;  %9451 = vmatprep.subr.mxu0 %v7119_v63  ;;  %9501 = vmatprep.subr.mxu1 %v5268_v9  ;;  %v3451_v60 = vadd.f32 %v12712_v26, %v3291_v3  ;;  %v3293_v15 = vadd.f32 %v12841_v48, %v3133_v21  ;;  %v13126_v55 = vpop.f32.mrf.mxu0  ;;  %v14151_v48 = vld [vmem:[#allocation27_spill] sm:$0xff] }
 0x3c1   : > { %9452 = vmatpush3.msra.mxu0 %v7119_v63  ;;  %9502 = vmatpush3.msra.mxu1 %v5268_v9  ;;  %v3763_v52 = vadd.f32 %v12837_v31, %v3609_v11  ;;  %v7116_v31 = vld [vmem:[%s13942_s5 + $0xa0] sm:$0xff]  ;;  %v3766_v51 = vadd.f32 %v14151_v48, %v12922_v4  ;;  %v13164_v3 = vld [vmem:[%s13942_s5 + $0x178] sm:$0xff] }
 0x3c2   : > { %9453 = vmatprep.subr.mxu0 %v7118_v61  ;;  %v3611_v26 = vadd.f32 %v12928_v53, %v3451_v60  ;;  %v3453_v7 = vadd.f32 %v14152_v29, %v3293_v15  ;;  %v13146_v25 = vpop.f32.mrf.mxu0  ;;  %14156 = vst [vmem:[#allocation37_spill] sm:$0xff] %v13164_v3 }
 0x3c3   : > { %v9025_v6 = vpop.f32.mrf.mxu1  ;;  %9454 = vmatpush3.msra.mxu0 %v7118_v61 }
 0x3c4   : > { %v3924_v59 = vadd.f32 %v9025_v6, %v3762_v41  ;;  %9455 = vmatprep.subr.mxu0 %v7117_v35  ;;  %v3765_v22 = vadd.f32 %v14153_v16, %v3611_v26  ;;  %v13144_v41 = vld [vmem:[%s13942_s5 + $0x1f8] sm:$0xff]  ;;  %v3613_v20 = vadd.f32 %v12980_v44, %v3453_v7  ;;  %v3768_v6 = vadd.f32 %v12862_v39, %v12941_v62  ;;  %v13158_v44 = vpop.f32.mrf.mxu0 }
 0x3c5   : > { %v3880_v33 = vpop.f32.mrf.mxu1  ;;  %9456 = vmatpush3.msra.mxu0 %v7117_v35  ;;  %14154 = vst [vmem:[#allocation23_spill] sm:$0xff] %v13144_v41 }
 0x3c6   : > { %v13090_v23 = vadd.f32 %v3880_v33, %v3761_v30  ;;  %v13093_v58 = vadd.f32 %v12937_v38, %v3924_v59  ;;  %v5267_v38 = vld [vmem:[%s13942_s5 + $0x18] sm:$0xff]  ;;  %9457 = vmatprep.subr.mxu0 %v7116_v31  ;;  %v14155_v59 = vld [vmem:[#allocation12_spill] sm:$0xff]  ;;  %v13167_v62 = vpop.f32.mrf.mxu0 }
 0x3c7   : > { %9503 = vmatprep.subr.mxu1 %v5267_v38  ;;  %9458 = vmatpush3.msra.mxu0 %v7116_v31  ;;  %v3767_v30 = vadd.f32 %v14155_v59, %v3613_v20 }
 0x3c8   : > { %9504 = vmatpush3.msra.mxu1 %v5267_v38  ;;  %9459 = vmatprep.subr.mxu0 %v7115_v57  ;;  %v13169_v33 = vpop.f32.mrf.mxu0 }
 0x3c9   : > { %v9028_v50 = vpop.f32.mrf.mxu1  ;;  %9505 = vmatprep.subr.mxu1 %v5266_v8  ;;  %9460 = vmatpush3.msra.mxu0 %v7115_v57 }
 0x3ca   : > { %v13107_v32 = vadd.f32 %v9028_v50, %v3764_v13  ;;  %9506 = vmatpush3.msra.mxu1 %v5266_v8  ;;  %9461 = vmatprep.subr.mxu0 %v7114_v1  ;;  %v13171_v63 = vpop.f32.mrf.mxu0 }
 0x3cb   : > { %v3890_v42 = vpop.f32.mrf.mxu1  ;;  %9507 = vmatprep.subr.mxu1 %v5265_v45  ;;  %9462 = vmatpush3.msra.mxu0 %v7114_v1 }
 0x3cc   : > { %v13118_v43 = vadd.f32 %v3890_v42, %v3763_v52  ;;  %9508 = vmatpush3.msra.mxu1 %v5265_v45  ;;  %9463 = vmatprep.subr.mxu0 %v7113_v24  ;;  %v9181_v13 = vpop.f32.mrf.mxu0  ;;  %v4086_v35 = vadd.f32 %v12958_v54, %v13107_v32 }
 0x3cd   : > { %9509 = vmatprep.subr.mxu1 %v5264_v56  ;;  %9464 = vmatpush3.msra.mxu0 %v7113_v24 }
 0x3ce   : > { %9510 = vmatpush3.msra.mxu1 %v5264_v56  ;;  %9465 = vmatprep.subr.mxu0 %v7112_v19  ;;  %v13179_v50 = vpop.f32.mrf.mxu0 }
 0x3cf   : > { %v9031_v53 = vpop.f32.mrf.mxu1  ;;  %9567 = vmatprep.subr.mxu1 %v13144_v41  ;;  %9466 = vmatpush3.msra.mxu0 %v7112_v19 }
 0x3d0   : > { %v3928_v17 = vadd.f32 %v9031_v53, %v3766_v51  ;;  %9523 = vmatprep.subr.mxu0 %v13164_v3  ;;  %v9184_v60 = vpop.f32.mrf.mxu0 }
 0x3d1   : > { %v3900_v4 = vpop.f32.mrf.mxu1 }
 0x3d2   : > { %v3927_v36 = vadd.f32 %v3900_v4, %v3765_v22  ;;  %v4390_v8 = vpop.f32.mrf.mxu0  ;;  %v4088_v48 = vadd.f32 %v12997_v34, %v3928_v17 }
 0x3d4   : > { %v13192_v31 = vpop.f32.mrf.mxu0  ;;  %v4087_v57 = vadd.f32 %v13022_v40, %v3927_v36 }
 0x3d5   : > { %v9034_v47 = vpop.f32.mrf.mxu1 }
 0x3d6   : > { %v3930_v18 = vadd.f32 %v9034_v47, %v3768_v6  ;;  %v13197_v53 = vpop.f32.mrf.mxu0 }
 0x3d7   : > { %v3910_v49 = vpop.f32.mrf.mxu1 }
 0x3d8   : > { %v3929_v39 = vadd.f32 %v3910_v49, %v3767_v30  ;;  %v4090_v54 = vadd.f32 %v13051_v10, %v3930_v18  ;;  %v13203_v32 = vpop.f32.mrf.mxu0 }
 0x3da   : > { %v4089_v22 = vadd.f32 %v13075_v46, %v3929_v39  ;;  %v13206_v34 = vpop.f32.mrf.mxu0 }
 0x3dc   : > { %v13208_v17 = vpop.f32.mrf.mxu0 }
 0x3de   : > { %v13210_v20 = vpop.f32.mrf.mxu0 }
 0x3e0   : > { %v13212_v24 = vpop.f32.mrf.mxu0 }
 0x3e1   : > { %14157 = vst [vmem:[#allocation18_spill] sm:$0xff] %v13212_v24 }
 0x3e2   : > { %v13214_v47 = vpop.f32.mrf.mxu0 }
 0x3e3   : > { %v13173_v9 = vpop.f32.mrf.mxu1  ;;  %14158 = vst [vmem:[#allocation24_spill] sm:$0xff] %v13214_v47 }
 0x3e4   : > { %v13220_v46 = vpop.f32.mrf.mxu0 }
 0x3e5   : > { %v13175_v11 = vpop.f32.mrf.mxu1  ;;  %14159 = vst [vmem:[#allocation26_spill] sm:$0xff] %v13220_v46 }
 0x3e6   : > { %v13226_v39 = vpop.f32.mrf.mxu0 }
 0x3e7   : > { %14160 = vst [vmem:[#allocation39_spill] sm:$0xff] %v13226_v39 }
 0x3e8   : > { %v13177_v21 = vpop.f32.mrf.mxu1 }
 0x3ea   : > { %v13181_v61 = vpop.f32.mrf.mxu1 }
 0x3ed   : > { %v9125_v38 = vpop.f32.mrf.mxu1 }
 0x3ee   : > { %v13184_v52 = vadd.f32 %v9125_v38, %v13093_v58 }
 0x3ef   : > { %v13186_v42 = vpop.f32.mrf.mxu1 }
 0x3f2   : > { %v9128_v15 = vpop.f32.mrf.mxu1 }
 0x3f3   : > { %v13190_v26 = vadd.f32 %v9128_v15, %v4086_v35 }
 0x3f4   : > { %v13194_v45 = vpop.f32.mrf.mxu1 }
 0x3f7   : > { %v9131_v51 = vpop.f32.mrf.mxu1 }
 0x3f8   : > { %v4248_v58 = vadd.f32 %v9131_v51, %v4088_v48  ;;  %v9284_v51 = vpop.f32.mrf.mxu0 }
 0x3f9   : > { %v4220_v56 = vpop.f32.mrf.mxu1 }
 0x3fa   : > { %v13200_v29 = vadd.f32 %v4220_v56, %v4087_v57  ;;  %v4408_v49 = vadd.f32 %v9181_v13, %v4248_v58 }
 0x3fc   : > { %v9134_v7 = vpop.f32.mrf.mxu1 }
 0x3fd   : > { %v4250_v16 = vadd.f32 %v9134_v7, %v4090_v54 }
 0x3fe   : > { %v4230_v4 = vpop.f32.mrf.mxu1 }
 0x3ff   : > { %v4249_v1 = vadd.f32 %v4230_v4, %v4089_v22  ;;  %v4410_v48 = vadd.f32 %v9184_v60, %v4250_v16  ;;  %v4706_v4 = vpop.f32.mrf.mxu0  ;;  %v14164_v60 = vld [vmem:[#allocation13_spill] sm:$0xff] }
 0x400   : > { %v4080_v16 = vadd.f32 %v14164_v60, %v13000_v12  ;;  %v14169_v12 = vld [vmem:[#allocation17_spill] sm:$0xff] }
 0x401   : > { %v4409_v54 = vadd.f32 %v4390_v8, %v4249_v1  ;;  %v9369_v58 = vpop.f32.mrf.mxu0  ;;  %v14166_v1 = vld [vmem:[#allocation14_spill] sm:$0xff]  ;;  %v4081_v60 = vadd.f32 %v14169_v12, %v13054_v28 }
 0x402   : > { %v4240_v8 = vadd.f32 %v13173_v9, %v4080_v16 }
 0x404   : > { %v4400_v9 = vadd.f32 %v13087_v27, %v4240_v8 }
 0x408   : > { %v9219_v40 = vpop.f32.mrf.mxu1 }
 0x40a   : > { %v4494_v36 = vpop.f32.mrf.mxu1 }
 0x40c   : > { %v9222_v6 = vpop.f32.mrf.mxu1 }
 0x40e   : > { %v4504_v10 = vpop.f32.mrf.mxu1 }
 0x410   : > { %v13216_v19 = vpop.f32.mrf.mxu1 }
 0x412   : > { %v13218_v18 = vpop.f32.mrf.mxu1 }
 0x414   : > { %v13222_v59 = vpop.f32.mrf.mxu1 }
 0x416   : > { %v13224_v30 = vpop.f32.mrf.mxu1 }
 0x418   : > { %v9231_v38 = vpop.f32.mrf.mxu1 }
 0x419   : > { %v13228_v35 = vadd.f32 %v9231_v38, %v4408_v49  ;;  %v4976_v49 = vpop.f32.mrf.mxu0 }
 0x41a   : > { %v13230_v15 = vpop.f32.mrf.mxu1 }
 0x41b   : > { %14161 = vst [vmem:[#allocation49_spill] sm:$0xff] %v13228_v35  ;;  %14162 = vst [vmem:[#allocation19_spill] sm:$0xff] %v13230_v15 }
 0x41c   : > { %v9234_v57 = vpop.f32.mrf.mxu1 }
 0x41d   : > { %v4564_v56 = vadd.f32 %v9234_v57, %v4410_v48  ;;  %v4079_v57 = vadd.f32 %v14166_v1, %v13014_v37  ;;  %v4241_v1 = vadd.f32 %v13181_v61, %v4081_v60 }
 0x41e   : > { %v4544_v7 = vpop.f32.mrf.mxu1 }
 0x41f   : > { %v4563_v22 = vadd.f32 %v4544_v7, %v4409_v54  ;;  %v9372_v54 = vpop.f32.mrf.mxu0  ;;  %v4726_v16 = vadd.f32 %v9284_v51, %v4564_v56  ;;  %v4401_v61 = vadd.f32 %v13146_v25, %v4241_v1 }
 0x421   : > { %v4725_v46 = vadd.f32 %v4706_v4, %v4563_v22  ;;  %v4239_v22 = vadd.f32 %v13175_v11, %v4079_v57  ;;  %v14168_v4 = vld [vmem:[#allocation15_spill] sm:$0xff]  ;;  %v4555_v8 = vadd.f32 %v4504_v10, %v4401_v61 }
 0x422   : > { %v4082_v35 = vadd.f32 %v14168_v4, %v13036_v2  ;;  %v4083_v2 = vadd.f32 %v12950_v0, %v13090_v23  ;;  %v4404_v0 = vadd.f32 %v13158_v44, %v13184_v52 }
 0x423   : > { %v4399_v11 = vadd.f32 %v13104_v5, %v4239_v22  ;;  %v4085_v5 = vadd.f32 %v12977_v14, %v13118_v43  ;;  %v4406_v14 = vadd.f32 %v13169_v33, %v13190_v26  ;;  %v4717_v44 = vadd.f32 %v13206_v34, %v4555_v8  ;;  %v14170_v22 = vld [vmem:[#allocation18_spill] sm:$0xff] }
 0x424   : > { %v4243_v27 = vadd.f32 %v13186_v42, %v4083_v2 }
 0x425   : > { %v4560_v52 = vadd.f32 %v13222_v59, %v4406_v14 }
 0x426   : > { %v4403_v42 = vadd.f32 %v13167_v62, %v4243_v27 }
 0x428   : > { %v9319_v3 = vpop.f32.mrf.mxu1 }
 0x42a   : > { %v4816_v41 = vpop.f32.mrf.mxu1 }
 0x42c   : > { %v9322_v47 = vpop.f32.mrf.mxu1 }
 0x42e   : > { %v4826_v13 = vpop.f32.mrf.mxu1 }
 0x430   : > { %v9325_v39 = vpop.f32.mrf.mxu1 }
 0x432   : > { %v13232_v24 = vpop.f32.mrf.mxu1 }
 0x434   : > { %v13234_v38 = vpop.f32.mrf.mxu1 }
 0x435   : > { %14163 = vst [vmem:[#allocation28_spill] sm:$0xff] %v13234_v38  ;;  %v4242_v38 = vadd.f32 %v13177_v21, %v4082_v35  ;;  %v4553_v35 = vadd.f32 %v4494_v36, %v4399_v11  ;;  %v4245_v36 = vadd.f32 %v13194_v45, %v4085_v5  ;;  %v14173_v11 = vld [vmem:[#allocation24_spill] sm:$0xff] }
 0x436   : > { %v13238_v48 = vpop.f32.mrf.mxu1 }
 0x437   : > { %14165 = vst [vmem:[#allocation29_spill] sm:$0xff] %v13238_v48  ;;  %v4986_v48 = vpop.f32.mrf.mxu0  ;;  %v4402_v28 = vadd.f32 %v13126_v55, %v4242_v38  ;;  %v4715_v55 = vadd.f32 %v13197_v53, %v4553_v35  ;;  %v4405_v45 = vadd.f32 %v13171_v63, %v4245_v36  ;;  %v4877_v53 = vadd.f32 %v4826_v13, %v4717_v44 }
 0x438   : > { %v13243_v7 = vpop.f32.mrf.mxu1 }
 0x439   : > { %14167 = vst [vmem:[#allocation38_spill] sm:$0xff] %v13243_v7  ;;  %v4554_v7 = vadd.f32 %v9219_v40, %v4400_v9  ;;  %v9375_v21 = vpop.f32.mrf.mxu0  ;;  %v4556_v51 = vadd.f32 %v9222_v6, %v4402_v28  ;;  %v4558_v6 = vadd.f32 %v13216_v19, %v4404_v0  ;;  %v4875_v25 = vadd.f32 %v4816_v41, %v4715_v55  ;;  %v13284_v41 = vld [vmem:[%s13941_s4] ss:$0 sm:$0xff]  ;;  %v7158_v0 = vld [vmem:[%s13942_s5 + $0x1f0] sm:$0xff]  ;;  %v14175_v55 = vld [vmem:[#allocation39_spill] sm:$0xff] }
 0x43a   : > { %v13248_v15 = vpop.f32.mrf.mxu1  ;;  %v4559_v26 = vadd.f32 %v13224_v30, %v4405_v45  ;;  %v5037_v9 = vadd.f32 %v4986_v48, %v4877_v53 }
 0x43b   : > { %v4716_v40 = vadd.f32 %v13192_v31, %v4554_v7  ;;  %v4996_v56 = vpop.f32.mrf.mxu0  ;;  %v4718_v31 = vadd.f32 %v13203_v32, %v4556_v51  ;;  %v4720_v32 = vadd.f32 %v13208_v17, %v4558_v6  ;;  %v5035_v33 = vadd.f32 %v4976_v49, %v4875_v25 }
 0x43c   : > { %v9334_v37 = vpop.f32.mrf.mxu1  ;;  %v4407_v7 = vadd.f32 %v13179_v50, %v13200_v29  ;;  %v4722_v17 = vadd.f32 %v14170_v22, %v4560_v52  ;;  %v7142_v22 = vld [vmem:[%s13942_s5 + $0x170] sm:$0xff] }
 0x43d   : > { %v13256_v57 = vadd.f32 %v9334_v37, %v4726_v16  ;;  %v4876_v23 = vadd.f32 %v9319_v3, %v4716_v40  ;;  %v9378_v43 = vpop.f32.mrf.mxu0  ;;  %v4878_v10 = vadd.f32 %v9322_v47, %v4718_v31  ;;  %v4880_v59 = vadd.f32 %v9325_v39, %v4720_v32  ;;  %v14171_v16 = vld [vmem:[#allocation19_spill] sm:$0xff]  ;;  %v14172_v37 = vld [vmem:[#allocation28_spill] sm:$0xff] }
 0x43e   : > { %v4866_v4 = vpop.f32.mrf.mxu1  ;;  %v4561_v39 = vadd.f32 %v14171_v16, %v4407_v7  ;;  %v4882_v1 = vadd.f32 %v14172_v37, %v4722_v17  ;;  %v14174_v28 = vld [vmem:[#allocation29_spill] sm:$0xff]  ;;  %v7155_v17 = vld [vmem:[%s13942_s5 + $0x1d8] sm:$0xff] }
 0x43f   : > { %v13261_v12 = vadd.f32 %v4866_v4, %v4725_v46  ;;  %v4557_v46 = vadd.f32 %v13218_v18, %v4403_v42  ;;  %v5036_v3 = vadd.f32 %v9369_v58, %v4876_v23  ;;  %v5006_v18 = vpop.f32.mrf.mxu0  ;;  %v5038_v38 = vadd.f32 %v9372_v54, %v4878_v10  ;;  %v14176_v10 = vld [vmem:[#allocation23_spill] sm:$0xff] }
 0x440   : > { %v4721_v54 = vadd.f32 %v14173_v11, %v4559_v26  ;;  %v5040_v35 = vadd.f32 %v9375_v21, %v4880_v59  ;;  %v4723_v36 = vadd.f32 %v14175_v55, %v4561_v39  ;;  %v5042_v42 = vadd.f32 %v9378_v43, %v4882_v1  ;;  %v7141_v1 = vld [vmem:[%s13942_s5 + $0x168] sm:$0xff] }
 0x441   : > { %v4719_v34 = vadd.f32 %v13210_v20, %v4557_v46  ;;  %v13300_v4 = vpop.f32.mrf.mxu0 }
 0x442   : > { %v4881_v27 = vadd.f32 %v14174_v28, %v4721_v54  ;;  %v4883_v52 = vadd.f32 %v13248_v15, %v4723_v36  ;;  %v7156_v15 = vld [vmem:[%s13942_s5 + $0x1e0] sm:$0xff] }
 0x443   : > { %v4879_v13 = vadd.f32 %v13232_v24, %v4719_v34  ;;  %v5016_v25 = vpop.f32.mrf.mxu0 }
 0x444   : > { %v5041_v45 = vadd.f32 %v5006_v18, %v4881_v27  ;;  %v5043_v16 = vadd.f32 %v5016_v25, %v4883_v52  ;;  %v7151_v52 = vld [vmem:[%s13942_s5 + $0x1b8] sm:$0xff] }
 0x445   : > { %v5039_v61 = vadd.f32 %v4996_v56, %v4879_v13  ;;  %v9384_v59 = vpop.f32.mrf.mxu0 }
 0x446   : > { %v5046_v11 = vadd.f32 %v9384_v59, %v13256_v57  ;;  %v7149_v59 = vld [vmem:[%s13942_s5 + $0x1a8] sm:$0xff] }
 0x447   : > { %v5026_v54 = vpop.f32.mrf.mxu0 }
 0x448   : > { %v9419_v62 = vpop.f32.mrf.mxu1  ;;  %v5045_v57 = vadd.f32 %v5026_v54, %v13261_v12  ;;  %v7153_v12 = vld [vmem:[%s13942_s5 + $0x1c8] sm:$0xff]  ;;  %v14179_v54 = vld [vmem:[#allocation26_spill] sm:$0xff] }
 0x449   : > { %v5196_v19 = vadd.f32 %v9419_v62, %v5036_v3  ;;  %v7157_v3 = vld [vmem:[%s13942_s5 + $0x1e8] sm:$0xff] }
 0x44a   : > { %v5136_v47 = vpop.f32.mrf.mxu1 }
 0x44b   : > { %v5215_v63 = vadd.f32 %v13284_v41, %v5196_v19  ;;  %v5195_v58 = vadd.f32 %v5136_v47, %v5035_v33 }
 0x44c   : > { %v9422_v60 = vpop.f32.mrf.mxu1 }
 0x44d   : > { %v13294_v49 = vmax.f32 %v5215_v63, 0.0  ;;  %v5214_v30 = vadd.f32 %v13284_v41, %v5195_v58  ;;  %v5198_v20 = vadd.f32 %v9422_v60, %v5038_v38 }
 0x44e   : > { %v5146_v2 = vpop.f32.mrf.mxu1 }
 0x44f   : > { %v5226_v50 = vmax.f32 %v5214_v30, 0.0  ;;  %v5217_v29 = vadd.f32 %v13284_v41, %v5198_v20  ;;  %v5197_v24 = vadd.f32 %v5146_v2, %v5037_v9  ;;  %v5307_v48 = vrot.slane %v13294_v49, 1  ;;  %v14177_v9 = vld [vmem:[#allocation37_spill] sm:$0xff] }
 0x450   : > { %v9425_v51 = vpop.f32.mrf.mxu1  ;;  %v5559_v6 = vrot.slane %v13294_v49, 2 }
 0x451   : > { %v13305_v40 = vmax.f32 %v5217_v29, 0.0  ;;  %v5216_v5 = vadd.f32 %v13284_v41, %v5197_v24  ;;  %v5200_v8 = vadd.f32 %v9425_v51, %v5040_v35  ;;  %9511 = vmatprep.mubr.f32.mxu1 %v5226_v50  ;;  %v5306_v23 = vrot.slane %v5226_v50, 1  ;;  %v7154_v29 = vld [vmem:[%s13942_s5 + $0x1d0] sm:$0xff] }
 0x452   : > { %v5156_v21 = vpop.f32.mrf.mxu1  ;;  %9512 = vmatmul.mubr.f32.vlgmr.msra.gmra.mxu1 %v13294_v49  ;;  %v5558_v56 = vrot.slane %v5226_v50, 2 }
 0x453   : > { %v13314_v31 = vmax.f32 %v5216_v5, 0.0  ;;  %v5219_v46 = vadd.f32 %v13284_v41, %v5200_v8  ;;  %v5199_v14 = vadd.f32 %v5156_v21, %v5039_v61  ;;  %9568 = vmatpush3.msra.mxu1 %v14176_v10  ;;  %v5308_v44 = vsel %vm1159_vm0, %v5306_v23, %v5307_v48  ;;  %v7140_v5 = vld [vmem:[%s13942_s5 + $0x160] sm:$0xff]  ;;  %v7139_v21 = vld [vmem:[%s13942_s5 + $0x158] sm:$0xff] }
 0x454   : > { %9569 = vmatprep.subr.mxu1 %v7158_v0  ;;  %v9428_v43 = vpop.f32.mrf.mxu1  ;;  %9467 = vmatprep.mubr.f32.mxu0 %v5308_v44  ;;  %v13324_v62 = vsel %vm1464_vm2, %v5558_v56, %v5559_v6  ;;  %v5311_v33 = vrot.slane %v13305_v40, 1  ;;  %v5563_v18 = vrot.slane %v13305_v40, 2 }
 0x455   : > { %v5309_v53 = vrot.slane %v13314_v31, 1  ;;  %v5561_v32 = vrot.slane %v13314_v31, 2  ;;  %v5218_v19 = vadd.f32 %v13284_v41, %v5199_v14  ;;  %9570 = vmatpush3.msra.mxu1 %v7158_v0  ;;  %9514 = vmatprep.mubr.f32.mxu1 %v13314_v31  ;;  %v13334_v26 = vmax.f32 %v5219_v46, 0.0 }
 0x456   : > { %v5202_v34 = vadd.f32 %v9428_v43, %v5042_v42  ;;  %9571 = vmatprep.subr.mxu1 %v7157_v3  ;;  %v5166_v47 = vpop.f32.mrf.mxu1  ;;  %9515 = vmatmul.mubr.f32.gmra.mxu1 %v13305_v40 }
 0x457   : > { %v13338_v63 = vmax.f32 %v5218_v19, 0.0  ;;  %v5201_v58 = vadd.f32 %v5166_v47, %v5041_v45  ;;  %9572 = vmatpush3.msra.mxu1 %v7157_v3  ;;  %v5310_v38 = vsel %vm1159_vm0, %v5307_v48, %v5309_v53  ;;  %v13342_v7 = vsel %vm1159_vm0, %v5309_v53, %v5311_v33  ;;  %v7138_v3 = vld [vmem:[%s13942_s5 + $0x150] sm:$0xff]  ;;  %v7136_v47 = vld [vmem:[%s13942_s5 + $0x140] sm:$0xff] }
 0x458   : > { %9573 = vmatprep.subr.mxu1 %v7156_v15  ;;  %v13344_v13 = vpop.f32.mrf.mxu1  ;;  %9468 = vmatmul.mubr.f32.vlgmr.msra.gmra.mxu0 %v5310_v38  ;;  %v13353_v60 = vsel %vm1464_vm2, %v5559_v6, %v5561_v32  ;;  %v13358_v49 = vsel %vm1464_vm2, %v5561_v32, %v5563_v18  ;;  %v5221_v30 = vadd.f32 %v13284_v41, %v5202_v34  ;;  %v5315_v35 = vrot.slane %v13334_v26, 1  ;;  %v7152_v6 = vld [vmem:[%s13942_s5 + $0x1c0] sm:$0xff]  ;;  %v7150_v32 = vld [vmem:[%s13942_s5 + $0x1b0] sm:$0xff] }
 0x459   : > { %v5220_v20 = vadd.f32 %v13284_v41, %v5201_v58  ;;  %9524 = vmatpush3.msra.mxu0 %v14177_v9  ;;  %9574 = vmatpush3.msra.mxu1 %v7156_v15  ;;  %v5313_v39 = vrot.slane %v13338_v63, 1  ;;  %v7135_v58 = vld [vmem:[%s13942_s5 + $0x138] sm:$0xff]  ;;  %v7148_v38 = vld [vmem:[%s13942_s5 + $0x1a0] sm:$0xff]  ;;  %v7145_v9 = vld [vmem:[%s13942_s5 + $0x188] sm:$0xff] }
 0x45a   : > { %9470 = vmatprep.mubr.f32.mxu0 %v13342_v7  ;;  %9517 = vmatprep.mubr.f32.mxu1 %v13338_v63  ;;  %v5176_v37 = vpop.f32.mrf.mxu1  ;;  %v13381_v27 = vmax.f32 %v5221_v30, 0.0  ;;  %v7146_v30 = vld [vmem:[%s13942_s5 + $0x190] sm:$0xff] }
 0x45b   : > { %v13370_v2 = vmax.f32 %v5220_v20, 0.0  ;;  %9525 = vmatprep.subr.mxu0 %v7142_v22  ;;  %9575 = vmatprep.subr.mxu1 %v7155_v17  ;;  %v5203_v50 = vadd.f32 %v5176_v37, %v5043_v16  ;;  %v13376_v24 = vsel %vm1159_vm0, %v5311_v33, %v5313_v39  ;;  %v13385_v48 = vsel %vm1159_vm0, %v5313_v39, %v5315_v35  ;;  %v7132_v20 = vld [vmem:[%s13942_s5 + $0x120] sm:$0xff]  ;;  %v7131_v16 = vld [vmem:[%s13942_s5 + $0x118] sm:$0xff]  ;;  %v7130_v37 = vld [vmem:[%s13942_s5 + $0x110] sm:$0xff] }
 0x45c   : > { %9518 = vmatmul.mubr.f32.gmra.mxu1 %v13334_v26  ;;  %9526 = vmatpush3.msra.mxu0 %v7142_v22  ;;  %v9434_v28 = vpop.f32.mrf.mxu1  ;;  %v5319_v25 = vrot.slane %v13381_v27, 1  ;;  %v7134_v22 = vld [vmem:[%s13942_s5 + $0x130] sm:$0xff]  ;;  %v7144_v39 = vld [vmem:[%s13942_s5 + $0x180] sm:$0xff] }
 0x45d   : > { %v5222_v51 = vadd.f32 %v13284_v41, %v5203_v50  ;;  %9576 = vmatpush3.msra.mxu1 %v7155_v17  ;;  %9527 = vmatprep.subr.mxu0 %v7141_v1  ;;  %v5206_v61 = vadd.f32 %v9434_v28, %v5046_v11  ;;  %v5317_v0 = vrot.slane %v13370_v2, 1  ;;  %v7133_v17 = vld [vmem:[%s13942_s5 + $0x128] sm:$0xff]  ;;  %v14180_v28 = vld [vmem:[#allocation38_spill] sm:$0xff] }
 0x45e   : > { %9577 = vmatprep.subr.mxu1 %v7154_v29  ;;  %9471 = vmatmul.mubr.f32.gmra.mxu0 %v13376_v24  ;;  %v5186_v8 = vpop.f32.mrf.mxu1  ;;  %v14178_v11 = vld [vmem:[#allocation49_spill] sm:$0xff] }
 0x45f   : > { %v13395_v23 = vmax.f32 %v5222_v51, 0.0  ;;  %v5225_v55 = vadd.f32 %v13284_v41, %v5206_v61  ;;  %9528 = vmatpush3.msra.mxu0 %v7141_v1  ;;  %9578 = vmatpush3.msra.mxu1 %v7154_v29  ;;  %v5205_v36 = vadd.f32 %v5186_v8, %v5045_v57  ;;  %v13412_v46 = vsel %vm1159_vm0, %v5315_v35, %v5317_v0  ;;  %v7191_v1 = vld [vmem:[%s13942_s5 + $0x2f8] sm:$0xff]  ;;  %v7129_v29 = vld [vmem:[%s13942_s5 + $0x108] sm:$0xff]  ;;  %v7190_v35 = vld [vmem:[%s13942_s5 + $0x2f0] sm:$0xff] }
 0x460   : > { %9473 = vmatprep.mubr.f32.mxu0 %v13385_v48  ;;  %9520 = vmatprep.mubr.f32.mxu1 %v13370_v2  ;;  %v13417_v10 = vsel %vm1159_vm0, %v5317_v0, %v5319_v25  ;;  %v4724_v50 = vadd.f32 %v14179_v54, %v14178_v11  ;;  %v7128_v51 = vld [vmem:[%s13942_s5 + $0x100] sm:$0xff]  ;;  %v7189_v61 = vld [vmem:[%s13942_s5 + $0x2e8] sm:$0xff] }
 0x461   : > { %v13403_v42 = vmax.f32 %v5225_v55, 0.0  ;;  %9529 = vmatprep.subr.mxu0 %v7140_v5  ;;  %9579 = vmatprep.subr.mxu1 %v7153_v12  ;;  %v5224_v56 = vadd.f32 %v13284_v41, %v5205_v36  ;;  %v5321_v44 = vrot.slane %v13395_v23, 1  ;;  %v7188_v8 = vld [vmem:[%s13942_s5 + $0x2e0] sm:$0xff]  ;;  %v7187_v55 = vld [vmem:[%s13942_s5 + $0x2d8] sm:$0xff]  ;;  %v5565_v36 = vrot.slane %v13338_v63, 2  ;;  %v7177_v54 = vld [vmem:[%s13942_s5 + $0x288] sm:$0xff] }
 0x462   : > { %9521 = vmatmul.mubr.f32.gmra.mxu1 %v13381_v27  ;;  %9530 = vmatpush3.msra.mxu0 %v7140_v5  ;;  %v4884_v57 = vadd.f32 %v14180_v28, %v4724_v50  ;;  %v7164_v11 = vld [vmem:[%s13942_s5 + $0x220] sm:$0xff]  ;;  %v7163_v50 = vld [vmem:[%s13942_s5 + $0x218] sm:$0xff] }
 0x463   : > { %v13414_v14 = vmax.f32 %v5224_v56, 0.0  ;;  %9580 = vmatpush3.msra.mxu1 %v7153_v12  ;;  %9531 = vmatprep.subr.mxu0 %v7139_v21  ;;  %v6249_v53 = vrot.slane %v13403_v42, 1  ;;  %v6385_v19 = vrot.slane %v13403_v42, 2  ;;  %v13442_v15 = vsel %vm1159_vm0, %v5319_v25, %v5321_v44  ;;  %v7175_v12 = vld [vmem:[%s13942_s5 + $0x278] sm:$0xff]  ;;  %v7172_v25 = vld [vmem:[%s13942_s5 + $0x260] sm:$0xff] }
 0x464   : > { %9581 = vmatprep.subr.mxu1 %v7152_v6  ;;  %9599 = vmatprep.mubr.f32.mxu1 %v13314_v31  ;;  %v7137_v31 = vld [vmem:[%s13942_s5 + $0x148] sm:$0xff]  ;;  %v5044_v5 = vadd.f32 %v13300_v4, %v4884_v57  ;;  %v7174_v4 = vld [vmem:[%s13942_s5 + $0x270] sm:$0xff]  ;;  %v5567_v56 = vrot.slane %v13334_v26, 2  ;;  %v7223_v28 = vld [vmem:[%s13942_s5 + $0x3f8] sm:$0xff] }
 0x465   : > { %v5847_v43 = vrot.slane %v13414_v14, 1  ;;  %v5983_v45 = vrot.slane %v13414_v14, 2  ;;  %9474 = vmatmul.mubr.f32.gmra.mxu0 %v13412_v46  ;;  %9582 = vmatpush3.msra.mxu1 %v7152_v6  ;;  %v7161_v57 = vld [vmem:[%s13942_s5 + $0x208] sm:$0xff] }
 0x466   : > { %9532 = vmatpush3.msra.mxu0 %v7139_v21  ;;  %9476 = vmatprep.mubr.f32.mxu0 %v13417_v10  ;;  %v5204_v0 = vadd.f32 %v13344_v13, %v5044_v5  ;;  %v7186_v21 = vld [vmem:[%s13942_s5 + $0x2d0] sm:$0xff]  ;;  %v13555_v6 = vsel %vm1464_vm2, %v5565_v36, %v5567_v56  ;;  %v7221_v5 = vld [vmem:[%s13942_s5 + $0x3e8] sm:$0xff] }
 0x467   : > { %9533 = vmatprep.subr.mxu0 %v7138_v3  ;;  %9583 = vmatprep.subr.mxu1 %v7151_v52  ;;  %v13449_v33 = vsel %vm1159_vm0, %v5847_v43, %v6249_v53  ;;  %v13456_v34 = vsel %vm1464_vm2, %v5983_v45, %v6385_v19 }
 0x468   : > { %9534 = vmatpush3.msra.mxu0 %v7138_v3  ;;  %9584 = vmatpush3.msra.mxu1 %v7151_v52  ;;  %v5223_v13 = vadd.f32 %v13284_v41, %v5204_v0  ;;  %v13551_v41 = vsel %vm1464_vm2, %v5563_v18, %v5565_v36  ;;  %v5569_v18 = vrot.slane %v13370_v2, 2  ;;  %v7171_v52 = vld [vmem:[%s13942_s5 + $0x258] sm:$0xff]  ;;  %v7206_v0 = vld [vmem:[%s13942_s5 + $0x370] sm:$0xff]  ;;  %v7205_v36 = vld [vmem:[%s13942_s5 + $0x368] sm:$0xff] }
 0x469   : > { %9535 = vmatprep.subr.mxu0 %v7137_v31  ;;  %9585 = vmatprep.subr.mxu1 %v7150_v32 }
 0x46a   : > { %9477 = vmatmul.mubr.f32.gmra.mxu0 %v13442_v15  ;;  %9586 = vmatpush3.msra.mxu1 %v7150_v32  ;;  %v13560_v3 = vmax.f32 %v5223_v13, 0.0  ;;  %v5571_v32 = vrot.slane %v13381_v27, 2  ;;  %v7218_v13 = vld [vmem:[%s13942_s5 + $0x3d0] sm:$0xff] }
 0x46b   : > { %9536 = vmatpush3.msra.mxu0 %v7137_v31  ;;  %9555 = vmatprep.mubr.f32.mxu0 %v13324_v62  ;;  %v7147_v62 = vld [vmem:[%s13942_s5 + $0x198] sm:$0xff]  ;;  %v7184_v31 = vld [vmem:[%s13942_s5 + $0x2c0] sm:$0xff] }
 0x46c   : > { %9537 = vmatprep.subr.mxu0 %v7136_v47  ;;  %9587 = vmatprep.subr.mxu1 %v7149_v59 }
 0x46d   : > { %9538 = vmatpush3.msra.mxu0 %v7136_v47  ;;  %9588 = vmatpush3.msra.mxu1 %v7149_v59  ;;  %v13577_v47 = vsel %vm1464_vm2, %v5567_v56, %v5569_v18  ;;  %v13581_v59 = vsel %vm1464_vm2, %v5569_v18, %v5571_v32  ;;  %v7202_v18 = vld [vmem:[%s13942_s5 + $0x350] sm:$0xff] }
 0x46e   : > { %9539 = vmatprep.subr.mxu0 %v7135_v58  ;;  %9589 = vmatprep.subr.mxu1 %v7148_v38 }
 0x46f   : > { %9540 = vmatpush3.msra.mxu0 %v7135_v58  ;;  %9590 = vmatpush3.msra.mxu1 %v7148_v38  ;;  %v7170_v58 = vld [vmem:[%s13942_s5 + $0x250] sm:$0xff]  ;;  %v7183_v38 = vld [vmem:[%s13942_s5 + $0x2b8] sm:$0xff] }
 0x470   : > { %9541 = vmatprep.subr.mxu0 %v7134_v22  ;;  %9591 = vmatprep.subr.mxu1 %v7147_v62 }
 0x471   : > { %9542 = vmatpush3.msra.mxu0 %v7134_v22  ;;  %9592 = vmatpush3.msra.mxu1 %v7147_v62  ;;  %v5573_v22 = vrot.slane %v13395_v23, 2  ;;  %v7182_v62 = vld [vmem:[%s13942_s5 + $0x2b0] sm:$0xff] }
 0x472   : > { %9543 = vmatprep.subr.mxu0 %v7133_v17  ;;  %9593 = vmatprep.subr.mxu1 %v7146_v30 }
 0x473   : > { %9544 = vmatpush3.msra.mxu0 %v7133_v17  ;;  %9594 = vmatpush3.msra.mxu1 %v7146_v30  ;;  %v13600_v17 = vsel %vm1464_vm2, %v5571_v32, %v5573_v22  ;;  %v7168_v30 = vld [vmem:[%s13942_s5 + $0x240] sm:$0xff] }
 0x474   : > { %9545 = vmatprep.subr.mxu0 %v7132_v20  ;;  %9595 = vmatprep.subr.mxu1 %v7145_v9  ;;  %v7200_v32 = vld [vmem:[%s13942_s5 + $0x340] sm:$0xff] }
 0x475   : > { %9546 = vmatpush3.msra.mxu0 %v7132_v20  ;;  %9596 = vmatpush3.msra.mxu1 %v7145_v9  ;;  %v7181_v20 = vld [vmem:[%s13942_s5 + $0x2a8] sm:$0xff]  ;;  %v7167_v9 = vld [vmem:[%s13942_s5 + $0x238] sm:$0xff] }
 0x476   : > { %9547 = vmatprep.subr.mxu0 %v7131_v16  ;;  %9597 = vmatprep.subr.mxu1 %v7144_v39 }
 0x477   : > { %9548 = vmatpush3.msra.mxu0 %v7131_v16  ;;  %9598 = vmatpush3.msra.mxu1 %v7144_v39  ;;  %v7180_v16 = vld [vmem:[%s13942_s5 + $0x2a0] sm:$0xff]  ;;  %v7166_v39 = vld [vmem:[%s13942_s5 + $0x230] sm:$0xff] }
 0x478   : > { %9549 = vmatprep.subr.mxu0 %v7130_v37  ;;  %9600 = vmatmul.mubr.f32.vlgmr.msra.gmra.mxu1 %v13305_v40  ;;  %v7185_v40 = vld [vmem:[%s13942_s5 + $0x2c8] sm:$0xff] }
 0x479   : > { %9655 = vmatprep.subr.mxu1 %v7191_v1  ;;  %9550 = vmatpush3.msra.mxu0 %v7130_v37  ;;  %v7165_v37 = vld [vmem:[%s13942_s5 + $0x228] sm:$0xff] }
 0x47a   : > { %9602 = vmatprep.mubr.f32.mxu1 %v13338_v63  ;;  %9656 = vmatpush3.msra.mxu1 %v7191_v1  ;;  %v7178_v1 = vld [vmem:[%s13942_s5 + $0x290] sm:$0xff] }
 0x47b   : > { %9551 = vmatprep.subr.mxu0 %v7129_v29  ;;  %9657 = vmatprep.subr.mxu1 %v7190_v35 }
 0x47c   : > { %9552 = vmatpush3.msra.mxu0 %v7129_v29  ;;  %9658 = vmatpush3.msra.mxu1 %v7190_v35  ;;  %v7176_v29 = vld [vmem:[%s13942_s5 + $0x280] sm:$0xff]  ;;  %v7162_v35 = vld [vmem:[%s13942_s5 + $0x210] sm:$0xff] }
 0x47d   : > { %9553 = vmatprep.subr.mxu0 %v7128_v51  ;;  %9603 = vmatmul.mubr.f32.gmra.mxu1 %v13334_v26 }
 0x47e   : > { %9659 = vmatprep.subr.mxu1 %v7189_v61  ;;  %9554 = vmatpush3.msra.mxu0 %v7128_v51  ;;  %v7222_v51 = vld [vmem:[%s13942_s5 + $0x3f0] sm:$0xff] }
 0x47f   : > { %9605 = vmatprep.mubr.f32.mxu1 %v13370_v2  ;;  %9660 = vmatpush3.msra.mxu1 %v7189_v61  ;;  %v7160_v61 = vld [vmem:[%s13942_s5 + $0x200] sm:$0xff] }
 0x480   : > { %9556 = vmatmul.mubr.f32.vlgmr.msra.gmra.mxu0 %v13353_v60  ;;  %9611 = vmatprep.subr.mxu0 %v7175_v12  ;;  %v7173_v60 = vld [vmem:[%s13942_s5 + $0x268] sm:$0xff] }
 0x481   : > { %9661 = vmatprep.subr.mxu1 %v7188_v8  ;;  %9558 = vmatprep.mubr.f32.mxu0 %v13358_v49 }
 0x482   : > { %9612 = vmatpush3.msra.mxu0 %v7175_v12  ;;  %9662 = vmatpush3.msra.mxu1 %v7188_v8  ;;  %v7207_v12 = vld [vmem:[%s13942_s5 + $0x378] sm:$0xff]  ;;  %v7220_v8 = vld [vmem:[%s13942_s5 + $0x3e0] sm:$0xff] }
 0x483   : > { %9606 = vmatmul.mubr.f32.gmra.mxu1 %v13381_v27  ;;  %9613 = vmatprep.subr.mxu0 %v7174_v4 }
 0x484   : > { %9663 = vmatprep.subr.mxu1 %v7187_v55  ;;  %9608 = vmatprep.mubr.f32.mxu1 %v13395_v23 }
 0x485   : > { %9614 = vmatpush3.msra.mxu0 %v7174_v4  ;;  %9664 = vmatpush3.msra.mxu1 %v7187_v55  ;;  %v7219_v4 = vld [vmem:[%s13942_s5 + $0x3d8] sm:$0xff]  ;;  %v5981_v55 = vrot.slane %v13560_v3, 2 }
 0x486   : > { %9559 = vmatmul.mubr.f32.gmra.mxu0 %v13551_v41  ;;  %9615 = vmatprep.subr.mxu0 %v7173_v60 }
 0x487   : > { %9665 = vmatprep.subr.mxu1 %v7186_v21  ;;  %9561 = vmatprep.mubr.f32.mxu0 %v13555_v6  ;;  %v13701_v56 = vsel %vm1464_vm2, %v5981_v55, %v5983_v45 }
 0x488   : > { %9616 = vmatpush3.msra.mxu0 %v7173_v60  ;;  %9666 = vmatpush3.msra.mxu1 %v7186_v21  ;;  %v7204_v60 = vld [vmem:[%s13942_s5 + $0x360] sm:$0xff]  ;;  %v7217_v21 = vld [vmem:[%s13942_s5 + $0x3c8] sm:$0xff] }
 0x489   : > { %9609 = vmatmul.mubr.f32.gmra.mxu1 %v13560_v3  ;;  %9617 = vmatprep.subr.mxu0 %v7172_v25 }
 0x48a   : > { %9667 = vmatprep.subr.mxu1 %v7185_v40  ;;  %9618 = vmatpush3.msra.mxu0 %v7172_v25  ;;  %v7216_v25 = vld [vmem:[%s13942_s5 + $0x3c0] sm:$0xff] }
 0x48b   : > { %9668 = vmatpush3.msra.mxu1 %v7185_v40  ;;  %9687 = vmatprep.mubr.f32.mxu1 %v13358_v49  ;;  %v7169_v49 = vld [vmem:[%s13942_s5 + $0x248] sm:$0xff]  ;;  %v5845_v40 = vrot.slane %v13560_v3, 1 }
 0x48c   : > { %9562 = vmatmul.mubr.f32.gmra.mxu0 %v13577_v47  ;;  %9619 = vmatprep.subr.mxu0 %v7171_v52 }
 0x48d   : > { %9669 = vmatprep.subr.mxu1 %v7184_v31  ;;  %9564 = vmatprep.mubr.f32.mxu0 %v13581_v59  ;;  %v13716_v45 = vsel %vm1159_vm0, %v5321_v44, %v5845_v40  ;;  %v7214_v44 = vld [vmem:[%s13942_s5 + $0x3b0] sm:$0xff] }
 0x48e   : > { %9620 = vmatpush3.msra.mxu0 %v7171_v52  ;;  %9670 = vmatpush3.msra.mxu1 %v7184_v31  ;;  %v7215_v52 = vld [vmem:[%s13942_s5 + $0x3b8] sm:$0xff]  ;;  %v5848_v31 = vsel %vm1159_vm0, %v5845_v40, %v5847_v43  ;;  %v7212_v43 = vld [vmem:[%s13942_s5 + $0x3a0] sm:$0xff] }
 0x48f   : > { %9621 = vmatprep.subr.mxu0 %v7170_v58  ;;  %9671 = vmatprep.subr.mxu1 %v7183_v38 }
 0x490   : > { %9622 = vmatpush3.msra.mxu0 %v7170_v58  ;;  %9672 = vmatpush3.msra.mxu1 %v7183_v38  ;;  %v7213_v58 = vld [vmem:[%s13942_s5 + $0x3a8] sm:$0xff]  ;;  %v7199_v38 = vld [vmem:[%s13942_s5 + $0x338] sm:$0xff] }
 0x491   : > { %9565 = vmatmul.mubr.f32.gmra.mxu0 %v13600_v17  ;;  %9623 = vmatprep.subr.mxu0 %v7169_v49 }
 0x492   : > { %9673 = vmatprep.subr.mxu1 %v7182_v62  ;;  %9624 = vmatpush3.msra.mxu0 %v7169_v49  ;;  %v7197_v49 = vld [vmem:[%s13942_s5 + $0x328] sm:$0xff] }
 0x493   : > { %9643 = vmatprep.mubr.f32.mxu0 %v13342_v7  ;;  %9674 = vmatpush3.msra.mxu1 %v7182_v62  ;;  %v7179_v7 = vld [vmem:[%s13942_s5 + $0x298] sm:$0xff]  ;;  %v7210_v62 = vld [vmem:[%s13942_s5 + $0x390] sm:$0xff] }
 0x494   : > { %9625 = vmatprep.subr.mxu0 %v7168_v30  ;;  %9675 = vmatprep.subr.mxu1 %v7181_v20 }
 0x495   : > { %9626 = vmatpush3.msra.mxu0 %v7168_v30  ;;  %9676 = vmatpush3.msra.mxu1 %v7181_v20  ;;  %v7196_v30 = vld [vmem:[%s13942_s5 + $0x320] sm:$0xff]  ;;  %v7209_v20 = vld [vmem:[%s13942_s5 + $0x388] sm:$0xff] }
 0x496   : > { %9627 = vmatprep.subr.mxu0 %v7167_v9  ;;  %9677 = vmatprep.subr.mxu1 %v7180_v16 }
 0x497   : > { %9628 = vmatpush3.msra.mxu0 %v7167_v9  ;;  %9678 = vmatpush3.msra.mxu1 %v7180_v16  ;;  %v7195_v9 = vld [vmem:[%s13942_s5 + $0x318] sm:$0xff]  ;;  %v7208_v16 = vld [vmem:[%s13942_s5 + $0x380] sm:$0xff] }
 0x498   : > { %9629 = vmatprep.subr.mxu0 %v7166_v39  ;;  %9679 = vmatprep.subr.mxu1 %v7179_v7 }
 0x499   : > { %9630 = vmatpush3.msra.mxu0 %v7166_v39  ;;  %9680 = vmatpush3.msra.mxu1 %v7179_v7  ;;  %v7194_v39 = vld [vmem:[%s13942_s5 + $0x310] sm:$0xff]  ;;  %v7193_v7 = vld [vmem:[%s13942_s5 + $0x308] sm:$0xff] }
 0x49a   : > { %9631 = vmatprep.subr.mxu0 %v7165_v37  ;;  %9681 = vmatprep.subr.mxu1 %v7178_v1 }
 0x49b   : > { %9632 = vmatpush3.msra.mxu0 %v7165_v37  ;;  %9682 = vmatpush3.msra.mxu1 %v7178_v1  ;;  %v7192_v37 = vld [vmem:[%s13942_s5 + $0x300] sm:$0xff]  ;;  %v7239_v1 = vld [vmem:[%s13942_s5 + $0x478] sm:$0xff] }
 0x49c   : > { %9633 = vmatprep.subr.mxu0 %v7164_v11  ;;  %9683 = vmatprep.subr.mxu1 %v7177_v54 }
 0x49d   : > { %9634 = vmatpush3.msra.mxu0 %v7164_v11  ;;  %9684 = vmatpush3.msra.mxu1 %v7177_v54  ;;  %v7229_v11 = vld [vmem:[%s13942_s5 + $0x428] sm:$0xff]  ;;  %v7227_v54 = vld [vmem:[%s13942_s5 + $0x418] sm:$0xff] }
 0x49e   : > { %9635 = vmatprep.subr.mxu0 %v7163_v50  ;;  %9685 = vmatprep.subr.mxu1 %v7176_v29 }
 0x49f   : > { %9636 = vmatpush3.msra.mxu0 %v7163_v50  ;;  %9686 = vmatpush3.msra.mxu1 %v7176_v29  ;;  %v7226_v50 = vld [vmem:[%s13942_s5 + $0x410] sm:$0xff]  ;;  %v7225_v29 = vld [vmem:[%s13942_s5 + $0x408] sm:$0xff] }
 0x4a0   : > { %9637 = vmatprep.subr.mxu0 %v7162_v35  ;;  %9688 = vmatmul.mubr.f32.vlgmr.msra.gmra.mxu1 %v13551_v41  ;;  %v7203_v41 = vld [vmem:[%s13942_s5 + $0x358] sm:$0xff] }
 0x4a1   : > { %9743 = vmatprep.subr.mxu1 %v7223_v28  ;;  %9638 = vmatpush3.msra.mxu0 %v7162_v35  ;;  %v7224_v35 = vld [vmem:[%s13942_s5 + $0x400] sm:$0xff] }
 0x4a2   : > { %9690 = vmatprep.mubr.f32.mxu1 %v13555_v6  ;;  %9744 = vmatpush3.msra.mxu1 %v7223_v28  ;;  %v14182_v28 = vld [vmem:[#allocation25_spill] sm:$0xff] }
 0x4a3   : > { %9639 = vmatprep.subr.mxu0 %v7161_v57  ;;  %9745 = vmatprep.subr.mxu1 %v7222_v51 }
 0x4a4   : > { %9640 = vmatpush3.msra.mxu0 %v7161_v57  ;;  %9746 = vmatpush3.msra.mxu1 %v7222_v51  ;;  %v6388_v57 = vsel %vm1464_vm2, %v6385_v19, %v14182_v28  ;;  %v6538_v19 = vld [vmem:[%s13944_s7 + $0x58] sm:$0xff]  ;;  %v6536_v51 = vld [vmem:[%s13944_s7 + $0x48] sm:$0xff] }
 0x4a5   : > { %9641 = vmatprep.subr.mxu0 %v7160_v61  ;;  %9691 = vmatmul.mubr.f32.gmra.mxu1 %v13577_v47 }
 0x4a6   : > { %9747 = vmatprep.subr.mxu1 %v7221_v5  ;;  %9642 = vmatpush3.msra.mxu0 %v7160_v61  ;;  %v6535_v61 = vld [vmem:[%s13944_s7 + $0x40] sm:$0xff] }
 0x4a7   : > { %9693 = vmatprep.mubr.f32.mxu1 %v13581_v59  ;;  %9748 = vmatpush3.msra.mxu1 %v7221_v5  ;;  %v6534_v5 = vld [vmem:[%s13944_s7 + $0x38] sm:$0xff] }
 0x4a8   : > { %9644 = vmatmul.mubr.f32.vlgmr.msra.gmra.mxu0 %v13376_v24  ;;  %9699 = vmatprep.subr.mxu0 %v7207_v12  ;;  %v13681_v24 = vsel %vm1464_vm2, %v5573_v22, %v5981_v55  ;;  %v7198_v22 = vld [vmem:[%s13942_s5 + $0x330] sm:$0xff] }
 0x4a9   : > { %9749 = vmatprep.subr.mxu1 %v7220_v8  ;;  %9646 = vmatprep.mubr.f32.mxu0 %v13385_v48  ;;  %v6529_v55 = vld [vmem:[%s13944_s7 + $0x10] sm:$0xff] }
 0x4aa   : > { %9700 = vmatpush3.msra.mxu0 %v7207_v12  ;;  %9750 = vmatpush3.msra.mxu1 %v7220_v8  ;;  %v6533_v12 = vld [vmem:[%s13944_s7 + $0x30] sm:$0xff]  ;;  %v6532_v8 = vld [vmem:[%s13944_s7 + $0x28] sm:$0xff] }
 0x4ab   : > { %9694 = vmatmul.mubr.f32.gmra.mxu1 %v13600_v17  ;;  %9701 = vmatprep.subr.mxu0 %v7206_v0 }
 0x4ac   : > { %9751 = vmatprep.subr.mxu1 %v7219_v4  ;;  %9696 = vmatprep.mubr.f32.mxu1 %v13681_v24 }
 0x4ad   : > { %9702 = vmatpush3.msra.mxu0 %v7206_v0  ;;  %9752 = vmatpush3.msra.mxu1 %v7219_v4  ;;  %v6531_v0 = vld [vmem:[%s13944_s7 + $0x20] sm:$0xff]  ;;  %v6530_v4 = vld [vmem:[%s13944_s7 + $0x18] sm:$0xff] }
 0x4ae   : > { %9647 = vmatmul.mubr.f32.gmra.mxu0 %v13412_v46  ;;  %9703 = vmatprep.subr.mxu0 %v7205_v36 }
 0x4af   : > { %9753 = vmatprep.subr.mxu1 %v7218_v13  ;;  %9649 = vmatprep.mubr.f32.mxu0 %v13417_v10 }
 0x4b0   : > { %9704 = vmatpush3.msra.mxu0 %v7205_v36  ;;  %9754 = vmatpush3.msra.mxu1 %v7218_v13  ;;  %v6527_v36 = vld [vmem:[%s13944_s7] sm:$0xff] }
 0x4b1   : > { %9697 = vmatmul.mubr.f32.gmra.mxu1 %v13701_v56  ;;  %9705 = vmatprep.subr.mxu0 %v7204_v60 }
 0x4b2   : > { %9755 = vmatprep.subr.mxu1 %v7217_v21  ;;  %9706 = vmatpush3.msra.mxu0 %v7204_v60 }
 0x4b3   : > { %9756 = vmatpush3.msra.mxu1 %v7217_v21  ;;  %9775 = vmatprep.mubr.f32.mxu1 %v13385_v48  ;;  %v7201_v48 = vld [vmem:[%s13942_s5 + $0x348] sm:$0xff] }
 0x4b4   : > { %9650 = vmatmul.mubr.f32.gmra.mxu0 %v13442_v15  ;;  %9707 = vmatprep.subr.mxu0 %v7203_v41 }
 0x4b5   : > { %9757 = vmatprep.subr.mxu1 %v7216_v25  ;;  %9652 = vmatprep.mubr.f32.mxu0 %v13716_v45 }
 0x4b6   : > { %9708 = vmatpush3.msra.mxu0 %v7203_v41  ;;  %9758 = vmatpush3.msra.mxu1 %v7216_v25 }
 0x4b7   : > { %9709 = vmatprep.subr.mxu0 %v7202_v18  ;;  %9759 = vmatprep.subr.mxu1 %v7215_v52 }
 0x4b8   : > { %9710 = vmatpush3.msra.mxu0 %v7202_v18  ;;  %9760 = vmatpush3.msra.mxu1 %v7215_v52 }
 0x4b9   : > { %9653 = vmatmul.mubr.f32.gmra.mxu0 %v5848_v31  ;;  %9711 = vmatprep.subr.mxu0 %v7201_v48 }
 0x4ba   : > { %9761 = vmatprep.subr.mxu1 %v7214_v44  ;;  %9712 = vmatpush3.msra.mxu0 %v7201_v48 }
 0x4bb   : > { %9731 = vmatprep.mubr.f32.mxu0 %v13338_v63  ;;  %9762 = vmatpush3.msra.mxu1 %v7214_v44  ;;  %v7211_v63 = vld [vmem:[%s13942_s5 + $0x398] sm:$0xff] }
 0x4bc   : > { %9713 = vmatprep.subr.mxu0 %v7200_v32  ;;  %9763 = vmatprep.subr.mxu1 %v7213_v58 }
 0x4bd   : > { %9714 = vmatpush3.msra.mxu0 %v7200_v32  ;;  %9764 = vmatpush3.msra.mxu1 %v7213_v58 }
 0x4be   : > { %9715 = vmatprep.subr.mxu0 %v7199_v38  ;;  %9765 = vmatprep.subr.mxu1 %v7212_v43 }
 0x4bf   : > { %9716 = vmatpush3.msra.mxu0 %v7199_v38  ;;  %9766 = vmatpush3.msra.mxu1 %v7212_v43 }
 0x4c0   : > { %9717 = vmatprep.subr.mxu0 %v7198_v22  ;;  %9767 = vmatprep.subr.mxu1 %v7211_v63 }
 0x4c1   : > { %9718 = vmatpush3.msra.mxu0 %v7198_v22  ;;  %9768 = vmatpush3.msra.mxu1 %v7211_v63 }
 0x4c2   : > { %9719 = vmatprep.subr.mxu0 %v7197_v49  ;;  %9769 = vmatprep.subr.mxu1 %v7210_v62 }
 0x4c3   : > { %9720 = vmatpush3.msra.mxu0 %v7197_v49  ;;  %9770 = vmatpush3.msra.mxu1 %v7210_v62 }
 0x4c4   : > { %9721 = vmatprep.subr.mxu0 %v7196_v30  ;;  %9771 = vmatprep.subr.mxu1 %v7209_v20 }
 0x4c5   : > { %9722 = vmatpush3.msra.mxu0 %v7196_v30  ;;  %9772 = vmatpush3.msra.mxu1 %v7209_v20 }
 0x4c6   : > { %9723 = vmatprep.subr.mxu0 %v7195_v9  ;;  %9773 = vmatprep.subr.mxu1 %v7208_v16 }
 0x4c7   : > { %9724 = vmatpush3.msra.mxu0 %v7195_v9  ;;  %9774 = vmatpush3.msra.mxu1 %v7208_v16 }
 0x4c8   : > { %9725 = vmatprep.subr.mxu0 %v7194_v39  ;;  %9776 = vmatmul.mubr.f32.vlgmr.msra.gmra.mxu1 %v13412_v46  ;;  %v7238_v46 = vld [vmem:[%s13942_s5 + $0x470] sm:$0xff] }
 0x4c9   : > { %9726 = vmatpush3.msra.mxu0 %v7194_v39  ;;  %9778 = vmatprep.mubr.f32.mxu1 %v13417_v10  ;;  %v7237_v10 = vld [vmem:[%s13942_s5 + $0x468] sm:$0xff] }
 0x4ca   : > { %9727 = vmatprep.subr.mxu0 %v7193_v7 }
 0x4cb   : > { %9728 = vmatpush3.msra.mxu0 %v7193_v7 }
 0x4cc   : > { %9729 = vmatprep.subr.mxu0 %v7192_v37  ;;  %9779 = vmatmul.mubr.f32.gmra.mxu1 %v13442_v15  ;;  %v7236_v15 = vld [vmem:[%s13942_s5 + $0x460] sm:$0xff] }
 0x4cd   : > { %9730 = vmatpush3.msra.mxu0 %v7192_v37  ;;  %9781 = vmatprep.mubr.f32.mxu1 %v13716_v45 }
 0x4ce   : > { %9732 = vmatmul.mubr.f32.vlgmr.msra.gmra.mxu0 %v13334_v26  ;;  %9787 = vmatprep.subr.mxu0 %v7239_v1  ;;  %v14181_v26 = vld [vmem:[#allocation16_spill] sm:$0xff] }
 0x4cf   : > { %9734 = vmatprep.mubr.f32.mxu0 %v13370_v2  ;;  %9788 = vmatpush3.msra.mxu0 %v7239_v1  ;;  %v6252_v2 = vsel %vm1159_vm0, %v6249_v53, %v14181_v26  ;;  %v7232_v53 = vld [vmem:[%s13942_s5 + $0x440] sm:$0xff] }
 0x4d0   : > { %9782 = vmatmul.mubr.f32.gmra.mxu1 %v5848_v31  ;;  %9789 = vmatprep.subr.mxu0 %v7238_v46 }
 0x4d1   : > { %9784 = vmatprep.mubr.f32.mxu1 %v13449_v33  ;;  %9790 = vmatpush3.msra.mxu0 %v7238_v46  ;;  %v7235_v33 = vld [vmem:[%s13942_s5 + $0x458] sm:$0xff] }
 0x4d2   : > { %9735 = vmatmul.mubr.f32.gmra.mxu0 %v13381_v27  ;;  %9791 = vmatprep.subr.mxu0 %v7237_v10  ;;  %v7234_v27 = vld [vmem:[%s13942_s5 + $0x450] sm:$0xff] }
 0x4d3   : > { %9737 = vmatprep.mubr.f32.mxu0 %v13395_v23  ;;  %9792 = vmatpush3.msra.mxu0 %v7237_v10  ;;  %v7233_v23 = vld [vmem:[%s13942_s5 + $0x448] sm:$0xff] }
 0x4d4   : > { %9785 = vmatmul.mubr.f32.gmra.mxu1 %v6252_v2  ;;  %9793 = vmatprep.subr.mxu0 %v7236_v15 }
 0x4d5   : > { %9794 = vmatpush3.msra.mxu0 %v7236_v15 }
 0x4d6   : > { %9738 = vmatmul.mubr.f32.gmra.mxu0 %v13560_v3  ;;  %9795 = vmatprep.subr.mxu0 %v7235_v33  ;;  %v7230_v3 = vld [vmem:[%s13942_s5 + $0x430] sm:$0xff] }
 0x4d7   : > { %9740 = vmatprep.mubr.f32.mxu0 %v13414_v14  ;;  %9796 = vmatpush3.msra.mxu0 %v7235_v33  ;;  %v7231_v14 = vld [vmem:[%s13942_s5 + $0x438] sm:$0xff] }
 0x4d8   : > { %9797 = vmatprep.subr.mxu0 %v7234_v27 }
 0x4d9   : > { %9798 = vmatpush3.msra.mxu0 %v7234_v27 }
 0x4da   : > { %9741 = vmatmul.mubr.f32.gmra.mxu0 %v13403_v42  ;;  %9799 = vmatprep.subr.mxu0 %v7233_v23  ;;  %v6539_v42 = vld [vmem:[%s13944_s7 + $0x60] sm:$0xff] }
 0x4db   : > { %9800 = vmatpush3.msra.mxu0 %v7233_v23  ;;  %9819 = vmatprep.mubr.f32.mxu0 %v13555_v6  ;;  %v7228_v6 = vld [vmem:[%s13942_s5 + $0x420] sm:$0xff] }
 0x4dc   : > { %9801 = vmatprep.subr.mxu0 %v7232_v53 }
 0x4dd   : > { %9802 = vmatpush3.msra.mxu0 %v7232_v53 }
 0x4de   : > { %9803 = vmatprep.subr.mxu0 %v7231_v14 }
 0x4df   : > { %9804 = vmatpush3.msra.mxu0 %v7231_v14 }
 0x4e0   : > { %9805 = vmatprep.subr.mxu0 %v7230_v3 }
 0x4e1   : > { %9806 = vmatpush3.msra.mxu0 %v7230_v3 }
 0x4e2   : > { %9807 = vmatprep.subr.mxu0 %v7229_v11 }
 0x4e3   : > { %9808 = vmatpush3.msra.mxu0 %v7229_v11 }
 0x4e4   : > { %9809 = vmatprep.subr.mxu0 %v7228_v6 }
 0x4e5   : > { %9810 = vmatpush3.msra.mxu0 %v7228_v6 }
 0x4e6   : > { %9811 = vmatprep.subr.mxu0 %v7227_v54 }
 0x4e7   : > { %9812 = vmatpush3.msra.mxu0 %v7227_v54 }
 0x4e8   : > { %9813 = vmatprep.subr.mxu0 %v7226_v50 }
 0x4e9   : > { %9814 = vmatpush3.msra.mxu0 %v7226_v50 }
 0x4ea   : > { %9815 = vmatprep.subr.mxu0 %v7225_v29 }
 0x4eb   : > { %9816 = vmatpush3.msra.mxu0 %v7225_v29 }
 0x4ec   : > { %9817 = vmatprep.subr.mxu0 %v7224_v35 }
 0x4ed   : > { %9818 = vmatpush3.msra.mxu0 %v7224_v35 }
 0x4ee   : > { %9820 = vmatmul.mubr.f32.vlgmr.msra.gmra.mxu0 %v13577_v47  ;;  %v6542_v47 = vld [vmem:[%s13944_s7 + $0x78] sm:$0xff] }
 0x4ef   : > { %9822 = vmatprep.mubr.f32.mxu0 %v13581_v59  ;;  %9831 = vmatprep.subr.mxu1 %v6542_v47  ;;  %v6541_v59 = vld [vmem:[%s13944_s7 + $0x70] sm:$0xff] }
 0x4f0   : > { %9832 = vmatpush3.msra.mxu1 %v6542_v47 }
 0x4f1   : > { %9833 = vmatprep.subr.mxu1 %v6541_v59 }
 0x4f2   : > { %9823 = vmatmul.mubr.f32.gmra.mxu0 %v13600_v17  ;;  %9834 = vmatpush3.msra.mxu1 %v6541_v59  ;;  %v6537_v17 = vld [vmem:[%s13944_s7 + $0x50] sm:$0xff] }
 0x4f3   : > { %9825 = vmatprep.mubr.f32.mxu0 %v13681_v24  ;;  %v6528_v24 = vld [vmem:[%s13944_s7 + $0x8] sm:$0xff] }
 0x4f6   : > { %9826 = vmatmul.mubr.f32.gmra.mxu0 %v13701_v56 }
 0x4f7   : > { %9828 = vmatprep.mubr.f32.mxu0 %v13456_v34  ;;  %v6540_v34 = vld [vmem:[%s13944_s7 + $0x68] sm:$0xff] }
 0x4f8   : > { %9835 = vmatprep.subr.mxu1 %v6540_v34 }
 0x4f9   : > { %9836 = vmatpush3.msra.mxu1 %v6540_v34 }
 0x4fa   : > { %9829 = vmatmul.mubr.f32.gmra.mxu0 %v6388_v57  ;;  %9837 = vmatprep.subr.mxu1 %v6539_v42 }
 0x4fb   : > { %9838 = vmatpush3.msra.mxu1 %v6539_v42 }
 0x4fc   : > { %9839 = vmatprep.subr.mxu1 %v6538_v19 }
 0x4fd   : > { %9840 = vmatpush3.msra.mxu1 %v6538_v19 }
 0x4fe   : > { %9841 = vmatprep.subr.mxu1 %v6537_v17 }
 0x4ff   : > { %9842 = vmatpush3.msra.mxu1 %v6537_v17 }
 0x500   : > { %9843 = vmatprep.subr.mxu1 %v6536_v51 }
 0x501   : > { %9844 = vmatpush3.msra.mxu1 %v6536_v51 }
 0x502   : > { %9845 = vmatprep.subr.mxu1 %v6535_v61 }
 0x503   : > { %9846 = vmatpush3.msra.mxu1 %v6535_v61 }
 0x504   : > { %9847 = vmatprep.subr.mxu1 %v6534_v5 }
 0x505   : > { %9848 = vmatpush3.msra.mxu1 %v6534_v5 }
 0x506   : > { %9849 = vmatprep.subr.mxu1 %v6533_v12 }
 0x507   : > { %9850 = vmatpush3.msra.mxu1 %v6533_v12 }
 0x508   : > { %9851 = vmatprep.subr.mxu1 %v6532_v8 }
 0x509   : > { %9852 = vmatpush3.msra.mxu1 %v6532_v8 }
 0x50a   : > { %9853 = vmatprep.subr.mxu1 %v6531_v0 }
 0x50b   : > { %9854 = vmatpush3.msra.mxu1 %v6531_v0 }
 0x50c   : > { %9855 = vmatprep.subr.mxu1 %v6530_v4 }
 0x50d   : > { %9856 = vmatpush3.msra.mxu1 %v6530_v4 }
 0x50e   : > { %9857 = vmatprep.subr.mxu1 %v6529_v55 }
 0x50f   : > { %9858 = vmatpush3.msra.mxu1 %v6529_v55 }
 0x510   : > { %9859 = vmatprep.subr.mxu1 %v6528_v24 }
 0x511   : > { %9860 = vmatpush3.msra.mxu1 %v6528_v24 }
 0x512   : > { %9861 = vmatprep.subr.mxu1 %v6527_v36  ;;  %v9513_v41 = vpop.f32.mrf.mxu1 }
 0x513   : > { %9862 = vmatpush3.msra.mxu1 %v6527_v36 }
 0x514   : > { %v5502_v40 = vpop.f32.mrf.mxu1 }
 0x516   : > { %v9516_v18 = vpop.f32.mrf.mxu1 }
 0x518   : > { %v9469_v13 = vpop.f32.mrf.mxu0  ;;  %v5512_v48 = vpop.f32.mrf.mxu1 }
 0x519   : > { %v5508_v34 = vadd.f32 %v9513_v41, %v9469_v13 }
 0x51a   : > { %v5397_v60 = vpop.f32.mrf.mxu0 }
 0x51b   : > { %v5503_v17 = vadd.f32 %v5502_v40, %v5397_v60 }
 0x51c   : > { %v9519_v31 = vpop.f32.mrf.mxu1 }
 0x51e   : > { %v9472_v21 = vpop.f32.mrf.mxu0  ;;  %v5522_v58 = vpop.f32.mrf.mxu1 }
 0x51f   : > { %v5518_v5 = vadd.f32 %v9516_v18, %v9472_v21 }
 0x520   : > { %v5407_v56 = vpop.f32.mrf.mxu0 }
 0x521   : > { %v5513_v0 = vadd.f32 %v5512_v48, %v5407_v56 }
 0x522   : > { %v9522_v43 = vpop.f32.mrf.mxu1 }
 0x524   : > { %v5532_v63 = vpop.f32.mrf.mxu1 }
 0x525   : > { %v9475_v25 = vpop.f32.mrf.mxu0 }
 0x526   : > { %v5528_v36 = vadd.f32 %v9519_v31, %v9475_v25 }
 0x527   : > { %v5417_v45 = vpop.f32.mrf.mxu0 }
 0x52a   : > { %v13903_v52 = vpop.f32.mrf.mxu0 }
 0x52b   : > { %v5538_v60 = vadd.f32 %v9522_v43, %v13903_v52 }
 0x52c   : > { %v13905_v44 = vpop.f32.mrf.mxu0 }
 0x52d   : > { %14183 = vst [vmem:[#allocation41_spill] sm:$0xff] %v13905_v44  ;;  %v5523_v44 = vadd.f32 %v5522_v58, %v5417_v45 }
 0x534   : > { %v14189_v56 = vld [vmem:[#allocation41_spill] sm:$0xff] }
 0x535   : > { %v5533_v48 = vadd.f32 %v5532_v63, %v14189_v56 }
 0x538   : > { %v9601_v62 = vpop.f32.mrf.mxu1 }
 0x53a   : > { %v5779_v20 = vpop.f32.mrf.mxu1 }
 0x53d   : > { %v9604_v16 = vpop.f32.mrf.mxu1 }
 0x53f   : > { %v5789_v7 = vpop.f32.mrf.mxu1 }
 0x540   : > { %v9557_v32 = vpop.f32.mrf.mxu0 }
 0x541   : > { %v5689_v51 = vadd.f32 %v9557_v32, %v5508_v34 }
 0x542   : > { %v5649_v38 = vpop.f32.mrf.mxu0 }
 0x543   : > { %v9607_v1 = vpop.f32.mrf.mxu1  ;;  %v5688_v12 = vadd.f32 %v5649_v38, %v5503_v17  ;;  %v5819_v55 = vadd.f32 %v9601_v62, %v5689_v51 }
 0x545   : > { %v5799_v10 = vpop.f32.mrf.mxu1 }
 0x546   : > { %v9560_v22 = vpop.f32.mrf.mxu0 }
 0x547   : > { %v5691_v4 = vadd.f32 %v9560_v22, %v5518_v5 }
 0x548   : > { %v5659_v49 = vpop.f32.mrf.mxu0 }
 0x549   : > { %v9610_v26 = vpop.f32.mrf.mxu1 }
 0x54b   : > { %v13907_v33 = vpop.f32.mrf.mxu1 }
 0x54c   : > { %v9563_v30 = vpop.f32.mrf.mxu0  ;;  %14184 = vst [vmem:[#allocation51_spill] sm:$0xff] %v13907_v33  ;;  %v5818_v33 = vadd.f32 %v5779_v20, %v5688_v12 }
 0x54d   : > { %v5693_v13 = vadd.f32 %v9563_v30, %v5528_v36 }
 0x54e   : > { %v5669_v9 = vpop.f32.mrf.mxu0 }
 0x54f   : > { %v5692_v32 = vadd.f32 %v5669_v9, %v5523_v44  ;;  %v5823_v31 = vadd.f32 %v9607_v1, %v5693_v13 }
 0x551   : > { %v9566_v39 = vpop.f32.mrf.mxu0  ;;  %v5822_v30 = vadd.f32 %v5799_v10, %v5692_v32 }
 0x552   : > { %v5695_v22 = vadd.f32 %v9566_v39, %v5538_v60 }
 0x553   : > { %v5679_v37 = vpop.f32.mrf.mxu0  ;;  %v14190_v63 = vld [vmem:[#allocation51_spill] sm:$0xff] }
 0x554   : > { %v5825_v52 = vadd.f32 %v9610_v26, %v5695_v22 }
 0x560   : > { %v9689_v23 = vpop.f32.mrf.mxu1 }
 0x562   : > { %v6053_v14 = vpop.f32.mrf.mxu1 }
 0x565   : > { %v9692_v11 = vpop.f32.mrf.mxu1 }
 0x567   : > { %v6063_v54 = vpop.f32.mrf.mxu1 }
 0x568   : > { %v9645_v46 = vpop.f32.mrf.mxu0 }
 0x56a   : > { %v5917_v15 = vpop.f32.mrf.mxu0 }
 0x56b   : > { %v9695_v29 = vpop.f32.mrf.mxu1  ;;  %v5956_v41 = vadd.f32 %v5917_v15, %v5818_v33 }
 0x56d   : > { %v13911_v28 = vpop.f32.mrf.mxu1  ;;  %v6092_v20 = vadd.f32 %v6053_v14, %v5956_v41 }
 0x56e   : > { %v9648_v2 = vpop.f32.mrf.mxu0  ;;  %14186 = vst [vmem:[#allocation30_spill] sm:$0xff] %v13911_v28  ;;  %v5690_v28 = vadd.f32 %v5659_v49, %v5513_v0 }
 0x570   : > { %v5927_v27 = vpop.f32.mrf.mxu0  ;;  %v5820_v18 = vadd.f32 %v5789_v7, %v5690_v28 }
 0x571   : > { %v13913_v47 = vpop.f32.mrf.mxu1 }
 0x572   : > { %14187 = vst [vmem:[#allocation31_spill] sm:$0xff] %v13913_v47  ;;  %v5958_v25 = vadd.f32 %v5927_v27, %v5820_v18 }
 0x573   : > { %v13915_v42 = vpop.f32.mrf.mxu1 }
 0x574   : > { %v9651_v53 = vpop.f32.mrf.mxu0  ;;  %14188 = vst [vmem:[#allocation40_spill] sm:$0xff] %v13915_v42  ;;  %v5821_v42 = vadd.f32 %v9604_v16, %v5691_v4  ;;  %v6094_v7 = vadd.f32 %v6063_v54, %v5958_v25 }
 0x575   : > { %v5961_v58 = vadd.f32 %v9651_v53, %v5823_v31 }
 0x576   : > { %v5937_v3 = vpop.f32.mrf.mxu0  ;;  %v5959_v21 = vadd.f32 %v9648_v2, %v5821_v42 }
 0x577   : > { %v5960_v44 = vadd.f32 %v5937_v3, %v5822_v30 }
 0x578   : > { %v6095_v15 = vadd.f32 %v9692_v11, %v5959_v21 }
 0x579   : > { %v9654_v6 = vpop.f32.mrf.mxu0 }
 0x57a   : > { %v5963_v33 = vadd.f32 %v9654_v6, %v5825_v52 }
 0x57b   : > { %v13909_v50 = vpop.f32.mrf.mxu0  ;;  %v14194_v5 = vld [vmem:[#allocation40_spill] sm:$0xff] }
 0x57c   : > { %14185 = vst [vmem:[#allocation20_spill] sm:$0xff] %v13909_v50  ;;  %v5957_v50 = vadd.f32 %v9645_v46, %v5819_v55  ;;  %v5694_v46 = vadd.f32 %v5679_v37, %v5533_v48  ;;  %v7240_v37 = vld [vmem:[%s13943_s6] ss:$0 sm:$0xff] }
 0x57e   : > { %v6093_v38 = vadd.f32 %v9689_v23, %v5957_v50  ;;  %v5824_v39 = vadd.f32 %v14190_v63, %v5694_v46  ;;  %v6097_v50 = vadd.f32 %v9695_v29, %v5961_v58 }
 0x583   : > { %v14191_v53 = vld [vmem:[#allocation20_spill] sm:$0xff] }
 0x584   : > { %v5962_v26 = vadd.f32 %v14191_v53, %v5824_v39 }
 0x586   : > { %v6098_v12 = vadd.f32 %v14194_v5, %v5962_v26 }
 0x588   : > { %v9777_v61 = vpop.f32.mrf.mxu1 }
 0x58a   : > { %v6321_v24 = vpop.f32.mrf.mxu1 }
 0x58c   : > { %v9780_v40 = vpop.f32.mrf.mxu1 }
 0x58e   : > { %v9733_v35 = vpop.f32.mrf.mxu0  ;;  %v6331_v45 = vpop.f32.mrf.mxu1 }
 0x58f   : > { %v6223_v49 = vadd.f32 %v9733_v35, %v6093_v38  ;;  %v14192_v35 = vld [vmem:[#allocation30_spill] sm:$0xff] }
 0x590   : > { %v6183_v57 = vpop.f32.mrf.mxu0  ;;  %v9783_v23 = vpop.f32.mrf.mxu1  ;;  %v6096_v54 = vadd.f32 %v14192_v35, %v5960_v44 }
 0x591   : > { %v6222_v16 = vadd.f32 %v6183_v57, %v6092_v20  ;;  %v6361_v2 = vadd.f32 %v9777_v61, %v6223_v49 }
 0x592   : > { %v9736_v59 = vpop.f32.mrf.mxu0  ;;  %v6341_v57 = vpop.f32.mrf.mxu1 }
 0x593   : > { %v6225_v9 = vadd.f32 %v9736_v59, %v6095_v15  ;;  %v6360_v10 = vadd.f32 %v6321_v24, %v6222_v16  ;;  %v14193_v59 = vld [vmem:[#allocation31_spill] sm:$0xff] }
 0x594   : > { %v6193_v19 = vpop.f32.mrf.mxu0  ;;  %v6099_v34 = vadd.f32 %v14193_v59, %v5963_v33  ;;  %v9786_v36 = vpop.f32.mrf.mxu1 }
 0x595   : > { %v6224_v1 = vadd.f32 %v6193_v19, %v6094_v7  ;;  %v6363_v6 = vadd.f32 %v9780_v40, %v6225_v9  ;;  %v7241_v9 = vld [vmem:[%s13945_s8] ss:$0 sm:$0xff] }
 0x596   : > { %v9739_v8 = vpop.f32.mrf.mxu0  ;;  %v6351_v22 = vpop.f32.mrf.mxu1 }
 0x597   : > { %v6227_v3 = vadd.f32 %v9739_v8, %v6097_v50  ;;  %v6362_v61 = vadd.f32 %v6331_v45, %v6224_v1 }
 0x598   : > { %v6203_v47 = vpop.f32.mrf.mxu0 }
 0x599   : > { %v6226_v29 = vadd.f32 %v6203_v47, %v6096_v54  ;;  %v6365_v8 = vadd.f32 %v9783_v23, %v6227_v3 }
 0x59a   : > { %v9742_v62 = vpop.f32.mrf.mxu0 }
 0x59b   : > { %v6229_v4 = vadd.f32 %v9742_v62, %v6099_v34  ;;  %v6364_v18 = vadd.f32 %v6341_v57, %v6226_v29 }
 0x59c   : > { %v6213_v43 = vpop.f32.mrf.mxu0 }
 0x59d   : > { %v6228_v40 = vadd.f32 %v6213_v43, %v6098_v12  ;;  %v6367_v48 = vadd.f32 %v9786_v36, %v6229_v4 }
 0x59f   : > { %v6366_v46 = vadd.f32 %v6351_v22, %v6228_v40 }
 0x5ae   : > { %v9821_v27 = vpop.f32.mrf.mxu0 }
 0x5af   : > { %v6497_v14 = vadd.f32 %v9821_v27, %v6361_v2 }
 0x5b0   : > { %v6457_v11 = vpop.f32.mrf.mxu0 }
 0x5b1   : > { %v6496_v28 = vadd.f32 %v6457_v11, %v6360_v10  ;;  %v6512_v42 = vadd.f32 %v7240_v37, %v6497_v14 }
 0x5b2   : > { %v9824_v19 = vpop.f32.mrf.mxu0 }
 0x5b3   : > { %v6511_v17 = vadd.f32 %v7240_v37, %v6496_v28  ;;  %v6499_v51 = vadd.f32 %v9824_v19, %v6363_v6  ;;  %v6520_v13 = vmax.f32 %v6512_v42, 0.0 }
 0x5b4   : > { %v6467_v0 = vpop.f32.mrf.mxu0 }
 0x5b5   : > { %v6519_v55 = vmax.f32 %v6511_v17, 0.0  ;;  %v6498_v24 = vadd.f32 %v6467_v0, %v6362_v61  ;;  %v6514_v41 = vadd.f32 %v7240_v37, %v6499_v51 }
 0x5b6   : > { %v9827_v60 = vpop.f32.mrf.mxu0 }
 0x5b7   : > { %v6513_v32 = vadd.f32 %v7240_v37, %v6498_v24  ;;  %v6501_v21 = vadd.f32 %v9827_v60, %v6365_v8  ;;  %9863 = vmatprep.mubr.f32.mxu1 %v6519_v55  ;;  %v6522_v25 = vmax.f32 %v6514_v41, 0.0 }
 0x5b8   : > { %v6477_v47 = vpop.f32.mrf.mxu0  ;;  %9864 = vmatmul.mubr.f32.vlgmr.msra.gmra.mxu1 %v6520_v13 }
 0x5b9   : > { %v6521_v38 = vmax.f32 %v6513_v32, 0.0  ;;  %v6500_v56 = vadd.f32 %v6477_v47, %v6364_v18  ;;  %v6516_v62 = vadd.f32 %v7240_v37, %v6501_v21 }
 0x5ba   : > { %v9830_v31 = vpop.f32.mrf.mxu0 }
 0x5bb   : > { %v6515_v49 = vadd.f32 %v7240_v37, %v6500_v56  ;;  %v6503_v20 = vadd.f32 %v9830_v31, %v6367_v48  ;;  %9866 = vmatprep.mubr.f32.mxu1 %v6521_v38  ;;  %v6524_v16 = vmax.f32 %v6516_v62, 0.0 }
 0x5bc   : > { %v6487_v45 = vpop.f32.mrf.mxu0  ;;  %9867 = vmatmul.mubr.f32.gmra.mxu1 %v6522_v25 }
 0x5bd   : > { %v6523_v58 = vmax.f32 %v6515_v49, 0.0  ;;  %v6502_v30 = vadd.f32 %v6487_v45, %v6366_v46  ;;  %v6518_v15 = vadd.f32 %v7240_v37, %v6503_v20 }
 0x5bf   : > { %v6517_v52 = vadd.f32 %v7240_v37, %v6502_v30  ;;  %9869 = vmatprep.mubr.f32.mxu1 %v6523_v58  ;;  %v6526_v44 = vmax.f32 %v6518_v15, 0.0 }
 0x5c0   : > { %9870 = vmatmul.mubr.f32.gmra.mxu1 %v6524_v16 }
 0x5c1   : > { %v6525_v43 = vmax.f32 %v6517_v52, 0.0 }
 0x5c3   : > { %9872 = vmatprep.mubr.f32.mxu1 %v6525_v43 }
 0x5c4   : > { %9873 = vmatmul.mubr.f32.gmra.mxu1 %v6526_v44 }
 0x678   : > { %v9865_v7 = vpop.f32.mrf.mxu1 }
 0x679   : > { %v6622_v2 = vadd.f32 %v9865_v7, %v7241_v9 }
 0x67a   : > { %v6616_v33 = vpop.f32.mrf.mxu1 }
 0x67b   : > { %6656 = vst [vmem:[%s332_s14 + $0x8] sm:$0xff] %v6622_v2  ;;  %v6617_v63 = vadd.f32 %v7241_v9, %v6616_v33 }
 0x67c   : > { %v9868_v39 = vpop.f32.mrf.mxu1 }
 0x67d   : > { %6655 = vst [vmem:[%s332_s14] sm:$0xff] %v6617_v63  ;;  %v6632_v23 = vadd.f32 %v9868_v39, %v7241_v9 }
 0x67e   : > { %v6626_v27 = vpop.f32.mrf.mxu1 }
 0x67f   : > { %6658 = vst [vmem:[%s332_s14 + $0x18] sm:$0xff] %v6632_v23  ;;  %v6627_v1 = vadd.f32 %v7241_v9, %v6626_v27 }
 0x680   : > { %v9871_v50 = vpop.f32.mrf.mxu1 }
 0x681   : > { %6657 = vst [vmem:[%s332_s14 + $0x10] sm:$0xff] %v6627_v1  ;;  %v6642_v14 = vadd.f32 %v9871_v50, %v7241_v9 }
 0x682   : > { %v6636_v37 = vpop.f32.mrf.mxu1 }
 0x683   : > { %6660 = vst [vmem:[%s332_s14 + $0x28] sm:$0xff] %v6642_v14  ;;  %v6637_v10 = vadd.f32 %v7241_v9, %v6636_v37 }
 0x684   : > { %v9874_v53 = vpop.f32.mrf.mxu1 }
 0x685   : > { %6659 = vst [vmem:[%s332_s14 + $0x20] sm:$0xff] %v6637_v10  ;;  %v6652_v26 = vadd.f32 %v9874_v53, %v7241_v9 }
 0x686   : > { %v6646_v11 = vpop.f32.mrf.mxu1 }
 0x687   : > { %6662 = vst [vmem:[%s332_s14 + $0x38] sm:$0xff] %v6652_v26  ;;  %v6647_v3 = vadd.f32 %v7241_v9, %v6646_v11 }
 0x689   : > { %6661 = vst [vmem:[%s332_s14 + $0x30] sm:$0xff] %v6647_v3 }
 0x68a PF: > { %s19_s30 = sadd.s32 1, %s9891_s30  }
 0x68b   : > { %p16_p4 = scmp.ge.s32.totalorder %s19_s30, 4  }
 0x68d   :  { %18 = sbr.rel (!%p16_p4) target bundleno = 1 (0x1), region = 118 }

</bundles_post_ra>
